<compile_context>
chip_gen: v5e
topology: v5e:2x2
jax: 0.10.0
libtpu: 0.0.40
codegen_flags: <defaults>
</compile_context>

<pallas_src>
import jax
import jax.numpy as jnp
from jax.experimental import pallas as pl
from jax.experimental.pallas import tpu as pltpu


BN_EPS = 1e-5      # nn.BatchNorm1d default eps
NEG_SLOPE = 0.2    # TalkSHOW ConvNormRelu(leaky=True) => nn.LeakyReLU(0.2)


def _frame_enc_kernel(x_ref, wproj_ref, bproj_ref,
                      w1_ref, s1_ref, t1_ref,
                      w2_ref, s2_ref, t2_ref,
                      wp_ref, bp_ref,
                      second_ref, last_ref,
                      hp_ref):
    # Blocks:
    #   x_ref    : (1, T, in_dim)
    #   wproj    : (in_dim, H)        bproj : (1, H)
    #   w{1,2}   : (3, C, C)          s/t   : (1, C)   (folded BN scale/shift)
    #   wp_ref   : (T, C, 3H)         bp    : (1, 3H)  ([proj_1 | proj_2])
    #   second   : (1, 1, 2H)         last  : (1, 1, H)
    #   hp_ref   : (T+2, C) VMEM scratch (zero-padded activation for the conv)
    T = x_ref.shape[1]
    C = w1_ref.shape[1]
    H = last_ref.shape[2]

    x = x_ref[0]                                               # (T, in_dim)

    # ---- proj: pointwise Conv1d(in_dim -> H) == channel matmul -------------
    h = jnp.dot(x, wproj_ref[...], preferred_element_type=jnp.float32)
    h = h + bproj_ref[...]                                     # (T, C)

    # ---- 2x residual Conv(k=3, p=1) + folded-BN + LeakyReLU ----------------
    def res_block(h, w_ref, scale_ref, shift_ref):
        zero_row = jnp.zeros((1, C), jnp.float32)
        hp_ref[0:1, :] = zero_row                  # left pad
        hp_ref[T + 1:T + 2, :] = zero_row          # right pad
        hp_ref[1:T + 1, :] = h
        acc = jnp.dot(hp_ref[0:T, :], w_ref[0],
                      preferred_element_type=jnp.float32)
        acc = acc + jnp.dot(hp_ref[1:T + 1, :], w_ref[1],
                            preferred_element_type=jnp.float32)
        acc = acc + jnp.dot(hp_ref[2:T + 2, :], w_ref[2],
                            preferred_element_type=jnp.float32)
        y = acc * scale_ref[...] + shift_ref[...] + h          # BN(eval)+res
        return jnp.where(y >= 0.0, y, NEG_SLOPE * y)           # LeakyReLU(0.2)

    h = res_block(h, w1_ref, s1_ref, t1_ref)
    h = res_block(h, w2_ref, s2_ref, t2_ref)

    # ---- flatten + proj_1 / proj_2 (fused into one (T, C, 3H) weight) ------
    # wp_ref[t][c, :H]  -> proj_1 ("last"), wp_ref[t][c, H:] -> proj_2
    # ("second_last"); flatten order (c, t) -> c*T + t is pre-folded.
    out = bp_ref[...]                                          # (1, 3H)
    for t in range(T):                                         # T is tiny/static
        out = out + jnp.dot(h[t:t + 1, :], wp_ref[t],
                            preferred_element_type=jnp.float32)
    last_ref[0] = out[:, 0:H].astype(last_ref.dtype)
    second_ref[0] = out[:, H:].astype(second_ref.dtype)


def _fold_bn(conv_b, gamma, beta, rmean, rvar):
    """Fold conv bias + eval-mode BatchNorm into per-channel scale/shift."""
    scale = gamma * jax.lax.rsqrt(rvar + BN_EPS)
    shift = beta - rmean * scale + conv_b * scale
    return scale.reshape(1, -1), shift.reshape(1, -1)


@jax.jit
def frame_enc_forward(x, params):
    """x: (B, in_dim, T) float32. Returns (second_last (B,2H,1), last (B,H,1))."""
    B, in_dim, T = x.shape
    H = params["w_proj"].shape[0]
    C = H
    H2 = params["w_p2"].shape[0]                 # 2*H
    assert H * T == params["w_p1"].shape[1]      # module hard-codes 256*4

    # --- layout glue (all KB-scale; output side is reshape-only) ------------
    x_t = jnp.transpose(x, (0, 2, 1))                            # (B, T, in_dim)
    wproj = jnp.transpose(params["w_proj"][:, :, 0], (1, 0))     # (in_dim, H)
    bproj = params["b_proj"].reshape(1, H)

    def prep_block(p):
        w = jnp.transpose(p["w"], (2, 1, 0))                     # (3, Cin, Cout)
        scale, shift = _fold_bn(p["b"], p["gamma"], p["beta"],
                                p["running_mean"], p["running_var"])
        return w, scale, shift

    w1, s1, t1 = prep_block(params["blk1"])
    w2, s2, t2 = prep_block(params["blk2"])

    def prep_proj(w):                              # (O, C*T, 1) -> (T, C, O)
        O = w.shape[0]
        return jnp.transpose(w[:, :, 0].reshape(O, C, T), (2, 1, 0))

    wp = jnp.concatenate([prep_proj(params["w_p1"]),
                          prep_proj(params["w_p2"])], axis=-1)   # (T, C, 3H)
    bp = jnp.concatenate([params["b_p1"], params["b_p2"]]).reshape(1, H + H2)

    second, last = pl.pallas_call(
        _frame_enc_kernel,
        out_shape=(
            jax.ShapeDtypeStruct((B, 1, H2), x.dtype),   # second_last
            jax.ShapeDtypeStruct((B, 1, H), x.dtype),    # last
        ),
        grid_spec=pltpu.PrefetchScalarGridSpec(
            num_scalar_prefetch=0,
            grid=(B,),
            in_specs=[
                pl.BlockSpec((1, T, in_dim), lambda b: (b, 0, 0)),
                pl.BlockSpec((in_dim, H), lambda b: (0, 0)),
                pl.BlockSpec((1, H), lambda b: (0, 0)),
                pl.BlockSpec((3, C, C), lambda b: (0, 0, 0)),
                pl.BlockSpec((1, C), lambda b: (0, 0)),
                pl.BlockSpec((1, C), lambda b: (0, 0)),
                pl.BlockSpec((3, C, C), lambda b: (0, 0, 0)),
                pl.BlockSpec((1, C), lambda b: (0, 0)),
                pl.BlockSpec((1, C), lambda b: (0, 0)),
                pl.BlockSpec((T, C, H + H2), lambda b: (0, 0, 0)),
                pl.BlockSpec((1, H + H2), lambda b: (0, 0)),
            ],
            out_specs=[
                pl.BlockSpec((1, 1, H2), lambda b: (b, 0, 0)),
                pl.BlockSpec((1, 1, H), lambda b: (b, 0, 0)),
            ],
            scratch_shapes=[pltpu.VMEM((T + 2, C), jnp.float32)],
        ),
        compiler_params=pltpu.CompilerParams(
            dimension_semantics=("parallel",),
            vmem_limit_bytes=32 * 1024 * 1024),
    )(x_t, wproj, bproj, w1, s1, t1, w2, s2, t2, wp, bp)

    # (B, 1, O) -> (B, O, 1): free reshape (a size-1 dim moves, no transpose)
    return second.reshape(B, H2, 1), last.reshape(B, H, 1)


# ----------------------------- pure-JAX reference ---------------------------
def _ref_forward(x, params):
    B, in_dim, T = x.shape
    HI = jax.lax.Precision.HIGHEST

    def conv1x1(h, w, b):            # w: (O, I, 1), h: (B, I, L)
        return jnp.einsum("oi,bit->bot", w[:, :, 0], h, precision=HI) \
            + b[None, :, None]

    def conv3(h, w, b):              # w: (O, I, 3), padding = 1
        hp = jnp.pad(h, ((0, 0), (0, 0), (1, 1)))
        out = sum(jnp.einsum("oi,bit->bot", w[:, :, k], hp[:, :, k:k + T],
                             precision=HI) for k in range(3))
        return out + b[None, :, None]

    def bn_eval(h, p):
        scale = p["gamma"] / jnp.sqrt(p["running_var"] + BN_EPS)
        shift = p["beta"] - p["running_mean"] * scale
        return h * scale[None, :, None] + shift[None, :, None]

    def leaky(h):
        return jnp.where(h >= 0, h, NEG_SLOPE * h)

    h = conv1x1(x, params["w_proj"], params["b_proj"])
    for name in ("blk1", "blk2"):
        p = params[name]
        h = leaky(bn_eval(conv3(h, p["w"], p["b"]), p) + h)

    v = h.reshape(B, -1, 1)                                  # (B, H*T, 1)
    second = conv1x1(v, params["w_p2"], params["b_p2"])      # (B, 2H, 1)
    last = conv1x1(v, params["w_p1"], params["b_p1"])        # (B, H, 1)
    return second, last


def init_params(key, in_dim, num_hiddens, T):
    """Deterministic synthetic parameters with PyTorch module shapes."""
    H = num_hiddens
    flat = H * T                         # must be 1024 (= 256 * 4) per module
    keys = jax.random.split(key, 8)

    def nrm(k, shape, s=0.05):
        return jax.random.normal(k, shape, jnp.float32) * s

    def blk(k):
        ks = jax.random.split(k, 6)
        return {
            "w": nrm(ks[0], (H, H, 3)),
            "b": nrm(ks[1], (H,), 0.02),
            "gamma": 1.0 + nrm(ks[2], (H,), 0.05),
            "beta": nrm(ks[3], (H,), 0.05),
            "running_mean": nrm(ks[4], (H,), 0.05),
            "running_var": 1.0 + jax.random.uniform(ks[5], (H,), jnp.float32,
                                                    0.0, 0.5),
        }

    return {
        "w_proj": nrm(keys[0], (H, in_dim, 1)),
        "b_proj": nrm(keys[1], (H,), 0.02),
        "blk1": blk(keys[2]),
        "blk2": blk(keys[3]),
        "w_p1": nrm(keys[4], (H, flat, 1)),          # Conv1d(1024 -> H, 1)
        "b_p1": nrm(keys[5], (H,), 0.02),
        "w_p2": nrm(keys[6], (2 * H, flat, 1)),      # Conv1d(1024 -> 2H, 1)
        "b_p2": nrm(keys[7], (2 * H,), 0.02),
    }


if __name__ == "__main__":
    # H * T must equal 1024 because proj_1/proj_2 are hard-coded Conv1d(256*4,...)
    B, in_dim, num_hiddens, T = 2, 64, 256, 4

    key = jax.random.PRNGKey(0)
    kx, kp = jax.random.split(key)
    x = jax.random.normal(kx, (B, in_dim, T), jnp.float32)
    params = init_params(kp, in_dim, num_hiddens, T)

    second, last = frame_enc_forward(x, params)
    second, last = jax.block_until_ready((second, last))

    second_ref, last_ref = _ref_forward(x, params)
    assert second.shape == (B, 2 * num_hiddens, 1)
    assert last.shape == (B, num_hiddens, 1)
    err = max(float(jnp.max(jnp.abs(second - second_ref))),
              float(jnp.max(jnp.abs(last - last_ref))))
    assert jnp.allclose(second, second_ref, atol=1e-3, rtol=1e-3) and \
        jnp.allclose(last, last_ref, atol=1e-3, rtol=1e-3), f"max err {err}"

    print("KERNEL_OK")
</pallas_src>

<mosaic_0001>
module attributes {stable_mosaic.version = 11 : i64} {
  func.func @_frame_enc_kernel(%arg0: i32, %arg1: memref<1x4x64xf32, #tpu.memory_space<vmem>>, %arg2: memref<64x256xf32, #tpu.memory_space<vmem>>, %arg3: memref<1x256xf32, #tpu.memory_space<vmem>>, %arg4: memref<3x256x256xf32, #tpu.memory_space<vmem>>, %arg5: memref<1x256xf32, #tpu.memory_space<vmem>>, %arg6: memref<1x256xf32, #tpu.memory_space<vmem>>, %arg7: memref<3x256x256xf32, #tpu.memory_space<vmem>>, %arg8: memref<1x256xf32, #tpu.memory_space<vmem>>, %arg9: memref<1x256xf32, #tpu.memory_space<vmem>>, %arg10: memref<4x256x768xf32, #tpu.memory_space<vmem>>, %arg11: memref<1x768xf32, #tpu.memory_space<vmem>>, %arg12: memref<1x1x512xf32, #tpu.memory_space<vmem>>, %arg13: memref<1x1x256xf32, #tpu.memory_space<vmem>>, %arg14: memref<6x256xf32, #tpu.memory_space<vmem>>) attributes {dimension_semantics = [#tpu.dimension_semantics<parallel>], iteration_bounds = array<i64: 2>, scalar_prefetch = 0 : i64, scratch_operands = 1 : i64, tpu.core_type = #tpu.core_type<tc>, window_params = [{transform_indices = @transform_0, window_bounds = array<i64: 1, 4, 64>}, {pipeline_mode = #tpu.pipeline_mode<synchronous>, transform_indices = @transform_1, window_bounds = array<i64: 64, 256>}, {pipeline_mode = #tpu.pipeline_mode<synchronous>, transform_indices = @transform_2, window_bounds = array<i64: 1, 256>}, {pipeline_mode = #tpu.pipeline_mode<synchronous>, transform_indices = @transform_3, window_bounds = array<i64: 3, 256, 256>}, {pipeline_mode = #tpu.pipeline_mode<synchronous>, transform_indices = @transform_4, window_bounds = array<i64: 1, 256>}, {pipeline_mode = #tpu.pipeline_mode<synchronous>, transform_indices = @transform_5, window_bounds = array<i64: 1, 256>}, {pipeline_mode = #tpu.pipeline_mode<synchronous>, transform_indices = @transform_6, window_bounds = array<i64: 3, 256, 256>}, {pipeline_mode = #tpu.pipeline_mode<synchronous>, transform_indices = @transform_7, window_bounds = array<i64: 1, 256>}, {pipeline_mode = #tpu.pipeline_mode<synchronous>, transform_indices = @transform_8, window_bounds = array<i64: 1, 256>}, {pipeline_mode = #tpu.pipeline_mode<synchronous>, transform_indices = @transform_9, window_bounds = array<i64: 4, 256, 768>}, {pipeline_mode = #tpu.pipeline_mode<synchronous>, transform_indices = @transform_10, window_bounds = array<i64: 1, 768>}, {transform_indices = @transform_11, window_bounds = array<i64: 1, 1, 512>}, {transform_indices = @transform_12, window_bounds = array<i64: 1, 1, 256>}]} {
    %c0 = arith.constant 0 : index
    %c0_0 = arith.constant 0 : index
    %c0_1 = arith.constant 0 : index
    %0 = vector.load %arg1[%c0, %c0_0, %c0_1] : memref<1x4x64xf32, #tpu.memory_space<vmem>>, vector<1x4x64xf32>
    %1 = vector.shape_cast %0 : vector<1x4x64xf32> to vector<4x64xf32>
    %c0_2 = arith.constant 0 : index
    %c0_3 = arith.constant 0 : index
    %2 = vector.load %arg2[%c0_2, %c0_3] : memref<64x256xf32, #tpu.memory_space<vmem>>, vector<64x256xf32>
    %cst = arith.constant dense<0.000000e+00> : vector<4x256xf32>
    %3 = tpu.matmul %1, %2, %cst {dimension_numbers = #tpu.dot_dimension_numbers<[1], [0], [0], [1], [0, 0, 1, 1], [], []>} : vector<4x64xf32>, vector<64x256xf32>, vector<4x256xf32> -> vector<4x256xf32>
    %c0_4 = arith.constant 0 : index
    %c0_5 = arith.constant 0 : index
    %4 = vector.load %arg3[%c0_4, %c0_5] : memref<1x256xf32, #tpu.memory_space<vmem>>, vector<1x256xf32>
    %5 = vector.broadcast %4 : vector<1x256xf32> to vector<4x256xf32>
    %6 = arith.addf %3, %5 : vector<4x256xf32>
    %cst_6 = arith.constant 0.000000e+00 : f32
    %7 = vector.broadcast %cst_6 : f32 to vector<1x256xf32>
    %c0_7 = arith.constant 0 : index
    %c0_8 = arith.constant 0 : index
    %8 = vector.load %arg14[%c0_7, %c0_8] : memref<6x256xf32, #tpu.memory_space<vmem>>, vector<1x256xf32>
    tpu.vector_store %arg14[%c0_7, %c0_8], %7 {strides = array<i32>} : memref<6x256xf32, #tpu.memory_space<vmem>>, vector<1x256xf32>,
    %c5 = arith.constant 5 : index
    %c0_9 = arith.constant 0 : index
    %9 = vector.load %arg14[%c5, %c0_9] : memref<6x256xf32, #tpu.memory_space<vmem>>, vector<1x256xf32>
    tpu.vector_store %arg14[%c5, %c0_9], %7 {strides = array<i32>} : memref<6x256xf32, #tpu.memory_space<vmem>>, vector<1x256xf32>,
    %c1 = arith.constant 1 : index
    %c0_10 = arith.constant 0 : index
    %10 = vector.load %arg14[%c1, %c0_10] : memref<6x256xf32, #tpu.memory_space<vmem>>, vector<4x256xf32>
    tpu.vector_store %arg14[%c1, %c0_10], %6 {strides = array<i32>} : memref<6x256xf32, #tpu.memory_space<vmem>>, vector<4x256xf32>,
    %c0_11 = arith.constant 0 : index
    %c0_12 = arith.constant 0 : index
    %11 = vector.load %arg14[%c0_11, %c0_12] : memref<6x256xf32, #tpu.memory_space<vmem>>, vector<4x256xf32>
    %c0_13 = arith.constant 0 : index
    %c0_14 = arith.constant 0 : index
    %c0_15 = arith.constant 0 : index
    %12 = vector.load %arg4[%c0_13, %c0_14, %c0_15] : memref<3x256x256xf32, #tpu.memory_space<vmem>>, vector<1x256x256xf32>
    %13 = vector.shape_cast %12 : vector<1x256x256xf32> to vector<256x256xf32>
    %cst_16 = arith.constant dense<0.000000e+00> : vector<4x256xf32>
    %14 = tpu.matmul %11, %13, %cst_16 {dimension_numbers = #tpu.dot_dimension_numbers<[1], [0], [0], [1], [0, 0, 1, 1], [], []>} : vector<4x256xf32>, vector<256x256xf32>, vector<4x256xf32> -> vector<4x256xf32>
    %c1_17 = arith.constant 1 : index
    %c0_18 = arith.constant 0 : index
    %15 = vector.load %arg14[%c1_17, %c0_18] : memref<6x256xf32, #tpu.memory_space<vmem>>, vector<4x256xf32>
    %c1_19 = arith.constant 1 : index
    %c0_20 = arith.constant 0 : index
    %c0_21 = arith.constant 0 : index
    %16 = vector.load %arg4[%c1_19, %c0_20, %c0_21] : memref<3x256x256xf32, #tpu.memory_space<vmem>>, vector<1x256x256xf32>
    %17 = vector.shape_cast %16 : vector<1x256x256xf32> to vector<256x256xf32>
    %cst_22 = arith.constant dense<0.000000e+00> : vector<4x256xf32>
    %18 = tpu.matmul %15, %17, %cst_22 {dimension_numbers = #tpu.dot_dimension_numbers<[1], [0], [0], [1], [0, 0, 1, 1], [], []>} : vector<4x256xf32>, vector<256x256xf32>, vector<4x256xf32> -> vector<4x256xf32>
    %19 = arith.addf %14, %18 : vector<4x256xf32>
    %c2 = arith.constant 2 : index
    %c0_23 = arith.constant 0 : index
    %20 = vector.load %arg14[%c2, %c0_23] : memref<6x256xf32, #tpu.memory_space<vmem>>, vector<4x256xf32>
    %c2_24 = arith.constant 2 : index
    %c0_25 = arith.constant 0 : index
    %c0_26 = arith.constant 0 : index
    %21 = vector.load %arg4[%c2_24, %c0_25, %c0_26] : memref<3x256x256xf32, #tpu.memory_space<vmem>>, vector<1x256x256xf32>
    %22 = vector.shape_cast %21 : vector<1x256x256xf32> to vector<256x256xf32>
    %cst_27 = arith.constant dense<0.000000e+00> : vector<4x256xf32>
    %23 = tpu.matmul %20, %22, %cst_27 {dimension_numbers = #tpu.dot_dimension_numbers<[1], [0], [0], [1], [0, 0, 1, 1], [], []>} : vector<4x256xf32>, vector<256x256xf32>, vector<4x256xf32> -> vector<4x256xf32>
    %24 = arith.addf %19, %23 : vector<4x256xf32>
    %c0_28 = arith.constant 0 : index
    %c0_29 = arith.constant 0 : index
    %25 = vector.load %arg5[%c0_28, %c0_29] : memref<1x256xf32, #tpu.memory_space<vmem>>, vector<1x256xf32>
    %26 = vector.broadcast %25 : vector<1x256xf32> to vector<4x256xf32>
    %27 = arith.mulf %24, %26 : vector<4x256xf32>
    %c0_30 = arith.constant 0 : index
    %c0_31 = arith.constant 0 : index
    %28 = vector.load %arg6[%c0_30, %c0_31] : memref<1x256xf32, #tpu.memory_space<vmem>>, vector<1x256xf32>
    %29 = vector.broadcast %28 : vector<1x256xf32> to vector<4x256xf32>
    %30 = arith.addf %27, %29 : vector<4x256xf32>
    %31 = arith.addf %30, %6 : vector<4x256xf32>
    %cst_32 = arith.constant 0.000000e+00 : f32
    %32 = vector.broadcast %cst_32 : f32 to vector<4x256xf32>
    %33 = arith.cmpf oge, %31, %32 : vector<4x256xf32>
    %cst_33 = arith.constant 2.000000e-01 : f32
    %34 = vector.broadcast %cst_33 : f32 to vector<4x256xf32>
    %35 = arith.mulf %34, %31 : vector<4x256xf32>
    %36 = arith.select %33, %31, %35 : vector<4x256xi1>, vector<4x256xf32>
    %cst_34 = arith.constant 0.000000e+00 : f32
    %37 = vector.broadcast %cst_34 : f32 to vector<1x256xf32>
    %c0_35 = arith.constant 0 : index
    %c0_36 = arith.constant 0 : index
    %38 = vector.load %arg14[%c0_35, %c0_36] : memref<6x256xf32, #tpu.memory_space<vmem>>, vector<1x256xf32>
    tpu.vector_store %arg14[%c0_35, %c0_36], %37 {strides = array<i32>} : memref<6x256xf32, #tpu.memory_space<vmem>>, vector<1x256xf32>,
    %c5_37 = arith.constant 5 : index
    %c0_38 = arith.constant 0 : index
    %39 = vector.load %arg14[%c5_37, %c0_38] : memref<6x256xf32, #tpu.memory_space<vmem>>, vector<1x256xf32>
    tpu.vector_store %arg14[%c5_37, %c0_38], %37 {strides = array<i32>} : memref<6x256xf32, #tpu.memory_space<vmem>>, vector<1x256xf32>,
    %c1_39 = arith.constant 1 : index
    %c0_40 = arith.constant 0 : index
    %40 = vector.load %arg14[%c1_39, %c0_40] : memref<6x256xf32, #tpu.memory_space<vmem>>, vector<4x256xf32>
    tpu.vector_store %arg14[%c1_39, %c0_40], %36 {strides = array<i32>} : memref<6x256xf32, #tpu.memory_space<vmem>>, vector<4x256xf32>,
    %c0_41 = arith.constant 0 : index
    %c0_42 = arith.constant 0 : index
    %41 = vector.load %arg14[%c0_41, %c0_42] : memref<6x256xf32, #tpu.memory_space<vmem>>, vector<4x256xf32>
    %c0_43 = arith.constant 0 : index
    %c0_44 = arith.constant 0 : index
    %c0_45 = arith.constant 0 : index
    %42 = vector.load %arg7[%c0_43, %c0_44, %c0_45] : memref<3x256x256xf32, #tpu.memory_space<vmem>>, vector<1x256x256xf32>
    %43 = vector.shape_cast %42 : vector<1x256x256xf32> to vector<256x256xf32>
    %cst_46 = arith.constant dense<0.000000e+00> : vector<4x256xf32>
    %44 = tpu.matmul %41, %43, %cst_46 {dimension_numbers = #tpu.dot_dimension_numbers<[1], [0], [0], [1], [0, 0, 1, 1], [], []>} : vector<4x256xf32>, vector<256x256xf32>, vector<4x256xf32> -> vector<4x256xf32>
    %c1_47 = arith.constant 1 : index
    %c0_48 = arith.constant 0 : index
    %45 = vector.load %arg14[%c1_47, %c0_48] : memref<6x256xf32, #tpu.memory_space<vmem>>, vector<4x256xf32>
    %c1_49 = arith.constant 1 : index
    %c0_50 = arith.constant 0 : index
    %c0_51 = arith.constant 0 : index
    %46 = vector.load %arg7[%c1_49, %c0_50, %c0_51] : memref<3x256x256xf32, #tpu.memory_space<vmem>>, vector<1x256x256xf32>
    %47 = vector.shape_cast %46 : vector<1x256x256xf32> to vector<256x256xf32>
    %cst_52 = arith.constant dense<0.000000e+00> : vector<4x256xf32>
    %48 = tpu.matmul %45, %47, %cst_52 {dimension_numbers = #tpu.dot_dimension_numbers<[1], [0], [0], [1], [0, 0, 1, 1], [], []>} : vector<4x256xf32>, vector<256x256xf32>, vector<4x256xf32> -> vector<4x256xf32>
    %49 = arith.addf %44, %48 : vector<4x256xf32>
    %c2_53 = arith.constant 2 : index
    %c0_54 = arith.constant 0 : index
    %50 = vector.load %arg14[%c2_53, %c0_54] : memref<6x256xf32, #tpu.memory_space<vmem>>, vector<4x256xf32>
    %c2_55 = arith.constant 2 : index
    %c0_56 = arith.constant 0 : index
    %c0_57 = arith.constant 0 : index
    %51 = vector.load %arg7[%c2_55, %c0_56, %c0_57] : memref<3x256x256xf32, #tpu.memory_space<vmem>>, vector<1x256x256xf32>
    %52 = vector.shape_cast %51 : vector<1x256x256xf32> to vector<256x256xf32>
    %cst_58 = arith.constant dense<0.000000e+00> : vector<4x256xf32>
    %53 = tpu.matmul %50, %52, %cst_58 {dimension_numbers = #tpu.dot_dimension_numbers<[1], [0], [0], [1], [0, 0, 1, 1], [], []>} : vector<4x256xf32>, vector<256x256xf32>, vector<4x256xf32> -> vector<4x256xf32>
    %54 = arith.addf %49, %53 : vector<4x256xf32>
    %c0_59 = arith.constant 0 : index
    %c0_60 = arith.constant 0 : index
    %55 = vector.load %arg8[%c0_59, %c0_60] : memref<1x256xf32, #tpu.memory_space<vmem>>, vector<1x256xf32>
    %56 = vector.broadcast %55 : vector<1x256xf32> to vector<4x256xf32>
    %57 = arith.mulf %54, %56 : vector<4x256xf32>
    %c0_61 = arith.constant 0 : index
    %c0_62 = arith.constant 0 : index
    %58 = vector.load %arg9[%c0_61, %c0_62] : memref<1x256xf32, #tpu.memory_space<vmem>>, vector<1x256xf32>
    %59 = vector.broadcast %58 : vector<1x256xf32> to vector<4x256xf32>
    %60 = arith.addf %57, %59 : vector<4x256xf32>
    %61 = arith.addf %60, %36 : vector<4x256xf32>
    %cst_63 = arith.constant 0.000000e+00 : f32
    %62 = vector.broadcast %cst_63 : f32 to vector<4x256xf32>
    %63 = arith.cmpf oge, %61, %62 : vector<4x256xf32>
    %cst_64 = arith.constant 2.000000e-01 : f32
    %64 = vector.broadcast %cst_64 : f32 to vector<4x256xf32>
    %65 = arith.mulf %64, %61 : vector<4x256xf32>
    %66 = arith.select %63, %61, %65 : vector<4x256xi1>, vector<4x256xf32>
    %c0_65 = arith.constant 0 : index
    %c0_66 = arith.constant 0 : index
    %67 = vector.load %arg11[%c0_65, %c0_66] : memref<1x768xf32, #tpu.memory_space<vmem>>, vector<1x768xf32>
    %68 = vector.extract_strided_slice %66 {offsets = [0, 0], sizes = [1, 256], strides = [1, 1]} : vector<4x256xf32> to vector<1x256xf32>
    %c0_67 = arith.constant 0 : index
    %c0_68 = arith.constant 0 : index
    %c0_69 = arith.constant 0 : index
    %69 = vector.load %arg10[%c0_67, %c0_68, %c0_69] : memref<4x256x768xf32, #tpu.memory_space<vmem>>, vector<1x256x768xf32>
    %70 = vector.shape_cast %69 : vector<1x256x768xf32> to vector<256x768xf32>
    %cst_70 = arith.constant dense<0.000000e+00> : vector<1x768xf32>
    %71 = tpu.matmul %68, %70, %cst_70 {dimension_numbers = #tpu.dot_dimension_numbers<[1], [0], [0], [1], [0, 0, 1, 1], [], []>} : vector<1x256xf32>, vector<256x768xf32>, vector<1x768xf32> -> vector<1x768xf32>
    %72 = arith.addf %67, %71 : vector<1x768xf32>
    %73 = vector.extract_strided_slice %66 {offsets = [1, 0], sizes = [1, 256], strides = [1, 1]} : vector<4x256xf32> to vector<1x256xf32>
    %c1_71 = arith.constant 1 : index
    %c0_72 = arith.constant 0 : index
    %c0_73 = arith.constant 0 : index
    %74 = vector.load %arg10[%c1_71, %c0_72, %c0_73] : memref<4x256x768xf32, #tpu.memory_space<vmem>>, vector<1x256x768xf32>
    %75 = vector.shape_cast %74 : vector<1x256x768xf32> to vector<256x768xf32>
    %cst_74 = arith.constant dense<0.000000e+00> : vector<1x768xf32>
    %76 = tpu.matmul %73, %75, %cst_74 {dimension_numbers = #tpu.dot_dimension_numbers<[1], [0], [0], [1], [0, 0, 1, 1], [], []>} : vector<1x256xf32>, vector<256x768xf32>, vector<1x768xf32> -> vector<1x768xf32>
    %77 = arith.addf %72, %76 : vector<1x768xf32>
    %78 = vector.extract_strided_slice %66 {offsets = [2, 0], sizes = [1, 256], strides = [1, 1]} : vector<4x256xf32> to vector<1x256xf32>
    %c2_75 = arith.constant 2 : index
    %c0_76 = arith.constant 0 : index
    %c0_77 = arith.constant 0 : index
    %79 = vector.load %arg10[%c2_75, %c0_76, %c0_77] : memref<4x256x768xf32, #tpu.memory_space<vmem>>, vector<1x256x768xf32>
    %80 = vector.shape_cast %79 : vector<1x256x768xf32> to vector<256x768xf32>
    %cst_78 = arith.constant dense<0.000000e+00> : vector<1x768xf32>
    %81 = tpu.matmul %78, %80, %cst_78 {dimension_numbers = #tpu.dot_dimension_numbers<[1], [0], [0], [1], [0, 0, 1, 1], [], []>} : vector<1x256xf32>, vector<256x768xf32>, vector<1x768xf32> -> vector<1x768xf32>
    %82 = arith.addf %77, %81 : vector<1x768xf32>
    %83 = vector.extract_strided_slice %66 {offsets = [3, 0], sizes = [1, 256], strides = [1, 1]} : vector<4x256xf32> to vector<1x256xf32>
    %c3 = arith.constant 3 : index
    %c0_79 = arith.constant 0 : index
    %c0_80 = arith.constant 0 : index
    %84 = vector.load %arg10[%c3, %c0_79, %c0_80] : memref<4x256x768xf32, #tpu.memory_space<vmem>>, vector<1x256x768xf32>
    %85 = vector.shape_cast %84 : vector<1x256x768xf32> to vector<256x768xf32>
    %cst_81 = arith.constant dense<0.000000e+00> : vector<1x768xf32>
    %86 = tpu.matmul %83, %85, %cst_81 {dimension_numbers = #tpu.dot_dimension_numbers<[1], [0], [0], [1], [0, 0, 1, 1], [], []>} : vector<1x256xf32>, vector<256x768xf32>, vector<1x768xf32> -> vector<1x768xf32>
    %87 = arith.addf %82, %86 : vector<1x768xf32>
    %88 = vector.extract_strided_slice %87 {offsets = [0, 0], sizes = [1, 256], strides = [1, 1]} : vector<1x768xf32> to vector<1x256xf32>
    %c0_82 = arith.constant 0 : index
    %c0_83 = arith.constant 0 : index
    %c0_84 = arith.constant 0 : index
    %89 = vector.load %arg13[%c0_82, %c0_83, %c0_84] : memref<1x1x256xf32, #tpu.memory_space<vmem>>, vector<1x1x256xf32>
    %90 = vector.shape_cast %89 : vector<1x1x256xf32> to vector<1x256xf32>
    %91 = vector.shape_cast %88 : vector<1x256xf32> to vector<1x1x256xf32>
    tpu.vector_store %arg13[%c0_82, %c0_83, %c0_84], %91 {strides = array<i32>} : memref<1x1x256xf32, #tpu.memory_space<vmem>>, vector<1x1x256xf32>,
    %92 = vector.extract_strided_slice %87 {offsets = [0, 256], sizes = [1, 512], strides = [1, 1]} : vector<1x768xf32> to vector<1x512xf32>
    %c0_85 = arith.constant 0 : index
    %c0_86 = arith.constant 0 : index
    %c0_87 = arith.constant 0 : index
    %93 = vector.load %arg12[%c0_85, %c0_86, %c0_87] : memref<1x1x512xf32, #tpu.memory_space<vmem>>, vector<1x1x512xf32>
    %94 = vector.shape_cast %93 : vector<1x1x512xf32> to vector<1x512xf32>
    %95 = vector.shape_cast %92 : vector<1x512xf32> to vector<1x1x512xf32>
    tpu.vector_store %arg12[%c0_85, %c0_86, %c0_87], %95 {strides = array<i32>} : memref<1x1x512xf32, #tpu.memory_space<vmem>>, vector<1x1x512xf32>,
    return
  }
  func.func @transform_0(%arg0: i32) -> (i32, i32, i32) {
    %c0_i32 = arith.constant 0 : i32
    %c0_i32_0 = arith.constant 0 : i32
    %c0_i32_1 = arith.constant 0 : i32
    return %arg0, %c0_i32, %c0_i32_0 : i32, i32, i32
  }
  func.func @transform_1(%arg0: i32) -> (i32, i32) {
    %c0_i32 = arith.constant 0 : i32
    %c0_i32_0 = arith.constant 0 : i32
    %c0_i32_1 = arith.constant 0 : i32
    return %c0_i32, %c0_i32_0 : i32, i32
  }
  func.func @transform_2(%arg0: i32) -> (i32, i32) {
    %c0_i32 = arith.constant 0 : i32
    %c0_i32_0 = arith.constant 0 : i32
    %c0_i32_1 = arith.constant 0 : i32
    return %c0_i32, %c0_i32_0 : i32, i32
  }
  func.func @transform_3(%arg0: i32) -> (i32, i32, i32) {
    %c0_i32 = arith.constant 0 : i32
    %c0_i32_0 = arith.constant 0 : i32
    %c0_i32_1 = arith.constant 0 : i32
    %c0_i32_2 = arith.constant 0 : i32
    return %c0_i32, %c0_i32_0, %c0_i32_1 : i32, i32, i32
  }
  func.func @transform_4(%arg0: i32) -> (i32, i32) {
    %c0_i32 = arith.constant 0 : i32
    %c0_i32_0 = arith.constant 0 : i32
    %c0_i32_1 = arith.constant 0 : i32
    return %c0_i32, %c0_i32_0 : i32, i32
  }
  func.func @transform_5(%arg0: i32) -> (i32, i32) {
    %c0_i32 = arith.constant 0 : i32
    %c0_i32_0 = arith.constant 0 : i32
    %c0_i32_1 = arith.constant 0 : i32
    return %c0_i32, %c0_i32_0 : i32, i32
  }
  func.func @transform_6(%arg0: i32) -> (i32, i32, i32) {
    %c0_i32 = arith.constant 0 : i32
    %c0_i32_0 = arith.constant 0 : i32
    %c0_i32_1 = arith.constant 0 : i32
    %c0_i32_2 = arith.constant 0 : i32
    return %c0_i32, %c0_i32_0, %c0_i32_1 : i32, i32, i32
  }
  func.func @transform_7(%arg0: i32) -> (i32, i32) {
    %c0_i32 = arith.constant 0 : i32
    %c0_i32_0 = arith.constant 0 : i32
    %c0_i32_1 = arith.constant 0 : i32
    return %c0_i32, %c0_i32_0 : i32, i32
  }
  func.func @transform_8(%arg0: i32) -> (i32, i32) {
    %c0_i32 = arith.constant 0 : i32
    %c0_i32_0 = arith.constant 0 : i32
    %c0_i32_1 = arith.constant 0 : i32
    return %c0_i32, %c0_i32_0 : i32, i32
  }
  func.func @transform_9(%arg0: i32) -> (i32, i32, i32) {
    %c0_i32 = arith.constant 0 : i32
    %c0_i32_0 = arith.constant 0 : i32
    %c0_i32_1 = arith.constant 0 : i32
    %c0_i32_2 = arith.constant 0 : i32
    return %c0_i32, %c0_i32_0, %c0_i32_1 : i32, i32, i32
  }
  func.func @transform_10(%arg0: i32) -> (i32, i32) {
    %c0_i32 = arith.constant 0 : i32
    %c0_i32_0 = arith.constant 0 : i32
    %c0_i32_1 = arith.constant 0 : i32
    return %c0_i32, %c0_i32_0 : i32, i32
  }
  func.func @transform_11(%arg0: i32) -> (i32, i32, i32) {
    %c0_i32 = arith.constant 0 : i32
    %c0_i32_0 = arith.constant 0 : i32
    %c0_i32_1 = arith.constant 0 : i32
    return %arg0, %c0_i32, %c0_i32_0 : i32, i32, i32
  }
  func.func @transform_12(%arg0: i32) -> (i32, i32, i32) {
    %c0_i32 = arith.constant 0 : i32
    %c0_i32_0 = arith.constant 0 : i32
    %c0_i32_1 = arith.constant 0 : i32
    return %arg0, %c0_i32, %c0_i32_0 : i32, i32, i32
  }
}

</mosaic_0001>

<bundles_post_ra>
// kernel: squeeze.5
= control target key start
LH: loop header
LB: loop body
LE: loop exit
PB: predicated region body
PF: predicated region fallthrough
CT: control target
= control target key end

     0   :  { %s5486_s6 = smov 0   ;;  %s6279_s0 = inlined_call_operand.vmem [shape: f32[512,1024,1], index: 0, kind: input, shape index: {}]   ;;  %s6280_s1 = inlined_call_operand.vmem [shape: f32[512,256,4], index: 1, kind: output, shape index: {}]  }
   0x1 LB: > { %s4686_s7 = sadd.s32 4294967295, %s5474_s6   ;;  %p4689_p0 = scmp.ge.s32.totalorder %s5474_s6, 1  ;;  %s5474_s6 = sphi %s5486_s6, %s7_s6  }
   0x2   : > { %p28_p1 = scmp.lt.s32.totalorder %s5474_s6, 3 }
   0x4   : > { %p29_p2 = pnand %p4689_p0, %p28_p1 }
   0x6   : > { %32 = sbr.rel (%p29_p2) target bundleno = 1041 (0x411), region = 20 }
   0xb   : > { %s4690_s8 = sshll.u32 %s4686_s7, 11 }
   0xc   : > { %p43_p3 = scmp.lt.s32.totalorder %s4690_s8, 4095 }
   0xe   : > { %s6282_s8 = smov (!%p43_p3, %s4690_s8), 4095 }
   0xf   : > { %s5500_s11 = scalar_lea.vmem %s6279_s0, %s6282_s8  ;;  %s5762_s14 = scalar_lea.vmem %s6280_s1, %s6282_s8 }
  0x10   : > { %v54_v0 = vld [vmem:[%s5500_s11] sm:$0xff]   ;;  %v4692_v1 = vld [vmem:[%s5500_s11 + $0x8] sm:$0xff]   ;;  %v4693_v2 = vld [vmem:[%s5500_s11 + $0x10] sm:$0xff]  }
  0x11   : > { %55 = vst [vmem:[#allocation0] sm:$0xf] %v54_v0   ;;  %v4694_v3 = vld [vmem:[%s5500_s11 + $0x18] sm:$0xff]   ;;  %v4695_v4 = vld [vmem:[%s5500_s11 + $0x20] sm:$0xff]   ;;  %v4696_v5 = vld [vmem:[%s5500_s11 + $0x28] sm:$0xff]  }
  0x12   : > { %57 = vst [vmem:[#allocation0 + $0x1c] sm:$0xf0] %v54_v0   ;;  %v4697_v6 = vld [vmem:[%s5500_s11 + $0x30] sm:$0xff]   ;;  %v4698_v7 = vld [vmem:[%s5500_s11 + $0x38] sm:$0xff]   ;;  %v4699_v8 = vld [vmem:[%s5500_s11 + $0x40] sm:$0xff]  }
  0x13   : > { %61 = vst [vmem:[#allocation0 + $0x8] sm:$0xf] %v4692_v1   ;;  %v4700_v9 = vld [vmem:[%s5500_s11 + $0x48] sm:$0xff]   ;;  %v4701_v10 = vld [vmem:[%s5500_s11 + $0x50] sm:$0xff]   ;;  %v4702_v11 = vld [vmem:[%s5500_s11 + $0x58] sm:$0xff]  }
  0x14   : > { %63 = vst [vmem:[#allocation0 + $0x24] sm:$0xf0] %v4692_v1   ;;  %v4703_v12 = vld [vmem:[%s5500_s11 + $0x60] sm:$0xff]   ;;  %v4704_v13 = vld [vmem:[%s5500_s11 + $0x68] sm:$0xff]   ;;  %v4705_v14 = vld [vmem:[%s5500_s11 + $0x70] sm:$0xff]  }
  0x15   : > { %67 = vst [vmem:[#allocation0 + $0x10] sm:$0xf] %v4693_v2   ;;  %v4706_v15 = vld [vmem:[%s5500_s11 + $0x78] sm:$0xff]   ;;  %v4707_v16 = vld [vmem:[%s5500_s11 + $0x80] sm:$0xff]   ;;  %v4708_v17 = vld [vmem:[%s5500_s11 + $0x88] sm:$0xff]  }
  0x16   : > { %69 = vst [vmem:[#allocation0 + $0x2c] sm:$0xf0] %v4693_v2   ;;  %v4709_v18 = vld [vmem:[%s5500_s11 + $0x90] sm:$0xff]   ;;  %v4710_v19 = vld [vmem:[%s5500_s11 + $0x98] sm:$0xff]   ;;  %v4711_v20 = vld [vmem:[%s5500_s11 + $0xa0] sm:$0xff]  }
  0x17   : > { %73 = vst [vmem:[#allocation0 + $0x18] sm:$0xf] %v4694_v3   ;;  %v4712_v21 = vld [vmem:[%s5500_s11 + $0xa8] sm:$0xff]   ;;  %v4713_v22 = vld [vmem:[%s5500_s11 + $0xb0] sm:$0xff]   ;;  %v4714_v23 = vld [vmem:[%s5500_s11 + $0xb8] sm:$0xff]  }
  0x18   : > { %75 = vst [vmem:[#allocation0 + $0x34] sm:$0xf0] %v4694_v3   ;;  %v4715_v24 = vld [vmem:[%s5500_s11 + $0xc0] sm:$0xff]   ;;  %v4716_v25 = vld [vmem:[%s5500_s11 + $0xc8] sm:$0xff]   ;;  %v4717_v26 = vld [vmem:[%s5500_s11 + $0xd0] sm:$0xff]  }
  0x19   : > { %79 = vst [vmem:[#allocation0 + $0x40] sm:$0xf] %v4695_v4   ;;  %v4718_v27 = vld [vmem:[%s5500_s11 + $0xd8] sm:$0xff]   ;;  %v4719_v28 = vld [vmem:[%s5500_s11 + $0xe0] sm:$0xff]   ;;  %v4720_v29 = vld [vmem:[%s5500_s11 + $0xe8] sm:$0xff]  }
  0x1a   : > { %81 = vst [vmem:[#allocation0 + $0x5c] sm:$0xf0] %v4695_v4   ;;  %v4721_v30 = vld [vmem:[%s5500_s11 + $0xf0] sm:$0xff]   ;;  %v4722_v31 = vld [vmem:[%s5500_s11 + $0xf8] sm:$0xff]   ;;  %v4723_v32 = vld [vmem:[%s5500_s11 + $0x100] sm:$0xff]  }
  0x1b   : > { %85 = vst [vmem:[#allocation0 + $0x48] sm:$0xf] %v4696_v5   ;;  %v4724_v33 = vld [vmem:[%s5500_s11 + $0x108] sm:$0xff]   ;;  %v4725_v34 = vld [vmem:[%s5500_s11 + $0x110] sm:$0xff]   ;;  %v4726_v35 = vld [vmem:[%s5500_s11 + $0x118] sm:$0xff]  }
  0x1c   : > { %87 = vst [vmem:[#allocation0 + $0x64] sm:$0xf0] %v4696_v5   ;;  %v4727_v36 = vld [vmem:[%s5500_s11 + $0x120] sm:$0xff]   ;;  %v4728_v37 = vld [vmem:[%s5500_s11 + $0x128] sm:$0xff]   ;;  %v4729_v38 = vld [vmem:[%s5500_s11 + $0x130] sm:$0xff]  }
  0x1d   : > { %91 = vst [vmem:[#allocation0 + $0x50] sm:$0xf] %v4697_v6   ;;  %v4730_v39 = vld [vmem:[%s5500_s11 + $0x138] sm:$0xff]   ;;  %v4731_v40 = vld [vmem:[%s5500_s11 + $0x140] sm:$0xff]   ;;  %v4732_v41 = vld [vmem:[%s5500_s11 + $0x148] sm:$0xff]  }
  0x1e   : > { %93 = vst [vmem:[#allocation0 + $0x6c] sm:$0xf0] %v4697_v6   ;;  %v4733_v42 = vld [vmem:[%s5500_s11 + $0x150] sm:$0xff]   ;;  %v4734_v43 = vld [vmem:[%s5500_s11 + $0x158] sm:$0xff]   ;;  %v4735_v44 = vld [vmem:[%s5500_s11 + $0x160] sm:$0xff]  }
  0x1f   : > { %97 = vst [vmem:[#allocation0 + $0x58] sm:$0xf] %v4698_v7   ;;  %v4736_v45 = vld [vmem:[%s5500_s11 + $0x168] sm:$0xff]   ;;  %v4737_v46 = vld [vmem:[%s5500_s11 + $0x170] sm:$0xff]   ;;  %v4738_v47 = vld [vmem:[%s5500_s11 + $0x178] sm:$0xff]  }
  0x20   : > { %99 = vst [vmem:[#allocation0 + $0x74] sm:$0xf0] %v4698_v7   ;;  %v4739_v48 = vld [vmem:[%s5500_s11 + $0x180] sm:$0xff]   ;;  %v4740_v49 = vld [vmem:[%s5500_s11 + $0x188] sm:$0xff]   ;;  %v4741_v50 = vld [vmem:[%s5500_s11 + $0x190] sm:$0xff]  }
  0x21   : > { %103 = vst [vmem:[#allocation0 + $0x80] sm:$0xf] %v4699_v8   ;;  %v4742_v51 = vld [vmem:[%s5500_s11 + $0x198] sm:$0xff]   ;;  %v4743_v52 = vld [vmem:[%s5500_s11 + $0x1a0] sm:$0xff]   ;;  %v4744_v53 = vld [vmem:[%s5500_s11 + $0x1a8] sm:$0xff]  }
  0x22   : > { %105 = vst [vmem:[#allocation0 + $0x9c] sm:$0xf0] %v4699_v8   ;;  %v4745_v54 = vld [vmem:[%s5500_s11 + $0x1b0] sm:$0xff]   ;;  %v4746_v55 = vld [vmem:[%s5500_s11 + $0x1b8] sm:$0xff]   ;;  %v4747_v56 = vld [vmem:[%s5500_s11 + $0x1c0] sm:$0xff]  }
  0x23   : > { %109 = vst [vmem:[#allocation0 + $0x88] sm:$0xf] %v4700_v9   ;;  %v4748_v57 = vld [vmem:[%s5500_s11 + $0x1c8] sm:$0xff]   ;;  %v4749_v58 = vld [vmem:[%s5500_s11 + $0x1d0] sm:$0xff]   ;;  %v4750_v59 = vld [vmem:[%s5500_s11 + $0x1d8] sm:$0xff]  }
  0x24   : > { %111 = vst [vmem:[#allocation0 + $0xa4] sm:$0xf0] %v4700_v9   ;;  %v4751_v60 = vld [vmem:[%s5500_s11 + $0x1e0] sm:$0xff]   ;;  %v4752_v61 = vld [vmem:[%s5500_s11 + $0x1e8] sm:$0xff]   ;;  %v4753_v62 = vld [vmem:[%s5500_s11 + $0x1f0] sm:$0xff]  }
  0x25   : > { %115 = vst [vmem:[#allocation0 + $0x90] sm:$0xf] %v4701_v10   ;;  %v4754_v63 = vld [vmem:[%s5500_s11 + $0x1f8] sm:$0xff]   ;;  %v4755_v0 = vld [vmem:[%s5500_s11 + $0x200] sm:$0xff]   ;;  %v4756_v1 = vld [vmem:[%s5500_s11 + $0x208] sm:$0xff]  }
  0x26   : > { %117 = vst [vmem:[#allocation0 + $0xac] sm:$0xf0] %v4701_v10   ;;  %v4757_v2 = vld [vmem:[%s5500_s11 + $0x210] sm:$0xff]   ;;  %v4758_v3 = vld [vmem:[%s5500_s11 + $0x218] sm:$0xff]   ;;  %v4759_v4 = vld [vmem:[%s5500_s11 + $0x220] sm:$0xff]  }
  0x27   : > { %121 = vst [vmem:[#allocation0 + $0x98] sm:$0xf] %v4702_v11   ;;  %v4760_v5 = vld [vmem:[%s5500_s11 + $0x228] sm:$0xff]   ;;  %v4761_v6 = vld [vmem:[%s5500_s11 + $0x230] sm:$0xff]   ;;  %v4762_v7 = vld [vmem:[%s5500_s11 + $0x238] sm:$0xff]  }
  0x28   : > { %123 = vst [vmem:[#allocation0 + $0xb4] sm:$0xf0] %v4702_v11   ;;  %v4763_v8 = vld [vmem:[%s5500_s11 + $0x240] sm:$0xff]   ;;  %v4764_v9 = vld [vmem:[%s5500_s11 + $0x248] sm:$0xff]   ;;  %v4765_v10 = vld [vmem:[%s5500_s11 + $0x250] sm:$0xff]  }
  0x29   : > { %127 = vst [vmem:[#allocation0 + $0xc0] sm:$0xf] %v4703_v12   ;;  %v4766_v11 = vld [vmem:[%s5500_s11 + $0x258] sm:$0xff]  }
  0x2a   : > { %129 = vst [vmem:[#allocation0 + $0xdc] sm:$0xf0] %v4703_v12   ;;  %v4767_v12 = vld [vmem:[%s5500_s11 + $0x260] sm:$0xff]  }
  0x2b   : > { %133 = vst [vmem:[#allocation0 + $0xc8] sm:$0xf] %v4704_v13  }
  0x2c   : > { %135 = vst [vmem:[#allocation0 + $0xe4] sm:$0xf0] %v4704_v13   ;;  %v4768_v13 = vld [vmem:[%s5500_s11 + $0x268] sm:$0xff]  }
  0x2d   : > { %139 = vst [vmem:[#allocation0 + $0xd0] sm:$0xf] %v4705_v14  }
  0x2e   : > { %141 = vst [vmem:[#allocation0 + $0xec] sm:$0xf0] %v4705_v14   ;;  %v4769_v14 = vld [vmem:[%s5500_s11 + $0x270] sm:$0xff]  }
  0x2f   : > { %145 = vst [vmem:[#allocation0 + $0xd8] sm:$0xf] %v4706_v15  }
  0x30   : > { %147 = vst [vmem:[#allocation0 + $0xf4] sm:$0xf0] %v4706_v15   ;;  %v4770_v15 = vld [vmem:[%s5500_s11 + $0x278] sm:$0xff]  }
  0x31   : > { %151 = vst [vmem:[#allocation0 + $0x100] sm:$0xf] %v4707_v16  }
  0x32   : > { %153 = vst [vmem:[#allocation0 + $0x11c] sm:$0xf0] %v4707_v16   ;;  %v4771_v16 = vld [vmem:[%s5500_s11 + $0x280] sm:$0xff]  }
  0x33   : > { %157 = vst [vmem:[#allocation0 + $0x108] sm:$0xf] %v4708_v17  }
  0x34   : > { %159 = vst [vmem:[#allocation0 + $0x124] sm:$0xf0] %v4708_v17   ;;  %v4772_v17 = vld [vmem:[%s5500_s11 + $0x288] sm:$0xff]  }
  0x35   : > { %163 = vst [vmem:[#allocation0 + $0x110] sm:$0xf] %v4709_v18  }
  0x36   : > { %165 = vst [vmem:[#allocation0 + $0x12c] sm:$0xf0] %v4709_v18   ;;  %v4773_v18 = vld [vmem:[%s5500_s11 + $0x290] sm:$0xff]  }
  0x37   : > { %169 = vst [vmem:[#allocation0 + $0x118] sm:$0xf] %v4710_v19  }
  0x38   : > { %171 = vst [vmem:[#allocation0 + $0x134] sm:$0xf0] %v4710_v19   ;;  %v4774_v19 = vld [vmem:[%s5500_s11 + $0x298] sm:$0xff]  }
  0x39   : > { %175 = vst [vmem:[#allocation0 + $0x140] sm:$0xf] %v4711_v20  }
  0x3a   : > { %177 = vst [vmem:[#allocation0 + $0x15c] sm:$0xf0] %v4711_v20   ;;  %v4775_v20 = vld [vmem:[%s5500_s11 + $0x2a0] sm:$0xff]  }
  0x3b   : > { %181 = vst [vmem:[#allocation0 + $0x148] sm:$0xf] %v4712_v21  }
  0x3c   : > { %183 = vst [vmem:[#allocation0 + $0x164] sm:$0xf0] %v4712_v21   ;;  %v4776_v21 = vld [vmem:[%s5500_s11 + $0x2a8] sm:$0xff]  }
  0x3d   : > { %187 = vst [vmem:[#allocation0 + $0x150] sm:$0xf] %v4713_v22  }
  0x3e   : > { %189 = vst [vmem:[#allocation0 + $0x16c] sm:$0xf0] %v4713_v22   ;;  %v4777_v22 = vld [vmem:[%s5500_s11 + $0x2b0] sm:$0xff]  }
  0x3f   : > { %193 = vst [vmem:[#allocation0 + $0x158] sm:$0xf] %v4714_v23  }
  0x40   : > { %195 = vst [vmem:[#allocation0 + $0x174] sm:$0xf0] %v4714_v23   ;;  %v4778_v23 = vld [vmem:[%s5500_s11 + $0x2b8] sm:$0xff]  }
  0x41   : > { %199 = vst [vmem:[#allocation0 + $0x180] sm:$0xf] %v4715_v24  }
  0x42   : > { %201 = vst [vmem:[#allocation0 + $0x19c] sm:$0xf0] %v4715_v24   ;;  %v4779_v24 = vld [vmem:[%s5500_s11 + $0x2c0] sm:$0xff]  }
  0x43   : > { %205 = vst [vmem:[#allocation0 + $0x188] sm:$0xf] %v4716_v25  }
  0x44   : > { %207 = vst [vmem:[#allocation0 + $0x1a4] sm:$0xf0] %v4716_v25   ;;  %v4780_v25 = vld [vmem:[%s5500_s11 + $0x2c8] sm:$0xff]  }
  0x45   : > { %211 = vst [vmem:[#allocation0 + $0x190] sm:$0xf] %v4717_v26  }
  0x46   : > { %213 = vst [vmem:[#allocation0 + $0x1ac] sm:$0xf0] %v4717_v26   ;;  %v4781_v26 = vld [vmem:[%s5500_s11 + $0x2d0] sm:$0xff]  }
  0x47   : > { %217 = vst [vmem:[#allocation0 + $0x198] sm:$0xf] %v4718_v27  }
  0x48   : > { %219 = vst [vmem:[#allocation0 + $0x1b4] sm:$0xf0] %v4718_v27   ;;  %v4782_v27 = vld [vmem:[%s5500_s11 + $0x2d8] sm:$0xff]  }
  0x49   : > { %223 = vst [vmem:[#allocation0 + $0x1c0] sm:$0xf] %v4719_v28  }
  0x4a   : > { %225 = vst [vmem:[#allocation0 + $0x1dc] sm:$0xf0] %v4719_v28   ;;  %v4783_v28 = vld [vmem:[%s5500_s11 + $0x2e0] sm:$0xff]  }
  0x4b   : > { %229 = vst [vmem:[#allocation0 + $0x1c8] sm:$0xf] %v4720_v29  }
  0x4c   : > { %231 = vst [vmem:[#allocation0 + $0x1e4] sm:$0xf0] %v4720_v29   ;;  %v4784_v29 = vld [vmem:[%s5500_s11 + $0x2e8] sm:$0xff]  }
  0x4d   : > { %235 = vst [vmem:[#allocation0 + $0x1d0] sm:$0xf] %v4721_v30  }
  0x4e   : > { %237 = vst [vmem:[#allocation0 + $0x1ec] sm:$0xf0] %v4721_v30   ;;  %v4785_v30 = vld [vmem:[%s5500_s11 + $0x2f0] sm:$0xff]  }
  0x4f   : > { %241 = vst [vmem:[#allocation0 + $0x1d8] sm:$0xf] %v4722_v31  }
  0x50   : > { %243 = vst [vmem:[#allocation0 + $0x1f4] sm:$0xf0] %v4722_v31   ;;  %v4786_v31 = vld [vmem:[%s5500_s11 + $0x2f8] sm:$0xff]  }
  0x51   : > { %247 = vst [vmem:[#allocation0 + $0x200] sm:$0xf] %v4723_v32  }
  0x52   : > { %249 = vst [vmem:[#allocation0 + $0x21c] sm:$0xf0] %v4723_v32   ;;  %v4787_v32 = vld [vmem:[%s5500_s11 + $0x300] sm:$0xff]  }
  0x53   : > { %253 = vst [vmem:[#allocation0 + $0x208] sm:$0xf] %v4724_v33  }
  0x54   : > { %255 = vst [vmem:[#allocation0 + $0x224] sm:$0xf0] %v4724_v33   ;;  %v4788_v33 = vld [vmem:[%s5500_s11 + $0x308] sm:$0xff]  }
  0x55   : > { %259 = vst [vmem:[#allocation0 + $0x210] sm:$0xf] %v4725_v34  }
  0x56   : > { %261 = vst [vmem:[#allocation0 + $0x22c] sm:$0xf0] %v4725_v34   ;;  %v4789_v34 = vld [vmem:[%s5500_s11 + $0x310] sm:$0xff]  }
  0x57   : > { %265 = vst [vmem:[#allocation0 + $0x218] sm:$0xf] %v4726_v35  }
  0x58   : > { %267 = vst [vmem:[#allocation0 + $0x234] sm:$0xf0] %v4726_v35   ;;  %v4790_v35 = vld [vmem:[%s5500_s11 + $0x318] sm:$0xff]  }
  0x59   : > { %271 = vst [vmem:[#allocation0 + $0x240] sm:$0xf] %v4727_v36  }
  0x5a   : > { %273 = vst [vmem:[#allocation0 + $0x25c] sm:$0xf0] %v4727_v36   ;;  %v4791_v36 = vld [vmem:[%s5500_s11 + $0x320] sm:$0xff]  }
  0x5b   : > { %277 = vst [vmem:[#allocation0 + $0x248] sm:$0xf] %v4728_v37  }
  0x5c   : > { %279 = vst [vmem:[#allocation0 + $0x264] sm:$0xf0] %v4728_v37   ;;  %v4792_v37 = vld [vmem:[%s5500_s11 + $0x328] sm:$0xff]  }
  0x5d   : > { %283 = vst [vmem:[#allocation0 + $0x250] sm:$0xf] %v4729_v38  }
  0x5e   : > { %285 = vst [vmem:[#allocation0 + $0x26c] sm:$0xf0] %v4729_v38   ;;  %v4793_v38 = vld [vmem:[%s5500_s11 + $0x330] sm:$0xff]  }
  0x5f   : > { %289 = vst [vmem:[#allocation0 + $0x258] sm:$0xf] %v4730_v39  }
  0x60   : > { %291 = vst [vmem:[#allocation0 + $0x274] sm:$0xf0] %v4730_v39   ;;  %v4794_v39 = vld [vmem:[%s5500_s11 + $0x338] sm:$0xff]  }
  0x61   : > { %295 = vst [vmem:[#allocation0 + $0x280] sm:$0xf] %v4731_v40  }
  0x62   : > { %297 = vst [vmem:[#allocation0 + $0x29c] sm:$0xf0] %v4731_v40   ;;  %v4795_v40 = vld [vmem:[%s5500_s11 + $0x340] sm:$0xff]  }
  0x63   : > { %301 = vst [vmem:[#allocation0 + $0x288] sm:$0xf] %v4732_v41  }
  0x64   : > { %303 = vst [vmem:[#allocation0 + $0x2a4] sm:$0xf0] %v4732_v41   ;;  %v4796_v41 = vld [vmem:[%s5500_s11 + $0x348] sm:$0xff]  }
  0x65   : > { %307 = vst [vmem:[#allocation0 + $0x290] sm:$0xf] %v4733_v42  }
  0x66   : > { %309 = vst [vmem:[#allocation0 + $0x2ac] sm:$0xf0] %v4733_v42   ;;  %v4797_v42 = vld [vmem:[%s5500_s11 + $0x350] sm:$0xff]  }
  0x67   : > { %313 = vst [vmem:[#allocation0 + $0x298] sm:$0xf] %v4734_v43  }
  0x68   : > { %315 = vst [vmem:[#allocation0 + $0x2b4] sm:$0xf0] %v4734_v43   ;;  %v4798_v43 = vld [vmem:[%s5500_s11 + $0x358] sm:$0xff]  }
  0x69   : > { %319 = vst [vmem:[#allocation0 + $0x2c0] sm:$0xf] %v4735_v44  }
  0x6a   : > { %321 = vst [vmem:[#allocation0 + $0x2dc] sm:$0xf0] %v4735_v44   ;;  %v4799_v44 = vld [vmem:[%s5500_s11 + $0x360] sm:$0xff]  }
  0x6b   : > { %325 = vst [vmem:[#allocation0 + $0x2c8] sm:$0xf] %v4736_v45  }
  0x6c   : > { %327 = vst [vmem:[#allocation0 + $0x2e4] sm:$0xf0] %v4736_v45   ;;  %v4800_v45 = vld [vmem:[%s5500_s11 + $0x368] sm:$0xff]  }
  0x6d   : > { %331 = vst [vmem:[#allocation0 + $0x2d0] sm:$0xf] %v4737_v46  }
  0x6e   : > { %333 = vst [vmem:[#allocation0 + $0x2ec] sm:$0xf0] %v4737_v46   ;;  %v4801_v46 = vld [vmem:[%s5500_s11 + $0x370] sm:$0xff]  }
  0x6f   : > { %337 = vst [vmem:[#allocation0 + $0x2d8] sm:$0xf] %v4738_v47  }
  0x70   : > { %339 = vst [vmem:[#allocation0 + $0x2f4] sm:$0xf0] %v4738_v47   ;;  %v4802_v47 = vld [vmem:[%s5500_s11 + $0x378] sm:$0xff]  }
  0x71   : > { %343 = vst [vmem:[#allocation0 + $0x300] sm:$0xf] %v4739_v48  }
  0x72   : > { %345 = vst [vmem:[#allocation0 + $0x31c] sm:$0xf0] %v4739_v48   ;;  %v4803_v48 = vld [vmem:[%s5500_s11 + $0x380] sm:$0xff]  }
  0x73   : > { %349 = vst [vmem:[#allocation0 + $0x308] sm:$0xf] %v4740_v49  }
  0x74   : > { %351 = vst [vmem:[#allocation0 + $0x324] sm:$0xf0] %v4740_v49   ;;  %v4804_v49 = vld [vmem:[%s5500_s11 + $0x388] sm:$0xff]  }
  0x75   : > { %355 = vst [vmem:[#allocation0 + $0x310] sm:$0xf] %v4741_v50  }
  0x76   : > { %357 = vst [vmem:[#allocation0 + $0x32c] sm:$0xf0] %v4741_v50   ;;  %v4805_v50 = vld [vmem:[%s5500_s11 + $0x390] sm:$0xff]  }
  0x77   : > { %361 = vst [vmem:[#allocation0 + $0x318] sm:$0xf] %v4742_v51  }
  0x78   : > { %363 = vst [vmem:[#allocation0 + $0x334] sm:$0xf0] %v4742_v51   ;;  %v4806_v51 = vld [vmem:[%s5500_s11 + $0x398] sm:$0xff]  }
  0x79   : > { %367 = vst [vmem:[#allocation0 + $0x340] sm:$0xf] %v4743_v52  }
  0x7a   : > { %369 = vst [vmem:[#allocation0 + $0x35c] sm:$0xf0] %v4743_v52   ;;  %v4807_v52 = vld [vmem:[%s5500_s11 + $0x3a0] sm:$0xff]  }
  0x7b   : > { %373 = vst [vmem:[#allocation0 + $0x348] sm:$0xf] %v4744_v53  }
  0x7c   : > { %375 = vst [vmem:[#allocation0 + $0x364] sm:$0xf0] %v4744_v53   ;;  %v4808_v53 = vld [vmem:[%s5500_s11 + $0x3a8] sm:$0xff]  }
  0x7d   : > { %379 = vst [vmem:[#allocation0 + $0x350] sm:$0xf] %v4745_v54  }
  0x7e   : > { %381 = vst [vmem:[#allocation0 + $0x36c] sm:$0xf0] %v4745_v54   ;;  %v4809_v54 = vld [vmem:[%s5500_s11 + $0x3b0] sm:$0xff]  }
  0x7f   : > { %385 = vst [vmem:[#allocation0 + $0x358] sm:$0xf] %v4746_v55  }
  0x80   : > { %387 = vst [vmem:[#allocation0 + $0x374] sm:$0xf0] %v4746_v55   ;;  %v4810_v55 = vld [vmem:[%s5500_s11 + $0x3b8] sm:$0xff]  }
  0x81   : > { %391 = vst [vmem:[#allocation0 + $0x380] sm:$0xf] %v4747_v56  }
  0x82   : > { %393 = vst [vmem:[#allocation0 + $0x39c] sm:$0xf0] %v4747_v56   ;;  %v4811_v56 = vld [vmem:[%s5500_s11 + $0x3c0] sm:$0xff]  }
  0x83   : > { %397 = vst [vmem:[#allocation0 + $0x388] sm:$0xf] %v4748_v57  }
  0x84   : > { %399 = vst [vmem:[#allocation0 + $0x3a4] sm:$0xf0] %v4748_v57   ;;  %v4812_v57 = vld [vmem:[%s5500_s11 + $0x3c8] sm:$0xff]  }
  0x85   : > { %403 = vst [vmem:[#allocation0 + $0x390] sm:$0xf] %v4749_v58  }
  0x86   : > { %405 = vst [vmem:[#allocation0 + $0x3ac] sm:$0xf0] %v4749_v58   ;;  %v4813_v58 = vld [vmem:[%s5500_s11 + $0x3d0] sm:$0xff]  }
  0x87   : > { %409 = vst [vmem:[#allocation0 + $0x398] sm:$0xf] %v4750_v59  }
  0x88   : > { %411 = vst [vmem:[#allocation0 + $0x3b4] sm:$0xf0] %v4750_v59   ;;  %v4814_v59 = vld [vmem:[%s5500_s11 + $0x3d8] sm:$0xff]  }
  0x89   : > { %415 = vst [vmem:[#allocation0 + $0x3c0] sm:$0xf] %v4751_v60  }
  0x8a   : > { %417 = vst [vmem:[#allocation0 + $0x3dc] sm:$0xf0] %v4751_v60   ;;  %v4815_v60 = vld [vmem:[%s5500_s11 + $0x3e0] sm:$0xff]  }
  0x8b   : > { %421 = vst [vmem:[#allocation0 + $0x3c8] sm:$0xf] %v4752_v61  }
  0x8c   : > { %423 = vst [vmem:[#allocation0 + $0x3e4] sm:$0xf0] %v4752_v61   ;;  %v4816_v61 = vld [vmem:[%s5500_s11 + $0x3e8] sm:$0xff]  }
  0x8d   : > { %427 = vst [vmem:[#allocation0 + $0x3d0] sm:$0xf] %v4753_v62  }
  0x8e   : > { %429 = vst [vmem:[#allocation0 + $0x3ec] sm:$0xf0] %v4753_v62   ;;  %v4817_v62 = vld [vmem:[%s5500_s11 + $0x3f0] sm:$0xff]  }
  0x8f   : > { %433 = vst [vmem:[#allocation0 + $0x3d8] sm:$0xf] %v4754_v63  }
  0x90   : > { %435 = vst [vmem:[#allocation0 + $0x3f4] sm:$0xf0] %v4754_v63   ;;  %v4818_v63 = vld [vmem:[%s5500_s11 + $0x3f8] sm:$0xff]  }
  0x91   : > { %439 = vst [vmem:[#allocation0 + $0x400] sm:$0xf] %v4755_v0  }
  0x92   : > { %441 = vst [vmem:[#allocation0 + $0x41c] sm:$0xf0] %v4755_v0   ;;  %v4819_v0 = vld [vmem:[%s5500_s11 + $0x400] sm:$0xff]  }
  0x93   : > { %445 = vst [vmem:[#allocation0 + $0x408] sm:$0xf] %v4756_v1  }
  0x94   : > { %447 = vst [vmem:[#allocation0 + $0x424] sm:$0xf0] %v4756_v1   ;;  %v4820_v1 = vld [vmem:[%s5500_s11 + $0x408] sm:$0xff]  }
  0x95   : > { %451 = vst [vmem:[#allocation0 + $0x410] sm:$0xf] %v4757_v2  }
  0x96   : > { %453 = vst [vmem:[#allocation0 + $0x42c] sm:$0xf0] %v4757_v2   ;;  %v4821_v2 = vld [vmem:[%s5500_s11 + $0x410] sm:$0xff]  }
  0x97   : > { %457 = vst [vmem:[#allocation0 + $0x418] sm:$0xf] %v4758_v3  }
  0x98   : > { %459 = vst [vmem:[#allocation0 + $0x434] sm:$0xf0] %v4758_v3   ;;  %v4822_v3 = vld [vmem:[%s5500_s11 + $0x418] sm:$0xff]  }
  0x99   : > { %463 = vst [vmem:[#allocation0 + $0x440] sm:$0xf] %v4759_v4  }
  0x9a   : > { %465 = vst [vmem:[#allocation0 + $0x45c] sm:$0xf0] %v4759_v4   ;;  %v4823_v4 = vld [vmem:[%s5500_s11 + $0x420] sm:$0xff]  }
  0x9b   : > { %469 = vst [vmem:[#allocation0 + $0x448] sm:$0xf] %v4760_v5  }
  0x9c   : > { %471 = vst [vmem:[#allocation0 + $0x464] sm:$0xf0] %v4760_v5   ;;  %v4824_v5 = vld [vmem:[%s5500_s11 + $0x428] sm:$0xff]  }
  0x9d   : > { %475 = vst [vmem:[#allocation0 + $0x450] sm:$0xf] %v4761_v6  }
  0x9e   : > { %477 = vst [vmem:[#allocation0 + $0x46c] sm:$0xf0] %v4761_v6   ;;  %v4825_v6 = vld [vmem:[%s5500_s11 + $0x430] sm:$0xff]  }
  0x9f   : > { %481 = vst [vmem:[#allocation0 + $0x458] sm:$0xf] %v4762_v7  }
  0xa0   : > { %483 = vst [vmem:[#allocation0 + $0x474] sm:$0xf0] %v4762_v7   ;;  %v4826_v7 = vld [vmem:[%s5500_s11 + $0x438] sm:$0xff]  }
  0xa1   : > { %487 = vst [vmem:[#allocation0 + $0x480] sm:$0xf] %v4763_v8  }
  0xa2   : > { %489 = vst [vmem:[#allocation0 + $0x49c] sm:$0xf0] %v4763_v8   ;;  %v4827_v8 = vld [vmem:[%s5500_s11 + $0x440] sm:$0xff]  }
  0xa3   : > { %493 = vst [vmem:[#allocation0 + $0x488] sm:$0xf] %v4764_v9  }
  0xa4   : > { %495 = vst [vmem:[#allocation0 + $0x4a4] sm:$0xf0] %v4764_v9   ;;  %v4828_v9 = vld [vmem:[%s5500_s11 + $0x448] sm:$0xff]  }
  0xa5   : > { %499 = vst [vmem:[#allocation0 + $0x490] sm:$0xf] %v4765_v10  }
  0xa6   : > { %501 = vst [vmem:[#allocation0 + $0x4ac] sm:$0xf0] %v4765_v10   ;;  %v4829_v10 = vld [vmem:[%s5500_s11 + $0x450] sm:$0xff]  }
  0xa7   : > { %505 = vst [vmem:[#allocation0 + $0x498] sm:$0xf] %v4766_v11  }
  0xa8   : > { %507 = vst [vmem:[#allocation0 + $0x4b4] sm:$0xf0] %v4766_v11   ;;  %v4830_v11 = vld [vmem:[%s5500_s11 + $0x458] sm:$0xff]  }
  0xa9   : > { %511 = vst [vmem:[#allocation0 + $0x4c0] sm:$0xf] %v4767_v12  }
  0xaa   : > { %513 = vst [vmem:[#allocation0 + $0x4dc] sm:$0xf0] %v4767_v12   ;;  %v4831_v12 = vld [vmem:[%s5500_s11 + $0x460] sm:$0xff]  }
  0xab   : > { %517 = vst [vmem:[#allocation0 + $0x4c8] sm:$0xf] %v4768_v13  }
  0xac   : > { %519 = vst [vmem:[#allocation0 + $0x4e4] sm:$0xf0] %v4768_v13   ;;  %v4832_v13 = vld [vmem:[%s5500_s11 + $0x468] sm:$0xff]  }
  0xad   : > { %523 = vst [vmem:[#allocation0 + $0x4d0] sm:$0xf] %v4769_v14  }
  0xae   : > { %525 = vst [vmem:[#allocation0 + $0x4ec] sm:$0xf0] %v4769_v14   ;;  %v4833_v14 = vld [vmem:[%s5500_s11 + $0x470] sm:$0xff]  }
  0xaf   : > { %529 = vst [vmem:[#allocation0 + $0x4d8] sm:$0xf] %v4770_v15  }
  0xb0   : > { %531 = vst [vmem:[#allocation0 + $0x4f4] sm:$0xf0] %v4770_v15   ;;  %v4834_v15 = vld [vmem:[%s5500_s11 + $0x478] sm:$0xff]  }
  0xb1   : > { %535 = vst [vmem:[#allocation0 + $0x500] sm:$0xf] %v4771_v16  }
  0xb2   : > { %537 = vst [vmem:[#allocation0 + $0x51c] sm:$0xf0] %v4771_v16   ;;  %v4835_v16 = vld [vmem:[%s5500_s11 + $0x480] sm:$0xff]  }
  0xb3   : > { %541 = vst [vmem:[#allocation0 + $0x508] sm:$0xf] %v4772_v17  }
  0xb4   : > { %543 = vst [vmem:[#allocation0 + $0x524] sm:$0xf0] %v4772_v17   ;;  %v4836_v17 = vld [vmem:[%s5500_s11 + $0x488] sm:$0xff]  }
  0xb5   : > { %547 = vst [vmem:[#allocation0 + $0x510] sm:$0xf] %v4773_v18  }
  0xb6   : > { %549 = vst [vmem:[#allocation0 + $0x52c] sm:$0xf0] %v4773_v18   ;;  %v4837_v18 = vld [vmem:[%s5500_s11 + $0x490] sm:$0xff]  }
  0xb7   : > { %553 = vst [vmem:[#allocation0 + $0x518] sm:$0xf] %v4774_v19  }
  0xb8   : > { %555 = vst [vmem:[#allocation0 + $0x534] sm:$0xf0] %v4774_v19   ;;  %v4838_v19 = vld [vmem:[%s5500_s11 + $0x498] sm:$0xff]  }
  0xb9   : > { %559 = vst [vmem:[#allocation0 + $0x540] sm:$0xf] %v4775_v20  }
  0xba   : > { %561 = vst [vmem:[#allocation0 + $0x55c] sm:$0xf0] %v4775_v20   ;;  %v4839_v20 = vld [vmem:[%s5500_s11 + $0x4a0] sm:$0xff]  }
  0xbb   : > { %565 = vst [vmem:[#allocation0 + $0x548] sm:$0xf] %v4776_v21  }
  0xbc   : > { %567 = vst [vmem:[#allocation0 + $0x564] sm:$0xf0] %v4776_v21   ;;  %v4840_v21 = vld [vmem:[%s5500_s11 + $0x4a8] sm:$0xff]  }
  0xbd   : > { %571 = vst [vmem:[#allocation0 + $0x550] sm:$0xf] %v4777_v22  }
  0xbe   : > { %573 = vst [vmem:[#allocation0 + $0x56c] sm:$0xf0] %v4777_v22   ;;  %v4841_v22 = vld [vmem:[%s5500_s11 + $0x4b0] sm:$0xff]  }
  0xbf   : > { %577 = vst [vmem:[#allocation0 + $0x558] sm:$0xf] %v4778_v23  }
  0xc0   : > { %579 = vst [vmem:[#allocation0 + $0x574] sm:$0xf0] %v4778_v23   ;;  %v4842_v23 = vld [vmem:[%s5500_s11 + $0x4b8] sm:$0xff]  }
  0xc1   : > { %583 = vst [vmem:[#allocation0 + $0x580] sm:$0xf] %v4779_v24  }
  0xc2   : > { %585 = vst [vmem:[#allocation0 + $0x59c] sm:$0xf0] %v4779_v24   ;;  %v4843_v24 = vld [vmem:[%s5500_s11 + $0x4c0] sm:$0xff]  }
  0xc3   : > { %589 = vst [vmem:[#allocation0 + $0x588] sm:$0xf] %v4780_v25  }
  0xc4   : > { %591 = vst [vmem:[#allocation0 + $0x5a4] sm:$0xf0] %v4780_v25   ;;  %v4844_v25 = vld [vmem:[%s5500_s11 + $0x4c8] sm:$0xff]  }
  0xc5   : > { %595 = vst [vmem:[#allocation0 + $0x590] sm:$0xf] %v4781_v26  }
  0xc6   : > { %597 = vst [vmem:[#allocation0 + $0x5ac] sm:$0xf0] %v4781_v26   ;;  %v4845_v26 = vld [vmem:[%s5500_s11 + $0x4d0] sm:$0xff]  }
  0xc7   : > { %601 = vst [vmem:[#allocation0 + $0x598] sm:$0xf] %v4782_v27  }
  0xc8   : > { %603 = vst [vmem:[#allocation0 + $0x5b4] sm:$0xf0] %v4782_v27   ;;  %v4846_v27 = vld [vmem:[%s5500_s11 + $0x4d8] sm:$0xff]  }
  0xc9   : > { %607 = vst [vmem:[#allocation0 + $0x5c0] sm:$0xf] %v4783_v28  }
  0xca   : > { %609 = vst [vmem:[#allocation0 + $0x5dc] sm:$0xf0] %v4783_v28   ;;  %v4847_v28 = vld [vmem:[%s5500_s11 + $0x4e0] sm:$0xff]  }
  0xcb   : > { %613 = vst [vmem:[#allocation0 + $0x5c8] sm:$0xf] %v4784_v29  }
  0xcc   : > { %615 = vst [vmem:[#allocation0 + $0x5e4] sm:$0xf0] %v4784_v29   ;;  %v4848_v29 = vld [vmem:[%s5500_s11 + $0x4e8] sm:$0xff]  }
  0xcd   : > { %619 = vst [vmem:[#allocation0 + $0x5d0] sm:$0xf] %v4785_v30  }
  0xce   : > { %621 = vst [vmem:[#allocation0 + $0x5ec] sm:$0xf0] %v4785_v30   ;;  %v4849_v30 = vld [vmem:[%s5500_s11 + $0x4f0] sm:$0xff]  }
  0xcf   : > { %625 = vst [vmem:[#allocation0 + $0x5d8] sm:$0xf] %v4786_v31  }
  0xd0   : > { %627 = vst [vmem:[#allocation0 + $0x5f4] sm:$0xf0] %v4786_v31   ;;  %v4850_v31 = vld [vmem:[%s5500_s11 + $0x4f8] sm:$0xff]  }
  0xd1   : > { %631 = vst [vmem:[#allocation0 + $0x600] sm:$0xf] %v4787_v32  }
  0xd2   : > { %633 = vst [vmem:[#allocation0 + $0x61c] sm:$0xf0] %v4787_v32   ;;  %v4851_v32 = vld [vmem:[%s5500_s11 + $0x500] sm:$0xff]  }
  0xd3   : > { %637 = vst [vmem:[#allocation0 + $0x608] sm:$0xf] %v4788_v33  }
  0xd4   : > { %639 = vst [vmem:[#allocation0 + $0x624] sm:$0xf0] %v4788_v33   ;;  %v4852_v33 = vld [vmem:[%s5500_s11 + $0x508] sm:$0xff]  }
  0xd5   : > { %643 = vst [vmem:[#allocation0 + $0x610] sm:$0xf] %v4789_v34  }
  0xd6   : > { %645 = vst [vmem:[#allocation0 + $0x62c] sm:$0xf0] %v4789_v34   ;;  %v4853_v34 = vld [vmem:[%s5500_s11 + $0x510] sm:$0xff]  }
  0xd7   : > { %649 = vst [vmem:[#allocation0 + $0x618] sm:$0xf] %v4790_v35  }
  0xd8   : > { %651 = vst [vmem:[#allocation0 + $0x634] sm:$0xf0] %v4790_v35   ;;  %v4854_v35 = vld [vmem:[%s5500_s11 + $0x518] sm:$0xff]  }
  0xd9   : > { %655 = vst [vmem:[#allocation0 + $0x640] sm:$0xf] %v4791_v36  }
  0xda   : > { %657 = vst [vmem:[#allocation0 + $0x65c] sm:$0xf0] %v4791_v36   ;;  %v4855_v36 = vld [vmem:[%s5500_s11 + $0x520] sm:$0xff]  }
  0xdb   : > { %661 = vst [vmem:[#allocation0 + $0x648] sm:$0xf] %v4792_v37  }
  0xdc   : > { %663 = vst [vmem:[#allocation0 + $0x664] sm:$0xf0] %v4792_v37   ;;  %v4856_v37 = vld [vmem:[%s5500_s11 + $0x528] sm:$0xff]  }
  0xdd   : > { %667 = vst [vmem:[#allocation0 + $0x650] sm:$0xf] %v4793_v38  }
  0xde   : > { %669 = vst [vmem:[#allocation0 + $0x66c] sm:$0xf0] %v4793_v38   ;;  %v4857_v38 = vld [vmem:[%s5500_s11 + $0x530] sm:$0xff]  }
  0xdf   : > { %673 = vst [vmem:[#allocation0 + $0x658] sm:$0xf] %v4794_v39  }
  0xe0   : > { %675 = vst [vmem:[#allocation0 + $0x674] sm:$0xf0] %v4794_v39   ;;  %v4858_v39 = vld [vmem:[%s5500_s11 + $0x538] sm:$0xff]  }
  0xe1   : > { %679 = vst [vmem:[#allocation0 + $0x680] sm:$0xf] %v4795_v40  }
  0xe2   : > { %681 = vst [vmem:[#allocation0 + $0x69c] sm:$0xf0] %v4795_v40   ;;  %v4859_v40 = vld [vmem:[%s5500_s11 + $0x540] sm:$0xff]  }
  0xe3   : > { %685 = vst [vmem:[#allocation0 + $0x688] sm:$0xf] %v4796_v41  }
  0xe4   : > { %687 = vst [vmem:[#allocation0 + $0x6a4] sm:$0xf0] %v4796_v41   ;;  %v4860_v41 = vld [vmem:[%s5500_s11 + $0x548] sm:$0xff]  }
  0xe5   : > { %691 = vst [vmem:[#allocation0 + $0x690] sm:$0xf] %v4797_v42  }
  0xe6   : > { %693 = vst [vmem:[#allocation0 + $0x6ac] sm:$0xf0] %v4797_v42   ;;  %v4861_v42 = vld [vmem:[%s5500_s11 + $0x550] sm:$0xff]  }
  0xe7   : > { %697 = vst [vmem:[#allocation0 + $0x698] sm:$0xf] %v4798_v43  }
  0xe8   : > { %699 = vst [vmem:[#allocation0 + $0x6b4] sm:$0xf0] %v4798_v43   ;;  %v4862_v43 = vld [vmem:[%s5500_s11 + $0x558] sm:$0xff]  }
  0xe9   : > { %703 = vst [vmem:[#allocation0 + $0x6c0] sm:$0xf] %v4799_v44  }
  0xea   : > { %705 = vst [vmem:[#allocation0 + $0x6dc] sm:$0xf0] %v4799_v44   ;;  %v4863_v44 = vld [vmem:[%s5500_s11 + $0x560] sm:$0xff]  }
  0xeb   : > { %709 = vst [vmem:[#allocation0 + $0x6c8] sm:$0xf] %v4800_v45  }
  0xec   : > { %711 = vst [vmem:[#allocation0 + $0x6e4] sm:$0xf0] %v4800_v45   ;;  %v4864_v45 = vld [vmem:[%s5500_s11 + $0x568] sm:$0xff]  }
  0xed   : > { %715 = vst [vmem:[#allocation0 + $0x6d0] sm:$0xf] %v4801_v46  }
  0xee   : > { %717 = vst [vmem:[#allocation0 + $0x6ec] sm:$0xf0] %v4801_v46   ;;  %v4865_v46 = vld [vmem:[%s5500_s11 + $0x570] sm:$0xff]  }
  0xef   : > { %721 = vst [vmem:[#allocation0 + $0x6d8] sm:$0xf] %v4802_v47  }
  0xf0   : > { %723 = vst [vmem:[#allocation0 + $0x6f4] sm:$0xf0] %v4802_v47   ;;  %v4866_v47 = vld [vmem:[%s5500_s11 + $0x578] sm:$0xff]  }
  0xf1   : > { %727 = vst [vmem:[#allocation0 + $0x700] sm:$0xf] %v4803_v48  }
  0xf2   : > { %729 = vst [vmem:[#allocation0 + $0x71c] sm:$0xf0] %v4803_v48   ;;  %v4867_v48 = vld [vmem:[%s5500_s11 + $0x580] sm:$0xff]  }
  0xf3   : > { %733 = vst [vmem:[#allocation0 + $0x708] sm:$0xf] %v4804_v49  }
  0xf4   : > { %735 = vst [vmem:[#allocation0 + $0x724] sm:$0xf0] %v4804_v49   ;;  %v4868_v49 = vld [vmem:[%s5500_s11 + $0x588] sm:$0xff]  }
  0xf5   : > { %739 = vst [vmem:[#allocation0 + $0x710] sm:$0xf] %v4805_v50  }
  0xf6   : > { %741 = vst [vmem:[#allocation0 + $0x72c] sm:$0xf0] %v4805_v50   ;;  %v4869_v50 = vld [vmem:[%s5500_s11 + $0x590] sm:$0xff]  }
  0xf7   : > { %745 = vst [vmem:[#allocation0 + $0x718] sm:$0xf] %v4806_v51  }
  0xf8   : > { %747 = vst [vmem:[#allocation0 + $0x734] sm:$0xf0] %v4806_v51   ;;  %v4870_v51 = vld [vmem:[%s5500_s11 + $0x598] sm:$0xff]  }
  0xf9   : > { %751 = vst [vmem:[#allocation0 + $0x740] sm:$0xf] %v4807_v52  }
  0xfa   : > { %753 = vst [vmem:[#allocation0 + $0x75c] sm:$0xf0] %v4807_v52   ;;  %v4871_v52 = vld [vmem:[%s5500_s11 + $0x5a0] sm:$0xff]  }
  0xfb   : > { %757 = vst [vmem:[#allocation0 + $0x748] sm:$0xf] %v4808_v53  }
  0xfc   : > { %759 = vst [vmem:[#allocation0 + $0x764] sm:$0xf0] %v4808_v53   ;;  %v4872_v53 = vld [vmem:[%s5500_s11 + $0x5a8] sm:$0xff]  }
  0xfd   : > { %763 = vst [vmem:[#allocation0 + $0x750] sm:$0xf] %v4809_v54  }
  0xfe   : > { %765 = vst [vmem:[#allocation0 + $0x76c] sm:$0xf0] %v4809_v54   ;;  %v4873_v54 = vld [vmem:[%s5500_s11 + $0x5b0] sm:$0xff]  }
  0xff   : > { %769 = vst [vmem:[#allocation0 + $0x758] sm:$0xf] %v4810_v55  }
 0x100   : > { %771 = vst [vmem:[#allocation0 + $0x774] sm:$0xf0] %v4810_v55   ;;  %v4874_v55 = vld [vmem:[%s5500_s11 + $0x5b8] sm:$0xff]  }
 0x101   : > { %775 = vst [vmem:[#allocation0 + $0x780] sm:$0xf] %v4811_v56  }
 0x102   : > { %777 = vst [vmem:[#allocation0 + $0x79c] sm:$0xf0] %v4811_v56   ;;  %v4875_v56 = vld [vmem:[%s5500_s11 + $0x5c0] sm:$0xff]  }
 0x103   : > { %781 = vst [vmem:[#allocation0 + $0x788] sm:$0xf] %v4812_v57  }
 0x104   : > { %783 = vst [vmem:[#allocation0 + $0x7a4] sm:$0xf0] %v4812_v57   ;;  %v4876_v57 = vld [vmem:[%s5500_s11 + $0x5c8] sm:$0xff]  }
 0x105   : > { %787 = vst [vmem:[#allocation0 + $0x790] sm:$0xf] %v4813_v58  }
 0x106   : > { %789 = vst [vmem:[#allocation0 + $0x7ac] sm:$0xf0] %v4813_v58   ;;  %v4877_v58 = vld [vmem:[%s5500_s11 + $0x5d0] sm:$0xff]  }
 0x107   : > { %793 = vst [vmem:[#allocation0 + $0x798] sm:$0xf] %v4814_v59  }
 0x108   : > { %795 = vst [vmem:[#allocation0 + $0x7b4] sm:$0xf0] %v4814_v59   ;;  %v4878_v59 = vld [vmem:[%s5500_s11 + $0x5d8] sm:$0xff]  }
 0x109   : > { %799 = vst [vmem:[#allocation0 + $0x7c0] sm:$0xf] %v4815_v60  }
 0x10a   : > { %801 = vst [vmem:[#allocation0 + $0x7dc] sm:$0xf0] %v4815_v60   ;;  %v4879_v60 = vld [vmem:[%s5500_s11 + $0x5e0] sm:$0xff]  }
 0x10b   : > { %805 = vst [vmem:[#allocation0 + $0x7c8] sm:$0xf] %v4816_v61  }
 0x10c   : > { %807 = vst [vmem:[#allocation0 + $0x7e4] sm:$0xf0] %v4816_v61   ;;  %v4880_v61 = vld [vmem:[%s5500_s11 + $0x5e8] sm:$0xff]  }
 0x10d   : > { %811 = vst [vmem:[#allocation0 + $0x7d0] sm:$0xf] %v4817_v62  }
 0x10e   : > { %813 = vst [vmem:[#allocation0 + $0x7ec] sm:$0xf0] %v4817_v62   ;;  %v4881_v62 = vld [vmem:[%s5500_s11 + $0x5f0] sm:$0xff]  }
 0x10f   : > { %817 = vst [vmem:[#allocation0 + $0x7d8] sm:$0xf] %v4818_v63  }
 0x110   : > { %819 = vst [vmem:[#allocation0 + $0x7f4] sm:$0xf0] %v4818_v63   ;;  %v4882_v63 = vld [vmem:[%s5500_s11 + $0x5f8] sm:$0xff]  }
 0x111   : > { %823 = vst [vmem:[#allocation0 + $0x800] sm:$0xf] %v4819_v0  }
 0x112   : > { %825 = vst [vmem:[#allocation0 + $0x81c] sm:$0xf0] %v4819_v0   ;;  %v4883_v0 = vld [vmem:[%s5500_s11 + $0x600] sm:$0xff]  }
 0x113   : > { %829 = vst [vmem:[#allocation0 + $0x808] sm:$0xf] %v4820_v1  }
 0x114   : > { %831 = vst [vmem:[#allocation0 + $0x824] sm:$0xf0] %v4820_v1   ;;  %v4884_v1 = vld [vmem:[%s5500_s11 + $0x608] sm:$0xff]  }
 0x115   : > { %835 = vst [vmem:[#allocation0 + $0x810] sm:$0xf] %v4821_v2  }
 0x116   : > { %837 = vst [vmem:[#allocation0 + $0x82c] sm:$0xf0] %v4821_v2   ;;  %v4885_v2 = vld [vmem:[%s5500_s11 + $0x610] sm:$0xff]  }
 0x117   : > { %841 = vst [vmem:[#allocation0 + $0x818] sm:$0xf] %v4822_v3  }
 0x118   : > { %843 = vst [vmem:[#allocation0 + $0x834] sm:$0xf0] %v4822_v3   ;;  %v4886_v3 = vld [vmem:[%s5500_s11 + $0x618] sm:$0xff]  }
 0x119   : > { %847 = vst [vmem:[#allocation0 + $0x840] sm:$0xf] %v4823_v4  }
 0x11a   : > { %849 = vst [vmem:[#allocation0 + $0x85c] sm:$0xf0] %v4823_v4   ;;  %v4887_v4 = vld [vmem:[%s5500_s11 + $0x620] sm:$0xff]  }
 0x11b   : > { %853 = vst [vmem:[#allocation0 + $0x848] sm:$0xf] %v4824_v5  }
 0x11c   : > { %855 = vst [vmem:[#allocation0 + $0x864] sm:$0xf0] %v4824_v5   ;;  %v4888_v5 = vld [vmem:[%s5500_s11 + $0x628] sm:$0xff]  }
 0x11d   : > { %859 = vst [vmem:[#allocation0 + $0x850] sm:$0xf] %v4825_v6  }
 0x11e   : > { %861 = vst [vmem:[#allocation0 + $0x86c] sm:$0xf0] %v4825_v6   ;;  %v4889_v6 = vld [vmem:[%s5500_s11 + $0x630] sm:$0xff]  }
 0x11f   : > { %865 = vst [vmem:[#allocation0 + $0x858] sm:$0xf] %v4826_v7  }
 0x120   : > { %867 = vst [vmem:[#allocation0 + $0x874] sm:$0xf0] %v4826_v7   ;;  %v4890_v7 = vld [vmem:[%s5500_s11 + $0x638] sm:$0xff]  }
 0x121   : > { %871 = vst [vmem:[#allocation0 + $0x880] sm:$0xf] %v4827_v8  }
 0x122   : > { %873 = vst [vmem:[#allocation0 + $0x89c] sm:$0xf0] %v4827_v8   ;;  %v4891_v8 = vld [vmem:[%s5500_s11 + $0x640] sm:$0xff]  }
 0x123   : > { %877 = vst [vmem:[#allocation0 + $0x888] sm:$0xf] %v4828_v9  }
 0x124   : > { %879 = vst [vmem:[#allocation0 + $0x8a4] sm:$0xf0] %v4828_v9   ;;  %v4892_v9 = vld [vmem:[%s5500_s11 + $0x648] sm:$0xff]  }
 0x125   : > { %883 = vst [vmem:[#allocation0 + $0x890] sm:$0xf] %v4829_v10  }
 0x126   : > { %885 = vst [vmem:[#allocation0 + $0x8ac] sm:$0xf0] %v4829_v10   ;;  %v4893_v10 = vld [vmem:[%s5500_s11 + $0x650] sm:$0xff]  }
 0x127   : > { %889 = vst [vmem:[#allocation0 + $0x898] sm:$0xf] %v4830_v11  }
 0x128   : > { %891 = vst [vmem:[#allocation0 + $0x8b4] sm:$0xf0] %v4830_v11   ;;  %v4894_v11 = vld [vmem:[%s5500_s11 + $0x658] sm:$0xff]  }
 0x129   : > { %895 = vst [vmem:[#allocation0 + $0x8c0] sm:$0xf] %v4831_v12  }
 0x12a   : > { %897 = vst [vmem:[#allocation0 + $0x8dc] sm:$0xf0] %v4831_v12   ;;  %v4895_v12 = vld [vmem:[%s5500_s11 + $0x660] sm:$0xff]  }
 0x12b   : > { %901 = vst [vmem:[#allocation0 + $0x8c8] sm:$0xf] %v4832_v13  }
 0x12c   : > { %903 = vst [vmem:[#allocation0 + $0x8e4] sm:$0xf0] %v4832_v13   ;;  %v4896_v13 = vld [vmem:[%s5500_s11 + $0x668] sm:$0xff]  }
 0x12d   : > { %907 = vst [vmem:[#allocation0 + $0x8d0] sm:$0xf] %v4833_v14  }
 0x12e   : > { %909 = vst [vmem:[#allocation0 + $0x8ec] sm:$0xf0] %v4833_v14   ;;  %v4897_v14 = vld [vmem:[%s5500_s11 + $0x670] sm:$0xff]  }
 0x12f   : > { %913 = vst [vmem:[#allocation0 + $0x8d8] sm:$0xf] %v4834_v15  }
 0x130   : > { %915 = vst [vmem:[#allocation0 + $0x8f4] sm:$0xf0] %v4834_v15   ;;  %v4898_v15 = vld [vmem:[%s5500_s11 + $0x678] sm:$0xff]  }
 0x131   : > { %919 = vst [vmem:[#allocation0 + $0x900] sm:$0xf] %v4835_v16  }
 0x132   : > { %921 = vst [vmem:[#allocation0 + $0x91c] sm:$0xf0] %v4835_v16   ;;  %v4899_v16 = vld [vmem:[%s5500_s11 + $0x680] sm:$0xff]  }
 0x133   : > { %925 = vst [vmem:[#allocation0 + $0x908] sm:$0xf] %v4836_v17  }
 0x134   : > { %927 = vst [vmem:[#allocation0 + $0x924] sm:$0xf0] %v4836_v17   ;;  %v4900_v17 = vld [vmem:[%s5500_s11 + $0x688] sm:$0xff]  }
 0x135   : > { %931 = vst [vmem:[#allocation0 + $0x910] sm:$0xf] %v4837_v18  }
 0x136   : > { %933 = vst [vmem:[#allocation0 + $0x92c] sm:$0xf0] %v4837_v18   ;;  %v4901_v18 = vld [vmem:[%s5500_s11 + $0x690] sm:$0xff]  }
 0x137   : > { %937 = vst [vmem:[#allocation0 + $0x918] sm:$0xf] %v4838_v19  }
 0x138   : > { %939 = vst [vmem:[#allocation0 + $0x934] sm:$0xf0] %v4838_v19   ;;  %v4902_v19 = vld [vmem:[%s5500_s11 + $0x698] sm:$0xff]  }
 0x139   : > { %943 = vst [vmem:[#allocation0 + $0x940] sm:$0xf] %v4839_v20  }
 0x13a   : > { %945 = vst [vmem:[#allocation0 + $0x95c] sm:$0xf0] %v4839_v20   ;;  %v4903_v20 = vld [vmem:[%s5500_s11 + $0x6a0] sm:$0xff]  }
 0x13b   : > { %949 = vst [vmem:[#allocation0 + $0x948] sm:$0xf] %v4840_v21  }
 0x13c   : > { %951 = vst [vmem:[#allocation0 + $0x964] sm:$0xf0] %v4840_v21   ;;  %v4904_v21 = vld [vmem:[%s5500_s11 + $0x6a8] sm:$0xff]  }
 0x13d   : > { %955 = vst [vmem:[#allocation0 + $0x950] sm:$0xf] %v4841_v22  }
 0x13e   : > { %957 = vst [vmem:[#allocation0 + $0x96c] sm:$0xf0] %v4841_v22   ;;  %v4905_v22 = vld [vmem:[%s5500_s11 + $0x6b0] sm:$0xff]  }
 0x13f   : > { %961 = vst [vmem:[#allocation0 + $0x958] sm:$0xf] %v4842_v23  }
 0x140   : > { %963 = vst [vmem:[#allocation0 + $0x974] sm:$0xf0] %v4842_v23   ;;  %v4906_v23 = vld [vmem:[%s5500_s11 + $0x6b8] sm:$0xff]  }
 0x141   : > { %967 = vst [vmem:[#allocation0 + $0x980] sm:$0xf] %v4843_v24  }
 0x142   : > { %969 = vst [vmem:[#allocation0 + $0x99c] sm:$0xf0] %v4843_v24   ;;  %v4907_v24 = vld [vmem:[%s5500_s11 + $0x6c0] sm:$0xff]  }
 0x143   : > { %973 = vst [vmem:[#allocation0 + $0x988] sm:$0xf] %v4844_v25  }
 0x144   : > { %975 = vst [vmem:[#allocation0 + $0x9a4] sm:$0xf0] %v4844_v25   ;;  %v4908_v25 = vld [vmem:[%s5500_s11 + $0x6c8] sm:$0xff]  }
 0x145   : > { %979 = vst [vmem:[#allocation0 + $0x990] sm:$0xf] %v4845_v26  }
 0x146   : > { %981 = vst [vmem:[#allocation0 + $0x9ac] sm:$0xf0] %v4845_v26   ;;  %v4909_v26 = vld [vmem:[%s5500_s11 + $0x6d0] sm:$0xff]  }
 0x147   : > { %985 = vst [vmem:[#allocation0 + $0x998] sm:$0xf] %v4846_v27  }
 0x148   : > { %987 = vst [vmem:[#allocation0 + $0x9b4] sm:$0xf0] %v4846_v27   ;;  %v4910_v27 = vld [vmem:[%s5500_s11 + $0x6d8] sm:$0xff]  }
 0x149   : > { %991 = vst [vmem:[#allocation0 + $0x9c0] sm:$0xf] %v4847_v28  }
 0x14a   : > { %993 = vst [vmem:[#allocation0 + $0x9dc] sm:$0xf0] %v4847_v28   ;;  %v4911_v28 = vld [vmem:[%s5500_s11 + $0x6e0] sm:$0xff]  }
 0x14b   : > { %997 = vst [vmem:[#allocation0 + $0x9c8] sm:$0xf] %v4848_v29  }
 0x14c   : > { %999 = vst [vmem:[#allocation0 + $0x9e4] sm:$0xf0] %v4848_v29   ;;  %v4912_v29 = vld [vmem:[%s5500_s11 + $0x6e8] sm:$0xff]  }
 0x14d   : > { %1003 = vst [vmem:[#allocation0 + $0x9d0] sm:$0xf] %v4849_v30  }
 0x14e   : > { %1005 = vst [vmem:[#allocation0 + $0x9ec] sm:$0xf0] %v4849_v30   ;;  %v4913_v30 = vld [vmem:[%s5500_s11 + $0x6f0] sm:$0xff]  }
 0x14f   : > { %1009 = vst [vmem:[#allocation0 + $0x9d8] sm:$0xf] %v4850_v31  }
 0x150   : > { %1011 = vst [vmem:[#allocation0 + $0x9f4] sm:$0xf0] %v4850_v31   ;;  %v4914_v31 = vld [vmem:[%s5500_s11 + $0x6f8] sm:$0xff]  }
 0x151   : > { %1015 = vst [vmem:[#allocation0 + $0xa00] sm:$0xf] %v4851_v32  }
 0x152   : > { %1017 = vst [vmem:[#allocation0 + $0xa1c] sm:$0xf0] %v4851_v32   ;;  %v4915_v32 = vld [vmem:[%s5500_s11 + $0x700] sm:$0xff]  }
 0x153   : > { %1021 = vst [vmem:[#allocation0 + $0xa08] sm:$0xf] %v4852_v33  }
 0x154   : > { %1023 = vst [vmem:[#allocation0 + $0xa24] sm:$0xf0] %v4852_v33   ;;  %v4916_v33 = vld [vmem:[%s5500_s11 + $0x708] sm:$0xff]  }
 0x155   : > { %1027 = vst [vmem:[#allocation0 + $0xa10] sm:$0xf] %v4853_v34  }
 0x156   : > { %1029 = vst [vmem:[#allocation0 + $0xa2c] sm:$0xf0] %v4853_v34   ;;  %v4917_v34 = vld [vmem:[%s5500_s11 + $0x710] sm:$0xff]  }
 0x157   : > { %1033 = vst [vmem:[#allocation0 + $0xa18] sm:$0xf] %v4854_v35  }
 0x158   : > { %1035 = vst [vmem:[#allocation0 + $0xa34] sm:$0xf0] %v4854_v35   ;;  %v4918_v35 = vld [vmem:[%s5500_s11 + $0x718] sm:$0xff]  }
 0x159   : > { %1039 = vst [vmem:[#allocation0 + $0xa40] sm:$0xf] %v4855_v36  }
 0x15a   : > { %1041 = vst [vmem:[#allocation0 + $0xa5c] sm:$0xf0] %v4855_v36   ;;  %v4919_v36 = vld [vmem:[%s5500_s11 + $0x720] sm:$0xff]  }
 0x15b   : > { %1045 = vst [vmem:[#allocation0 + $0xa48] sm:$0xf] %v4856_v37  }
 0x15c   : > { %1047 = vst [vmem:[#allocation0 + $0xa64] sm:$0xf0] %v4856_v37   ;;  %v4920_v37 = vld [vmem:[%s5500_s11 + $0x728] sm:$0xff]  }
 0x15d   : > { %1051 = vst [vmem:[#allocation0 + $0xa50] sm:$0xf] %v4857_v38  }
 0x15e   : > { %1053 = vst [vmem:[#allocation0 + $0xa6c] sm:$0xf0] %v4857_v38   ;;  %v4921_v38 = vld [vmem:[%s5500_s11 + $0x730] sm:$0xff]  }
 0x15f   : > { %1057 = vst [vmem:[#allocation0 + $0xa58] sm:$0xf] %v4858_v39  }
 0x160   : > { %1059 = vst [vmem:[#allocation0 + $0xa74] sm:$0xf0] %v4858_v39   ;;  %v4922_v39 = vld [vmem:[%s5500_s11 + $0x738] sm:$0xff]  }
 0x161   : > { %1063 = vst [vmem:[#allocation0 + $0xa80] sm:$0xf] %v4859_v40  }
 0x162   : > { %1065 = vst [vmem:[#allocation0 + $0xa9c] sm:$0xf0] %v4859_v40   ;;  %v4923_v40 = vld [vmem:[%s5500_s11 + $0x740] sm:$0xff]  }
 0x163   : > { %1069 = vst [vmem:[#allocation0 + $0xa88] sm:$0xf] %v4860_v41  }
 0x164   : > { %1071 = vst [vmem:[#allocation0 + $0xaa4] sm:$0xf0] %v4860_v41   ;;  %v4924_v41 = vld [vmem:[%s5500_s11 + $0x748] sm:$0xff]  }
 0x165   : > { %1075 = vst [vmem:[#allocation0 + $0xa90] sm:$0xf] %v4861_v42  }
 0x166   : > { %1077 = vst [vmem:[#allocation0 + $0xaac] sm:$0xf0] %v4861_v42   ;;  %v4925_v42 = vld [vmem:[%s5500_s11 + $0x750] sm:$0xff]  }
 0x167   : > { %1081 = vst [vmem:[#allocation0 + $0xa98] sm:$0xf] %v4862_v43  }
 0x168   : > { %1083 = vst [vmem:[#allocation0 + $0xab4] sm:$0xf0] %v4862_v43   ;;  %v4926_v43 = vld [vmem:[%s5500_s11 + $0x758] sm:$0xff]  }
 0x169   : > { %1087 = vst [vmem:[#allocation0 + $0xac0] sm:$0xf] %v4863_v44  }
 0x16a   : > { %1089 = vst [vmem:[#allocation0 + $0xadc] sm:$0xf0] %v4863_v44   ;;  %v4927_v44 = vld [vmem:[%s5500_s11 + $0x760] sm:$0xff]  }
 0x16b   : > { %1093 = vst [vmem:[#allocation0 + $0xac8] sm:$0xf] %v4864_v45  }
 0x16c   : > { %1095 = vst [vmem:[#allocation0 + $0xae4] sm:$0xf0] %v4864_v45   ;;  %v4928_v45 = vld [vmem:[%s5500_s11 + $0x768] sm:$0xff]  }
 0x16d   : > { %1099 = vst [vmem:[#allocation0 + $0xad0] sm:$0xf] %v4865_v46  }
 0x16e   : > { %1101 = vst [vmem:[#allocation0 + $0xaec] sm:$0xf0] %v4865_v46   ;;  %v4929_v46 = vld [vmem:[%s5500_s11 + $0x770] sm:$0xff]  }
 0x16f   : > { %1105 = vst [vmem:[#allocation0 + $0xad8] sm:$0xf] %v4866_v47  }
 0x170   : > { %1107 = vst [vmem:[#allocation0 + $0xaf4] sm:$0xf0] %v4866_v47   ;;  %v4930_v47 = vld [vmem:[%s5500_s11 + $0x778] sm:$0xff]  }
 0x171   : > { %1111 = vst [vmem:[#allocation0 + $0xb00] sm:$0xf] %v4867_v48  }
 0x172   : > { %1113 = vst [vmem:[#allocation0 + $0xb1c] sm:$0xf0] %v4867_v48   ;;  %v4931_v48 = vld [vmem:[%s5500_s11 + $0x780] sm:$0xff]  }
 0x173   : > { %1117 = vst [vmem:[#allocation0 + $0xb08] sm:$0xf] %v4868_v49  }
 0x174   : > { %1119 = vst [vmem:[#allocation0 + $0xb24] sm:$0xf0] %v4868_v49   ;;  %v4932_v49 = vld [vmem:[%s5500_s11 + $0x788] sm:$0xff]  }
 0x175   : > { %1123 = vst [vmem:[#allocation0 + $0xb10] sm:$0xf] %v4869_v50  }
 0x176   : > { %1125 = vst [vmem:[#allocation0 + $0xb2c] sm:$0xf0] %v4869_v50   ;;  %v4933_v50 = vld [vmem:[%s5500_s11 + $0x790] sm:$0xff]  }
 0x177   : > { %1129 = vst [vmem:[#allocation0 + $0xb18] sm:$0xf] %v4870_v51  }
 0x178   : > { %1131 = vst [vmem:[#allocation0 + $0xb34] sm:$0xf0] %v4870_v51   ;;  %v4934_v51 = vld [vmem:[%s5500_s11 + $0x798] sm:$0xff]  }
 0x179   : > { %1135 = vst [vmem:[#allocation0 + $0xb40] sm:$0xf] %v4871_v52  }
 0x17a   : > { %1137 = vst [vmem:[#allocation0 + $0xb5c] sm:$0xf0] %v4871_v52   ;;  %v4935_v52 = vld [vmem:[%s5500_s11 + $0x7a0] sm:$0xff]  }
 0x17b   : > { %1141 = vst [vmem:[#allocation0 + $0xb48] sm:$0xf] %v4872_v53  }
 0x17c   : > { %1143 = vst [vmem:[#allocation0 + $0xb64] sm:$0xf0] %v4872_v53   ;;  %v4936_v53 = vld [vmem:[%s5500_s11 + $0x7a8] sm:$0xff]  }
 0x17d   : > { %1147 = vst [vmem:[#allocation0 + $0xb50] sm:$0xf] %v4873_v54  }
 0x17e   : > { %1149 = vst [vmem:[#allocation0 + $0xb6c] sm:$0xf0] %v4873_v54   ;;  %v4937_v54 = vld [vmem:[%s5500_s11 + $0x7b0] sm:$0xff]  }
 0x17f   : > { %1153 = vst [vmem:[#allocation0 + $0xb58] sm:$0xf] %v4874_v55  }
 0x180   : > { %1155 = vst [vmem:[#allocation0 + $0xb74] sm:$0xf0] %v4874_v55   ;;  %v4938_v55 = vld [vmem:[%s5500_s11 + $0x7b8] sm:$0xff]  }
 0x181   : > { %1159 = vst [vmem:[#allocation0 + $0xb80] sm:$0xf] %v4875_v56  }
 0x182   : > { %1161 = vst [vmem:[#allocation0 + $0xb9c] sm:$0xf0] %v4875_v56   ;;  %v4939_v56 = vld [vmem:[%s5500_s11 + $0x7c0] sm:$0xff]  }
 0x183   : > { %1165 = vst [vmem:[#allocation0 + $0xb88] sm:$0xf] %v4876_v57  }
 0x184   : > { %1167 = vst [vmem:[#allocation0 + $0xba4] sm:$0xf0] %v4876_v57   ;;  %v4940_v57 = vld [vmem:[%s5500_s11 + $0x7c8] sm:$0xff]  }
 0x185   : > { %1171 = vst [vmem:[#allocation0 + $0xb90] sm:$0xf] %v4877_v58  }
 0x186   : > { %1173 = vst [vmem:[#allocation0 + $0xbac] sm:$0xf0] %v4877_v58   ;;  %v4941_v58 = vld [vmem:[%s5500_s11 + $0x7d0] sm:$0xff]  }
 0x187   : > { %1177 = vst [vmem:[#allocation0 + $0xb98] sm:$0xf] %v4878_v59  }
 0x188   : > { %1179 = vst [vmem:[#allocation0 + $0xbb4] sm:$0xf0] %v4878_v59   ;;  %v4942_v59 = vld [vmem:[%s5500_s11 + $0x7d8] sm:$0xff]  }
 0x189   : > { %1183 = vst [vmem:[#allocation0 + $0xbc0] sm:$0xf] %v4879_v60  }
 0x18a   : > { %1185 = vst [vmem:[#allocation0 + $0xbdc] sm:$0xf0] %v4879_v60   ;;  %v4943_v60 = vld [vmem:[%s5500_s11 + $0x7e0] sm:$0xff]  }
 0x18b   : > { %1189 = vst [vmem:[#allocation0 + $0xbc8] sm:$0xf] %v4880_v61  }
 0x18c   : > { %1191 = vst [vmem:[#allocation0 + $0xbe4] sm:$0xf0] %v4880_v61   ;;  %v4944_v61 = vld [vmem:[%s5500_s11 + $0x7e8] sm:$0xff]  }
 0x18d   : > { %1195 = vst [vmem:[#allocation0 + $0xbd0] sm:$0xf] %v4881_v62  }
 0x18e   : > { %1197 = vst [vmem:[#allocation0 + $0xbec] sm:$0xf0] %v4881_v62   ;;  %v4945_v62 = vld [vmem:[%s5500_s11 + $0x7f0] sm:$0xff]  }
 0x18f   : > { %1201 = vst [vmem:[#allocation0 + $0xbd8] sm:$0xf] %v4882_v63  }
 0x190   : > { %1203 = vst [vmem:[#allocation0 + $0xbf4] sm:$0xf0] %v4882_v63   ;;  %v4946_v63 = vld [vmem:[%s5500_s11 + $0x7f8] sm:$0xff]  }
 0x191   : > { %1207 = vst [vmem:[#allocation0 + $0xc00] sm:$0xf] %v4883_v0  }
 0x192   : > { %1209 = vst [vmem:[#allocation0 + $0xc1c] sm:$0xf0] %v4883_v0   ;;  %v1590_v0 = vld [vmem:[#allocation0] sm:$0xf] }
 0x193   : > { %1213 = vst [vmem:[#allocation0 + $0xc08] sm:$0xf] %v4884_v1  }
 0x194   : > { %1215 = vst [vmem:[#allocation0 + $0xc24] sm:$0xf0] %v4884_v1   ;;  %v1595_v1 = vld [vmem:[#allocation0 + $0x8] sm:$0xf] }
 0x195   : > { %1219 = vst [vmem:[#allocation0 + $0xc10] sm:$0xf] %v4885_v2  }
 0x196   : > { %1221 = vst [vmem:[#allocation0 + $0xc2c] sm:$0xf0] %v4885_v2   ;;  %v1601_v2 = vld [vmem:[#allocation0 + $0x10] sm:$0xf] }
 0x197   : > { %1225 = vst [vmem:[#allocation0 + $0xc18] sm:$0xf] %v4886_v3  }
 0x198   : > { %1227 = vst [vmem:[#allocation0 + $0xc34] sm:$0xf0] %v4886_v3   ;;  %v1607_v3 = vld [vmem:[#allocation0 + $0x18] sm:$0xf] }
 0x199   : > { %1231 = vst [vmem:[#allocation0 + $0xc40] sm:$0xf] %v4887_v4  }
 0x19a   : > { %1233 = vst [vmem:[#allocation0 + $0xc5c] sm:$0xf0] %v4887_v4   ;;  %v1613_v4 = vld [vmem:[#allocation0 + $0x20] sm:$0xf] }
 0x19b   : > { %1237 = vst [vmem:[#allocation0 + $0xc48] sm:$0xf] %v4888_v5  }
 0x19c   : > { %1239 = vst [vmem:[#allocation0 + $0xc64] sm:$0xf0] %v4888_v5   ;;  %v1619_v5 = vld [vmem:[#allocation0 + $0x28] sm:$0xf] }
 0x19d   : > { %1243 = vst [vmem:[#allocation0 + $0xc50] sm:$0xf] %v4889_v6  }
 0x19e   : > { %1245 = vst [vmem:[#allocation0 + $0xc6c] sm:$0xf0] %v4889_v6   ;;  %v1625_v6 = vld [vmem:[#allocation0 + $0x30] sm:$0xf] }
 0x19f   : > { %1249 = vst [vmem:[#allocation0 + $0xc58] sm:$0xf] %v4890_v7  }
 0x1a0   : > { %1251 = vst [vmem:[#allocation0 + $0xc74] sm:$0xf0] %v4890_v7   ;;  %v1631_v7 = vld [vmem:[#allocation0 + $0x38] sm:$0xf] }
 0x1a1   : > { %1255 = vst [vmem:[#allocation0 + $0xc80] sm:$0xf] %v4891_v8  }
 0x1a2   : > { %1257 = vst [vmem:[#allocation0 + $0xc9c] sm:$0xf0] %v4891_v8   ;;  %v1637_v8 = vld [vmem:[#allocation0 + $0x40] sm:$0xf] }
 0x1a3   : > { %1261 = vst [vmem:[#allocation0 + $0xc88] sm:$0xf] %v4892_v9  }
 0x1a4   : > { %1263 = vst [vmem:[#allocation0 + $0xca4] sm:$0xf0] %v4892_v9   ;;  %v1643_v9 = vld [vmem:[#allocation0 + $0x48] sm:$0xf] }
 0x1a5   : > { %1267 = vst [vmem:[#allocation0 + $0xc90] sm:$0xf] %v4893_v10  }
 0x1a6   : > { %1269 = vst [vmem:[#allocation0 + $0xcac] sm:$0xf0] %v4893_v10   ;;  %v1649_v10 = vld [vmem:[#allocation0 + $0x50] sm:$0xf] }
 0x1a7   : > { %1273 = vst [vmem:[#allocation0 + $0xc98] sm:$0xf] %v4894_v11  }
 0x1a8   : > { %1275 = vst [vmem:[#allocation0 + $0xcb4] sm:$0xf0] %v4894_v11   ;;  %v1655_v11 = vld [vmem:[#allocation0 + $0x58] sm:$0xf] }
 0x1a9   : > { %1279 = vst [vmem:[#allocation0 + $0xcc0] sm:$0xf] %v4895_v12  }
 0x1aa   : > { %1281 = vst [vmem:[#allocation0 + $0xcdc] sm:$0xf0] %v4895_v12   ;;  %v1661_v12 = vld [vmem:[#allocation0 + $0x60] sm:$0xf] }
 0x1ab   : > { %1285 = vst [vmem:[#allocation0 + $0xcc8] sm:$0xf] %v4896_v13  }
 0x1ac   : > { %1287 = vst [vmem:[#allocation0 + $0xce4] sm:$0xf0] %v4896_v13   ;;  %v1667_v13 = vld [vmem:[#allocation0 + $0x68] sm:$0xf] }
 0x1ad   : > { %1291 = vst [vmem:[#allocation0 + $0xcd0] sm:$0xf] %v4897_v14  }
 0x1ae   : > { %1293 = vst [vmem:[#allocation0 + $0xcec] sm:$0xf0] %v4897_v14   ;;  %v1673_v14 = vld [vmem:[#allocation0 + $0x70] sm:$0xf] }
 0x1af   : > { %1297 = vst [vmem:[#allocation0 + $0xcd8] sm:$0xf] %v4898_v15  }
 0x1b0   : > { %1299 = vst [vmem:[#allocation0 + $0xcf4] sm:$0xf0] %v4898_v15   ;;  %v1679_v15 = vld [vmem:[#allocation0 + $0x78] sm:$0xf] }
 0x1b1   : > { %1303 = vst [vmem:[#allocation0 + $0xd00] sm:$0xf] %v4899_v16  }
 0x1b2   : > { %1305 = vst [vmem:[#allocation0 + $0xd1c] sm:$0xf0] %v4899_v16   ;;  %v1685_v16 = vld [vmem:[#allocation0 + $0x80] sm:$0xf] }
 0x1b3   : > { %1309 = vst [vmem:[#allocation0 + $0xd08] sm:$0xf] %v4900_v17  }
 0x1b4   : > { %1311 = vst [vmem:[#allocation0 + $0xd24] sm:$0xf0] %v4900_v17   ;;  %v1691_v17 = vld [vmem:[#allocation0 + $0x88] sm:$0xf] }
 0x1b5   : > { %1315 = vst [vmem:[#allocation0 + $0xd10] sm:$0xf] %v4901_v18  }
 0x1b6   : > { %1317 = vst [vmem:[#allocation0 + $0xd2c] sm:$0xf0] %v4901_v18   ;;  %v1697_v18 = vld [vmem:[#allocation0 + $0x90] sm:$0xf] }
 0x1b7   : > { %1321 = vst [vmem:[#allocation0 + $0xd18] sm:$0xf] %v4902_v19  }
 0x1b8   : > { %1323 = vst [vmem:[#allocation0 + $0xd34] sm:$0xf0] %v4902_v19   ;;  %v1703_v19 = vld [vmem:[#allocation0 + $0x98] sm:$0xf] }
 0x1b9   : > { %1327 = vst [vmem:[#allocation0 + $0xd40] sm:$0xf] %v4903_v20  }
 0x1ba   : > { %1329 = vst [vmem:[#allocation0 + $0xd5c] sm:$0xf0] %v4903_v20   ;;  %v1709_v20 = vld [vmem:[#allocation0 + $0xa0] sm:$0xf] }
 0x1bb   : > { %1333 = vst [vmem:[#allocation0 + $0xd48] sm:$0xf] %v4904_v21  }
 0x1bc   : > { %1335 = vst [vmem:[#allocation0 + $0xd64] sm:$0xf0] %v4904_v21   ;;  %v1715_v21 = vld [vmem:[#allocation0 + $0xa8] sm:$0xf] }
 0x1bd   : > { %1339 = vst [vmem:[#allocation0 + $0xd50] sm:$0xf] %v4905_v22  }
 0x1be   : > { %1341 = vst [vmem:[#allocation0 + $0xd6c] sm:$0xf0] %v4905_v22   ;;  %v1721_v22 = vld [vmem:[#allocation0 + $0xb0] sm:$0xf] }
 0x1bf   : > { %1345 = vst [vmem:[#allocation0 + $0xd58] sm:$0xf] %v4906_v23  }
 0x1c0   : > { %1347 = vst [vmem:[#allocation0 + $0xd74] sm:$0xf0] %v4906_v23   ;;  %v1727_v23 = vld [vmem:[#allocation0 + $0xb8] sm:$0xf] }
 0x1c1   : > { %1351 = vst [vmem:[#allocation0 + $0xd80] sm:$0xf] %v4907_v24  }
 0x1c2   : > { %1353 = vst [vmem:[#allocation0 + $0xd9c] sm:$0xf0] %v4907_v24   ;;  %v1733_v24 = vld [vmem:[#allocation0 + $0xc0] sm:$0xf] }
 0x1c3   : > { %1357 = vst [vmem:[#allocation0 + $0xd88] sm:$0xf] %v4908_v25  }
 0x1c4   : > { %1359 = vst [vmem:[#allocation0 + $0xda4] sm:$0xf0] %v4908_v25   ;;  %v1739_v25 = vld [vmem:[#allocation0 + $0xc8] sm:$0xf] }
 0x1c5   : > { %1363 = vst [vmem:[#allocation0 + $0xd90] sm:$0xf] %v4909_v26  }
 0x1c6   : > { %1365 = vst [vmem:[#allocation0 + $0xdac] sm:$0xf0] %v4909_v26   ;;  %v1745_v26 = vld [vmem:[#allocation0 + $0xd0] sm:$0xf] }
 0x1c7   : > { %1369 = vst [vmem:[#allocation0 + $0xd98] sm:$0xf] %v4910_v27  }
 0x1c8   : > { %1371 = vst [vmem:[#allocation0 + $0xdb4] sm:$0xf0] %v4910_v27   ;;  %v1751_v27 = vld [vmem:[#allocation0 + $0xd8] sm:$0xf] }
 0x1c9   : > { %1375 = vst [vmem:[#allocation0 + $0xdc0] sm:$0xf] %v4911_v28  }
 0x1ca   : > { %1377 = vst [vmem:[#allocation0 + $0xddc] sm:$0xf0] %v4911_v28   ;;  %v1757_v28 = vld [vmem:[#allocation0 + $0xe0] sm:$0xf] }
 0x1cb   : > { %1381 = vst [vmem:[#allocation0 + $0xdc8] sm:$0xf] %v4912_v29  }
 0x1cc   : > { %1383 = vst [vmem:[#allocation0 + $0xde4] sm:$0xf0] %v4912_v29   ;;  %v1763_v29 = vld [vmem:[#allocation0 + $0xe8] sm:$0xf] }
 0x1cd   : > { %1387 = vst [vmem:[#allocation0 + $0xdd0] sm:$0xf] %v4913_v30  }
 0x1ce   : > { %1389 = vst [vmem:[#allocation0 + $0xdec] sm:$0xf0] %v4913_v30   ;;  %v1769_v30 = vld [vmem:[#allocation0 + $0xf0] sm:$0xf] }
 0x1cf   : > { %1393 = vst [vmem:[#allocation0 + $0xdd8] sm:$0xf] %v4914_v31  }
 0x1d0   : > { %1395 = vst [vmem:[#allocation0 + $0xdf4] sm:$0xf0] %v4914_v31   ;;  %v1775_v31 = vld [vmem:[#allocation0 + $0xf8] sm:$0xf] }
 0x1d1   : > { %1399 = vst [vmem:[#allocation0 + $0xe00] sm:$0xf] %v4915_v32  }
 0x1d2   : > { %1401 = vst [vmem:[#allocation0 + $0xe1c] sm:$0xf0] %v4915_v32   ;;  %v1781_v32 = vld [vmem:[#allocation0 + $0x100] sm:$0xf] }
 0x1d3   : > { %1405 = vst [vmem:[#allocation0 + $0xe08] sm:$0xf] %v4916_v33  }
 0x1d4   : > { %1407 = vst [vmem:[#allocation0 + $0xe24] sm:$0xf0] %v4916_v33   ;;  %v1787_v33 = vld [vmem:[#allocation0 + $0x108] sm:$0xf] }
 0x1d5   : > { %1411 = vst [vmem:[#allocation0 + $0xe10] sm:$0xf] %v4917_v34  }
 0x1d6   : > { %1413 = vst [vmem:[#allocation0 + $0xe2c] sm:$0xf0] %v4917_v34   ;;  %v1793_v34 = vld [vmem:[#allocation0 + $0x110] sm:$0xf] }
 0x1d7   : > { %1417 = vst [vmem:[#allocation0 + $0xe18] sm:$0xf] %v4918_v35  }
 0x1d8   : > { %1419 = vst [vmem:[#allocation0 + $0xe34] sm:$0xf0] %v4918_v35   ;;  %v1799_v35 = vld [vmem:[#allocation0 + $0x118] sm:$0xf] }
 0x1d9   : > { %1423 = vst [vmem:[#allocation0 + $0xe40] sm:$0xf] %v4919_v36  }
 0x1da   : > { %1425 = vst [vmem:[#allocation0 + $0xe5c] sm:$0xf0] %v4919_v36   ;;  %v1805_v36 = vld [vmem:[#allocation0 + $0x120] sm:$0xf] }
 0x1db   : > { %1429 = vst [vmem:[#allocation0 + $0xe48] sm:$0xf] %v4920_v37  }
 0x1dc   : > { %1431 = vst [vmem:[#allocation0 + $0xe64] sm:$0xf0] %v4920_v37   ;;  %v1811_v37 = vld [vmem:[#allocation0 + $0x128] sm:$0xf] }
 0x1dd   : > { %1435 = vst [vmem:[#allocation0 + $0xe50] sm:$0xf] %v4921_v38  }
 0x1de   : > { %1437 = vst [vmem:[#allocation0 + $0xe6c] sm:$0xf0] %v4921_v38   ;;  %v1817_v38 = vld [vmem:[#allocation0 + $0x130] sm:$0xf] }
 0x1df   : > { %1441 = vst [vmem:[#allocation0 + $0xe58] sm:$0xf] %v4922_v39  }
 0x1e0   : > { %1443 = vst [vmem:[#allocation0 + $0xe74] sm:$0xf0] %v4922_v39   ;;  %v1823_v39 = vld [vmem:[#allocation0 + $0x138] sm:$0xf] }
 0x1e1   : > { %1447 = vst [vmem:[#allocation0 + $0xe80] sm:$0xf] %v4923_v40  }
 0x1e2   : > { %1449 = vst [vmem:[#allocation0 + $0xe9c] sm:$0xf0] %v4923_v40   ;;  %v1829_v40 = vld [vmem:[#allocation0 + $0x140] sm:$0xf] }
 0x1e3   : > { %1453 = vst [vmem:[#allocation0 + $0xe88] sm:$0xf] %v4924_v41  }
 0x1e4   : > { %1455 = vst [vmem:[#allocation0 + $0xea4] sm:$0xf0] %v4924_v41   ;;  %v1835_v41 = vld [vmem:[#allocation0 + $0x148] sm:$0xf] }
 0x1e5   : > { %1459 = vst [vmem:[#allocation0 + $0xe90] sm:$0xf] %v4925_v42  }
 0x1e6   : > { %1461 = vst [vmem:[#allocation0 + $0xeac] sm:$0xf0] %v4925_v42   ;;  %v1841_v42 = vld [vmem:[#allocation0 + $0x150] sm:$0xf] }
 0x1e7   : > { %1465 = vst [vmem:[#allocation0 + $0xe98] sm:$0xf] %v4926_v43  }
 0x1e8   : > { %1467 = vst [vmem:[#allocation0 + $0xeb4] sm:$0xf0] %v4926_v43   ;;  %v1847_v43 = vld [vmem:[#allocation0 + $0x158] sm:$0xf] }
 0x1e9   : > { %1471 = vst [vmem:[#allocation0 + $0xec0] sm:$0xf] %v4927_v44  }
 0x1ea   : > { %1473 = vst [vmem:[#allocation0 + $0xedc] sm:$0xf0] %v4927_v44   ;;  %v1853_v44 = vld [vmem:[#allocation0 + $0x160] sm:$0xf] }
 0x1eb   : > { %1477 = vst [vmem:[#allocation0 + $0xec8] sm:$0xf] %v4928_v45  }
 0x1ec   : > { %1479 = vst [vmem:[#allocation0 + $0xee4] sm:$0xf0] %v4928_v45   ;;  %v1859_v45 = vld [vmem:[#allocation0 + $0x168] sm:$0xf] }
 0x1ed   : > { %1483 = vst [vmem:[#allocation0 + $0xed0] sm:$0xf] %v4929_v46  }
 0x1ee   : > { %1485 = vst [vmem:[#allocation0 + $0xeec] sm:$0xf0] %v4929_v46   ;;  %v1865_v46 = vld [vmem:[#allocation0 + $0x170] sm:$0xf] }
 0x1ef   : > { %1489 = vst [vmem:[#allocation0 + $0xed8] sm:$0xf] %v4930_v47  }
 0x1f0   : > { %1491 = vst [vmem:[#allocation0 + $0xef4] sm:$0xf0] %v4930_v47   ;;  %v1871_v47 = vld [vmem:[#allocation0 + $0x178] sm:$0xf] }
 0x1f1   : > { %1495 = vst [vmem:[#allocation0 + $0xf00] sm:$0xf] %v4931_v48  }
 0x1f2   : > { %1497 = vst [vmem:[#allocation0 + $0xf1c] sm:$0xf0] %v4931_v48   ;;  %v1877_v48 = vld [vmem:[#allocation0 + $0x180] sm:$0xf] }
 0x1f3   : > { %1501 = vst [vmem:[#allocation0 + $0xf08] sm:$0xf] %v4932_v49  }
 0x1f4   : > { %1503 = vst [vmem:[#allocation0 + $0xf24] sm:$0xf0] %v4932_v49   ;;  %v1883_v49 = vld [vmem:[#allocation0 + $0x188] sm:$0xf] }
 0x1f5   : > { %1507 = vst [vmem:[#allocation0 + $0xf10] sm:$0xf] %v4933_v50  }
 0x1f6   : > { %1509 = vst [vmem:[#allocation0 + $0xf2c] sm:$0xf0] %v4933_v50   ;;  %v1889_v50 = vld [vmem:[#allocation0 + $0x190] sm:$0xf] }
 0x1f7   : > { %1513 = vst [vmem:[#allocation0 + $0xf18] sm:$0xf] %v4934_v51  }
 0x1f8   : > { %1515 = vst [vmem:[#allocation0 + $0xf34] sm:$0xf0] %v4934_v51   ;;  %v1895_v51 = vld [vmem:[#allocation0 + $0x198] sm:$0xf] }
 0x1f9   : > { %1519 = vst [vmem:[#allocation0 + $0xf40] sm:$0xf] %v4935_v52  }
 0x1fa   : > { %1521 = vst [vmem:[#allocation0 + $0xf5c] sm:$0xf0] %v4935_v52   ;;  %v1901_v52 = vld [vmem:[#allocation0 + $0x1a0] sm:$0xf] }
 0x1fb   : > { %1525 = vst [vmem:[#allocation0 + $0xf48] sm:$0xf] %v4936_v53  }
 0x1fc   : > { %1527 = vst [vmem:[#allocation0 + $0xf64] sm:$0xf0] %v4936_v53   ;;  %v1907_v53 = vld [vmem:[#allocation0 + $0x1a8] sm:$0xf] }
 0x1fd   : > { %1531 = vst [vmem:[#allocation0 + $0xf50] sm:$0xf] %v4937_v54  }
 0x1fe   : > { %1533 = vst [vmem:[#allocation0 + $0xf6c] sm:$0xf0] %v4937_v54   ;;  %v1913_v54 = vld [vmem:[#allocation0 + $0x1b0] sm:$0xf] }
 0x1ff   : > { %1537 = vst [vmem:[#allocation0 + $0xf58] sm:$0xf] %v4938_v55  }
 0x200   : > { %1539 = vst [vmem:[#allocation0 + $0xf74] sm:$0xf0] %v4938_v55   ;;  %v1919_v55 = vld [vmem:[#allocation0 + $0x1b8] sm:$0xf] }
 0x201   : > { %1543 = vst [vmem:[#allocation0 + $0xf80] sm:$0xf] %v4939_v56  }
 0x202   : > { %1545 = vst [vmem:[#allocation0 + $0xf9c] sm:$0xf0] %v4939_v56   ;;  %v1925_v56 = vld [vmem:[#allocation0 + $0x1c0] sm:$0xf] }
 0x203   : > { %1549 = vst [vmem:[#allocation0 + $0xf88] sm:$0xf] %v4940_v57  }
 0x204   : > { %1551 = vst [vmem:[#allocation0 + $0xfa4] sm:$0xf0] %v4940_v57   ;;  %v1931_v57 = vld [vmem:[#allocation0 + $0x1c8] sm:$0xf] }
 0x205   : > { %1555 = vst [vmem:[#allocation0 + $0xf90] sm:$0xf] %v4941_v58  }
 0x206   : > { %1557 = vst [vmem:[#allocation0 + $0xfac] sm:$0xf0] %v4941_v58   ;;  %v1937_v58 = vld [vmem:[#allocation0 + $0x1d0] sm:$0xf] }
 0x207   : > { %1561 = vst [vmem:[#allocation0 + $0xf98] sm:$0xf] %v4942_v59  }
 0x208   : > { %1563 = vst [vmem:[#allocation0 + $0xfb4] sm:$0xf0] %v4942_v59   ;;  %v1943_v59 = vld [vmem:[#allocation0 + $0x1d8] sm:$0xf] }
 0x209   : > { %1567 = vst [vmem:[#allocation0 + $0xfc0] sm:$0xf] %v4943_v60  }
 0x20a   : > { %1569 = vst [vmem:[#allocation0 + $0xfdc] sm:$0xf0] %v4943_v60   ;;  %v1949_v60 = vld [vmem:[#allocation0 + $0x1e0] sm:$0xf] }
 0x20b   : > { %1573 = vst [vmem:[#allocation0 + $0xfc8] sm:$0xf] %v4944_v61  }
 0x20c   : > { %1575 = vst [vmem:[#allocation0 + $0xfe4] sm:$0xf0] %v4944_v61   ;;  %v1955_v61 = vld [vmem:[#allocation0 + $0x1e8] sm:$0xf] }
 0x20d   : > { %1579 = vst [vmem:[#allocation0 + $0xfd0] sm:$0xf] %v4945_v62  }
 0x20e   : > { %1581 = vst [vmem:[#allocation0 + $0xfec] sm:$0xf0] %v4945_v62   ;;  %v1961_v62 = vld [vmem:[#allocation0 + $0x1f0] sm:$0xf] }
 0x20f   : > { %1585 = vst [vmem:[#allocation0 + $0xfd8] sm:$0xf] %v4946_v63  }
 0x210   : > { %1587 = vst [vmem:[#allocation0 + $0xff4] sm:$0xf0] %v4946_v63   ;;  %v1967_v63 = vld [vmem:[#allocation0 + $0x1f8] sm:$0xf] }
 0x211   : > { %1593 = vst [vmem:[%s5762_s14] sm:$0xf] %v1590_v0  ;;  %v1973_v0 = vld [vmem:[#allocation0 + $0x200] sm:$0xf] }
 0x212   : > { %4947 = vst [vmem:[%s5762_s14 + $0x4] sm:$0xf] %v1595_v1  ;;  %v1979_v1 = vld [vmem:[#allocation0 + $0x208] sm:$0xf] }
 0x213   : > { %4948 = vst [vmem:[%s5762_s14 + $0x8] sm:$0xf] %v1601_v2  ;;  %v1985_v2 = vld [vmem:[#allocation0 + $0x210] sm:$0xf] }
 0x214   : > { %4949 = vst [vmem:[%s5762_s14 + $0xc] sm:$0xf] %v1607_v3  ;;  %v1991_v3 = vld [vmem:[#allocation0 + $0x218] sm:$0xf] }
 0x215   : > { %4950 = vst [vmem:[%s5762_s14 + $0x10] sm:$0xf] %v1613_v4  ;;  %v1997_v4 = vld [vmem:[#allocation0 + $0x220] sm:$0xf] }
 0x216   : > { %4951 = vst [vmem:[%s5762_s14 + $0x14] sm:$0xf] %v1619_v5  ;;  %v2003_v5 = vld [vmem:[#allocation0 + $0x228] sm:$0xf] }
 0x217   : > { %4952 = vst [vmem:[%s5762_s14 + $0x18] sm:$0xf] %v1625_v6  ;;  %v2009_v6 = vld [vmem:[#allocation0 + $0x230] sm:$0xf] }
 0x218   : > { %4953 = vst [vmem:[%s5762_s14 + $0x1c] sm:$0xf] %v1631_v7  ;;  %v2015_v7 = vld [vmem:[#allocation0 + $0x238] sm:$0xf] }
 0x219   : > { %4954 = vst [vmem:[%s5762_s14 + $0x20] sm:$0xf] %v1637_v8  ;;  %v2021_v8 = vld [vmem:[#allocation0 + $0x240] sm:$0xf] }
 0x21a   : > { %4955 = vst [vmem:[%s5762_s14 + $0x24] sm:$0xf] %v1643_v9  ;;  %v2027_v9 = vld [vmem:[#allocation0 + $0x248] sm:$0xf] }
 0x21b   : > { %4956 = vst [vmem:[%s5762_s14 + $0x28] sm:$0xf] %v1649_v10  ;;  %v2033_v10 = vld [vmem:[#allocation0 + $0x250] sm:$0xf] }
 0x21c   : > { %4957 = vst [vmem:[%s5762_s14 + $0x2c] sm:$0xf] %v1655_v11  ;;  %v2039_v11 = vld [vmem:[#allocation0 + $0x258] sm:$0xf] }
 0x21d   : > { %4958 = vst [vmem:[%s5762_s14 + $0x30] sm:$0xf] %v1661_v12  ;;  %v2045_v12 = vld [vmem:[#allocation0 + $0x260] sm:$0xf] }
 0x21e   : > { %4959 = vst [vmem:[%s5762_s14 + $0x34] sm:$0xf] %v1667_v13  ;;  %v2051_v13 = vld [vmem:[#allocation0 + $0x268] sm:$0xf] }
 0x21f   : > { %4960 = vst [vmem:[%s5762_s14 + $0x38] sm:$0xf] %v1673_v14  ;;  %v2057_v14 = vld [vmem:[#allocation0 + $0x270] sm:$0xf] }
 0x220   : > { %4961 = vst [vmem:[%s5762_s14 + $0x3c] sm:$0xf] %v1679_v15  ;;  %v2063_v15 = vld [vmem:[#allocation0 + $0x278] sm:$0xf] }
 0x221   : > { %4962 = vst [vmem:[%s5762_s14 + $0x40] sm:$0xf] %v1685_v16  ;;  %v2069_v16 = vld [vmem:[#allocation0 + $0x280] sm:$0xf] }
 0x222   : > { %4963 = vst [vmem:[%s5762_s14 + $0x44] sm:$0xf] %v1691_v17  ;;  %v2075_v17 = vld [vmem:[#allocation0 + $0x288] sm:$0xf] }
 0x223   : > { %4964 = vst [vmem:[%s5762_s14 + $0x48] sm:$0xf] %v1697_v18  ;;  %v2081_v18 = vld [vmem:[#allocation0 + $0x290] sm:$0xf] }
 0x224   : > { %4965 = vst [vmem:[%s5762_s14 + $0x4c] sm:$0xf] %v1703_v19  ;;  %v2087_v19 = vld [vmem:[#allocation0 + $0x298] sm:$0xf] }
 0x225   : > { %4966 = vst [vmem:[%s5762_s14 + $0x50] sm:$0xf] %v1709_v20  ;;  %v2093_v20 = vld [vmem:[#allocation0 + $0x2a0] sm:$0xf] }
 0x226   : > { %4967 = vst [vmem:[%s5762_s14 + $0x54] sm:$0xf] %v1715_v21  ;;  %v2099_v21 = vld [vmem:[#allocation0 + $0x2a8] sm:$0xf] }
 0x227   : > { %4968 = vst [vmem:[%s5762_s14 + $0x58] sm:$0xf] %v1721_v22  ;;  %v2105_v22 = vld [vmem:[#allocation0 + $0x2b0] sm:$0xf] }
 0x228   : > { %4969 = vst [vmem:[%s5762_s14 + $0x5c] sm:$0xf] %v1727_v23  ;;  %v2111_v23 = vld [vmem:[#allocation0 + $0x2b8] sm:$0xf] }
 0x229   : > { %4970 = vst [vmem:[%s5762_s14 + $0x60] sm:$0xf] %v1733_v24  ;;  %v2117_v24 = vld [vmem:[#allocation0 + $0x2c0] sm:$0xf] }
 0x22a   : > { %4971 = vst [vmem:[%s5762_s14 + $0x64] sm:$0xf] %v1739_v25  ;;  %v2123_v25 = vld [vmem:[#allocation0 + $0x2c8] sm:$0xf] }
 0x22b   : > { %4972 = vst [vmem:[%s5762_s14 + $0x68] sm:$0xf] %v1745_v26  ;;  %v2129_v26 = vld [vmem:[#allocation0 + $0x2d0] sm:$0xf] }
 0x22c   : > { %4973 = vst [vmem:[%s5762_s14 + $0x6c] sm:$0xf] %v1751_v27  ;;  %v2135_v27 = vld [vmem:[#allocation0 + $0x2d8] sm:$0xf] }
 0x22d   : > { %4974 = vst [vmem:[%s5762_s14 + $0x70] sm:$0xf] %v1757_v28  ;;  %v2141_v28 = vld [vmem:[#allocation0 + $0x2e0] sm:$0xf] }
 0x22e   : > { %4975 = vst [vmem:[%s5762_s14 + $0x74] sm:$0xf] %v1763_v29  ;;  %v2147_v29 = vld [vmem:[#allocation0 + $0x2e8] sm:$0xf] }
 0x22f   : > { %4976 = vst [vmem:[%s5762_s14 + $0x78] sm:$0xf] %v1769_v30  ;;  %v2153_v30 = vld [vmem:[#allocation0 + $0x2f0] sm:$0xf] }
 0x230   : > { %4977 = vst [vmem:[%s5762_s14 + $0x7c] sm:$0xf] %v1775_v31  ;;  %v2159_v31 = vld [vmem:[#allocation0 + $0x2f8] sm:$0xf] }
 0x231   : > { %4978 = vst [vmem:[%s5762_s14 + $0x80] sm:$0xf] %v1781_v32  ;;  %v2165_v32 = vld [vmem:[#allocation0 + $0x300] sm:$0xf] }
 0x232   : > { %4979 = vst [vmem:[%s5762_s14 + $0x84] sm:$0xf] %v1787_v33  ;;  %v2171_v33 = vld [vmem:[#allocation0 + $0x308] sm:$0xf] }
 0x233   : > { %4980 = vst [vmem:[%s5762_s14 + $0x88] sm:$0xf] %v1793_v34  ;;  %v2177_v34 = vld [vmem:[#allocation0 + $0x310] sm:$0xf] }
 0x234   : > { %4981 = vst [vmem:[%s5762_s14 + $0x8c] sm:$0xf] %v1799_v35  ;;  %v2183_v35 = vld [vmem:[#allocation0 + $0x318] sm:$0xf] }
 0x235   : > { %4982 = vst [vmem:[%s5762_s14 + $0x90] sm:$0xf] %v1805_v36  ;;  %v2189_v36 = vld [vmem:[#allocation0 + $0x320] sm:$0xf] }
 0x236   : > { %4983 = vst [vmem:[%s5762_s14 + $0x94] sm:$0xf] %v1811_v37  ;;  %v2195_v37 = vld [vmem:[#allocation0 + $0x328] sm:$0xf] }
 0x237   : > { %4984 = vst [vmem:[%s5762_s14 + $0x98] sm:$0xf] %v1817_v38  ;;  %v2201_v38 = vld [vmem:[#allocation0 + $0x330] sm:$0xf] }
 0x238   : > { %4985 = vst [vmem:[%s5762_s14 + $0x9c] sm:$0xf] %v1823_v39  ;;  %v2207_v39 = vld [vmem:[#allocation0 + $0x338] sm:$0xf] }
 0x239   : > { %4986 = vst [vmem:[%s5762_s14 + $0xa0] sm:$0xf] %v1829_v40  ;;  %v2213_v40 = vld [vmem:[#allocation0 + $0x340] sm:$0xf] }
 0x23a   : > { %4987 = vst [vmem:[%s5762_s14 + $0xa4] sm:$0xf] %v1835_v41  ;;  %v2219_v41 = vld [vmem:[#allocation0 + $0x348] sm:$0xf] }
 0x23b   : > { %4988 = vst [vmem:[%s5762_s14 + $0xa8] sm:$0xf] %v1841_v42  ;;  %v2225_v42 = vld [vmem:[#allocation0 + $0x350] sm:$0xf] }
 0x23c   : > { %4989 = vst [vmem:[%s5762_s14 + $0xac] sm:$0xf] %v1847_v43  ;;  %v2231_v43 = vld [vmem:[#allocation0 + $0x358] sm:$0xf] }
 0x23d   : > { %4990 = vst [vmem:[%s5762_s14 + $0xb0] sm:$0xf] %v1853_v44  ;;  %v2237_v44 = vld [vmem:[#allocation0 + $0x360] sm:$0xf] }
 0x23e   : > { %4991 = vst [vmem:[%s5762_s14 + $0xb4] sm:$0xf] %v1859_v45  ;;  %v2243_v45 = vld [vmem:[#allocation0 + $0x368] sm:$0xf] }
 0x23f   : > { %4992 = vst [vmem:[%s5762_s14 + $0xb8] sm:$0xf] %v1865_v46  ;;  %v2249_v46 = vld [vmem:[#allocation0 + $0x370] sm:$0xf] }
 0x240   : > { %4993 = vst [vmem:[%s5762_s14 + $0xbc] sm:$0xf] %v1871_v47  ;;  %v2255_v47 = vld [vmem:[#allocation0 + $0x378] sm:$0xf] }
 0x241   : > { %4994 = vst [vmem:[%s5762_s14 + $0xc0] sm:$0xf] %v1877_v48  ;;  %v2261_v48 = vld [vmem:[#allocation0 + $0x380] sm:$0xf] }
 0x242   : > { %4995 = vst [vmem:[%s5762_s14 + $0xc4] sm:$0xf] %v1883_v49  ;;  %v2267_v49 = vld [vmem:[#allocation0 + $0x388] sm:$0xf] }
 0x243   : > { %4996 = vst [vmem:[%s5762_s14 + $0xc8] sm:$0xf] %v1889_v50  ;;  %v2273_v50 = vld [vmem:[#allocation0 + $0x390] sm:$0xf] }
 0x244   : > { %4997 = vst [vmem:[%s5762_s14 + $0xcc] sm:$0xf] %v1895_v51  ;;  %v2279_v51 = vld [vmem:[#allocation0 + $0x398] sm:$0xf] }
 0x245   : > { %4998 = vst [vmem:[%s5762_s14 + $0xd0] sm:$0xf] %v1901_v52  ;;  %v2285_v52 = vld [vmem:[#allocation0 + $0x3a0] sm:$0xf] }
 0x246   : > { %4999 = vst [vmem:[%s5762_s14 + $0xd4] sm:$0xf] %v1907_v53  ;;  %v2291_v53 = vld [vmem:[#allocation0 + $0x3a8] sm:$0xf] }
 0x247   : > { %5000 = vst [vmem:[%s5762_s14 + $0xd8] sm:$0xf] %v1913_v54  ;;  %v2297_v54 = vld [vmem:[#allocation0 + $0x3b0] sm:$0xf] }
 0x248   : > { %5001 = vst [vmem:[%s5762_s14 + $0xdc] sm:$0xf] %v1919_v55  ;;  %v2303_v55 = vld [vmem:[#allocation0 + $0x3b8] sm:$0xf] }
 0x249   : > { %5002 = vst [vmem:[%s5762_s14 + $0xe0] sm:$0xf] %v1925_v56  ;;  %v2309_v56 = vld [vmem:[#allocation0 + $0x3c0] sm:$0xf] }
 0x24a   : > { %5003 = vst [vmem:[%s5762_s14 + $0xe4] sm:$0xf] %v1931_v57  ;;  %v2315_v57 = vld [vmem:[#allocation0 + $0x3c8] sm:$0xf] }
 0x24b   : > { %5004 = vst [vmem:[%s5762_s14 + $0xe8] sm:$0xf] %v1937_v58  ;;  %v2321_v58 = vld [vmem:[#allocation0 + $0x3d0] sm:$0xf] }
 0x24c   : > { %5005 = vst [vmem:[%s5762_s14 + $0xec] sm:$0xf] %v1943_v59  ;;  %v2327_v59 = vld [vmem:[#allocation0 + $0x3d8] sm:$0xf] }
 0x24d   : > { %5006 = vst [vmem:[%s5762_s14 + $0xf0] sm:$0xf] %v1949_v60  ;;  %v2333_v60 = vld [vmem:[#allocation0 + $0x3e0] sm:$0xf] }
 0x24e   : > { %5007 = vst [vmem:[%s5762_s14 + $0xf4] sm:$0xf] %v1955_v61  ;;  %v2339_v61 = vld [vmem:[#allocation0 + $0x3e8] sm:$0xf] }
 0x24f   : > { %5008 = vst [vmem:[%s5762_s14 + $0xf8] sm:$0xf] %v1961_v62  ;;  %v2345_v62 = vld [vmem:[#allocation0 + $0x3f0] sm:$0xf] }
 0x250   : > { %5009 = vst [vmem:[%s5762_s14 + $0xfc] sm:$0xf] %v1967_v63  ;;  %v2351_v63 = vld [vmem:[#allocation0 + $0x3f8] sm:$0xf] }
 0x251   : > { %5010 = vst [vmem:[%s5762_s14 + $0x100] sm:$0xf] %v1973_v0  ;;  %v2357_v0 = vld [vmem:[#allocation0 + $0x400] sm:$0xf] }
 0x252   : > { %5011 = vst [vmem:[%s5762_s14 + $0x104] sm:$0xf] %v1979_v1  ;;  %v2363_v1 = vld [vmem:[#allocation0 + $0x408] sm:$0xf] }
 0x253   : > { %5012 = vst [vmem:[%s5762_s14 + $0x108] sm:$0xf] %v1985_v2  ;;  %v2369_v2 = vld [vmem:[#allocation0 + $0x410] sm:$0xf] }
 0x254   : > { %5013 = vst [vmem:[%s5762_s14 + $0x10c] sm:$0xf] %v1991_v3  ;;  %v2375_v3 = vld [vmem:[#allocation0 + $0x418] sm:$0xf] }
 0x255   : > { %5014 = vst [vmem:[%s5762_s14 + $0x110] sm:$0xf] %v1997_v4  ;;  %v2381_v4 = vld [vmem:[#allocation0 + $0x420] sm:$0xf] }
 0x256   : > { %5015 = vst [vmem:[%s5762_s14 + $0x114] sm:$0xf] %v2003_v5  ;;  %v2387_v5 = vld [vmem:[#allocation0 + $0x428] sm:$0xf] }
 0x257   : > { %5016 = vst [vmem:[%s5762_s14 + $0x118] sm:$0xf] %v2009_v6  ;;  %v2393_v6 = vld [vmem:[#allocation0 + $0x430] sm:$0xf] }
 0x258   : > { %5017 = vst [vmem:[%s5762_s14 + $0x11c] sm:$0xf] %v2015_v7  ;;  %v2399_v7 = vld [vmem:[#allocation0 + $0x438] sm:$0xf] }
 0x259   : > { %5018 = vst [vmem:[%s5762_s14 + $0x120] sm:$0xf] %v2021_v8  ;;  %v2405_v8 = vld [vmem:[#allocation0 + $0x440] sm:$0xf] }
 0x25a   : > { %5019 = vst [vmem:[%s5762_s14 + $0x124] sm:$0xf] %v2027_v9  ;;  %v2411_v9 = vld [vmem:[#allocation0 + $0x448] sm:$0xf] }
 0x25b   : > { %5020 = vst [vmem:[%s5762_s14 + $0x128] sm:$0xf] %v2033_v10  ;;  %v2417_v10 = vld [vmem:[#allocation0 + $0x450] sm:$0xf] }
 0x25c   : > { %5021 = vst [vmem:[%s5762_s14 + $0x12c] sm:$0xf] %v2039_v11  ;;  %v2423_v11 = vld [vmem:[#allocation0 + $0x458] sm:$0xf] }
 0x25d   : > { %5022 = vst [vmem:[%s5762_s14 + $0x130] sm:$0xf] %v2045_v12  ;;  %v2429_v12 = vld [vmem:[#allocation0 + $0x460] sm:$0xf] }
 0x25e   : > { %5023 = vst [vmem:[%s5762_s14 + $0x134] sm:$0xf] %v2051_v13  ;;  %v2435_v13 = vld [vmem:[#allocation0 + $0x468] sm:$0xf] }
 0x25f   : > { %5024 = vst [vmem:[%s5762_s14 + $0x138] sm:$0xf] %v2057_v14  ;;  %v2441_v14 = vld [vmem:[#allocation0 + $0x470] sm:$0xf] }
 0x260   : > { %5025 = vst [vmem:[%s5762_s14 + $0x13c] sm:$0xf] %v2063_v15  ;;  %v2447_v15 = vld [vmem:[#allocation0 + $0x478] sm:$0xf] }
 0x261   : > { %5026 = vst [vmem:[%s5762_s14 + $0x140] sm:$0xf] %v2069_v16  ;;  %v2453_v16 = vld [vmem:[#allocation0 + $0x480] sm:$0xf] }
 0x262   : > { %5027 = vst [vmem:[%s5762_s14 + $0x144] sm:$0xf] %v2075_v17  ;;  %v2459_v17 = vld [vmem:[#allocation0 + $0x488] sm:$0xf] }
 0x263   : > { %5028 = vst [vmem:[%s5762_s14 + $0x148] sm:$0xf] %v2081_v18  ;;  %v2465_v18 = vld [vmem:[#allocation0 + $0x490] sm:$0xf] }
 0x264   : > { %5029 = vst [vmem:[%s5762_s14 + $0x14c] sm:$0xf] %v2087_v19  ;;  %v2471_v19 = vld [vmem:[#allocation0 + $0x498] sm:$0xf] }
 0x265   : > { %5030 = vst [vmem:[%s5762_s14 + $0x150] sm:$0xf] %v2093_v20  ;;  %v2477_v20 = vld [vmem:[#allocation0 + $0x4a0] sm:$0xf] }
 0x266   : > { %5031 = vst [vmem:[%s5762_s14 + $0x154] sm:$0xf] %v2099_v21  ;;  %v2483_v21 = vld [vmem:[#allocation0 + $0x4a8] sm:$0xf] }
 0x267   : > { %5032 = vst [vmem:[%s5762_s14 + $0x158] sm:$0xf] %v2105_v22  ;;  %v2489_v22 = vld [vmem:[#allocation0 + $0x4b0] sm:$0xf] }
 0x268   : > { %5033 = vst [vmem:[%s5762_s14 + $0x15c] sm:$0xf] %v2111_v23  ;;  %v2495_v23 = vld [vmem:[#allocation0 + $0x4b8] sm:$0xf] }
 0x269   : > { %5034 = vst [vmem:[%s5762_s14 + $0x160] sm:$0xf] %v2117_v24  ;;  %v2501_v24 = vld [vmem:[#allocation0 + $0x4c0] sm:$0xf] }
 0x26a   : > { %5035 = vst [vmem:[%s5762_s14 + $0x164] sm:$0xf] %v2123_v25  ;;  %v2507_v25 = vld [vmem:[#allocation0 + $0x4c8] sm:$0xf] }
 0x26b   : > { %5036 = vst [vmem:[%s5762_s14 + $0x168] sm:$0xf] %v2129_v26  ;;  %v2513_v26 = vld [vmem:[#allocation0 + $0x4d0] sm:$0xf] }
 0x26c   : > { %5037 = vst [vmem:[%s5762_s14 + $0x16c] sm:$0xf] %v2135_v27  ;;  %v2519_v27 = vld [vmem:[#allocation0 + $0x4d8] sm:$0xf] }
 0x26d   : > { %5038 = vst [vmem:[%s5762_s14 + $0x170] sm:$0xf] %v2141_v28  ;;  %v2525_v28 = vld [vmem:[#allocation0 + $0x4e0] sm:$0xf] }
 0x26e   : > { %5039 = vst [vmem:[%s5762_s14 + $0x174] sm:$0xf] %v2147_v29  ;;  %v2531_v29 = vld [vmem:[#allocation0 + $0x4e8] sm:$0xf] }
 0x26f   : > { %5040 = vst [vmem:[%s5762_s14 + $0x178] sm:$0xf] %v2153_v30  ;;  %v2537_v30 = vld [vmem:[#allocation0 + $0x4f0] sm:$0xf] }
 0x270   : > { %5041 = vst [vmem:[%s5762_s14 + $0x17c] sm:$0xf] %v2159_v31  ;;  %v2543_v31 = vld [vmem:[#allocation0 + $0x4f8] sm:$0xf] }
 0x271   : > { %5042 = vst [vmem:[%s5762_s14 + $0x180] sm:$0xf] %v2165_v32  ;;  %v2549_v32 = vld [vmem:[#allocation0 + $0x500] sm:$0xf] }
 0x272   : > { %5043 = vst [vmem:[%s5762_s14 + $0x184] sm:$0xf] %v2171_v33  ;;  %v2555_v33 = vld [vmem:[#allocation0 + $0x508] sm:$0xf] }
 0x273   : > { %5044 = vst [vmem:[%s5762_s14 + $0x188] sm:$0xf] %v2177_v34  ;;  %v2561_v34 = vld [vmem:[#allocation0 + $0x510] sm:$0xf] }
 0x274   : > { %5045 = vst [vmem:[%s5762_s14 + $0x18c] sm:$0xf] %v2183_v35  ;;  %v2567_v35 = vld [vmem:[#allocation0 + $0x518] sm:$0xf] }
 0x275   : > { %5046 = vst [vmem:[%s5762_s14 + $0x190] sm:$0xf] %v2189_v36  ;;  %v2573_v36 = vld [vmem:[#allocation0 + $0x520] sm:$0xf] }
 0x276   : > { %5047 = vst [vmem:[%s5762_s14 + $0x194] sm:$0xf] %v2195_v37  ;;  %v2579_v37 = vld [vmem:[#allocation0 + $0x528] sm:$0xf] }
 0x277   : > { %5048 = vst [vmem:[%s5762_s14 + $0x198] sm:$0xf] %v2201_v38  ;;  %v2585_v38 = vld [vmem:[#allocation0 + $0x530] sm:$0xf] }
 0x278   : > { %5049 = vst [vmem:[%s5762_s14 + $0x19c] sm:$0xf] %v2207_v39  ;;  %v2591_v39 = vld [vmem:[#allocation0 + $0x538] sm:$0xf] }
 0x279   : > { %5050 = vst [vmem:[%s5762_s14 + $0x1a0] sm:$0xf] %v2213_v40  ;;  %v2597_v40 = vld [vmem:[#allocation0 + $0x540] sm:$0xf] }
 0x27a   : > { %5051 = vst [vmem:[%s5762_s14 + $0x1a4] sm:$0xf] %v2219_v41  ;;  %v2603_v41 = vld [vmem:[#allocation0 + $0x548] sm:$0xf] }
 0x27b   : > { %5052 = vst [vmem:[%s5762_s14 + $0x1a8] sm:$0xf] %v2225_v42  ;;  %v2609_v42 = vld [vmem:[#allocation0 + $0x550] sm:$0xf] }
 0x27c   : > { %5053 = vst [vmem:[%s5762_s14 + $0x1ac] sm:$0xf] %v2231_v43  ;;  %v2615_v43 = vld [vmem:[#allocation0 + $0x558] sm:$0xf] }
 0x27d   : > { %5054 = vst [vmem:[%s5762_s14 + $0x1b0] sm:$0xf] %v2237_v44  ;;  %v2621_v44 = vld [vmem:[#allocation0 + $0x560] sm:$0xf] }
 0x27e   : > { %5055 = vst [vmem:[%s5762_s14 + $0x1b4] sm:$0xf] %v2243_v45  ;;  %v2627_v45 = vld [vmem:[#allocation0 + $0x568] sm:$0xf] }
 0x27f   : > { %5056 = vst [vmem:[%s5762_s14 + $0x1b8] sm:$0xf] %v2249_v46  ;;  %v2633_v46 = vld [vmem:[#allocation0 + $0x570] sm:$0xf] }
 0x280   : > { %5057 = vst [vmem:[%s5762_s14 + $0x1bc] sm:$0xf] %v2255_v47  ;;  %v2639_v47 = vld [vmem:[#allocation0 + $0x578] sm:$0xf] }
 0x281   : > { %5058 = vst [vmem:[%s5762_s14 + $0x1c0] sm:$0xf] %v2261_v48  ;;  %v2645_v48 = vld [vmem:[#allocation0 + $0x580] sm:$0xf] }
 0x282   : > { %5059 = vst [vmem:[%s5762_s14 + $0x1c4] sm:$0xf] %v2267_v49  ;;  %v2651_v49 = vld [vmem:[#allocation0 + $0x588] sm:$0xf] }
 0x283   : > { %5060 = vst [vmem:[%s5762_s14 + $0x1c8] sm:$0xf] %v2273_v50  ;;  %v2657_v50 = vld [vmem:[#allocation0 + $0x590] sm:$0xf] }
 0x284   : > { %5061 = vst [vmem:[%s5762_s14 + $0x1cc] sm:$0xf] %v2279_v51  ;;  %v2663_v51 = vld [vmem:[#allocation0 + $0x598] sm:$0xf] }
 0x285   : > { %5062 = vst [vmem:[%s5762_s14 + $0x1d0] sm:$0xf] %v2285_v52  ;;  %v2669_v52 = vld [vmem:[#allocation0 + $0x5a0] sm:$0xf] }
 0x286   : > { %5063 = vst [vmem:[%s5762_s14 + $0x1d4] sm:$0xf] %v2291_v53  ;;  %v2675_v53 = vld [vmem:[#allocation0 + $0x5a8] sm:$0xf] }
 0x287   : > { %5064 = vst [vmem:[%s5762_s14 + $0x1d8] sm:$0xf] %v2297_v54  ;;  %v2681_v54 = vld [vmem:[#allocation0 + $0x5b0] sm:$0xf] }
 0x288   : > { %5065 = vst [vmem:[%s5762_s14 + $0x1dc] sm:$0xf] %v2303_v55  ;;  %v2687_v55 = vld [vmem:[#allocation0 + $0x5b8] sm:$0xf] }
 0x289   : > { %5066 = vst [vmem:[%s5762_s14 + $0x1e0] sm:$0xf] %v2309_v56  ;;  %v2693_v56 = vld [vmem:[#allocation0 + $0x5c0] sm:$0xf] }
 0x28a   : > { %5067 = vst [vmem:[%s5762_s14 + $0x1e4] sm:$0xf] %v2315_v57  ;;  %v2699_v57 = vld [vmem:[#allocation0 + $0x5c8] sm:$0xf] }
 0x28b   : > { %5068 = vst [vmem:[%s5762_s14 + $0x1e8] sm:$0xf] %v2321_v58  ;;  %v2705_v58 = vld [vmem:[#allocation0 + $0x5d0] sm:$0xf] }
 0x28c   : > { %5069 = vst [vmem:[%s5762_s14 + $0x1ec] sm:$0xf] %v2327_v59  ;;  %v2711_v59 = vld [vmem:[#allocation0 + $0x5d8] sm:$0xf] }
 0x28d   : > { %5070 = vst [vmem:[%s5762_s14 + $0x1f0] sm:$0xf] %v2333_v60  ;;  %v2717_v60 = vld [vmem:[#allocation0 + $0x5e0] sm:$0xf] }
 0x28e   : > { %5071 = vst [vmem:[%s5762_s14 + $0x1f4] sm:$0xf] %v2339_v61  ;;  %v2723_v61 = vld [vmem:[#allocation0 + $0x5e8] sm:$0xf] }
 0x28f   : > { %5072 = vst [vmem:[%s5762_s14 + $0x1f8] sm:$0xf] %v2345_v62  ;;  %v2729_v62 = vld [vmem:[#allocation0 + $0x5f0] sm:$0xf] }
 0x290   : > { %5073 = vst [vmem:[%s5762_s14 + $0x1fc] sm:$0xf] %v2351_v63  ;;  %v2735_v63 = vld [vmem:[#allocation0 + $0x5f8] sm:$0xf] }
 0x291   : > { %5074 = vst [vmem:[%s5762_s14 + $0x200] sm:$0xf] %v2357_v0  ;;  %v2741_v0 = vld [vmem:[#allocation0 + $0x600] sm:$0xf] }
 0x292   : > { %5075 = vst [vmem:[%s5762_s14 + $0x204] sm:$0xf] %v2363_v1  ;;  %v2747_v1 = vld [vmem:[#allocation0 + $0x608] sm:$0xf] }
 0x293   : > { %5076 = vst [vmem:[%s5762_s14 + $0x208] sm:$0xf] %v2369_v2  ;;  %v2753_v2 = vld [vmem:[#allocation0 + $0x610] sm:$0xf] }
 0x294   : > { %5077 = vst [vmem:[%s5762_s14 + $0x20c] sm:$0xf] %v2375_v3  ;;  %v2759_v3 = vld [vmem:[#allocation0 + $0x618] sm:$0xf] }
 0x295   : > { %5078 = vst [vmem:[%s5762_s14 + $0x210] sm:$0xf] %v2381_v4  ;;  %v2765_v4 = vld [vmem:[#allocation0 + $0x620] sm:$0xf] }
 0x296   : > { %5079 = vst [vmem:[%s5762_s14 + $0x214] sm:$0xf] %v2387_v5  ;;  %v2771_v5 = vld [vmem:[#allocation0 + $0x628] sm:$0xf] }
 0x297   : > { %5080 = vst [vmem:[%s5762_s14 + $0x218] sm:$0xf] %v2393_v6  ;;  %v2777_v6 = vld [vmem:[#allocation0 + $0x630] sm:$0xf] }
 0x298   : > { %5081 = vst [vmem:[%s5762_s14 + $0x21c] sm:$0xf] %v2399_v7  ;;  %v2783_v7 = vld [vmem:[#allocation0 + $0x638] sm:$0xf] }
 0x299   : > { %5082 = vst [vmem:[%s5762_s14 + $0x220] sm:$0xf] %v2405_v8  ;;  %v2789_v8 = vld [vmem:[#allocation0 + $0x640] sm:$0xf] }
 0x29a   : > { %5083 = vst [vmem:[%s5762_s14 + $0x224] sm:$0xf] %v2411_v9  ;;  %v2795_v9 = vld [vmem:[#allocation0 + $0x648] sm:$0xf] }
 0x29b   : > { %5084 = vst [vmem:[%s5762_s14 + $0x228] sm:$0xf] %v2417_v10  ;;  %v2801_v10 = vld [vmem:[#allocation0 + $0x650] sm:$0xf] }
 0x29c   : > { %5085 = vst [vmem:[%s5762_s14 + $0x22c] sm:$0xf] %v2423_v11  ;;  %v2807_v11 = vld [vmem:[#allocation0 + $0x658] sm:$0xf] }
 0x29d   : > { %5086 = vst [vmem:[%s5762_s14 + $0x230] sm:$0xf] %v2429_v12  ;;  %v2813_v12 = vld [vmem:[#allocation0 + $0x660] sm:$0xf] }
 0x29e   : > { %5087 = vst [vmem:[%s5762_s14 + $0x234] sm:$0xf] %v2435_v13  ;;  %v2819_v13 = vld [vmem:[#allocation0 + $0x668] sm:$0xf] }
 0x29f   : > { %5088 = vst [vmem:[%s5762_s14 + $0x238] sm:$0xf] %v2441_v14  ;;  %v2825_v14 = vld [vmem:[#allocation0 + $0x670] sm:$0xf] }
 0x2a0   : > { %5089 = vst [vmem:[%s5762_s14 + $0x23c] sm:$0xf] %v2447_v15  ;;  %v2831_v15 = vld [vmem:[#allocation0 + $0x678] sm:$0xf] }
 0x2a1   : > { %5090 = vst [vmem:[%s5762_s14 + $0x240] sm:$0xf] %v2453_v16  ;;  %v2837_v16 = vld [vmem:[#allocation0 + $0x680] sm:$0xf] }
 0x2a2   : > { %5091 = vst [vmem:[%s5762_s14 + $0x244] sm:$0xf] %v2459_v17  ;;  %v2843_v17 = vld [vmem:[#allocation0 + $0x688] sm:$0xf] }
 0x2a3   : > { %5092 = vst [vmem:[%s5762_s14 + $0x248] sm:$0xf] %v2465_v18  ;;  %v2849_v18 = vld [vmem:[#allocation0 + $0x690] sm:$0xf] }
 0x2a4   : > { %5093 = vst [vmem:[%s5762_s14 + $0x24c] sm:$0xf] %v2471_v19  ;;  %v2855_v19 = vld [vmem:[#allocation0 + $0x698] sm:$0xf] }
 0x2a5   : > { %5094 = vst [vmem:[%s5762_s14 + $0x250] sm:$0xf] %v2477_v20  ;;  %v2861_v20 = vld [vmem:[#allocation0 + $0x6a0] sm:$0xf] }
 0x2a6   : > { %5095 = vst [vmem:[%s5762_s14 + $0x254] sm:$0xf] %v2483_v21  ;;  %v2867_v21 = vld [vmem:[#allocation0 + $0x6a8] sm:$0xf] }
 0x2a7   : > { %5096 = vst [vmem:[%s5762_s14 + $0x258] sm:$0xf] %v2489_v22  ;;  %v2873_v22 = vld [vmem:[#allocation0 + $0x6b0] sm:$0xf] }
 0x2a8   : > { %5097 = vst [vmem:[%s5762_s14 + $0x25c] sm:$0xf] %v2495_v23  ;;  %v2879_v23 = vld [vmem:[#allocation0 + $0x6b8] sm:$0xf] }
 0x2a9   : > { %5098 = vst [vmem:[%s5762_s14 + $0x260] sm:$0xf] %v2501_v24  ;;  %v2885_v24 = vld [vmem:[#allocation0 + $0x6c0] sm:$0xf] }
 0x2aa   : > { %5099 = vst [vmem:[%s5762_s14 + $0x264] sm:$0xf] %v2507_v25  ;;  %v2891_v25 = vld [vmem:[#allocation0 + $0x6c8] sm:$0xf] }
 0x2ab   : > { %5100 = vst [vmem:[%s5762_s14 + $0x268] sm:$0xf] %v2513_v26  ;;  %v2897_v26 = vld [vmem:[#allocation0 + $0x6d0] sm:$0xf] }
 0x2ac   : > { %5101 = vst [vmem:[%s5762_s14 + $0x26c] sm:$0xf] %v2519_v27  ;;  %v2903_v27 = vld [vmem:[#allocation0 + $0x6d8] sm:$0xf] }
 0x2ad   : > { %5102 = vst [vmem:[%s5762_s14 + $0x270] sm:$0xf] %v2525_v28  ;;  %v2909_v28 = vld [vmem:[#allocation0 + $0x6e0] sm:$0xf] }
 0x2ae   : > { %5103 = vst [vmem:[%s5762_s14 + $0x274] sm:$0xf] %v2531_v29  ;;  %v2915_v29 = vld [vmem:[#allocation0 + $0x6e8] sm:$0xf] }
 0x2af   : > { %5104 = vst [vmem:[%s5762_s14 + $0x278] sm:$0xf] %v2537_v30  ;;  %v2921_v30 = vld [vmem:[#allocation0 + $0x6f0] sm:$0xf] }
 0x2b0   : > { %5105 = vst [vmem:[%s5762_s14 + $0x27c] sm:$0xf] %v2543_v31  ;;  %v2927_v31 = vld [vmem:[#allocation0 + $0x6f8] sm:$0xf] }
 0x2b1   : > { %5106 = vst [vmem:[%s5762_s14 + $0x280] sm:$0xf] %v2549_v32  ;;  %v2933_v32 = vld [vmem:[#allocation0 + $0x700] sm:$0xf] }
 0x2b2   : > { %5107 = vst [vmem:[%s5762_s14 + $0x284] sm:$0xf] %v2555_v33  ;;  %v2939_v33 = vld [vmem:[#allocation0 + $0x708] sm:$0xf] }
 0x2b3   : > { %5108 = vst [vmem:[%s5762_s14 + $0x288] sm:$0xf] %v2561_v34  ;;  %v2945_v34 = vld [vmem:[#allocation0 + $0x710] sm:$0xf] }
 0x2b4   : > { %5109 = vst [vmem:[%s5762_s14 + $0x28c] sm:$0xf] %v2567_v35  ;;  %v2951_v35 = vld [vmem:[#allocation0 + $0x718] sm:$0xf] }
 0x2b5   : > { %5110 = vst [vmem:[%s5762_s14 + $0x290] sm:$0xf] %v2573_v36  ;;  %v2957_v36 = vld [vmem:[#allocation0 + $0x720] sm:$0xf] }
 0x2b6   : > { %5111 = vst [vmem:[%s5762_s14 + $0x294] sm:$0xf] %v2579_v37  ;;  %v2963_v37 = vld [vmem:[#allocation0 + $0x728] sm:$0xf] }
 0x2b7   : > { %5112 = vst [vmem:[%s5762_s14 + $0x298] sm:$0xf] %v2585_v38  ;;  %v2969_v38 = vld [vmem:[#allocation0 + $0x730] sm:$0xf] }
 0x2b8   : > { %5113 = vst [vmem:[%s5762_s14 + $0x29c] sm:$0xf] %v2591_v39  ;;  %v2975_v39 = vld [vmem:[#allocation0 + $0x738] sm:$0xf] }
 0x2b9   : > { %5114 = vst [vmem:[%s5762_s14 + $0x2a0] sm:$0xf] %v2597_v40  ;;  %v2981_v40 = vld [vmem:[#allocation0 + $0x740] sm:$0xf] }
 0x2ba   : > { %5115 = vst [vmem:[%s5762_s14 + $0x2a4] sm:$0xf] %v2603_v41  ;;  %v2987_v41 = vld [vmem:[#allocation0 + $0x748] sm:$0xf] }
 0x2bb   : > { %5116 = vst [vmem:[%s5762_s14 + $0x2a8] sm:$0xf] %v2609_v42  ;;  %v2993_v42 = vld [vmem:[#allocation0 + $0x750] sm:$0xf] }
 0x2bc   : > { %5117 = vst [vmem:[%s5762_s14 + $0x2ac] sm:$0xf] %v2615_v43  ;;  %v2999_v43 = vld [vmem:[#allocation0 + $0x758] sm:$0xf] }
 0x2bd   : > { %5118 = vst [vmem:[%s5762_s14 + $0x2b0] sm:$0xf] %v2621_v44  ;;  %v3005_v44 = vld [vmem:[#allocation0 + $0x760] sm:$0xf] }
 0x2be   : > { %5119 = vst [vmem:[%s5762_s14 + $0x2b4] sm:$0xf] %v2627_v45  ;;  %v3011_v45 = vld [vmem:[#allocation0 + $0x768] sm:$0xf] }
 0x2bf   : > { %5120 = vst [vmem:[%s5762_s14 + $0x2b8] sm:$0xf] %v2633_v46  ;;  %v3017_v46 = vld [vmem:[#allocation0 + $0x770] sm:$0xf] }
 0x2c0   : > { %5121 = vst [vmem:[%s5762_s14 + $0x2bc] sm:$0xf] %v2639_v47  ;;  %v3023_v47 = vld [vmem:[#allocation0 + $0x778] sm:$0xf] }
 0x2c1   : > { %5122 = vst [vmem:[%s5762_s14 + $0x2c0] sm:$0xf] %v2645_v48  ;;  %v3029_v48 = vld [vmem:[#allocation0 + $0x780] sm:$0xf] }
 0x2c2   : > { %5123 = vst [vmem:[%s5762_s14 + $0x2c4] sm:$0xf] %v2651_v49  ;;  %v3035_v49 = vld [vmem:[#allocation0 + $0x788] sm:$0xf] }
 0x2c3   : > { %5124 = vst [vmem:[%s5762_s14 + $0x2c8] sm:$0xf] %v2657_v50  ;;  %v3041_v50 = vld [vmem:[#allocation0 + $0x790] sm:$0xf] }
 0x2c4   : > { %5125 = vst [vmem:[%s5762_s14 + $0x2cc] sm:$0xf] %v2663_v51  ;;  %v3047_v51 = vld [vmem:[#allocation0 + $0x798] sm:$0xf] }
 0x2c5   : > { %5126 = vst [vmem:[%s5762_s14 + $0x2d0] sm:$0xf] %v2669_v52  ;;  %v3053_v52 = vld [vmem:[#allocation0 + $0x7a0] sm:$0xf] }
 0x2c6   : > { %5127 = vst [vmem:[%s5762_s14 + $0x2d4] sm:$0xf] %v2675_v53  ;;  %v3059_v53 = vld [vmem:[#allocation0 + $0x7a8] sm:$0xf] }
 0x2c7   : > { %5128 = vst [vmem:[%s5762_s14 + $0x2d8] sm:$0xf] %v2681_v54  ;;  %v3065_v54 = vld [vmem:[#allocation0 + $0x7b0] sm:$0xf] }
 0x2c8   : > { %5129 = vst [vmem:[%s5762_s14 + $0x2dc] sm:$0xf] %v2687_v55  ;;  %v3071_v55 = vld [vmem:[#allocation0 + $0x7b8] sm:$0xf] }
 0x2c9   : > { %5130 = vst [vmem:[%s5762_s14 + $0x2e0] sm:$0xf] %v2693_v56  ;;  %v3077_v56 = vld [vmem:[#allocation0 + $0x7c0] sm:$0xf] }
 0x2ca   : > { %5131 = vst [vmem:[%s5762_s14 + $0x2e4] sm:$0xf] %v2699_v57  ;;  %v3083_v57 = vld [vmem:[#allocation0 + $0x7c8] sm:$0xf] }
 0x2cb   : > { %5132 = vst [vmem:[%s5762_s14 + $0x2e8] sm:$0xf] %v2705_v58  ;;  %v3089_v58 = vld [vmem:[#allocation0 + $0x7d0] sm:$0xf] }
 0x2cc   : > { %5133 = vst [vmem:[%s5762_s14 + $0x2ec] sm:$0xf] %v2711_v59  ;;  %v3095_v59 = vld [vmem:[#allocation0 + $0x7d8] sm:$0xf] }
 0x2cd   : > { %5134 = vst [vmem:[%s5762_s14 + $0x2f0] sm:$0xf] %v2717_v60  ;;  %v3101_v60 = vld [vmem:[#allocation0 + $0x7e0] sm:$0xf] }
 0x2ce   : > { %5135 = vst [vmem:[%s5762_s14 + $0x2f4] sm:$0xf] %v2723_v61  ;;  %v3107_v61 = vld [vmem:[#allocation0 + $0x7e8] sm:$0xf] }
 0x2cf   : > { %5136 = vst [vmem:[%s5762_s14 + $0x2f8] sm:$0xf] %v2729_v62  ;;  %v3113_v62 = vld [vmem:[#allocation0 + $0x7f0] sm:$0xf] }
 0x2d0   : > { %5137 = vst [vmem:[%s5762_s14 + $0x2fc] sm:$0xf] %v2735_v63  ;;  %v3119_v63 = vld [vmem:[#allocation0 + $0x7f8] sm:$0xf] }
 0x2d1   : > { %5138 = vst [vmem:[%s5762_s14 + $0x300] sm:$0xf] %v2741_v0  ;;  %v3125_v0 = vld [vmem:[#allocation0 + $0x800] sm:$0xf] }
 0x2d2   : > { %5139 = vst [vmem:[%s5762_s14 + $0x304] sm:$0xf] %v2747_v1  ;;  %v3131_v1 = vld [vmem:[#allocation0 + $0x808] sm:$0xf] }
 0x2d3   : > { %5140 = vst [vmem:[%s5762_s14 + $0x308] sm:$0xf] %v2753_v2  ;;  %v3137_v2 = vld [vmem:[#allocation0 + $0x810] sm:$0xf] }
 0x2d4   : > { %5141 = vst [vmem:[%s5762_s14 + $0x30c] sm:$0xf] %v2759_v3  ;;  %v3143_v3 = vld [vmem:[#allocation0 + $0x818] sm:$0xf] }
 0x2d5   : > { %5142 = vst [vmem:[%s5762_s14 + $0x310] sm:$0xf] %v2765_v4  ;;  %v3149_v4 = vld [vmem:[#allocation0 + $0x820] sm:$0xf] }
 0x2d6   : > { %5143 = vst [vmem:[%s5762_s14 + $0x314] sm:$0xf] %v2771_v5  ;;  %v3155_v5 = vld [vmem:[#allocation0 + $0x828] sm:$0xf] }
 0x2d7   : > { %5144 = vst [vmem:[%s5762_s14 + $0x318] sm:$0xf] %v2777_v6  ;;  %v3161_v6 = vld [vmem:[#allocation0 + $0x830] sm:$0xf] }
 0x2d8   : > { %5145 = vst [vmem:[%s5762_s14 + $0x31c] sm:$0xf] %v2783_v7  ;;  %v3167_v7 = vld [vmem:[#allocation0 + $0x838] sm:$0xf] }
 0x2d9   : > { %5146 = vst [vmem:[%s5762_s14 + $0x320] sm:$0xf] %v2789_v8  ;;  %v3173_v8 = vld [vmem:[#allocation0 + $0x840] sm:$0xf] }
 0x2da   : > { %5147 = vst [vmem:[%s5762_s14 + $0x324] sm:$0xf] %v2795_v9  ;;  %v3179_v9 = vld [vmem:[#allocation0 + $0x848] sm:$0xf] }
 0x2db   : > { %5148 = vst [vmem:[%s5762_s14 + $0x328] sm:$0xf] %v2801_v10  ;;  %v3185_v10 = vld [vmem:[#allocation0 + $0x850] sm:$0xf] }
 0x2dc   : > { %5149 = vst [vmem:[%s5762_s14 + $0x32c] sm:$0xf] %v2807_v11  ;;  %v3191_v11 = vld [vmem:[#allocation0 + $0x858] sm:$0xf] }
 0x2dd   : > { %5150 = vst [vmem:[%s5762_s14 + $0x330] sm:$0xf] %v2813_v12  ;;  %v3197_v12 = vld [vmem:[#allocation0 + $0x860] sm:$0xf] }
 0x2de   : > { %5151 = vst [vmem:[%s5762_s14 + $0x334] sm:$0xf] %v2819_v13  ;;  %v3203_v13 = vld [vmem:[#allocation0 + $0x868] sm:$0xf] }
 0x2df   : > { %5152 = vst [vmem:[%s5762_s14 + $0x338] sm:$0xf] %v2825_v14  ;;  %v3209_v14 = vld [vmem:[#allocation0 + $0x870] sm:$0xf] }
 0x2e0   : > { %5153 = vst [vmem:[%s5762_s14 + $0x33c] sm:$0xf] %v2831_v15  ;;  %v3215_v15 = vld [vmem:[#allocation0 + $0x878] sm:$0xf] }
 0x2e1   : > { %5154 = vst [vmem:[%s5762_s14 + $0x340] sm:$0xf] %v2837_v16  ;;  %v3221_v16 = vld [vmem:[#allocation0 + $0x880] sm:$0xf] }
 0x2e2   : > { %5155 = vst [vmem:[%s5762_s14 + $0x344] sm:$0xf] %v2843_v17  ;;  %v3227_v17 = vld [vmem:[#allocation0 + $0x888] sm:$0xf] }
 0x2e3   : > { %5156 = vst [vmem:[%s5762_s14 + $0x348] sm:$0xf] %v2849_v18  ;;  %v3233_v18 = vld [vmem:[#allocation0 + $0x890] sm:$0xf] }
 0x2e4   : > { %5157 = vst [vmem:[%s5762_s14 + $0x34c] sm:$0xf] %v2855_v19  ;;  %v3239_v19 = vld [vmem:[#allocation0 + $0x898] sm:$0xf] }
 0x2e5   : > { %5158 = vst [vmem:[%s5762_s14 + $0x350] sm:$0xf] %v2861_v20  ;;  %v3245_v20 = vld [vmem:[#allocation0 + $0x8a0] sm:$0xf] }
 0x2e6   : > { %5159 = vst [vmem:[%s5762_s14 + $0x354] sm:$0xf] %v2867_v21  ;;  %v3251_v21 = vld [vmem:[#allocation0 + $0x8a8] sm:$0xf] }
 0x2e7   : > { %5160 = vst [vmem:[%s5762_s14 + $0x358] sm:$0xf] %v2873_v22  ;;  %v3257_v22 = vld [vmem:[#allocation0 + $0x8b0] sm:$0xf] }
 0x2e8   : > { %5161 = vst [vmem:[%s5762_s14 + $0x35c] sm:$0xf] %v2879_v23  ;;  %v3263_v23 = vld [vmem:[#allocation0 + $0x8b8] sm:$0xf] }
 0x2e9   : > { %5162 = vst [vmem:[%s5762_s14 + $0x360] sm:$0xf] %v2885_v24  ;;  %v3269_v24 = vld [vmem:[#allocation0 + $0x8c0] sm:$0xf] }
 0x2ea   : > { %5163 = vst [vmem:[%s5762_s14 + $0x364] sm:$0xf] %v2891_v25  ;;  %v3275_v25 = vld [vmem:[#allocation0 + $0x8c8] sm:$0xf] }
 0x2eb   : > { %5164 = vst [vmem:[%s5762_s14 + $0x368] sm:$0xf] %v2897_v26  ;;  %v3281_v26 = vld [vmem:[#allocation0 + $0x8d0] sm:$0xf] }
 0x2ec   : > { %5165 = vst [vmem:[%s5762_s14 + $0x36c] sm:$0xf] %v2903_v27  ;;  %v3287_v27 = vld [vmem:[#allocation0 + $0x8d8] sm:$0xf] }
 0x2ed   : > { %5166 = vst [vmem:[%s5762_s14 + $0x370] sm:$0xf] %v2909_v28  ;;  %v3293_v28 = vld [vmem:[#allocation0 + $0x8e0] sm:$0xf] }
 0x2ee   : > { %5167 = vst [vmem:[%s5762_s14 + $0x374] sm:$0xf] %v2915_v29  ;;  %v3299_v29 = vld [vmem:[#allocation0 + $0x8e8] sm:$0xf] }
 0x2ef   : > { %5168 = vst [vmem:[%s5762_s14 + $0x378] sm:$0xf] %v2921_v30  ;;  %v3305_v30 = vld [vmem:[#allocation0 + $0x8f0] sm:$0xf] }
 0x2f0   : > { %5169 = vst [vmem:[%s5762_s14 + $0x37c] sm:$0xf] %v2927_v31  ;;  %v3311_v31 = vld [vmem:[#allocation0 + $0x8f8] sm:$0xf] }
 0x2f1   : > { %5170 = vst [vmem:[%s5762_s14 + $0x380] sm:$0xf] %v2933_v32  ;;  %v3317_v32 = vld [vmem:[#allocation0 + $0x900] sm:$0xf] }
 0x2f2   : > { %5171 = vst [vmem:[%s5762_s14 + $0x384] sm:$0xf] %v2939_v33  ;;  %v3323_v33 = vld [vmem:[#allocation0 + $0x908] sm:$0xf] }
 0x2f3   : > { %5172 = vst [vmem:[%s5762_s14 + $0x388] sm:$0xf] %v2945_v34  ;;  %v3329_v34 = vld [vmem:[#allocation0 + $0x910] sm:$0xf] }
 0x2f4   : > { %5173 = vst [vmem:[%s5762_s14 + $0x38c] sm:$0xf] %v2951_v35  ;;  %v3335_v35 = vld [vmem:[#allocation0 + $0x918] sm:$0xf] }
 0x2f5   : > { %5174 = vst [vmem:[%s5762_s14 + $0x390] sm:$0xf] %v2957_v36  ;;  %v3341_v36 = vld [vmem:[#allocation0 + $0x920] sm:$0xf] }
 0x2f6   : > { %5175 = vst [vmem:[%s5762_s14 + $0x394] sm:$0xf] %v2963_v37  ;;  %v3347_v37 = vld [vmem:[#allocation0 + $0x928] sm:$0xf] }
 0x2f7   : > { %5176 = vst [vmem:[%s5762_s14 + $0x398] sm:$0xf] %v2969_v38  ;;  %v3353_v38 = vld [vmem:[#allocation0 + $0x930] sm:$0xf] }
 0x2f8   : > { %5177 = vst [vmem:[%s5762_s14 + $0x39c] sm:$0xf] %v2975_v39  ;;  %v3359_v39 = vld [vmem:[#allocation0 + $0x938] sm:$0xf] }
 0x2f9   : > { %5178 = vst [vmem:[%s5762_s14 + $0x3a0] sm:$0xf] %v2981_v40  ;;  %v3365_v40 = vld [vmem:[#allocation0 + $0x940] sm:$0xf] }
 0x2fa   : > { %5179 = vst [vmem:[%s5762_s14 + $0x3a4] sm:$0xf] %v2987_v41  ;;  %v3371_v41 = vld [vmem:[#allocation0 + $0x948] sm:$0xf] }
 0x2fb   : > { %5180 = vst [vmem:[%s5762_s14 + $0x3a8] sm:$0xf] %v2993_v42  ;;  %v3377_v42 = vld [vmem:[#allocation0 + $0x950] sm:$0xf] }
 0x2fc   : > { %5181 = vst [vmem:[%s5762_s14 + $0x3ac] sm:$0xf] %v2999_v43  ;;  %v3383_v43 = vld [vmem:[#allocation0 + $0x958] sm:$0xf] }
 0x2fd   : > { %5182 = vst [vmem:[%s5762_s14 + $0x3b0] sm:$0xf] %v3005_v44  ;;  %v3389_v44 = vld [vmem:[#allocation0 + $0x960] sm:$0xf] }
 0x2fe   : > { %5183 = vst [vmem:[%s5762_s14 + $0x3b4] sm:$0xf] %v3011_v45  ;;  %v3395_v45 = vld [vmem:[#allocation0 + $0x968] sm:$0xf] }
 0x2ff   : > { %5184 = vst [vmem:[%s5762_s14 + $0x3b8] sm:$0xf] %v3017_v46  ;;  %v3401_v46 = vld [vmem:[#allocation0 + $0x970] sm:$0xf] }
 0x300   : > { %5185 = vst [vmem:[%s5762_s14 + $0x3bc] sm:$0xf] %v3023_v47  ;;  %v3407_v47 = vld [vmem:[#allocation0 + $0x978] sm:$0xf] }
 0x301   : > { %5186 = vst [vmem:[%s5762_s14 + $0x3c0] sm:$0xf] %v3029_v48  ;;  %v3413_v48 = vld [vmem:[#allocation0 + $0x980] sm:$0xf] }
 0x302   : > { %5187 = vst [vmem:[%s5762_s14 + $0x3c4] sm:$0xf] %v3035_v49  ;;  %v3419_v49 = vld [vmem:[#allocation0 + $0x988] sm:$0xf] }
 0x303   : > { %5188 = vst [vmem:[%s5762_s14 + $0x3c8] sm:$0xf] %v3041_v50  ;;  %v3425_v50 = vld [vmem:[#allocation0 + $0x990] sm:$0xf] }
 0x304   : > { %5189 = vst [vmem:[%s5762_s14 + $0x3cc] sm:$0xf] %v3047_v51  ;;  %v3431_v51 = vld [vmem:[#allocation0 + $0x998] sm:$0xf] }
 0x305   : > { %5190 = vst [vmem:[%s5762_s14 + $0x3d0] sm:$0xf] %v3053_v52  ;;  %v3437_v52 = vld [vmem:[#allocation0 + $0x9a0] sm:$0xf] }
 0x306   : > { %5191 = vst [vmem:[%s5762_s14 + $0x3d4] sm:$0xf] %v3059_v53  ;;  %v3443_v53 = vld [vmem:[#allocation0 + $0x9a8] sm:$0xf] }
 0x307   : > { %5192 = vst [vmem:[%s5762_s14 + $0x3d8] sm:$0xf] %v3065_v54  ;;  %v3449_v54 = vld [vmem:[#allocation0 + $0x9b0] sm:$0xf] }
 0x308   : > { %5193 = vst [vmem:[%s5762_s14 + $0x3dc] sm:$0xf] %v3071_v55  ;;  %v3455_v55 = vld [vmem:[#allocation0 + $0x9b8] sm:$0xf] }
 0x309   : > { %5194 = vst [vmem:[%s5762_s14 + $0x3e0] sm:$0xf] %v3077_v56  ;;  %v3461_v56 = vld [vmem:[#allocation0 + $0x9c0] sm:$0xf] }
 0x30a   : > { %5195 = vst [vmem:[%s5762_s14 + $0x3e4] sm:$0xf] %v3083_v57  ;;  %v3467_v57 = vld [vmem:[#allocation0 + $0x9c8] sm:$0xf] }
 0x30b   : > { %5196 = vst [vmem:[%s5762_s14 + $0x3e8] sm:$0xf] %v3089_v58  ;;  %v3473_v58 = vld [vmem:[#allocation0 + $0x9d0] sm:$0xf] }
 0x30c   : > { %5197 = vst [vmem:[%s5762_s14 + $0x3ec] sm:$0xf] %v3095_v59  ;;  %v3479_v59 = vld [vmem:[#allocation0 + $0x9d8] sm:$0xf] }
 0x30d   : > { %5198 = vst [vmem:[%s5762_s14 + $0x3f0] sm:$0xf] %v3101_v60  ;;  %v3485_v60 = vld [vmem:[#allocation0 + $0x9e0] sm:$0xf] }
 0x30e   : > { %5199 = vst [vmem:[%s5762_s14 + $0x3f4] sm:$0xf] %v3107_v61  ;;  %v3491_v61 = vld [vmem:[#allocation0 + $0x9e8] sm:$0xf] }
 0x30f   : > { %5200 = vst [vmem:[%s5762_s14 + $0x3f8] sm:$0xf] %v3113_v62  ;;  %v3497_v62 = vld [vmem:[#allocation0 + $0x9f0] sm:$0xf] }
 0x310   : > { %5201 = vst [vmem:[%s5762_s14 + $0x3fc] sm:$0xf] %v3119_v63  ;;  %v3503_v63 = vld [vmem:[#allocation0 + $0x9f8] sm:$0xf] }
 0x311   : > { %5202 = vst [vmem:[%s5762_s14 + $0x400] sm:$0xf] %v3125_v0  ;;  %v3509_v0 = vld [vmem:[#allocation0 + $0xa00] sm:$0xf] }
 0x312   : > { %5203 = vst [vmem:[%s5762_s14 + $0x404] sm:$0xf] %v3131_v1  ;;  %v3515_v1 = vld [vmem:[#allocation0 + $0xa08] sm:$0xf] }
 0x313   : > { %5204 = vst [vmem:[%s5762_s14 + $0x408] sm:$0xf] %v3137_v2  ;;  %v3521_v2 = vld [vmem:[#allocation0 + $0xa10] sm:$0xf] }
 0x314   : > { %5205 = vst [vmem:[%s5762_s14 + $0x40c] sm:$0xf] %v3143_v3  ;;  %v3527_v3 = vld [vmem:[#allocation0 + $0xa18] sm:$0xf] }
 0x315   : > { %5206 = vst [vmem:[%s5762_s14 + $0x410] sm:$0xf] %v3149_v4  ;;  %v3533_v4 = vld [vmem:[#allocation0 + $0xa20] sm:$0xf] }
 0x316   : > { %5207 = vst [vmem:[%s5762_s14 + $0x414] sm:$0xf] %v3155_v5  ;;  %v3539_v5 = vld [vmem:[#allocation0 + $0xa28] sm:$0xf] }
 0x317   : > { %5208 = vst [vmem:[%s5762_s14 + $0x418] sm:$0xf] %v3161_v6  ;;  %v3545_v6 = vld [vmem:[#allocation0 + $0xa30] sm:$0xf] }
 0x318   : > { %5209 = vst [vmem:[%s5762_s14 + $0x41c] sm:$0xf] %v3167_v7  ;;  %v3551_v7 = vld [vmem:[#allocation0 + $0xa38] sm:$0xf] }
 0x319   : > { %5210 = vst [vmem:[%s5762_s14 + $0x420] sm:$0xf] %v3173_v8  ;;  %v3557_v8 = vld [vmem:[#allocation0 + $0xa40] sm:$0xf] }
 0x31a   : > { %5211 = vst [vmem:[%s5762_s14 + $0x424] sm:$0xf] %v3179_v9  ;;  %v3563_v9 = vld [vmem:[#allocation0 + $0xa48] sm:$0xf] }
 0x31b   : > { %5212 = vst [vmem:[%s5762_s14 + $0x428] sm:$0xf] %v3185_v10  ;;  %v3569_v10 = vld [vmem:[#allocation0 + $0xa50] sm:$0xf] }
 0x31c   : > { %5213 = vst [vmem:[%s5762_s14 + $0x42c] sm:$0xf] %v3191_v11  ;;  %v3575_v11 = vld [vmem:[#allocation0 + $0xa58] sm:$0xf] }
 0x31d   : > { %5214 = vst [vmem:[%s5762_s14 + $0x430] sm:$0xf] %v3197_v12  ;;  %v3581_v12 = vld [vmem:[#allocation0 + $0xa60] sm:$0xf] }
 0x31e   : > { %5215 = vst [vmem:[%s5762_s14 + $0x434] sm:$0xf] %v3203_v13  ;;  %v3587_v13 = vld [vmem:[#allocation0 + $0xa68] sm:$0xf] }
 0x31f   : > { %5216 = vst [vmem:[%s5762_s14 + $0x438] sm:$0xf] %v3209_v14  ;;  %v3593_v14 = vld [vmem:[#allocation0 + $0xa70] sm:$0xf] }
 0x320   : > { %5217 = vst [vmem:[%s5762_s14 + $0x43c] sm:$0xf] %v3215_v15  ;;  %v3599_v15 = vld [vmem:[#allocation0 + $0xa78] sm:$0xf] }
 0x321   : > { %5218 = vst [vmem:[%s5762_s14 + $0x440] sm:$0xf] %v3221_v16  ;;  %v3605_v16 = vld [vmem:[#allocation0 + $0xa80] sm:$0xf] }
 0x322   : > { %5219 = vst [vmem:[%s5762_s14 + $0x444] sm:$0xf] %v3227_v17  ;;  %v3611_v17 = vld [vmem:[#allocation0 + $0xa88] sm:$0xf] }
 0x323   : > { %5220 = vst [vmem:[%s5762_s14 + $0x448] sm:$0xf] %v3233_v18  ;;  %v3617_v18 = vld [vmem:[#allocation0 + $0xa90] sm:$0xf] }
 0x324   : > { %5221 = vst [vmem:[%s5762_s14 + $0x44c] sm:$0xf] %v3239_v19  ;;  %v3623_v19 = vld [vmem:[#allocation0 + $0xa98] sm:$0xf] }
 0x325   : > { %5222 = vst [vmem:[%s5762_s14 + $0x450] sm:$0xf] %v3245_v20  ;;  %v3629_v20 = vld [vmem:[#allocation0 + $0xaa0] sm:$0xf] }
 0x326   : > { %5223 = vst [vmem:[%s5762_s14 + $0x454] sm:$0xf] %v3251_v21  ;;  %v3635_v21 = vld [vmem:[#allocation0 + $0xaa8] sm:$0xf] }
 0x327   : > { %5224 = vst [vmem:[%s5762_s14 + $0x458] sm:$0xf] %v3257_v22  ;;  %v3641_v22 = vld [vmem:[#allocation0 + $0xab0] sm:$0xf] }
 0x328   : > { %5225 = vst [vmem:[%s5762_s14 + $0x45c] sm:$0xf] %v3263_v23  ;;  %v3647_v23 = vld [vmem:[#allocation0 + $0xab8] sm:$0xf] }
 0x329   : > { %5226 = vst [vmem:[%s5762_s14 + $0x460] sm:$0xf] %v3269_v24  ;;  %v3653_v24 = vld [vmem:[#allocation0 + $0xac0] sm:$0xf] }
 0x32a   : > { %5227 = vst [vmem:[%s5762_s14 + $0x464] sm:$0xf] %v3275_v25  ;;  %v3659_v25 = vld [vmem:[#allocation0 + $0xac8] sm:$0xf] }
 0x32b   : > { %5228 = vst [vmem:[%s5762_s14 + $0x468] sm:$0xf] %v3281_v26  ;;  %v3665_v26 = vld [vmem:[#allocation0 + $0xad0] sm:$0xf] }
 0x32c   : > { %5229 = vst [vmem:[%s5762_s14 + $0x46c] sm:$0xf] %v3287_v27  ;;  %v3671_v27 = vld [vmem:[#allocation0 + $0xad8] sm:$0xf] }
 0x32d   : > { %5230 = vst [vmem:[%s5762_s14 + $0x470] sm:$0xf] %v3293_v28  ;;  %v3677_v28 = vld [vmem:[#allocation0 + $0xae0] sm:$0xf] }
 0x32e   : > { %5231 = vst [vmem:[%s5762_s14 + $0x474] sm:$0xf] %v3299_v29  ;;  %v3683_v29 = vld [vmem:[#allocation0 + $0xae8] sm:$0xf] }
 0x32f   : > { %5232 = vst [vmem:[%s5762_s14 + $0x478] sm:$0xf] %v3305_v30  ;;  %v3689_v30 = vld [vmem:[#allocation0 + $0xaf0] sm:$0xf] }
 0x330   : > { %5233 = vst [vmem:[%s5762_s14 + $0x47c] sm:$0xf] %v3311_v31  ;;  %v3695_v31 = vld [vmem:[#allocation0 + $0xaf8] sm:$0xf] }
 0x331   : > { %5234 = vst [vmem:[%s5762_s14 + $0x480] sm:$0xf] %v3317_v32  ;;  %v3701_v32 = vld [vmem:[#allocation0 + $0xb00] sm:$0xf] }
 0x332   : > { %5235 = vst [vmem:[%s5762_s14 + $0x484] sm:$0xf] %v3323_v33  ;;  %v3707_v33 = vld [vmem:[#allocation0 + $0xb08] sm:$0xf] }
 0x333   : > { %5236 = vst [vmem:[%s5762_s14 + $0x488] sm:$0xf] %v3329_v34  ;;  %v3713_v34 = vld [vmem:[#allocation0 + $0xb10] sm:$0xf] }
 0x334   : > { %5237 = vst [vmem:[%s5762_s14 + $0x48c] sm:$0xf] %v3335_v35  ;;  %v3719_v35 = vld [vmem:[#allocation0 + $0xb18] sm:$0xf] }
 0x335   : > { %5238 = vst [vmem:[%s5762_s14 + $0x490] sm:$0xf] %v3341_v36  ;;  %v3725_v36 = vld [vmem:[#allocation0 + $0xb20] sm:$0xf] }
 0x336   : > { %5239 = vst [vmem:[%s5762_s14 + $0x494] sm:$0xf] %v3347_v37  ;;  %v3731_v37 = vld [vmem:[#allocation0 + $0xb28] sm:$0xf] }
 0x337   : > { %5240 = vst [vmem:[%s5762_s14 + $0x498] sm:$0xf] %v3353_v38  ;;  %v3737_v38 = vld [vmem:[#allocation0 + $0xb30] sm:$0xf] }
 0x338   : > { %5241 = vst [vmem:[%s5762_s14 + $0x49c] sm:$0xf] %v3359_v39  ;;  %v3743_v39 = vld [vmem:[#allocation0 + $0xb38] sm:$0xf] }
 0x339   : > { %5242 = vst [vmem:[%s5762_s14 + $0x4a0] sm:$0xf] %v3365_v40  ;;  %v3749_v40 = vld [vmem:[#allocation0 + $0xb40] sm:$0xf] }
 0x33a   : > { %5243 = vst [vmem:[%s5762_s14 + $0x4a4] sm:$0xf] %v3371_v41  ;;  %v3755_v41 = vld [vmem:[#allocation0 + $0xb48] sm:$0xf] }
 0x33b   : > { %5244 = vst [vmem:[%s5762_s14 + $0x4a8] sm:$0xf] %v3377_v42  ;;  %v3761_v42 = vld [vmem:[#allocation0 + $0xb50] sm:$0xf] }
 0x33c   : > { %5245 = vst [vmem:[%s5762_s14 + $0x4ac] sm:$0xf] %v3383_v43  ;;  %v3767_v43 = vld [vmem:[#allocation0 + $0xb58] sm:$0xf] }
 0x33d   : > { %5246 = vst [vmem:[%s5762_s14 + $0x4b0] sm:$0xf] %v3389_v44  ;;  %v3773_v44 = vld [vmem:[#allocation0 + $0xb60] sm:$0xf] }
 0x33e   : > { %5247 = vst [vmem:[%s5762_s14 + $0x4b4] sm:$0xf] %v3395_v45  ;;  %v3779_v45 = vld [vmem:[#allocation0 + $0xb68] sm:$0xf] }
 0x33f   : > { %5248 = vst [vmem:[%s5762_s14 + $0x4b8] sm:$0xf] %v3401_v46  ;;  %v3785_v46 = vld [vmem:[#allocation0 + $0xb70] sm:$0xf] }
 0x340   : > { %5249 = vst [vmem:[%s5762_s14 + $0x4bc] sm:$0xf] %v3407_v47  ;;  %v3791_v47 = vld [vmem:[#allocation0 + $0xb78] sm:$0xf] }
 0x341   : > { %5250 = vst [vmem:[%s5762_s14 + $0x4c0] sm:$0xf] %v3413_v48  ;;  %v3797_v48 = vld [vmem:[#allocation0 + $0xb80] sm:$0xf] }
 0x342   : > { %5251 = vst [vmem:[%s5762_s14 + $0x4c4] sm:$0xf] %v3419_v49  ;;  %v3803_v49 = vld [vmem:[#allocation0 + $0xb88] sm:$0xf] }
 0x343   : > { %5252 = vst [vmem:[%s5762_s14 + $0x4c8] sm:$0xf] %v3425_v50  ;;  %v3809_v50 = vld [vmem:[#allocation0 + $0xb90] sm:$0xf] }
 0x344   : > { %5253 = vst [vmem:[%s5762_s14 + $0x4cc] sm:$0xf] %v3431_v51  ;;  %v3815_v51 = vld [vmem:[#allocation0 + $0xb98] sm:$0xf] }
 0x345   : > { %5254 = vst [vmem:[%s5762_s14 + $0x4d0] sm:$0xf] %v3437_v52  ;;  %v3821_v52 = vld [vmem:[#allocation0 + $0xba0] sm:$0xf] }
 0x346   : > { %5255 = vst [vmem:[%s5762_s14 + $0x4d4] sm:$0xf] %v3443_v53  ;;  %v3827_v53 = vld [vmem:[#allocation0 + $0xba8] sm:$0xf] }
 0x347   : > { %5256 = vst [vmem:[%s5762_s14 + $0x4d8] sm:$0xf] %v3449_v54  ;;  %v3833_v54 = vld [vmem:[#allocation0 + $0xbb0] sm:$0xf] }
 0x348   : > { %5257 = vst [vmem:[%s5762_s14 + $0x4dc] sm:$0xf] %v3455_v55  ;;  %v3839_v55 = vld [vmem:[#allocation0 + $0xbb8] sm:$0xf] }
 0x349   : > { %5258 = vst [vmem:[%s5762_s14 + $0x4e0] sm:$0xf] %v3461_v56  ;;  %v3845_v56 = vld [vmem:[#allocation0 + $0xbc0] sm:$0xf] }
 0x34a   : > { %5259 = vst [vmem:[%s5762_s14 + $0x4e4] sm:$0xf] %v3467_v57  ;;  %v3851_v57 = vld [vmem:[#allocation0 + $0xbc8] sm:$0xf] }
 0x34b   : > { %5260 = vst [vmem:[%s5762_s14 + $0x4e8] sm:$0xf] %v3473_v58  ;;  %v3857_v58 = vld [vmem:[#allocation0 + $0xbd0] sm:$0xf] }
 0x34c   : > { %5261 = vst [vmem:[%s5762_s14 + $0x4ec] sm:$0xf] %v3479_v59  ;;  %v3863_v59 = vld [vmem:[#allocation0 + $0xbd8] sm:$0xf] }
 0x34d   : > { %5262 = vst [vmem:[%s5762_s14 + $0x4f0] sm:$0xf] %v3485_v60  ;;  %v3869_v60 = vld [vmem:[#allocation0 + $0xbe0] sm:$0xf] }
 0x34e   : > { %5263 = vst [vmem:[%s5762_s14 + $0x4f4] sm:$0xf] %v3491_v61  ;;  %v3875_v61 = vld [vmem:[#allocation0 + $0xbe8] sm:$0xf] }
 0x34f   : > { %5264 = vst [vmem:[%s5762_s14 + $0x4f8] sm:$0xf] %v3497_v62  ;;  %v3881_v62 = vld [vmem:[#allocation0 + $0xbf0] sm:$0xf] }
 0x350   : > { %5265 = vst [vmem:[%s5762_s14 + $0x4fc] sm:$0xf] %v3503_v63  ;;  %v3887_v63 = vld [vmem:[#allocation0 + $0xbf8] sm:$0xf] }
 0x351   : > { %5266 = vst [vmem:[%s5762_s14 + $0x500] sm:$0xf] %v3509_v0  ;;  %v3893_v0 = vld [vmem:[#allocation0 + $0xc00] sm:$0xf] }
 0x352   : > { %5267 = vst [vmem:[%s5762_s14 + $0x504] sm:$0xf] %v3515_v1  ;;  %v3899_v1 = vld [vmem:[#allocation0 + $0xc08] sm:$0xf] }
 0x353   : > { %5268 = vst [vmem:[%s5762_s14 + $0x508] sm:$0xf] %v3521_v2  ;;  %v3905_v2 = vld [vmem:[#allocation0 + $0xc10] sm:$0xf] }
 0x354   : > { %5269 = vst [vmem:[%s5762_s14 + $0x50c] sm:$0xf] %v3527_v3  ;;  %v3911_v3 = vld [vmem:[#allocation0 + $0xc18] sm:$0xf] }
 0x355   : > { %5270 = vst [vmem:[%s5762_s14 + $0x510] sm:$0xf] %v3533_v4  ;;  %v3917_v4 = vld [vmem:[#allocation0 + $0xc20] sm:$0xf] }
 0x356   : > { %5271 = vst [vmem:[%s5762_s14 + $0x514] sm:$0xf] %v3539_v5  ;;  %v3923_v5 = vld [vmem:[#allocation0 + $0xc28] sm:$0xf] }
 0x357   : > { %5272 = vst [vmem:[%s5762_s14 + $0x518] sm:$0xf] %v3545_v6  ;;  %v3929_v6 = vld [vmem:[#allocation0 + $0xc30] sm:$0xf] }
 0x358   : > { %5273 = vst [vmem:[%s5762_s14 + $0x51c] sm:$0xf] %v3551_v7  ;;  %v3935_v7 = vld [vmem:[#allocation0 + $0xc38] sm:$0xf] }
 0x359   : > { %5274 = vst [vmem:[%s5762_s14 + $0x520] sm:$0xf] %v3557_v8  ;;  %v3941_v8 = vld [vmem:[#allocation0 + $0xc40] sm:$0xf] }
 0x35a   : > { %5275 = vst [vmem:[%s5762_s14 + $0x524] sm:$0xf] %v3563_v9  ;;  %v3947_v9 = vld [vmem:[#allocation0 + $0xc48] sm:$0xf] }
 0x35b   : > { %5276 = vst [vmem:[%s5762_s14 + $0x528] sm:$0xf] %v3569_v10  ;;  %v3953_v10 = vld [vmem:[#allocation0 + $0xc50] sm:$0xf] }
 0x35c   : > { %5277 = vst [vmem:[%s5762_s14 + $0x52c] sm:$0xf] %v3575_v11  ;;  %v3959_v11 = vld [vmem:[#allocation0 + $0xc58] sm:$0xf] }
 0x35d   : > { %5278 = vst [vmem:[%s5762_s14 + $0x530] sm:$0xf] %v3581_v12  ;;  %v3965_v12 = vld [vmem:[#allocation0 + $0xc60] sm:$0xf] }
 0x35e   : > { %5279 = vst [vmem:[%s5762_s14 + $0x534] sm:$0xf] %v3587_v13  ;;  %v3971_v13 = vld [vmem:[#allocation0 + $0xc68] sm:$0xf] }
 0x35f   : > { %5280 = vst [vmem:[%s5762_s14 + $0x538] sm:$0xf] %v3593_v14  ;;  %v3977_v14 = vld [vmem:[#allocation0 + $0xc70] sm:$0xf] }
 0x360   : > { %5281 = vst [vmem:[%s5762_s14 + $0x53c] sm:$0xf] %v3599_v15  ;;  %v3983_v15 = vld [vmem:[#allocation0 + $0xc78] sm:$0xf] }
 0x361   : > { %5282 = vst [vmem:[%s5762_s14 + $0x540] sm:$0xf] %v3605_v16  ;;  %v3989_v16 = vld [vmem:[#allocation0 + $0xc80] sm:$0xf] }
 0x362   : > { %5283 = vst [vmem:[%s5762_s14 + $0x544] sm:$0xf] %v3611_v17  ;;  %v3995_v17 = vld [vmem:[#allocation0 + $0xc88] sm:$0xf] }
 0x363   : > { %5284 = vst [vmem:[%s5762_s14 + $0x548] sm:$0xf] %v3617_v18  ;;  %v4001_v18 = vld [vmem:[#allocation0 + $0xc90] sm:$0xf] }
 0x364   : > { %5285 = vst [vmem:[%s5762_s14 + $0x54c] sm:$0xf] %v3623_v19  ;;  %v4007_v19 = vld [vmem:[#allocation0 + $0xc98] sm:$0xf] }
 0x365   : > { %5286 = vst [vmem:[%s5762_s14 + $0x550] sm:$0xf] %v3629_v20  ;;  %v4013_v20 = vld [vmem:[#allocation0 + $0xca0] sm:$0xf] }
 0x366   : > { %5287 = vst [vmem:[%s5762_s14 + $0x554] sm:$0xf] %v3635_v21  ;;  %v4019_v21 = vld [vmem:[#allocation0 + $0xca8] sm:$0xf] }
 0x367   : > { %5288 = vst [vmem:[%s5762_s14 + $0x558] sm:$0xf] %v3641_v22  ;;  %v4025_v22 = vld [vmem:[#allocation0 + $0xcb0] sm:$0xf] }
 0x368   : > { %5289 = vst [vmem:[%s5762_s14 + $0x55c] sm:$0xf] %v3647_v23  ;;  %v4031_v23 = vld [vmem:[#allocation0 + $0xcb8] sm:$0xf] }
 0x369   : > { %5290 = vst [vmem:[%s5762_s14 + $0x560] sm:$0xf] %v3653_v24  ;;  %v4037_v24 = vld [vmem:[#allocation0 + $0xcc0] sm:$0xf] }
 0x36a   : > { %5291 = vst [vmem:[%s5762_s14 + $0x564] sm:$0xf] %v3659_v25  ;;  %v4043_v25 = vld [vmem:[#allocation0 + $0xcc8] sm:$0xf] }
 0x36b   : > { %5292 = vst [vmem:[%s5762_s14 + $0x568] sm:$0xf] %v3665_v26  ;;  %v4049_v26 = vld [vmem:[#allocation0 + $0xcd0] sm:$0xf] }
 0x36c   : > { %5293 = vst [vmem:[%s5762_s14 + $0x56c] sm:$0xf] %v3671_v27  ;;  %v4055_v27 = vld [vmem:[#allocation0 + $0xcd8] sm:$0xf] }
 0x36d   : > { %5294 = vst [vmem:[%s5762_s14 + $0x570] sm:$0xf] %v3677_v28  ;;  %v4061_v28 = vld [vmem:[#allocation0 + $0xce0] sm:$0xf] }
 0x36e   : > { %5295 = vst [vmem:[%s5762_s14 + $0x574] sm:$0xf] %v3683_v29  ;;  %v4067_v29 = vld [vmem:[#allocation0 + $0xce8] sm:$0xf] }
 0x36f   : > { %5296 = vst [vmem:[%s5762_s14 + $0x578] sm:$0xf] %v3689_v30  ;;  %v4073_v30 = vld [vmem:[#allocation0 + $0xcf0] sm:$0xf] }
 0x370   : > { %5297 = vst [vmem:[%s5762_s14 + $0x57c] sm:$0xf] %v3695_v31  ;;  %v4079_v31 = vld [vmem:[#allocation0 + $0xcf8] sm:$0xf] }
 0x371   : > { %5298 = vst [vmem:[%s5762_s14 + $0x580] sm:$0xf] %v3701_v32  ;;  %v4085_v32 = vld [vmem:[#allocation0 + $0xd00] sm:$0xf] }
 0x372   : > { %5299 = vst [vmem:[%s5762_s14 + $0x584] sm:$0xf] %v3707_v33  ;;  %v4091_v33 = vld [vmem:[#allocation0 + $0xd08] sm:$0xf] }
 0x373   : > { %5300 = vst [vmem:[%s5762_s14 + $0x588] sm:$0xf] %v3713_v34  ;;  %v4097_v34 = vld [vmem:[#allocation0 + $0xd10] sm:$0xf] }
 0x374   : > { %5301 = vst [vmem:[%s5762_s14 + $0x58c] sm:$0xf] %v3719_v35  ;;  %v4103_v35 = vld [vmem:[#allocation0 + $0xd18] sm:$0xf] }
 0x375   : > { %5302 = vst [vmem:[%s5762_s14 + $0x590] sm:$0xf] %v3725_v36  ;;  %v4109_v36 = vld [vmem:[#allocation0 + $0xd20] sm:$0xf] }
 0x376   : > { %5303 = vst [vmem:[%s5762_s14 + $0x594] sm:$0xf] %v3731_v37  ;;  %v4115_v37 = vld [vmem:[#allocation0 + $0xd28] sm:$0xf] }
 0x377   : > { %5304 = vst [vmem:[%s5762_s14 + $0x598] sm:$0xf] %v3737_v38  ;;  %v4121_v38 = vld [vmem:[#allocation0 + $0xd30] sm:$0xf] }
 0x378   : > { %5305 = vst [vmem:[%s5762_s14 + $0x59c] sm:$0xf] %v3743_v39  ;;  %v4127_v39 = vld [vmem:[#allocation0 + $0xd38] sm:$0xf] }
 0x379   : > { %5306 = vst [vmem:[%s5762_s14 + $0x5a0] sm:$0xf] %v3749_v40  ;;  %v4133_v40 = vld [vmem:[#allocation0 + $0xd40] sm:$0xf] }
 0x37a   : > { %5307 = vst [vmem:[%s5762_s14 + $0x5a4] sm:$0xf] %v3755_v41  ;;  %v4139_v41 = vld [vmem:[#allocation0 + $0xd48] sm:$0xf] }
 0x37b   : > { %5308 = vst [vmem:[%s5762_s14 + $0x5a8] sm:$0xf] %v3761_v42  ;;  %v4145_v42 = vld [vmem:[#allocation0 + $0xd50] sm:$0xf] }
 0x37c   : > { %5309 = vst [vmem:[%s5762_s14 + $0x5ac] sm:$0xf] %v3767_v43  ;;  %v4151_v43 = vld [vmem:[#allocation0 + $0xd58] sm:$0xf] }
 0x37d   : > { %5310 = vst [vmem:[%s5762_s14 + $0x5b0] sm:$0xf] %v3773_v44  ;;  %v4157_v44 = vld [vmem:[#allocation0 + $0xd60] sm:$0xf] }
 0x37e   : > { %5311 = vst [vmem:[%s5762_s14 + $0x5b4] sm:$0xf] %v3779_v45  ;;  %v4163_v45 = vld [vmem:[#allocation0 + $0xd68] sm:$0xf] }
 0x37f   : > { %5312 = vst [vmem:[%s5762_s14 + $0x5b8] sm:$0xf] %v3785_v46  ;;  %v4169_v46 = vld [vmem:[#allocation0 + $0xd70] sm:$0xf] }
 0x380   : > { %5313 = vst [vmem:[%s5762_s14 + $0x5bc] sm:$0xf] %v3791_v47  ;;  %v4175_v47 = vld [vmem:[#allocation0 + $0xd78] sm:$0xf] }
 0x381   : > { %5314 = vst [vmem:[%s5762_s14 + $0x5c0] sm:$0xf] %v3797_v48  ;;  %v4181_v48 = vld [vmem:[#allocation0 + $0xd80] sm:$0xf] }
 0x382   : > { %5315 = vst [vmem:[%s5762_s14 + $0x5c4] sm:$0xf] %v3803_v49  ;;  %v4187_v49 = vld [vmem:[#allocation0 + $0xd88] sm:$0xf] }
 0x383   : > { %5316 = vst [vmem:[%s5762_s14 + $0x5c8] sm:$0xf] %v3809_v50  ;;  %v4193_v50 = vld [vmem:[#allocation0 + $0xd90] sm:$0xf] }
 0x384   : > { %5317 = vst [vmem:[%s5762_s14 + $0x5cc] sm:$0xf] %v3815_v51  ;;  %v4199_v51 = vld [vmem:[#allocation0 + $0xd98] sm:$0xf] }
 0x385   : > { %5318 = vst [vmem:[%s5762_s14 + $0x5d0] sm:$0xf] %v3821_v52  ;;  %v4205_v52 = vld [vmem:[#allocation0 + $0xda0] sm:$0xf] }
 0x386   : > { %5319 = vst [vmem:[%s5762_s14 + $0x5d4] sm:$0xf] %v3827_v53  ;;  %v4211_v53 = vld [vmem:[#allocation0 + $0xda8] sm:$0xf] }
 0x387   : > { %5320 = vst [vmem:[%s5762_s14 + $0x5d8] sm:$0xf] %v3833_v54  ;;  %v4217_v54 = vld [vmem:[#allocation0 + $0xdb0] sm:$0xf] }
 0x388   : > { %5321 = vst [vmem:[%s5762_s14 + $0x5dc] sm:$0xf] %v3839_v55  ;;  %v4223_v55 = vld [vmem:[#allocation0 + $0xdb8] sm:$0xf] }
 0x389   : > { %5322 = vst [vmem:[%s5762_s14 + $0x5e0] sm:$0xf] %v3845_v56  ;;  %v4229_v56 = vld [vmem:[#allocation0 + $0xdc0] sm:$0xf] }
 0x38a   : > { %5323 = vst [vmem:[%s5762_s14 + $0x5e4] sm:$0xf] %v3851_v57  ;;  %v4235_v57 = vld [vmem:[#allocation0 + $0xdc8] sm:$0xf] }
 0x38b   : > { %5324 = vst [vmem:[%s5762_s14 + $0x5e8] sm:$0xf] %v3857_v58  ;;  %v4241_v58 = vld [vmem:[#allocation0 + $0xdd0] sm:$0xf] }
 0x38c   : > { %5325 = vst [vmem:[%s5762_s14 + $0x5ec] sm:$0xf] %v3863_v59  ;;  %v4247_v59 = vld [vmem:[#allocation0 + $0xdd8] sm:$0xf] }
 0x38d   : > { %5326 = vst [vmem:[%s5762_s14 + $0x5f0] sm:$0xf] %v3869_v60  ;;  %v4253_v60 = vld [vmem:[#allocation0 + $0xde0] sm:$0xf] }
 0x38e   : > { %5327 = vst [vmem:[%s5762_s14 + $0x5f4] sm:$0xf] %v3875_v61  ;;  %v4259_v61 = vld [vmem:[#allocation0 + $0xde8] sm:$0xf] }
 0x38f   : > { %5328 = vst [vmem:[%s5762_s14 + $0x5f8] sm:$0xf] %v3881_v62  ;;  %v4265_v62 = vld [vmem:[#allocation0 + $0xdf0] sm:$0xf] }
 0x390   : > { %5329 = vst [vmem:[%s5762_s14 + $0x5fc] sm:$0xf] %v3887_v63  ;;  %v4271_v63 = vld [vmem:[#allocation0 + $0xdf8] sm:$0xf] }
 0x391   : > { %5330 = vst [vmem:[%s5762_s14 + $0x600] sm:$0xf] %v3893_v0  ;;  %v4277_v0 = vld [vmem:[#allocation0 + $0xe00] sm:$0xf] }
 0x392   : > { %5331 = vst [vmem:[%s5762_s14 + $0x604] sm:$0xf] %v3899_v1  ;;  %v4283_v1 = vld [vmem:[#allocation0 + $0xe08] sm:$0xf] }
 0x393   : > { %5332 = vst [vmem:[%s5762_s14 + $0x608] sm:$0xf] %v3905_v2  ;;  %v4289_v2 = vld [vmem:[#allocation0 + $0xe10] sm:$0xf] }
 0x394   : > { %5333 = vst [vmem:[%s5762_s14 + $0x60c] sm:$0xf] %v3911_v3  ;;  %v4295_v3 = vld [vmem:[#allocation0 + $0xe18] sm:$0xf] }
 0x395   : > { %5334 = vst [vmem:[%s5762_s14 + $0x610] sm:$0xf] %v3917_v4  ;;  %v4301_v4 = vld [vmem:[#allocation0 + $0xe20] sm:$0xf] }
 0x396   : > { %5335 = vst [vmem:[%s5762_s14 + $0x614] sm:$0xf] %v3923_v5  ;;  %v4307_v5 = vld [vmem:[#allocation0 + $0xe28] sm:$0xf] }
 0x397   : > { %5336 = vst [vmem:[%s5762_s14 + $0x618] sm:$0xf] %v3929_v6  ;;  %v4313_v6 = vld [vmem:[#allocation0 + $0xe30] sm:$0xf] }
 0x398   : > { %5337 = vst [vmem:[%s5762_s14 + $0x61c] sm:$0xf] %v3935_v7  ;;  %v4319_v7 = vld [vmem:[#allocation0 + $0xe38] sm:$0xf] }
 0x399   : > { %5338 = vst [vmem:[%s5762_s14 + $0x620] sm:$0xf] %v3941_v8  ;;  %v4325_v8 = vld [vmem:[#allocation0 + $0xe40] sm:$0xf] }
 0x39a   : > { %5339 = vst [vmem:[%s5762_s14 + $0x624] sm:$0xf] %v3947_v9  ;;  %v4331_v9 = vld [vmem:[#allocation0 + $0xe48] sm:$0xf] }
 0x39b   : > { %5340 = vst [vmem:[%s5762_s14 + $0x628] sm:$0xf] %v3953_v10  ;;  %v4337_v10 = vld [vmem:[#allocation0 + $0xe50] sm:$0xf] }
 0x39c   : > { %5341 = vst [vmem:[%s5762_s14 + $0x62c] sm:$0xf] %v3959_v11  ;;  %v4343_v11 = vld [vmem:[#allocation0 + $0xe58] sm:$0xf] }
 0x39d   : > { %5342 = vst [vmem:[%s5762_s14 + $0x630] sm:$0xf] %v3965_v12  ;;  %v4349_v12 = vld [vmem:[#allocation0 + $0xe60] sm:$0xf] }
 0x39e   : > { %5343 = vst [vmem:[%s5762_s14 + $0x634] sm:$0xf] %v3971_v13  ;;  %v4355_v13 = vld [vmem:[#allocation0 + $0xe68] sm:$0xf] }
 0x39f   : > { %5344 = vst [vmem:[%s5762_s14 + $0x638] sm:$0xf] %v3977_v14  ;;  %v4361_v14 = vld [vmem:[#allocation0 + $0xe70] sm:$0xf] }
 0x3a0   : > { %5345 = vst [vmem:[%s5762_s14 + $0x63c] sm:$0xf] %v3983_v15  ;;  %v4367_v15 = vld [vmem:[#allocation0 + $0xe78] sm:$0xf] }
 0x3a1   : > { %5346 = vst [vmem:[%s5762_s14 + $0x640] sm:$0xf] %v3989_v16  ;;  %v4373_v16 = vld [vmem:[#allocation0 + $0xe80] sm:$0xf] }
 0x3a2   : > { %5347 = vst [vmem:[%s5762_s14 + $0x644] sm:$0xf] %v3995_v17  ;;  %v4379_v17 = vld [vmem:[#allocation0 + $0xe88] sm:$0xf] }
 0x3a3   : > { %5348 = vst [vmem:[%s5762_s14 + $0x648] sm:$0xf] %v4001_v18  ;;  %v4385_v18 = vld [vmem:[#allocation0 + $0xe90] sm:$0xf] }
 0x3a4   : > { %5349 = vst [vmem:[%s5762_s14 + $0x64c] sm:$0xf] %v4007_v19  ;;  %v4391_v19 = vld [vmem:[#allocation0 + $0xe98] sm:$0xf] }
 0x3a5   : > { %5350 = vst [vmem:[%s5762_s14 + $0x650] sm:$0xf] %v4013_v20  ;;  %v4397_v20 = vld [vmem:[#allocation0 + $0xea0] sm:$0xf] }
 0x3a6   : > { %5351 = vst [vmem:[%s5762_s14 + $0x654] sm:$0xf] %v4019_v21  ;;  %v4403_v21 = vld [vmem:[#allocation0 + $0xea8] sm:$0xf] }
 0x3a7   : > { %5352 = vst [vmem:[%s5762_s14 + $0x658] sm:$0xf] %v4025_v22  ;;  %v4409_v22 = vld [vmem:[#allocation0 + $0xeb0] sm:$0xf] }
 0x3a8   : > { %5353 = vst [vmem:[%s5762_s14 + $0x65c] sm:$0xf] %v4031_v23  ;;  %v4415_v23 = vld [vmem:[#allocation0 + $0xeb8] sm:$0xf] }
 0x3a9   : > { %5354 = vst [vmem:[%s5762_s14 + $0x660] sm:$0xf] %v4037_v24  ;;  %v4421_v24 = vld [vmem:[#allocation0 + $0xec0] sm:$0xf] }
 0x3aa   : > { %5355 = vst [vmem:[%s5762_s14 + $0x664] sm:$0xf] %v4043_v25  ;;  %v4427_v25 = vld [vmem:[#allocation0 + $0xec8] sm:$0xf] }
 0x3ab   : > { %5356 = vst [vmem:[%s5762_s14 + $0x668] sm:$0xf] %v4049_v26  ;;  %v4433_v26 = vld [vmem:[#allocation0 + $0xed0] sm:$0xf] }
 0x3ac   : > { %5357 = vst [vmem:[%s5762_s14 + $0x66c] sm:$0xf] %v4055_v27  ;;  %v4439_v27 = vld [vmem:[#allocation0 + $0xed8] sm:$0xf] }
 0x3ad   : > { %5358 = vst [vmem:[%s5762_s14 + $0x670] sm:$0xf] %v4061_v28  ;;  %v4445_v28 = vld [vmem:[#allocation0 + $0xee0] sm:$0xf] }
 0x3ae   : > { %5359 = vst [vmem:[%s5762_s14 + $0x674] sm:$0xf] %v4067_v29  ;;  %v4451_v29 = vld [vmem:[#allocation0 + $0xee8] sm:$0xf] }
 0x3af   : > { %5360 = vst [vmem:[%s5762_s14 + $0x678] sm:$0xf] %v4073_v30  ;;  %v4457_v30 = vld [vmem:[#allocation0 + $0xef0] sm:$0xf] }
 0x3b0   : > { %5361 = vst [vmem:[%s5762_s14 + $0x67c] sm:$0xf] %v4079_v31  ;;  %v4463_v31 = vld [vmem:[#allocation0 + $0xef8] sm:$0xf] }
 0x3b1   : > { %5362 = vst [vmem:[%s5762_s14 + $0x680] sm:$0xf] %v4085_v32  ;;  %v4469_v32 = vld [vmem:[#allocation0 + $0xf00] sm:$0xf] }
 0x3b2   : > { %5363 = vst [vmem:[%s5762_s14 + $0x684] sm:$0xf] %v4091_v33  ;;  %v4475_v33 = vld [vmem:[#allocation0 + $0xf08] sm:$0xf] }
 0x3b3   : > { %5364 = vst [vmem:[%s5762_s14 + $0x688] sm:$0xf] %v4097_v34  ;;  %v4481_v34 = vld [vmem:[#allocation0 + $0xf10] sm:$0xf] }
 0x3b4   : > { %5365 = vst [vmem:[%s5762_s14 + $0x68c] sm:$0xf] %v4103_v35  ;;  %v4487_v35 = vld [vmem:[#allocation0 + $0xf18] sm:$0xf] }
 0x3b5   : > { %5366 = vst [vmem:[%s5762_s14 + $0x690] sm:$0xf] %v4109_v36  ;;  %v4493_v36 = vld [vmem:[#allocation0 + $0xf20] sm:$0xf] }
 0x3b6   : > { %5367 = vst [vmem:[%s5762_s14 + $0x694] sm:$0xf] %v4115_v37  ;;  %v4499_v37 = vld [vmem:[#allocation0 + $0xf28] sm:$0xf] }
 0x3b7   : > { %5368 = vst [vmem:[%s5762_s14 + $0x698] sm:$0xf] %v4121_v38  ;;  %v4505_v38 = vld [vmem:[#allocation0 + $0xf30] sm:$0xf] }
 0x3b8   : > { %5369 = vst [vmem:[%s5762_s14 + $0x69c] sm:$0xf] %v4127_v39  ;;  %v4511_v39 = vld [vmem:[#allocation0 + $0xf38] sm:$0xf] }
 0x3b9   : > { %5370 = vst [vmem:[%s5762_s14 + $0x6a0] sm:$0xf] %v4133_v40  ;;  %v4517_v40 = vld [vmem:[#allocation0 + $0xf40] sm:$0xf] }
 0x3ba   : > { %5371 = vst [vmem:[%s5762_s14 + $0x6a4] sm:$0xf] %v4139_v41  ;;  %v4523_v41 = vld [vmem:[#allocation0 + $0xf48] sm:$0xf] }
 0x3bb   : > { %5372 = vst [vmem:[%s5762_s14 + $0x6a8] sm:$0xf] %v4145_v42  ;;  %v4529_v42 = vld [vmem:[#allocation0 + $0xf50] sm:$0xf] }
 0x3bc   : > { %5373 = vst [vmem:[%s5762_s14 + $0x6ac] sm:$0xf] %v4151_v43  ;;  %v4535_v43 = vld [vmem:[#allocation0 + $0xf58] sm:$0xf] }
 0x3bd   : > { %5374 = vst [vmem:[%s5762_s14 + $0x6b0] sm:$0xf] %v4157_v44  ;;  %v4541_v44 = vld [vmem:[#allocation0 + $0xf60] sm:$0xf] }
 0x3be   : > { %5375 = vst [vmem:[%s5762_s14 + $0x6b4] sm:$0xf] %v4163_v45  ;;  %v4547_v45 = vld [vmem:[#allocation0 + $0xf68] sm:$0xf] }
 0x3bf   : > { %5376 = vst [vmem:[%s5762_s14 + $0x6b8] sm:$0xf] %v4169_v46  ;;  %v4553_v46 = vld [vmem:[#allocation0 + $0xf70] sm:$0xf] }
 0x3c0   : > { %5377 = vst [vmem:[%s5762_s14 + $0x6bc] sm:$0xf] %v4175_v47  ;;  %v4559_v47 = vld [vmem:[#allocation0 + $0xf78] sm:$0xf] }
 0x3c1   : > { %5378 = vst [vmem:[%s5762_s14 + $0x6c0] sm:$0xf] %v4181_v48  ;;  %v4565_v48 = vld [vmem:[#allocation0 + $0xf80] sm:$0xf] }
 0x3c2   : > { %5379 = vst [vmem:[%s5762_s14 + $0x6c4] sm:$0xf] %v4187_v49  ;;  %v4571_v49 = vld [vmem:[#allocation0 + $0xf88] sm:$0xf] }
 0x3c3   : > { %5380 = vst [vmem:[%s5762_s14 + $0x6c8] sm:$0xf] %v4193_v50  ;;  %v4577_v50 = vld [vmem:[#allocation0 + $0xf90] sm:$0xf] }
 0x3c4   : > { %5381 = vst [vmem:[%s5762_s14 + $0x6cc] sm:$0xf] %v4199_v51  ;;  %v4583_v51 = vld [vmem:[#allocation0 + $0xf98] sm:$0xf] }
 0x3c5   : > { %5382 = vst [vmem:[%s5762_s14 + $0x6d0] sm:$0xf] %v4205_v52  ;;  %v4589_v52 = vld [vmem:[#allocation0 + $0xfa0] sm:$0xf] }
 0x3c6   : > { %5383 = vst [vmem:[%s5762_s14 + $0x6d4] sm:$0xf] %v4211_v53  ;;  %v4595_v53 = vld [vmem:[#allocation0 + $0xfa8] sm:$0xf] }
 0x3c7   : > { %5384 = vst [vmem:[%s5762_s14 + $0x6d8] sm:$0xf] %v4217_v54  ;;  %v4601_v54 = vld [vmem:[#allocation0 + $0xfb0] sm:$0xf] }
 0x3c8   : > { %5385 = vst [vmem:[%s5762_s14 + $0x6dc] sm:$0xf] %v4223_v55  ;;  %v4607_v55 = vld [vmem:[#allocation0 + $0xfb8] sm:$0xf] }
 0x3c9   : > { %5386 = vst [vmem:[%s5762_s14 + $0x6e0] sm:$0xf] %v4229_v56  ;;  %v4613_v56 = vld [vmem:[#allocation0 + $0xfc0] sm:$0xf] }
 0x3ca   : > { %5387 = vst [vmem:[%s5762_s14 + $0x6e4] sm:$0xf] %v4235_v57  ;;  %v4619_v57 = vld [vmem:[#allocation0 + $0xfc8] sm:$0xf] }
 0x3cb   : > { %5388 = vst [vmem:[%s5762_s14 + $0x6e8] sm:$0xf] %v4241_v58  ;;  %v4625_v58 = vld [vmem:[#allocation0 + $0xfd0] sm:$0xf] }
 0x3cc   : > { %5389 = vst [vmem:[%s5762_s14 + $0x6ec] sm:$0xf] %v4247_v59  ;;  %v4631_v59 = vld [vmem:[#allocation0 + $0xfd8] sm:$0xf] }
 0x3cd   : > { %5390 = vst [vmem:[%s5762_s14 + $0x6f0] sm:$0xf] %v4253_v60  ;;  %v4637_v60 = vld [vmem:[#allocation0 + $0xfe0] sm:$0xf] }
 0x3ce   : > { %5391 = vst [vmem:[%s5762_s14 + $0x6f4] sm:$0xf] %v4259_v61  ;;  %v4643_v61 = vld [vmem:[#allocation0 + $0xfe8] sm:$0xf] }
 0x3cf   : > { %5392 = vst [vmem:[%s5762_s14 + $0x6f8] sm:$0xf] %v4265_v62  ;;  %v4649_v62 = vld [vmem:[#allocation0 + $0xff0] sm:$0xf] }
 0x3d0   : > { %5393 = vst [vmem:[%s5762_s14 + $0x6fc] sm:$0xf] %v4271_v63  ;;  %v4655_v63 = vld [vmem:[#allocation0 + $0xff8] sm:$0xf] }
 0x3d1   : > { %5394 = vst [vmem:[%s5762_s14 + $0x700] sm:$0xf] %v4277_v0 }
 0x3d2   : > { %5395 = vst [vmem:[%s5762_s14 + $0x704] sm:$0xf] %v4283_v1 }
 0x3d3   : > { %5396 = vst [vmem:[%s5762_s14 + $0x708] sm:$0xf] %v4289_v2 }
 0x3d4   : > { %5397 = vst [vmem:[%s5762_s14 + $0x70c] sm:$0xf] %v4295_v3 }
 0x3d5   : > { %5398 = vst [vmem:[%s5762_s14 + $0x710] sm:$0xf] %v4301_v4 }
 0x3d6   : > { %5399 = vst [vmem:[%s5762_s14 + $0x714] sm:$0xf] %v4307_v5 }
 0x3d7   : > { %5400 = vst [vmem:[%s5762_s14 + $0x718] sm:$0xf] %v4313_v6 }
 0x3d8   : > { %5401 = vst [vmem:[%s5762_s14 + $0x71c] sm:$0xf] %v4319_v7 }
 0x3d9   : > { %5402 = vst [vmem:[%s5762_s14 + $0x720] sm:$0xf] %v4325_v8 }
 0x3da   : > { %5403 = vst [vmem:[%s5762_s14 + $0x724] sm:$0xf] %v4331_v9 }
 0x3db   : > { %5404 = vst [vmem:[%s5762_s14 + $0x728] sm:$0xf] %v4337_v10 }
 0x3dc   : > { %5405 = vst [vmem:[%s5762_s14 + $0x72c] sm:$0xf] %v4343_v11 }
 0x3dd   : > { %5406 = vst [vmem:[%s5762_s14 + $0x730] sm:$0xf] %v4349_v12 }
 0x3de   : > { %5407 = vst [vmem:[%s5762_s14 + $0x734] sm:$0xf] %v4355_v13 }
 0x3df   : > { %5408 = vst [vmem:[%s5762_s14 + $0x738] sm:$0xf] %v4361_v14 }
 0x3e0   : > { %5409 = vst [vmem:[%s5762_s14 + $0x73c] sm:$0xf] %v4367_v15 }
 0x3e1   : > { %5410 = vst [vmem:[%s5762_s14 + $0x740] sm:$0xf] %v4373_v16 }
 0x3e2   : > { %5411 = vst [vmem:[%s5762_s14 + $0x744] sm:$0xf] %v4379_v17 }
 0x3e3   : > { %5412 = vst [vmem:[%s5762_s14 + $0x748] sm:$0xf] %v4385_v18 }
 0x3e4   : > { %5413 = vst [vmem:[%s5762_s14 + $0x74c] sm:$0xf] %v4391_v19 }
 0x3e5   : > { %5414 = vst [vmem:[%s5762_s14 + $0x750] sm:$0xf] %v4397_v20 }
 0x3e6   : > { %5415 = vst [vmem:[%s5762_s14 + $0x754] sm:$0xf] %v4403_v21 }
 0x3e7   : > { %5416 = vst [vmem:[%s5762_s14 + $0x758] sm:$0xf] %v4409_v22 }
 0x3e8   : > { %5417 = vst [vmem:[%s5762_s14 + $0x75c] sm:$0xf] %v4415_v23 }
 0x3e9   : > { %5418 = vst [vmem:[%s5762_s14 + $0x760] sm:$0xf] %v4421_v24 }
 0x3ea   : > { %5419 = vst [vmem:[%s5762_s14 + $0x764] sm:$0xf] %v4427_v25 }
 0x3eb   : > { %5420 = vst [vmem:[%s5762_s14 + $0x768] sm:$0xf] %v4433_v26 }
 0x3ec   : > { %5421 = vst [vmem:[%s5762_s14 + $0x76c] sm:$0xf] %v4439_v27 }
 0x3ed   : > { %5422 = vst [vmem:[%s5762_s14 + $0x770] sm:$0xf] %v4445_v28 }
 0x3ee   : > { %5423 = vst [vmem:[%s5762_s14 + $0x774] sm:$0xf] %v4451_v29 }
 0x3ef   : > { %5424 = vst [vmem:[%s5762_s14 + $0x778] sm:$0xf] %v4457_v30 }
 0x3f0   : > { %5425 = vst [vmem:[%s5762_s14 + $0x77c] sm:$0xf] %v4463_v31 }
 0x3f1   : > { %5426 = vst [vmem:[%s5762_s14 + $0x780] sm:$0xf] %v4469_v32 }
 0x3f2   : > { %5427 = vst [vmem:[%s5762_s14 + $0x784] sm:$0xf] %v4475_v33 }
 0x3f3   : > { %5428 = vst [vmem:[%s5762_s14 + $0x788] sm:$0xf] %v4481_v34 }
 0x3f4   : > { %5429 = vst [vmem:[%s5762_s14 + $0x78c] sm:$0xf] %v4487_v35 }
 0x3f5   : > { %5430 = vst [vmem:[%s5762_s14 + $0x790] sm:$0xf] %v4493_v36 }
 0x3f6   : > { %5431 = vst [vmem:[%s5762_s14 + $0x794] sm:$0xf] %v4499_v37 }
 0x3f7   : > { %5432 = vst [vmem:[%s5762_s14 + $0x798] sm:$0xf] %v4505_v38 }
 0x3f8   : > { %5433 = vst [vmem:[%s5762_s14 + $0x79c] sm:$0xf] %v4511_v39 }
 0x3f9   : > { %5434 = vst [vmem:[%s5762_s14 + $0x7a0] sm:$0xf] %v4517_v40 }
 0x3fa   : > { %5435 = vst [vmem:[%s5762_s14 + $0x7a4] sm:$0xf] %v4523_v41 }
 0x3fb   : > { %5436 = vst [vmem:[%s5762_s14 + $0x7a8] sm:$0xf] %v4529_v42 }
 0x3fc   : > { %5437 = vst [vmem:[%s5762_s14 + $0x7ac] sm:$0xf] %v4535_v43 }
 0x3fd   : > { %5438 = vst [vmem:[%s5762_s14 + $0x7b0] sm:$0xf] %v4541_v44 }
 0x3fe   : > { %5439 = vst [vmem:[%s5762_s14 + $0x7b4] sm:$0xf] %v4547_v45 }
 0x3ff   : > { %5440 = vst [vmem:[%s5762_s14 + $0x7b8] sm:$0xf] %v4553_v46 }
 0x400   : > { %5441 = vst [vmem:[%s5762_s14 + $0x7bc] sm:$0xf] %v4559_v47 }
 0x401   : > { %5442 = vst [vmem:[%s5762_s14 + $0x7c0] sm:$0xf] %v4565_v48 }
 0x402   : > { %5443 = vst [vmem:[%s5762_s14 + $0x7c4] sm:$0xf] %v4571_v49 }
 0x403   : > { %5444 = vst [vmem:[%s5762_s14 + $0x7c8] sm:$0xf] %v4577_v50 }
 0x404   : > { %5445 = vst [vmem:[%s5762_s14 + $0x7cc] sm:$0xf] %v4583_v51 }
 0x405   : > { %5446 = vst [vmem:[%s5762_s14 + $0x7d0] sm:$0xf] %v4589_v52 }
 0x406   : > { %5447 = vst [vmem:[%s5762_s14 + $0x7d4] sm:$0xf] %v4595_v53 }
 0x407   : > { %5448 = vst [vmem:[%s5762_s14 + $0x7d8] sm:$0xf] %v4601_v54 }
 0x408   : > { %5449 = vst [vmem:[%s5762_s14 + $0x7dc] sm:$0xf] %v4607_v55 }
 0x409   : > { %5450 = vst [vmem:[%s5762_s14 + $0x7e0] sm:$0xf] %v4613_v56 }
 0x40a   : > { %5451 = vst [vmem:[%s5762_s14 + $0x7e4] sm:$0xf] %v4619_v57 }
 0x40b   : > { %5452 = vst [vmem:[%s5762_s14 + $0x7e8] sm:$0xf] %v4625_v58 }
 0x40c   : > { %5453 = vst [vmem:[%s5762_s14 + $0x7ec] sm:$0xf] %v4631_v59 }
 0x40d   : > { %5454 = vst [vmem:[%s5762_s14 + $0x7f0] sm:$0xf] %v4637_v60 }
 0x40e   : > { %5455 = vst [vmem:[%s5762_s14 + $0x7f4] sm:$0xf] %v4643_v61 }
 0x40f   : > { %5456 = vst [vmem:[%s5762_s14 + $0x7f8] sm:$0xf] %v4649_v62 }
 0x410   : > { %5457 = vst [vmem:[%s5762_s14 + $0x7fc] sm:$0xf] %v4655_v63 }
 0x411 PF: > { %s7_s6 = sadd.s32 1, %s5474_s6  }
 0x412   : > { %p4_p4 = scmp.ge.s32.totalorder %s7_s6, 4  }
 0x414   :  { %6 = sbr.rel (!%p4_p4) target bundleno = 1 (0x1), region = 1829 }

// kernel: squeeze.4
= control target key start
LH: loop header
LB: loop body
LE: loop exit
PB: predicated region body
PF: predicated region fallthrough
CT: control target
= control target key end

     0   :  { %s7688_s0 = inlined_call_operand.vmem [shape: f32[256,1024,1], index: 0, kind: input, shape index: {}]   ;;  %s7689_s1 = inlined_call_operand.vmem [shape: f32[256,256,4], index: 1, kind: output, shape index: {}]  }
   0x1   :  { %v2_v0 = vld [vmem:[%s7688_s0] sm:$0xff]   ;;  %v4608_v1 = vld [vmem:[%s7688_s0 + $0x8] sm:$0xff]   ;;  %v4609_v2 = vld [vmem:[%s7688_s0 + $0x10] sm:$0xff]  }
   0x2   :  { %3 = vst [vmem:[#allocation0] sm:$0xf] %v2_v0   ;;  %v4610_v3 = vld [vmem:[%s7688_s0 + $0x18] sm:$0xff]   ;;  %v4611_v4 = vld [vmem:[%s7688_s0 + $0x20] sm:$0xff]   ;;  %v4612_v5 = vld [vmem:[%s7688_s0 + $0x28] sm:$0xff]  }
   0x3   :  { %5 = vst [vmem:[#allocation0 + $0xc] sm:$0xf0] %v2_v0   ;;  %v4613_v6 = vld [vmem:[%s7688_s0 + $0x30] sm:$0xff]   ;;  %v4614_v7 = vld [vmem:[%s7688_s0 + $0x38] sm:$0xff]   ;;  %v4615_v8 = vld [vmem:[%s7688_s0 + $0x40] sm:$0xff]  }
   0x4   :  { %9 = vst [vmem:[#allocation0 + $0x8] sm:$0xf] %v4608_v1   ;;  %v4616_v9 = vld [vmem:[%s7688_s0 + $0x48] sm:$0xff]   ;;  %v4617_v10 = vld [vmem:[%s7688_s0 + $0x50] sm:$0xff]   ;;  %v4618_v11 = vld [vmem:[%s7688_s0 + $0x58] sm:$0xff]  }
   0x5   :  { %11 = vst [vmem:[#allocation0 + $0x14] sm:$0xf0] %v4608_v1   ;;  %v4619_v12 = vld [vmem:[%s7688_s0 + $0x60] sm:$0xff]   ;;  %v4620_v13 = vld [vmem:[%s7688_s0 + $0x68] sm:$0xff]   ;;  %v4621_v14 = vld [vmem:[%s7688_s0 + $0x70] sm:$0xff]  }
   0x6   :  { %15 = vst [vmem:[#allocation0 + $0x20] sm:$0xf] %v4609_v2   ;;  %v4622_v15 = vld [vmem:[%s7688_s0 + $0x78] sm:$0xff]   ;;  %v4623_v16 = vld [vmem:[%s7688_s0 + $0x80] sm:$0xff]   ;;  %v4624_v17 = vld [vmem:[%s7688_s0 + $0x88] sm:$0xff]  }
   0x7   :  { %17 = vst [vmem:[#allocation0 + $0x2c] sm:$0xf0] %v4609_v2   ;;  %v4625_v18 = vld [vmem:[%s7688_s0 + $0x90] sm:$0xff]   ;;  %v4626_v19 = vld [vmem:[%s7688_s0 + $0x98] sm:$0xff]   ;;  %v4627_v20 = vld [vmem:[%s7688_s0 + $0xa0] sm:$0xff]  }
   0x8   :  { %21 = vst [vmem:[#allocation0 + $0x28] sm:$0xf] %v4610_v3   ;;  %v4628_v21 = vld [vmem:[%s7688_s0 + $0xa8] sm:$0xff]   ;;  %v4629_v22 = vld [vmem:[%s7688_s0 + $0xb0] sm:$0xff]   ;;  %v4630_v23 = vld [vmem:[%s7688_s0 + $0xb8] sm:$0xff]  }
   0x9   :  { %23 = vst [vmem:[#allocation0 + $0x34] sm:$0xf0] %v4610_v3   ;;  %v4631_v24 = vld [vmem:[%s7688_s0 + $0xc0] sm:$0xff]   ;;  %v4632_v25 = vld [vmem:[%s7688_s0 + $0xc8] sm:$0xff]   ;;  %v4633_v26 = vld [vmem:[%s7688_s0 + $0xd0] sm:$0xff]  }
   0xa   :  { %27 = vst [vmem:[#allocation0 + $0x40] sm:$0xf] %v4611_v4   ;;  %v4634_v27 = vld [vmem:[%s7688_s0 + $0xd8] sm:$0xff]   ;;  %v4635_v28 = vld [vmem:[%s7688_s0 + $0xe0] sm:$0xff]   ;;  %v4636_v29 = vld [vmem:[%s7688_s0 + $0xe8] sm:$0xff]  }
   0xb   :  { %29 = vst [vmem:[#allocation0 + $0x4c] sm:$0xf0] %v4611_v4   ;;  %v4637_v30 = vld [vmem:[%s7688_s0 + $0xf0] sm:$0xff]   ;;  %v4638_v31 = vld [vmem:[%s7688_s0 + $0xf8] sm:$0xff]   ;;  %v4639_v32 = vld [vmem:[%s7688_s0 + $0x100] sm:$0xff]  }
   0xc   :  { %33 = vst [vmem:[#allocation0 + $0x48] sm:$0xf] %v4612_v5   ;;  %v4640_v33 = vld [vmem:[%s7688_s0 + $0x108] sm:$0xff]   ;;  %v4641_v34 = vld [vmem:[%s7688_s0 + $0x110] sm:$0xff]   ;;  %v4642_v35 = vld [vmem:[%s7688_s0 + $0x118] sm:$0xff]  }
   0xd   :  { %35 = vst [vmem:[#allocation0 + $0x54] sm:$0xf0] %v4612_v5   ;;  %v4643_v36 = vld [vmem:[%s7688_s0 + $0x120] sm:$0xff]   ;;  %v4644_v37 = vld [vmem:[%s7688_s0 + $0x128] sm:$0xff]   ;;  %v4645_v38 = vld [vmem:[%s7688_s0 + $0x130] sm:$0xff]  }
   0xe   :  { %39 = vst [vmem:[#allocation0 + $0x60] sm:$0xf] %v4613_v6   ;;  %v4646_v39 = vld [vmem:[%s7688_s0 + $0x138] sm:$0xff]   ;;  %v4647_v40 = vld [vmem:[%s7688_s0 + $0x140] sm:$0xff]   ;;  %v4648_v41 = vld [vmem:[%s7688_s0 + $0x148] sm:$0xff]  }
   0xf   :  { %41 = vst [vmem:[#allocation0 + $0x6c] sm:$0xf0] %v4613_v6   ;;  %v4649_v42 = vld [vmem:[%s7688_s0 + $0x150] sm:$0xff]   ;;  %v4650_v43 = vld [vmem:[%s7688_s0 + $0x158] sm:$0xff]   ;;  %v4651_v44 = vld [vmem:[%s7688_s0 + $0x160] sm:$0xff]  }
  0x10   :  { %45 = vst [vmem:[#allocation0 + $0x68] sm:$0xf] %v4614_v7   ;;  %v4652_v45 = vld [vmem:[%s7688_s0 + $0x168] sm:$0xff]   ;;  %v4653_v46 = vld [vmem:[%s7688_s0 + $0x170] sm:$0xff]   ;;  %v4654_v47 = vld [vmem:[%s7688_s0 + $0x178] sm:$0xff]  }
  0x11   :  { %47 = vst [vmem:[#allocation0 + $0x74] sm:$0xf0] %v4614_v7   ;;  %v4655_v48 = vld [vmem:[%s7688_s0 + $0x180] sm:$0xff]   ;;  %v4656_v49 = vld [vmem:[%s7688_s0 + $0x188] sm:$0xff]   ;;  %v4657_v50 = vld [vmem:[%s7688_s0 + $0x190] sm:$0xff]  }
  0x12   :  { %51 = vst [vmem:[#allocation0 + $0x80] sm:$0xf] %v4615_v8   ;;  %v4658_v51 = vld [vmem:[%s7688_s0 + $0x198] sm:$0xff]   ;;  %v4659_v52 = vld [vmem:[%s7688_s0 + $0x1a0] sm:$0xff]   ;;  %v4660_v53 = vld [vmem:[%s7688_s0 + $0x1a8] sm:$0xff]  }
  0x13   :  { %53 = vst [vmem:[#allocation0 + $0x8c] sm:$0xf0] %v4615_v8   ;;  %v4661_v54 = vld [vmem:[%s7688_s0 + $0x1b0] sm:$0xff]   ;;  %v4662_v55 = vld [vmem:[%s7688_s0 + $0x1b8] sm:$0xff]   ;;  %v4663_v56 = vld [vmem:[%s7688_s0 + $0x1c0] sm:$0xff]  }
  0x14   :  { %57 = vst [vmem:[#allocation0 + $0x88] sm:$0xf] %v4616_v9   ;;  %v4664_v57 = vld [vmem:[%s7688_s0 + $0x1c8] sm:$0xff]   ;;  %v4665_v58 = vld [vmem:[%s7688_s0 + $0x1d0] sm:$0xff]   ;;  %v4666_v59 = vld [vmem:[%s7688_s0 + $0x1d8] sm:$0xff]  }
  0x15   :  { %59 = vst [vmem:[#allocation0 + $0x94] sm:$0xf0] %v4616_v9   ;;  %v4667_v60 = vld [vmem:[%s7688_s0 + $0x1e0] sm:$0xff]   ;;  %v4668_v61 = vld [vmem:[%s7688_s0 + $0x1e8] sm:$0xff]   ;;  %v4669_v62 = vld [vmem:[%s7688_s0 + $0x1f0] sm:$0xff]  }
  0x16   :  { %63 = vst [vmem:[#allocation0 + $0xa0] sm:$0xf] %v4617_v10   ;;  %v4670_v63 = vld [vmem:[%s7688_s0 + $0x1f8] sm:$0xff]   ;;  %v4671_v0 = vld [vmem:[%s7688_s0 + $0x200] sm:$0xff]   ;;  %v4672_v1 = vld [vmem:[%s7688_s0 + $0x208] sm:$0xff]  }
  0x17   :  { %65 = vst [vmem:[#allocation0 + $0xac] sm:$0xf0] %v4617_v10   ;;  %v4673_v2 = vld [vmem:[%s7688_s0 + $0x210] sm:$0xff]   ;;  %v4674_v3 = vld [vmem:[%s7688_s0 + $0x218] sm:$0xff]   ;;  %v4675_v4 = vld [vmem:[%s7688_s0 + $0x220] sm:$0xff]  }
  0x18   :  { %69 = vst [vmem:[#allocation0 + $0xa8] sm:$0xf] %v4618_v11   ;;  %v4676_v5 = vld [vmem:[%s7688_s0 + $0x228] sm:$0xff]   ;;  %v4677_v6 = vld [vmem:[%s7688_s0 + $0x230] sm:$0xff]   ;;  %v4678_v7 = vld [vmem:[%s7688_s0 + $0x238] sm:$0xff]  }
  0x19   :  { %71 = vst [vmem:[#allocation0 + $0xb4] sm:$0xf0] %v4618_v11   ;;  %v4679_v8 = vld [vmem:[%s7688_s0 + $0x240] sm:$0xff]   ;;  %v4680_v9 = vld [vmem:[%s7688_s0 + $0x248] sm:$0xff]   ;;  %v4681_v10 = vld [vmem:[%s7688_s0 + $0x250] sm:$0xff]  }
  0x1a   :  { %75 = vst [vmem:[#allocation0 + $0xc0] sm:$0xf] %v4619_v12   ;;  %v4682_v11 = vld [vmem:[%s7688_s0 + $0x258] sm:$0xff]  }
  0x1b   :  { %77 = vst [vmem:[#allocation0 + $0xcc] sm:$0xf0] %v4619_v12   ;;  %v4683_v12 = vld [vmem:[%s7688_s0 + $0x260] sm:$0xff]  }
  0x1c   :  { %81 = vst [vmem:[#allocation0 + $0xc8] sm:$0xf] %v4620_v13  }
  0x1d   :  { %83 = vst [vmem:[#allocation0 + $0xd4] sm:$0xf0] %v4620_v13   ;;  %v4684_v13 = vld [vmem:[%s7688_s0 + $0x268] sm:$0xff]  }
  0x1e   :  { %87 = vst [vmem:[#allocation0 + $0xe0] sm:$0xf] %v4621_v14  }
  0x1f   :  { %89 = vst [vmem:[#allocation0 + $0xec] sm:$0xf0] %v4621_v14   ;;  %v4685_v14 = vld [vmem:[%s7688_s0 + $0x270] sm:$0xff]  }
  0x20   :  { %93 = vst [vmem:[#allocation0 + $0xe8] sm:$0xf] %v4622_v15  }
  0x21   :  { %95 = vst [vmem:[#allocation0 + $0xf4] sm:$0xf0] %v4622_v15   ;;  %v4686_v15 = vld [vmem:[%s7688_s0 + $0x278] sm:$0xff]  }
  0x22   :  { %99 = vst [vmem:[#allocation0 + $0x100] sm:$0xf] %v4623_v16  }
  0x23   :  { %101 = vst [vmem:[#allocation0 + $0x10c] sm:$0xf0] %v4623_v16   ;;  %v4687_v16 = vld [vmem:[%s7688_s0 + $0x280] sm:$0xff]  }
  0x24   :  { %105 = vst [vmem:[#allocation0 + $0x108] sm:$0xf] %v4624_v17  }
  0x25   :  { %107 = vst [vmem:[#allocation0 + $0x114] sm:$0xf0] %v4624_v17   ;;  %v4688_v17 = vld [vmem:[%s7688_s0 + $0x288] sm:$0xff]  }
  0x26   :  { %111 = vst [vmem:[#allocation0 + $0x120] sm:$0xf] %v4625_v18  }
  0x27   :  { %113 = vst [vmem:[#allocation0 + $0x12c] sm:$0xf0] %v4625_v18   ;;  %v4689_v18 = vld [vmem:[%s7688_s0 + $0x290] sm:$0xff]  }
  0x28   :  { %117 = vst [vmem:[#allocation0 + $0x128] sm:$0xf] %v4626_v19  }
  0x29   :  { %119 = vst [vmem:[#allocation0 + $0x134] sm:$0xf0] %v4626_v19   ;;  %v4690_v19 = vld [vmem:[%s7688_s0 + $0x298] sm:$0xff]  }
  0x2a   :  { %123 = vst [vmem:[#allocation0 + $0x140] sm:$0xf] %v4627_v20  }
  0x2b   :  { %125 = vst [vmem:[#allocation0 + $0x14c] sm:$0xf0] %v4627_v20   ;;  %v4691_v20 = vld [vmem:[%s7688_s0 + $0x2a0] sm:$0xff]  }
  0x2c   :  { %129 = vst [vmem:[#allocation0 + $0x148] sm:$0xf] %v4628_v21  }
  0x2d   :  { %131 = vst [vmem:[#allocation0 + $0x154] sm:$0xf0] %v4628_v21   ;;  %v4692_v21 = vld [vmem:[%s7688_s0 + $0x2a8] sm:$0xff]  }
  0x2e   :  { %135 = vst [vmem:[#allocation0 + $0x160] sm:$0xf] %v4629_v22  }
  0x2f   :  { %137 = vst [vmem:[#allocation0 + $0x16c] sm:$0xf0] %v4629_v22   ;;  %v4693_v22 = vld [vmem:[%s7688_s0 + $0x2b0] sm:$0xff]  }
  0x30   :  { %141 = vst [vmem:[#allocation0 + $0x168] sm:$0xf] %v4630_v23  }
  0x31   :  { %143 = vst [vmem:[#allocation0 + $0x174] sm:$0xf0] %v4630_v23   ;;  %v4694_v23 = vld [vmem:[%s7688_s0 + $0x2b8] sm:$0xff]  }
  0x32   :  { %147 = vst [vmem:[#allocation0 + $0x180] sm:$0xf] %v4631_v24  }
  0x33   :  { %149 = vst [vmem:[#allocation0 + $0x18c] sm:$0xf0] %v4631_v24   ;;  %v4695_v24 = vld [vmem:[%s7688_s0 + $0x2c0] sm:$0xff]  }
  0x34   :  { %153 = vst [vmem:[#allocation0 + $0x188] sm:$0xf] %v4632_v25  }
  0x35   :  { %155 = vst [vmem:[#allocation0 + $0x194] sm:$0xf0] %v4632_v25   ;;  %v4696_v25 = vld [vmem:[%s7688_s0 + $0x2c8] sm:$0xff]  }
  0x36   :  { %159 = vst [vmem:[#allocation0 + $0x1a0] sm:$0xf] %v4633_v26  }
  0x37   :  { %161 = vst [vmem:[#allocation0 + $0x1ac] sm:$0xf0] %v4633_v26   ;;  %v4697_v26 = vld [vmem:[%s7688_s0 + $0x2d0] sm:$0xff]  }
  0x38   :  { %165 = vst [vmem:[#allocation0 + $0x1a8] sm:$0xf] %v4634_v27  }
  0x39   :  { %167 = vst [vmem:[#allocation0 + $0x1b4] sm:$0xf0] %v4634_v27   ;;  %v4698_v27 = vld [vmem:[%s7688_s0 + $0x2d8] sm:$0xff]  }
  0x3a   :  { %171 = vst [vmem:[#allocation0 + $0x1c0] sm:$0xf] %v4635_v28  }
  0x3b   :  { %173 = vst [vmem:[#allocation0 + $0x1cc] sm:$0xf0] %v4635_v28   ;;  %v4699_v28 = vld [vmem:[%s7688_s0 + $0x2e0] sm:$0xff]  }
  0x3c   :  { %177 = vst [vmem:[#allocation0 + $0x1c8] sm:$0xf] %v4636_v29  }
  0x3d   :  { %179 = vst [vmem:[#allocation0 + $0x1d4] sm:$0xf0] %v4636_v29   ;;  %v4700_v29 = vld [vmem:[%s7688_s0 + $0x2e8] sm:$0xff]  }
  0x3e   :  { %183 = vst [vmem:[#allocation0 + $0x1e0] sm:$0xf] %v4637_v30  }
  0x3f   :  { %185 = vst [vmem:[#allocation0 + $0x1ec] sm:$0xf0] %v4637_v30   ;;  %v4701_v30 = vld [vmem:[%s7688_s0 + $0x2f0] sm:$0xff]  }
  0x40   :  { %189 = vst [vmem:[#allocation0 + $0x1e8] sm:$0xf] %v4638_v31  }
  0x41   :  { %191 = vst [vmem:[#allocation0 + $0x1f4] sm:$0xf0] %v4638_v31   ;;  %v4702_v31 = vld [vmem:[%s7688_s0 + $0x2f8] sm:$0xff]  }
  0x42   :  { %195 = vst [vmem:[#allocation0 + $0x200] sm:$0xf] %v4639_v32  }
  0x43   :  { %197 = vst [vmem:[#allocation0 + $0x20c] sm:$0xf0] %v4639_v32   ;;  %v4703_v32 = vld [vmem:[%s7688_s0 + $0x300] sm:$0xff]  }
  0x44   :  { %201 = vst [vmem:[#allocation0 + $0x208] sm:$0xf] %v4640_v33  }
  0x45   :  { %203 = vst [vmem:[#allocation0 + $0x214] sm:$0xf0] %v4640_v33   ;;  %v4704_v33 = vld [vmem:[%s7688_s0 + $0x308] sm:$0xff]  }
  0x46   :  { %207 = vst [vmem:[#allocation0 + $0x220] sm:$0xf] %v4641_v34  }
  0x47   :  { %209 = vst [vmem:[#allocation0 + $0x22c] sm:$0xf0] %v4641_v34   ;;  %v4705_v34 = vld [vmem:[%s7688_s0 + $0x310] sm:$0xff]  }
  0x48   :  { %213 = vst [vmem:[#allocation0 + $0x228] sm:$0xf] %v4642_v35  }
  0x49   :  { %215 = vst [vmem:[#allocation0 + $0x234] sm:$0xf0] %v4642_v35   ;;  %v4706_v35 = vld [vmem:[%s7688_s0 + $0x318] sm:$0xff]  }
  0x4a   :  { %219 = vst [vmem:[#allocation0 + $0x240] sm:$0xf] %v4643_v36  }
  0x4b   :  { %221 = vst [vmem:[#allocation0 + $0x24c] sm:$0xf0] %v4643_v36   ;;  %v4707_v36 = vld [vmem:[%s7688_s0 + $0x320] sm:$0xff]  }
  0x4c   :  { %225 = vst [vmem:[#allocation0 + $0x248] sm:$0xf] %v4644_v37  }
  0x4d   :  { %227 = vst [vmem:[#allocation0 + $0x254] sm:$0xf0] %v4644_v37   ;;  %v4708_v37 = vld [vmem:[%s7688_s0 + $0x328] sm:$0xff]  }
  0x4e   :  { %231 = vst [vmem:[#allocation0 + $0x260] sm:$0xf] %v4645_v38  }
  0x4f   :  { %233 = vst [vmem:[#allocation0 + $0x26c] sm:$0xf0] %v4645_v38   ;;  %v4709_v38 = vld [vmem:[%s7688_s0 + $0x330] sm:$0xff]  }
  0x50   :  { %237 = vst [vmem:[#allocation0 + $0x268] sm:$0xf] %v4646_v39  }
  0x51   :  { %239 = vst [vmem:[#allocation0 + $0x274] sm:$0xf0] %v4646_v39   ;;  %v4710_v39 = vld [vmem:[%s7688_s0 + $0x338] sm:$0xff]  }
  0x52   :  { %243 = vst [vmem:[#allocation0 + $0x280] sm:$0xf] %v4647_v40  }
  0x53   :  { %245 = vst [vmem:[#allocation0 + $0x28c] sm:$0xf0] %v4647_v40   ;;  %v4711_v40 = vld [vmem:[%s7688_s0 + $0x340] sm:$0xff]  }
  0x54   :  { %249 = vst [vmem:[#allocation0 + $0x288] sm:$0xf] %v4648_v41  }
  0x55   :  { %251 = vst [vmem:[#allocation0 + $0x294] sm:$0xf0] %v4648_v41   ;;  %v4712_v41 = vld [vmem:[%s7688_s0 + $0x348] sm:$0xff]  }
  0x56   :  { %255 = vst [vmem:[#allocation0 + $0x2a0] sm:$0xf] %v4649_v42  }
  0x57   :  { %257 = vst [vmem:[#allocation0 + $0x2ac] sm:$0xf0] %v4649_v42   ;;  %v4713_v42 = vld [vmem:[%s7688_s0 + $0x350] sm:$0xff]  }
  0x58   :  { %261 = vst [vmem:[#allocation0 + $0x2a8] sm:$0xf] %v4650_v43  }
  0x59   :  { %263 = vst [vmem:[#allocation0 + $0x2b4] sm:$0xf0] %v4650_v43   ;;  %v4714_v43 = vld [vmem:[%s7688_s0 + $0x358] sm:$0xff]  }
  0x5a   :  { %267 = vst [vmem:[#allocation0 + $0x2c0] sm:$0xf] %v4651_v44  }
  0x5b   :  { %269 = vst [vmem:[#allocation0 + $0x2cc] sm:$0xf0] %v4651_v44   ;;  %v4715_v44 = vld [vmem:[%s7688_s0 + $0x360] sm:$0xff]  }
  0x5c   :  { %273 = vst [vmem:[#allocation0 + $0x2c8] sm:$0xf] %v4652_v45  }
  0x5d   :  { %275 = vst [vmem:[#allocation0 + $0x2d4] sm:$0xf0] %v4652_v45   ;;  %v4716_v45 = vld [vmem:[%s7688_s0 + $0x368] sm:$0xff]  }
  0x5e   :  { %279 = vst [vmem:[#allocation0 + $0x2e0] sm:$0xf] %v4653_v46  }
  0x5f   :  { %281 = vst [vmem:[#allocation0 + $0x2ec] sm:$0xf0] %v4653_v46   ;;  %v4717_v46 = vld [vmem:[%s7688_s0 + $0x370] sm:$0xff]  }
  0x60   :  { %285 = vst [vmem:[#allocation0 + $0x2e8] sm:$0xf] %v4654_v47  }
  0x61   :  { %287 = vst [vmem:[#allocation0 + $0x2f4] sm:$0xf0] %v4654_v47   ;;  %v4718_v47 = vld [vmem:[%s7688_s0 + $0x378] sm:$0xff]  }
  0x62   :  { %291 = vst [vmem:[#allocation0 + $0x300] sm:$0xf] %v4655_v48  }
  0x63   :  { %293 = vst [vmem:[#allocation0 + $0x30c] sm:$0xf0] %v4655_v48   ;;  %v4719_v48 = vld [vmem:[%s7688_s0 + $0x380] sm:$0xff]  }
  0x64   :  { %297 = vst [vmem:[#allocation0 + $0x308] sm:$0xf] %v4656_v49  }
  0x65   :  { %299 = vst [vmem:[#allocation0 + $0x314] sm:$0xf0] %v4656_v49   ;;  %v4720_v49 = vld [vmem:[%s7688_s0 + $0x388] sm:$0xff]  }
  0x66   :  { %303 = vst [vmem:[#allocation0 + $0x320] sm:$0xf] %v4657_v50  }
  0x67   :  { %305 = vst [vmem:[#allocation0 + $0x32c] sm:$0xf0] %v4657_v50   ;;  %v4721_v50 = vld [vmem:[%s7688_s0 + $0x390] sm:$0xff]  }
  0x68   :  { %309 = vst [vmem:[#allocation0 + $0x328] sm:$0xf] %v4658_v51  }
  0x69   :  { %311 = vst [vmem:[#allocation0 + $0x334] sm:$0xf0] %v4658_v51   ;;  %v4722_v51 = vld [vmem:[%s7688_s0 + $0x398] sm:$0xff]  }
  0x6a   :  { %315 = vst [vmem:[#allocation0 + $0x340] sm:$0xf] %v4659_v52  }
  0x6b   :  { %317 = vst [vmem:[#allocation0 + $0x34c] sm:$0xf0] %v4659_v52   ;;  %v4723_v52 = vld [vmem:[%s7688_s0 + $0x3a0] sm:$0xff]  }
  0x6c   :  { %321 = vst [vmem:[#allocation0 + $0x348] sm:$0xf] %v4660_v53  }
  0x6d   :  { %323 = vst [vmem:[#allocation0 + $0x354] sm:$0xf0] %v4660_v53   ;;  %v4724_v53 = vld [vmem:[%s7688_s0 + $0x3a8] sm:$0xff]  }
  0x6e   :  { %327 = vst [vmem:[#allocation0 + $0x360] sm:$0xf] %v4661_v54  }
  0x6f   :  { %329 = vst [vmem:[#allocation0 + $0x36c] sm:$0xf0] %v4661_v54   ;;  %v4725_v54 = vld [vmem:[%s7688_s0 + $0x3b0] sm:$0xff]  }
  0x70   :  { %333 = vst [vmem:[#allocation0 + $0x368] sm:$0xf] %v4662_v55  }
  0x71   :  { %335 = vst [vmem:[#allocation0 + $0x374] sm:$0xf0] %v4662_v55   ;;  %v4726_v55 = vld [vmem:[%s7688_s0 + $0x3b8] sm:$0xff]  }
  0x72   :  { %339 = vst [vmem:[#allocation0 + $0x380] sm:$0xf] %v4663_v56  }
  0x73   :  { %341 = vst [vmem:[#allocation0 + $0x38c] sm:$0xf0] %v4663_v56   ;;  %v4727_v56 = vld [vmem:[%s7688_s0 + $0x3c0] sm:$0xff]  }
  0x74   :  { %345 = vst [vmem:[#allocation0 + $0x388] sm:$0xf] %v4664_v57  }
  0x75   :  { %347 = vst [vmem:[#allocation0 + $0x394] sm:$0xf0] %v4664_v57   ;;  %v4728_v57 = vld [vmem:[%s7688_s0 + $0x3c8] sm:$0xff]  }
  0x76   :  { %351 = vst [vmem:[#allocation0 + $0x3a0] sm:$0xf] %v4665_v58  }
  0x77   :  { %353 = vst [vmem:[#allocation0 + $0x3ac] sm:$0xf0] %v4665_v58   ;;  %v4729_v58 = vld [vmem:[%s7688_s0 + $0x3d0] sm:$0xff]  }
  0x78   :  { %357 = vst [vmem:[#allocation0 + $0x3a8] sm:$0xf] %v4666_v59  }
  0x79   :  { %359 = vst [vmem:[#allocation0 + $0x3b4] sm:$0xf0] %v4666_v59   ;;  %v4730_v59 = vld [vmem:[%s7688_s0 + $0x3d8] sm:$0xff]  }
  0x7a   :  { %363 = vst [vmem:[#allocation0 + $0x3c0] sm:$0xf] %v4667_v60  }
  0x7b   :  { %365 = vst [vmem:[#allocation0 + $0x3cc] sm:$0xf0] %v4667_v60   ;;  %v4731_v60 = vld [vmem:[%s7688_s0 + $0x3e0] sm:$0xff]  }
  0x7c   :  { %369 = vst [vmem:[#allocation0 + $0x3c8] sm:$0xf] %v4668_v61  }
  0x7d   :  { %371 = vst [vmem:[#allocation0 + $0x3d4] sm:$0xf0] %v4668_v61   ;;  %v4732_v61 = vld [vmem:[%s7688_s0 + $0x3e8] sm:$0xff]  }
  0x7e   :  { %375 = vst [vmem:[#allocation0 + $0x3e0] sm:$0xf] %v4669_v62  }
  0x7f   :  { %377 = vst [vmem:[#allocation0 + $0x3ec] sm:$0xf0] %v4669_v62   ;;  %v4733_v62 = vld [vmem:[%s7688_s0 + $0x3f0] sm:$0xff]  }
  0x80   :  { %381 = vst [vmem:[#allocation0 + $0x3e8] sm:$0xf] %v4670_v63  }
  0x81   :  { %383 = vst [vmem:[#allocation0 + $0x3f4] sm:$0xf0] %v4670_v63   ;;  %v4734_v63 = vld [vmem:[%s7688_s0 + $0x3f8] sm:$0xff]  }
  0x82   :  { %387 = vst [vmem:[#allocation0 + $0x400] sm:$0xf] %v4671_v0  }
  0x83   :  { %389 = vst [vmem:[#allocation0 + $0x40c] sm:$0xf0] %v4671_v0   ;;  %v4735_v0 = vld [vmem:[%s7688_s0 + $0x400] sm:$0xff]  }
  0x84   :  { %393 = vst [vmem:[#allocation0 + $0x408] sm:$0xf] %v4672_v1  }
  0x85   :  { %395 = vst [vmem:[#allocation0 + $0x414] sm:$0xf0] %v4672_v1   ;;  %v4736_v1 = vld [vmem:[%s7688_s0 + $0x408] sm:$0xff]  }
  0x86   :  { %399 = vst [vmem:[#allocation0 + $0x420] sm:$0xf] %v4673_v2  }
  0x87   :  { %401 = vst [vmem:[#allocation0 + $0x42c] sm:$0xf0] %v4673_v2   ;;  %v4737_v2 = vld [vmem:[%s7688_s0 + $0x410] sm:$0xff]  }
  0x88   :  { %405 = vst [vmem:[#allocation0 + $0x428] sm:$0xf] %v4674_v3  }
  0x89   :  { %407 = vst [vmem:[#allocation0 + $0x434] sm:$0xf0] %v4674_v3   ;;  %v4738_v3 = vld [vmem:[%s7688_s0 + $0x418] sm:$0xff]  }
  0x8a   :  { %411 = vst [vmem:[#allocation0 + $0x440] sm:$0xf] %v4675_v4  }
  0x8b   :  { %413 = vst [vmem:[#allocation0 + $0x44c] sm:$0xf0] %v4675_v4   ;;  %v4739_v4 = vld [vmem:[%s7688_s0 + $0x420] sm:$0xff]  }
  0x8c   :  { %417 = vst [vmem:[#allocation0 + $0x448] sm:$0xf] %v4676_v5  }
  0x8d   :  { %419 = vst [vmem:[#allocation0 + $0x454] sm:$0xf0] %v4676_v5   ;;  %v4740_v5 = vld [vmem:[%s7688_s0 + $0x428] sm:$0xff]  }
  0x8e   :  { %423 = vst [vmem:[#allocation0 + $0x460] sm:$0xf] %v4677_v6  }
  0x8f   :  { %425 = vst [vmem:[#allocation0 + $0x46c] sm:$0xf0] %v4677_v6   ;;  %v4741_v6 = vld [vmem:[%s7688_s0 + $0x430] sm:$0xff]  }
  0x90   :  { %429 = vst [vmem:[#allocation0 + $0x468] sm:$0xf] %v4678_v7  }
  0x91   :  { %431 = vst [vmem:[#allocation0 + $0x474] sm:$0xf0] %v4678_v7   ;;  %v4742_v7 = vld [vmem:[%s7688_s0 + $0x438] sm:$0xff]  }
  0x92   :  { %435 = vst [vmem:[#allocation0 + $0x480] sm:$0xf] %v4679_v8  }
  0x93   :  { %437 = vst [vmem:[#allocation0 + $0x48c] sm:$0xf0] %v4679_v8   ;;  %v4743_v8 = vld [vmem:[%s7688_s0 + $0x440] sm:$0xff]  }
  0x94   :  { %441 = vst [vmem:[#allocation0 + $0x488] sm:$0xf] %v4680_v9  }
  0x95   :  { %443 = vst [vmem:[#allocation0 + $0x494] sm:$0xf0] %v4680_v9   ;;  %v4744_v9 = vld [vmem:[%s7688_s0 + $0x448] sm:$0xff]  }
  0x96   :  { %447 = vst [vmem:[#allocation0 + $0x4a0] sm:$0xf] %v4681_v10  }
  0x97   :  { %449 = vst [vmem:[#allocation0 + $0x4ac] sm:$0xf0] %v4681_v10   ;;  %v4745_v10 = vld [vmem:[%s7688_s0 + $0x450] sm:$0xff]  }
  0x98   :  { %453 = vst [vmem:[#allocation0 + $0x4a8] sm:$0xf] %v4682_v11  }
  0x99   :  { %455 = vst [vmem:[#allocation0 + $0x4b4] sm:$0xf0] %v4682_v11   ;;  %v4746_v11 = vld [vmem:[%s7688_s0 + $0x458] sm:$0xff]  }
  0x9a   :  { %459 = vst [vmem:[#allocation0 + $0x4c0] sm:$0xf] %v4683_v12  }
  0x9b   :  { %461 = vst [vmem:[#allocation0 + $0x4cc] sm:$0xf0] %v4683_v12   ;;  %v4747_v12 = vld [vmem:[%s7688_s0 + $0x460] sm:$0xff]  }
  0x9c   :  { %465 = vst [vmem:[#allocation0 + $0x4c8] sm:$0xf] %v4684_v13  }
  0x9d   :  { %467 = vst [vmem:[#allocation0 + $0x4d4] sm:$0xf0] %v4684_v13   ;;  %v4748_v13 = vld [vmem:[%s7688_s0 + $0x468] sm:$0xff]  }
  0x9e   :  { %471 = vst [vmem:[#allocation0 + $0x4e0] sm:$0xf] %v4685_v14  }
  0x9f   :  { %473 = vst [vmem:[#allocation0 + $0x4ec] sm:$0xf0] %v4685_v14   ;;  %v4749_v14 = vld [vmem:[%s7688_s0 + $0x470] sm:$0xff]  }
  0xa0   :  { %477 = vst [vmem:[#allocation0 + $0x4e8] sm:$0xf] %v4686_v15  }
  0xa1   :  { %479 = vst [vmem:[#allocation0 + $0x4f4] sm:$0xf0] %v4686_v15   ;;  %v4750_v15 = vld [vmem:[%s7688_s0 + $0x478] sm:$0xff]  }
  0xa2   :  { %483 = vst [vmem:[#allocation0 + $0x500] sm:$0xf] %v4687_v16  }
  0xa3   :  { %485 = vst [vmem:[#allocation0 + $0x50c] sm:$0xf0] %v4687_v16   ;;  %v4751_v16 = vld [vmem:[%s7688_s0 + $0x480] sm:$0xff]  }
  0xa4   :  { %489 = vst [vmem:[#allocation0 + $0x508] sm:$0xf] %v4688_v17  }
  0xa5   :  { %491 = vst [vmem:[#allocation0 + $0x514] sm:$0xf0] %v4688_v17   ;;  %v4752_v17 = vld [vmem:[%s7688_s0 + $0x488] sm:$0xff]  }
  0xa6   :  { %495 = vst [vmem:[#allocation0 + $0x520] sm:$0xf] %v4689_v18  }
  0xa7   :  { %497 = vst [vmem:[#allocation0 + $0x52c] sm:$0xf0] %v4689_v18   ;;  %v4753_v18 = vld [vmem:[%s7688_s0 + $0x490] sm:$0xff]  }
  0xa8   :  { %501 = vst [vmem:[#allocation0 + $0x528] sm:$0xf] %v4690_v19  }
  0xa9   :  { %503 = vst [vmem:[#allocation0 + $0x534] sm:$0xf0] %v4690_v19   ;;  %v4754_v19 = vld [vmem:[%s7688_s0 + $0x498] sm:$0xff]  }
  0xaa   :  { %507 = vst [vmem:[#allocation0 + $0x540] sm:$0xf] %v4691_v20  }
  0xab   :  { %509 = vst [vmem:[#allocation0 + $0x54c] sm:$0xf0] %v4691_v20   ;;  %v4755_v20 = vld [vmem:[%s7688_s0 + $0x4a0] sm:$0xff]  }
  0xac   :  { %513 = vst [vmem:[#allocation0 + $0x548] sm:$0xf] %v4692_v21  }
  0xad   :  { %515 = vst [vmem:[#allocation0 + $0x554] sm:$0xf0] %v4692_v21   ;;  %v4756_v21 = vld [vmem:[%s7688_s0 + $0x4a8] sm:$0xff]  }
  0xae   :  { %519 = vst [vmem:[#allocation0 + $0x560] sm:$0xf] %v4693_v22  }
  0xaf   :  { %521 = vst [vmem:[#allocation0 + $0x56c] sm:$0xf0] %v4693_v22   ;;  %v4757_v22 = vld [vmem:[%s7688_s0 + $0x4b0] sm:$0xff]  }
  0xb0   :  { %525 = vst [vmem:[#allocation0 + $0x568] sm:$0xf] %v4694_v23  }
  0xb1   :  { %527 = vst [vmem:[#allocation0 + $0x574] sm:$0xf0] %v4694_v23   ;;  %v4758_v23 = vld [vmem:[%s7688_s0 + $0x4b8] sm:$0xff]  }
  0xb2   :  { %531 = vst [vmem:[#allocation0 + $0x580] sm:$0xf] %v4695_v24  }
  0xb3   :  { %533 = vst [vmem:[#allocation0 + $0x58c] sm:$0xf0] %v4695_v24   ;;  %v4759_v24 = vld [vmem:[%s7688_s0 + $0x4c0] sm:$0xff]  }
  0xb4   :  { %537 = vst [vmem:[#allocation0 + $0x588] sm:$0xf] %v4696_v25  }
  0xb5   :  { %539 = vst [vmem:[#allocation0 + $0x594] sm:$0xf0] %v4696_v25   ;;  %v4760_v25 = vld [vmem:[%s7688_s0 + $0x4c8] sm:$0xff]  }
  0xb6   :  { %543 = vst [vmem:[#allocation0 + $0x5a0] sm:$0xf] %v4697_v26  }
  0xb7   :  { %545 = vst [vmem:[#allocation0 + $0x5ac] sm:$0xf0] %v4697_v26   ;;  %v4761_v26 = vld [vmem:[%s7688_s0 + $0x4d0] sm:$0xff]  }
  0xb8   :  { %549 = vst [vmem:[#allocation0 + $0x5a8] sm:$0xf] %v4698_v27  }
  0xb9   :  { %551 = vst [vmem:[#allocation0 + $0x5b4] sm:$0xf0] %v4698_v27   ;;  %v4762_v27 = vld [vmem:[%s7688_s0 + $0x4d8] sm:$0xff]  }
  0xba   :  { %555 = vst [vmem:[#allocation0 + $0x5c0] sm:$0xf] %v4699_v28  }
  0xbb   :  { %557 = vst [vmem:[#allocation0 + $0x5cc] sm:$0xf0] %v4699_v28   ;;  %v4763_v28 = vld [vmem:[%s7688_s0 + $0x4e0] sm:$0xff]  }
  0xbc   :  { %561 = vst [vmem:[#allocation0 + $0x5c8] sm:$0xf] %v4700_v29  }
  0xbd   :  { %563 = vst [vmem:[#allocation0 + $0x5d4] sm:$0xf0] %v4700_v29   ;;  %v4764_v29 = vld [vmem:[%s7688_s0 + $0x4e8] sm:$0xff]  }
  0xbe   :  { %567 = vst [vmem:[#allocation0 + $0x5e0] sm:$0xf] %v4701_v30  }
  0xbf   :  { %569 = vst [vmem:[#allocation0 + $0x5ec] sm:$0xf0] %v4701_v30   ;;  %v4765_v30 = vld [vmem:[%s7688_s0 + $0x4f0] sm:$0xff]  }
  0xc0   :  { %573 = vst [vmem:[#allocation0 + $0x5e8] sm:$0xf] %v4702_v31  }
  0xc1   :  { %575 = vst [vmem:[#allocation0 + $0x5f4] sm:$0xf0] %v4702_v31   ;;  %v4766_v31 = vld [vmem:[%s7688_s0 + $0x4f8] sm:$0xff]  }
  0xc2   :  { %579 = vst [vmem:[#allocation0 + $0x600] sm:$0xf] %v4703_v32  }
  0xc3   :  { %581 = vst [vmem:[#allocation0 + $0x60c] sm:$0xf0] %v4703_v32   ;;  %v4767_v32 = vld [vmem:[%s7688_s0 + $0x500] sm:$0xff]  }
  0xc4   :  { %585 = vst [vmem:[#allocation0 + $0x608] sm:$0xf] %v4704_v33  }
  0xc5   :  { %587 = vst [vmem:[#allocation0 + $0x614] sm:$0xf0] %v4704_v33   ;;  %v4768_v33 = vld [vmem:[%s7688_s0 + $0x508] sm:$0xff]  }
  0xc6   :  { %591 = vst [vmem:[#allocation0 + $0x620] sm:$0xf] %v4705_v34  }
  0xc7   :  { %593 = vst [vmem:[#allocation0 + $0x62c] sm:$0xf0] %v4705_v34   ;;  %v4769_v34 = vld [vmem:[%s7688_s0 + $0x510] sm:$0xff]  }
  0xc8   :  { %597 = vst [vmem:[#allocation0 + $0x628] sm:$0xf] %v4706_v35  }
  0xc9   :  { %599 = vst [vmem:[#allocation0 + $0x634] sm:$0xf0] %v4706_v35   ;;  %v4770_v35 = vld [vmem:[%s7688_s0 + $0x518] sm:$0xff]  }
  0xca   :  { %603 = vst [vmem:[#allocation0 + $0x640] sm:$0xf] %v4707_v36  }
  0xcb   :  { %605 = vst [vmem:[#allocation0 + $0x64c] sm:$0xf0] %v4707_v36   ;;  %v4771_v36 = vld [vmem:[%s7688_s0 + $0x520] sm:$0xff]  }
  0xcc   :  { %609 = vst [vmem:[#allocation0 + $0x648] sm:$0xf] %v4708_v37  }
  0xcd   :  { %611 = vst [vmem:[#allocation0 + $0x654] sm:$0xf0] %v4708_v37   ;;  %v4772_v37 = vld [vmem:[%s7688_s0 + $0x528] sm:$0xff]  }
  0xce   :  { %615 = vst [vmem:[#allocation0 + $0x660] sm:$0xf] %v4709_v38  }
  0xcf   :  { %617 = vst [vmem:[#allocation0 + $0x66c] sm:$0xf0] %v4709_v38   ;;  %v4773_v38 = vld [vmem:[%s7688_s0 + $0x530] sm:$0xff]  }
  0xd0   :  { %621 = vst [vmem:[#allocation0 + $0x668] sm:$0xf] %v4710_v39  }
  0xd1   :  { %623 = vst [vmem:[#allocation0 + $0x674] sm:$0xf0] %v4710_v39   ;;  %v4774_v39 = vld [vmem:[%s7688_s0 + $0x538] sm:$0xff]  }
  0xd2   :  { %627 = vst [vmem:[#allocation0 + $0x680] sm:$0xf] %v4711_v40  }
  0xd3   :  { %629 = vst [vmem:[#allocation0 + $0x68c] sm:$0xf0] %v4711_v40   ;;  %v4775_v40 = vld [vmem:[%s7688_s0 + $0x540] sm:$0xff]  }
  0xd4   :  { %633 = vst [vmem:[#allocation0 + $0x688] sm:$0xf] %v4712_v41  }
  0xd5   :  { %635 = vst [vmem:[#allocation0 + $0x694] sm:$0xf0] %v4712_v41   ;;  %v4776_v41 = vld [vmem:[%s7688_s0 + $0x548] sm:$0xff]  }
  0xd6   :  { %639 = vst [vmem:[#allocation0 + $0x6a0] sm:$0xf] %v4713_v42  }
  0xd7   :  { %641 = vst [vmem:[#allocation0 + $0x6ac] sm:$0xf0] %v4713_v42   ;;  %v4777_v42 = vld [vmem:[%s7688_s0 + $0x550] sm:$0xff]  }
  0xd8   :  { %645 = vst [vmem:[#allocation0 + $0x6a8] sm:$0xf] %v4714_v43  }
  0xd9   :  { %647 = vst [vmem:[#allocation0 + $0x6b4] sm:$0xf0] %v4714_v43   ;;  %v4778_v43 = vld [vmem:[%s7688_s0 + $0x558] sm:$0xff]  }
  0xda   :  { %651 = vst [vmem:[#allocation0 + $0x6c0] sm:$0xf] %v4715_v44  }
  0xdb   :  { %653 = vst [vmem:[#allocation0 + $0x6cc] sm:$0xf0] %v4715_v44   ;;  %v4779_v44 = vld [vmem:[%s7688_s0 + $0x560] sm:$0xff]  }
  0xdc   :  { %657 = vst [vmem:[#allocation0 + $0x6c8] sm:$0xf] %v4716_v45  }
  0xdd   :  { %659 = vst [vmem:[#allocation0 + $0x6d4] sm:$0xf0] %v4716_v45   ;;  %v4780_v45 = vld [vmem:[%s7688_s0 + $0x568] sm:$0xff]  }
  0xde   :  { %663 = vst [vmem:[#allocation0 + $0x6e0] sm:$0xf] %v4717_v46  }
  0xdf   :  { %665 = vst [vmem:[#allocation0 + $0x6ec] sm:$0xf0] %v4717_v46   ;;  %v4781_v46 = vld [vmem:[%s7688_s0 + $0x570] sm:$0xff]  }
  0xe0   :  { %669 = vst [vmem:[#allocation0 + $0x6e8] sm:$0xf] %v4718_v47  }
  0xe1   :  { %671 = vst [vmem:[#allocation0 + $0x6f4] sm:$0xf0] %v4718_v47   ;;  %v4782_v47 = vld [vmem:[%s7688_s0 + $0x578] sm:$0xff]  }
  0xe2   :  { %675 = vst [vmem:[#allocation0 + $0x700] sm:$0xf] %v4719_v48  }
  0xe3   :  { %677 = vst [vmem:[#allocation0 + $0x70c] sm:$0xf0] %v4719_v48   ;;  %v4783_v48 = vld [vmem:[%s7688_s0 + $0x580] sm:$0xff]  }
  0xe4   :  { %681 = vst [vmem:[#allocation0 + $0x708] sm:$0xf] %v4720_v49  }
  0xe5   :  { %683 = vst [vmem:[#allocation0 + $0x714] sm:$0xf0] %v4720_v49   ;;  %v4784_v49 = vld [vmem:[%s7688_s0 + $0x588] sm:$0xff]  }
  0xe6   :  { %687 = vst [vmem:[#allocation0 + $0x720] sm:$0xf] %v4721_v50  }
  0xe7   :  { %689 = vst [vmem:[#allocation0 + $0x72c] sm:$0xf0] %v4721_v50   ;;  %v4785_v50 = vld [vmem:[%s7688_s0 + $0x590] sm:$0xff]  }
  0xe8   :  { %693 = vst [vmem:[#allocation0 + $0x728] sm:$0xf] %v4722_v51  }
  0xe9   :  { %695 = vst [vmem:[#allocation0 + $0x734] sm:$0xf0] %v4722_v51   ;;  %v4786_v51 = vld [vmem:[%s7688_s0 + $0x598] sm:$0xff]  }
  0xea   :  { %699 = vst [vmem:[#allocation0 + $0x740] sm:$0xf] %v4723_v52  }
  0xeb   :  { %701 = vst [vmem:[#allocation0 + $0x74c] sm:$0xf0] %v4723_v52   ;;  %v4787_v52 = vld [vmem:[%s7688_s0 + $0x5a0] sm:$0xff]  }
  0xec   :  { %705 = vst [vmem:[#allocation0 + $0x748] sm:$0xf] %v4724_v53  }
  0xed   :  { %707 = vst [vmem:[#allocation0 + $0x754] sm:$0xf0] %v4724_v53   ;;  %v4788_v53 = vld [vmem:[%s7688_s0 + $0x5a8] sm:$0xff]  }
  0xee   :  { %711 = vst [vmem:[#allocation0 + $0x760] sm:$0xf] %v4725_v54  }
  0xef   :  { %713 = vst [vmem:[#allocation0 + $0x76c] sm:$0xf0] %v4725_v54   ;;  %v4789_v54 = vld [vmem:[%s7688_s0 + $0x5b0] sm:$0xff]  }
  0xf0   :  { %717 = vst [vmem:[#allocation0 + $0x768] sm:$0xf] %v4726_v55  }
  0xf1   :  { %719 = vst [vmem:[#allocation0 + $0x774] sm:$0xf0] %v4726_v55   ;;  %v4790_v55 = vld [vmem:[%s7688_s0 + $0x5b8] sm:$0xff]  }
  0xf2   :  { %723 = vst [vmem:[#allocation0 + $0x780] sm:$0xf] %v4727_v56  }
  0xf3   :  { %725 = vst [vmem:[#allocation0 + $0x78c] sm:$0xf0] %v4727_v56   ;;  %v4791_v56 = vld [vmem:[%s7688_s0 + $0x5c0] sm:$0xff]  }
  0xf4   :  { %729 = vst [vmem:[#allocation0 + $0x788] sm:$0xf] %v4728_v57  }
  0xf5   :  { %731 = vst [vmem:[#allocation0 + $0x794] sm:$0xf0] %v4728_v57   ;;  %v4792_v57 = vld [vmem:[%s7688_s0 + $0x5c8] sm:$0xff]  }
  0xf6   :  { %735 = vst [vmem:[#allocation0 + $0x7a0] sm:$0xf] %v4729_v58  }
  0xf7   :  { %737 = vst [vmem:[#allocation0 + $0x7ac] sm:$0xf0] %v4729_v58   ;;  %v4793_v58 = vld [vmem:[%s7688_s0 + $0x5d0] sm:$0xff]  }
  0xf8   :  { %741 = vst [vmem:[#allocation0 + $0x7a8] sm:$0xf] %v4730_v59  }
  0xf9   :  { %743 = vst [vmem:[#allocation0 + $0x7b4] sm:$0xf0] %v4730_v59   ;;  %v4794_v59 = vld [vmem:[%s7688_s0 + $0x5d8] sm:$0xff]  }
  0xfa   :  { %747 = vst [vmem:[#allocation0 + $0x7c0] sm:$0xf] %v4731_v60  }
  0xfb   :  { %749 = vst [vmem:[#allocation0 + $0x7cc] sm:$0xf0] %v4731_v60   ;;  %v4795_v60 = vld [vmem:[%s7688_s0 + $0x5e0] sm:$0xff]  }
  0xfc   :  { %753 = vst [vmem:[#allocation0 + $0x7c8] sm:$0xf] %v4732_v61  }
  0xfd   :  { %755 = vst [vmem:[#allocation0 + $0x7d4] sm:$0xf0] %v4732_v61   ;;  %v4796_v61 = vld [vmem:[%s7688_s0 + $0x5e8] sm:$0xff]  }
  0xfe   :  { %759 = vst [vmem:[#allocation0 + $0x7e0] sm:$0xf] %v4733_v62  }
  0xff   :  { %761 = vst [vmem:[#allocation0 + $0x7ec] sm:$0xf0] %v4733_v62   ;;  %v4797_v62 = vld [vmem:[%s7688_s0 + $0x5f0] sm:$0xff]  }
 0x100   :  { %765 = vst [vmem:[#allocation0 + $0x7e8] sm:$0xf] %v4734_v63  }
 0x101   :  { %767 = vst [vmem:[#allocation0 + $0x7f4] sm:$0xf0] %v4734_v63   ;;  %v4798_v63 = vld [vmem:[%s7688_s0 + $0x5f8] sm:$0xff]  }
 0x102   :  { %771 = vst [vmem:[#allocation0 + $0x800] sm:$0xf] %v4735_v0  }
 0x103   :  { %773 = vst [vmem:[#allocation0 + $0x80c] sm:$0xf0] %v4735_v0   ;;  %v4799_v0 = vld [vmem:[%s7688_s0 + $0x600] sm:$0xff]  }
 0x104   :  { %777 = vst [vmem:[#allocation0 + $0x808] sm:$0xf] %v4736_v1  }
 0x105   :  { %779 = vst [vmem:[#allocation0 + $0x814] sm:$0xf0] %v4736_v1   ;;  %v4800_v1 = vld [vmem:[%s7688_s0 + $0x608] sm:$0xff]  }
 0x106   :  { %783 = vst [vmem:[#allocation0 + $0x820] sm:$0xf] %v4737_v2  }
 0x107   :  { %785 = vst [vmem:[#allocation0 + $0x82c] sm:$0xf0] %v4737_v2   ;;  %v4801_v2 = vld [vmem:[%s7688_s0 + $0x610] sm:$0xff]  }
 0x108   :  { %789 = vst [vmem:[#allocation0 + $0x828] sm:$0xf] %v4738_v3  }
 0x109   :  { %791 = vst [vmem:[#allocation0 + $0x834] sm:$0xf0] %v4738_v3   ;;  %v4802_v3 = vld [vmem:[%s7688_s0 + $0x618] sm:$0xff]  }
 0x10a   :  { %795 = vst [vmem:[#allocation0 + $0x840] sm:$0xf] %v4739_v4  }
 0x10b   :  { %797 = vst [vmem:[#allocation0 + $0x84c] sm:$0xf0] %v4739_v4   ;;  %v4803_v4 = vld [vmem:[%s7688_s0 + $0x620] sm:$0xff]  }
 0x10c   :  { %801 = vst [vmem:[#allocation0 + $0x848] sm:$0xf] %v4740_v5  }
 0x10d   :  { %803 = vst [vmem:[#allocation0 + $0x854] sm:$0xf0] %v4740_v5   ;;  %v4804_v5 = vld [vmem:[%s7688_s0 + $0x628] sm:$0xff]  }
 0x10e   :  { %807 = vst [vmem:[#allocation0 + $0x860] sm:$0xf] %v4741_v6  }
 0x10f   :  { %809 = vst [vmem:[#allocation0 + $0x86c] sm:$0xf0] %v4741_v6   ;;  %v4805_v6 = vld [vmem:[%s7688_s0 + $0x630] sm:$0xff]  }
 0x110   :  { %813 = vst [vmem:[#allocation0 + $0x868] sm:$0xf] %v4742_v7  }
 0x111   :  { %815 = vst [vmem:[#allocation0 + $0x874] sm:$0xf0] %v4742_v7   ;;  %v4806_v7 = vld [vmem:[%s7688_s0 + $0x638] sm:$0xff]  }
 0x112   :  { %819 = vst [vmem:[#allocation0 + $0x880] sm:$0xf] %v4743_v8  }
 0x113   :  { %821 = vst [vmem:[#allocation0 + $0x88c] sm:$0xf0] %v4743_v8   ;;  %v4807_v8 = vld [vmem:[%s7688_s0 + $0x640] sm:$0xff]  }
 0x114   :  { %825 = vst [vmem:[#allocation0 + $0x888] sm:$0xf] %v4744_v9  }
 0x115   :  { %827 = vst [vmem:[#allocation0 + $0x894] sm:$0xf0] %v4744_v9   ;;  %v4808_v9 = vld [vmem:[%s7688_s0 + $0x648] sm:$0xff]  }
 0x116   :  { %831 = vst [vmem:[#allocation0 + $0x8a0] sm:$0xf] %v4745_v10  }
 0x117   :  { %833 = vst [vmem:[#allocation0 + $0x8ac] sm:$0xf0] %v4745_v10   ;;  %v4809_v10 = vld [vmem:[%s7688_s0 + $0x650] sm:$0xff]  }
 0x118   :  { %837 = vst [vmem:[#allocation0 + $0x8a8] sm:$0xf] %v4746_v11  }
 0x119   :  { %839 = vst [vmem:[#allocation0 + $0x8b4] sm:$0xf0] %v4746_v11   ;;  %v4810_v11 = vld [vmem:[%s7688_s0 + $0x658] sm:$0xff]  }
 0x11a   :  { %843 = vst [vmem:[#allocation0 + $0x8c0] sm:$0xf] %v4747_v12  }
 0x11b   :  { %845 = vst [vmem:[#allocation0 + $0x8cc] sm:$0xf0] %v4747_v12   ;;  %v4811_v12 = vld [vmem:[%s7688_s0 + $0x660] sm:$0xff]  }
 0x11c   :  { %849 = vst [vmem:[#allocation0 + $0x8c8] sm:$0xf] %v4748_v13  }
 0x11d   :  { %851 = vst [vmem:[#allocation0 + $0x8d4] sm:$0xf0] %v4748_v13   ;;  %v4812_v13 = vld [vmem:[%s7688_s0 + $0x668] sm:$0xff]  }
 0x11e   :  { %855 = vst [vmem:[#allocation0 + $0x8e0] sm:$0xf] %v4749_v14  }
 0x11f   :  { %857 = vst [vmem:[#allocation0 + $0x8ec] sm:$0xf0] %v4749_v14   ;;  %v4813_v14 = vld [vmem:[%s7688_s0 + $0x670] sm:$0xff]  }
 0x120   :  { %861 = vst [vmem:[#allocation0 + $0x8e8] sm:$0xf] %v4750_v15  }
 0x121   :  { %863 = vst [vmem:[#allocation0 + $0x8f4] sm:$0xf0] %v4750_v15   ;;  %v4814_v15 = vld [vmem:[%s7688_s0 + $0x678] sm:$0xff]  }
 0x122   :  { %867 = vst [vmem:[#allocation0 + $0x900] sm:$0xf] %v4751_v16  }
 0x123   :  { %869 = vst [vmem:[#allocation0 + $0x90c] sm:$0xf0] %v4751_v16   ;;  %v4815_v16 = vld [vmem:[%s7688_s0 + $0x680] sm:$0xff]  }
 0x124   :  { %873 = vst [vmem:[#allocation0 + $0x908] sm:$0xf] %v4752_v17  }
 0x125   :  { %875 = vst [vmem:[#allocation0 + $0x914] sm:$0xf0] %v4752_v17   ;;  %v4816_v17 = vld [vmem:[%s7688_s0 + $0x688] sm:$0xff]  }
 0x126   :  { %879 = vst [vmem:[#allocation0 + $0x920] sm:$0xf] %v4753_v18  }
 0x127   :  { %881 = vst [vmem:[#allocation0 + $0x92c] sm:$0xf0] %v4753_v18   ;;  %v4817_v18 = vld [vmem:[%s7688_s0 + $0x690] sm:$0xff]  }
 0x128   :  { %885 = vst [vmem:[#allocation0 + $0x928] sm:$0xf] %v4754_v19  }
 0x129   :  { %887 = vst [vmem:[#allocation0 + $0x934] sm:$0xf0] %v4754_v19   ;;  %v4818_v19 = vld [vmem:[%s7688_s0 + $0x698] sm:$0xff]  }
 0x12a   :  { %891 = vst [vmem:[#allocation0 + $0x940] sm:$0xf] %v4755_v20  }
 0x12b   :  { %893 = vst [vmem:[#allocation0 + $0x94c] sm:$0xf0] %v4755_v20   ;;  %v4819_v20 = vld [vmem:[%s7688_s0 + $0x6a0] sm:$0xff]  }
 0x12c   :  { %897 = vst [vmem:[#allocation0 + $0x948] sm:$0xf] %v4756_v21  }
 0x12d   :  { %899 = vst [vmem:[#allocation0 + $0x954] sm:$0xf0] %v4756_v21   ;;  %v4820_v21 = vld [vmem:[%s7688_s0 + $0x6a8] sm:$0xff]  }
 0x12e   :  { %903 = vst [vmem:[#allocation0 + $0x960] sm:$0xf] %v4757_v22  }
 0x12f   :  { %905 = vst [vmem:[#allocation0 + $0x96c] sm:$0xf0] %v4757_v22   ;;  %v4821_v22 = vld [vmem:[%s7688_s0 + $0x6b0] sm:$0xff]  }
 0x130   :  { %909 = vst [vmem:[#allocation0 + $0x968] sm:$0xf] %v4758_v23  }
 0x131   :  { %911 = vst [vmem:[#allocation0 + $0x974] sm:$0xf0] %v4758_v23   ;;  %v4822_v23 = vld [vmem:[%s7688_s0 + $0x6b8] sm:$0xff]  }
 0x132   :  { %915 = vst [vmem:[#allocation0 + $0x980] sm:$0xf] %v4759_v24  }
 0x133   :  { %917 = vst [vmem:[#allocation0 + $0x98c] sm:$0xf0] %v4759_v24   ;;  %v4823_v24 = vld [vmem:[%s7688_s0 + $0x6c0] sm:$0xff]  }
 0x134   :  { %921 = vst [vmem:[#allocation0 + $0x988] sm:$0xf] %v4760_v25  }
 0x135   :  { %923 = vst [vmem:[#allocation0 + $0x994] sm:$0xf0] %v4760_v25   ;;  %v4824_v25 = vld [vmem:[%s7688_s0 + $0x6c8] sm:$0xff]  }
 0x136   :  { %927 = vst [vmem:[#allocation0 + $0x9a0] sm:$0xf] %v4761_v26  }
 0x137   :  { %929 = vst [vmem:[#allocation0 + $0x9ac] sm:$0xf0] %v4761_v26   ;;  %v4825_v26 = vld [vmem:[%s7688_s0 + $0x6d0] sm:$0xff]  }
 0x138   :  { %933 = vst [vmem:[#allocation0 + $0x9a8] sm:$0xf] %v4762_v27  }
 0x139   :  { %935 = vst [vmem:[#allocation0 + $0x9b4] sm:$0xf0] %v4762_v27   ;;  %v4826_v27 = vld [vmem:[%s7688_s0 + $0x6d8] sm:$0xff]  }
 0x13a   :  { %939 = vst [vmem:[#allocation0 + $0x9c0] sm:$0xf] %v4763_v28  }
 0x13b   :  { %941 = vst [vmem:[#allocation0 + $0x9cc] sm:$0xf0] %v4763_v28   ;;  %v4827_v28 = vld [vmem:[%s7688_s0 + $0x6e0] sm:$0xff]  }
 0x13c   :  { %945 = vst [vmem:[#allocation0 + $0x9c8] sm:$0xf] %v4764_v29  }
 0x13d   :  { %947 = vst [vmem:[#allocation0 + $0x9d4] sm:$0xf0] %v4764_v29   ;;  %v4828_v29 = vld [vmem:[%s7688_s0 + $0x6e8] sm:$0xff]  }
 0x13e   :  { %951 = vst [vmem:[#allocation0 + $0x9e0] sm:$0xf] %v4765_v30  }
 0x13f   :  { %953 = vst [vmem:[#allocation0 + $0x9ec] sm:$0xf0] %v4765_v30   ;;  %v4829_v30 = vld [vmem:[%s7688_s0 + $0x6f0] sm:$0xff]  }
 0x140   :  { %957 = vst [vmem:[#allocation0 + $0x9e8] sm:$0xf] %v4766_v31  }
 0x141   :  { %959 = vst [vmem:[#allocation0 + $0x9f4] sm:$0xf0] %v4766_v31   ;;  %v4830_v31 = vld [vmem:[%s7688_s0 + $0x6f8] sm:$0xff]  }
 0x142   :  { %963 = vst [vmem:[#allocation0 + $0xa00] sm:$0xf] %v4767_v32  }
 0x143   :  { %965 = vst [vmem:[#allocation0 + $0xa0c] sm:$0xf0] %v4767_v32   ;;  %v4831_v32 = vld [vmem:[%s7688_s0 + $0x700] sm:$0xff]  }
 0x144   :  { %969 = vst [vmem:[#allocation0 + $0xa08] sm:$0xf] %v4768_v33  }
 0x145   :  { %971 = vst [vmem:[#allocation0 + $0xa14] sm:$0xf0] %v4768_v33   ;;  %v4832_v33 = vld [vmem:[%s7688_s0 + $0x708] sm:$0xff]  }
 0x146   :  { %975 = vst [vmem:[#allocation0 + $0xa20] sm:$0xf] %v4769_v34  }
 0x147   :  { %977 = vst [vmem:[#allocation0 + $0xa2c] sm:$0xf0] %v4769_v34   ;;  %v4833_v34 = vld [vmem:[%s7688_s0 + $0x710] sm:$0xff]  }
 0x148   :  { %981 = vst [vmem:[#allocation0 + $0xa28] sm:$0xf] %v4770_v35  }
 0x149   :  { %983 = vst [vmem:[#allocation0 + $0xa34] sm:$0xf0] %v4770_v35   ;;  %v4834_v35 = vld [vmem:[%s7688_s0 + $0x718] sm:$0xff]  }
 0x14a   :  { %987 = vst [vmem:[#allocation0 + $0xa40] sm:$0xf] %v4771_v36  }
 0x14b   :  { %989 = vst [vmem:[#allocation0 + $0xa4c] sm:$0xf0] %v4771_v36   ;;  %v4835_v36 = vld [vmem:[%s7688_s0 + $0x720] sm:$0xff]  }
 0x14c   :  { %993 = vst [vmem:[#allocation0 + $0xa48] sm:$0xf] %v4772_v37  }
 0x14d   :  { %995 = vst [vmem:[#allocation0 + $0xa54] sm:$0xf0] %v4772_v37   ;;  %v4836_v37 = vld [vmem:[%s7688_s0 + $0x728] sm:$0xff]  }
 0x14e   :  { %999 = vst [vmem:[#allocation0 + $0xa60] sm:$0xf] %v4773_v38  }
 0x14f   :  { %1001 = vst [vmem:[#allocation0 + $0xa6c] sm:$0xf0] %v4773_v38   ;;  %v4837_v38 = vld [vmem:[%s7688_s0 + $0x730] sm:$0xff]  }
 0x150   :  { %1005 = vst [vmem:[#allocation0 + $0xa68] sm:$0xf] %v4774_v39  }
 0x151   :  { %1007 = vst [vmem:[#allocation0 + $0xa74] sm:$0xf0] %v4774_v39   ;;  %v4838_v39 = vld [vmem:[%s7688_s0 + $0x738] sm:$0xff]  }
 0x152   :  { %1011 = vst [vmem:[#allocation0 + $0xa80] sm:$0xf] %v4775_v40  }
 0x153   :  { %1013 = vst [vmem:[#allocation0 + $0xa8c] sm:$0xf0] %v4775_v40   ;;  %v4839_v40 = vld [vmem:[%s7688_s0 + $0x740] sm:$0xff]  }
 0x154   :  { %1017 = vst [vmem:[#allocation0 + $0xa88] sm:$0xf] %v4776_v41  }
 0x155   :  { %1019 = vst [vmem:[#allocation0 + $0xa94] sm:$0xf0] %v4776_v41   ;;  %v4840_v41 = vld [vmem:[%s7688_s0 + $0x748] sm:$0xff]  }
 0x156   :  { %1023 = vst [vmem:[#allocation0 + $0xaa0] sm:$0xf] %v4777_v42  }
 0x157   :  { %1025 = vst [vmem:[#allocation0 + $0xaac] sm:$0xf0] %v4777_v42   ;;  %v4841_v42 = vld [vmem:[%s7688_s0 + $0x750] sm:$0xff]  }
 0x158   :  { %1029 = vst [vmem:[#allocation0 + $0xaa8] sm:$0xf] %v4778_v43  }
 0x159   :  { %1031 = vst [vmem:[#allocation0 + $0xab4] sm:$0xf0] %v4778_v43   ;;  %v4842_v43 = vld [vmem:[%s7688_s0 + $0x758] sm:$0xff]  }
 0x15a   :  { %1035 = vst [vmem:[#allocation0 + $0xac0] sm:$0xf] %v4779_v44  }
 0x15b   :  { %1037 = vst [vmem:[#allocation0 + $0xacc] sm:$0xf0] %v4779_v44   ;;  %v4843_v44 = vld [vmem:[%s7688_s0 + $0x760] sm:$0xff]  }
 0x15c   :  { %1041 = vst [vmem:[#allocation0 + $0xac8] sm:$0xf] %v4780_v45  }
 0x15d   :  { %1043 = vst [vmem:[#allocation0 + $0xad4] sm:$0xf0] %v4780_v45   ;;  %v4844_v45 = vld [vmem:[%s7688_s0 + $0x768] sm:$0xff]  }
 0x15e   :  { %1047 = vst [vmem:[#allocation0 + $0xae0] sm:$0xf] %v4781_v46  }
 0x15f   :  { %1049 = vst [vmem:[#allocation0 + $0xaec] sm:$0xf0] %v4781_v46   ;;  %v4845_v46 = vld [vmem:[%s7688_s0 + $0x770] sm:$0xff]  }
 0x160   :  { %1053 = vst [vmem:[#allocation0 + $0xae8] sm:$0xf] %v4782_v47  }
 0x161   :  { %1055 = vst [vmem:[#allocation0 + $0xaf4] sm:$0xf0] %v4782_v47   ;;  %v4846_v47 = vld [vmem:[%s7688_s0 + $0x778] sm:$0xff]  }
 0x162   :  { %1059 = vst [vmem:[#allocation0 + $0xb00] sm:$0xf] %v4783_v48  }
 0x163   :  { %1061 = vst [vmem:[#allocation0 + $0xb0c] sm:$0xf0] %v4783_v48   ;;  %v4847_v48 = vld [vmem:[%s7688_s0 + $0x780] sm:$0xff]  }
 0x164   :  { %1065 = vst [vmem:[#allocation0 + $0xb08] sm:$0xf] %v4784_v49  }
 0x165   :  { %1067 = vst [vmem:[#allocation0 + $0xb14] sm:$0xf0] %v4784_v49   ;;  %v4848_v49 = vld [vmem:[%s7688_s0 + $0x788] sm:$0xff]  }
 0x166   :  { %1071 = vst [vmem:[#allocation0 + $0xb20] sm:$0xf] %v4785_v50  }
 0x167   :  { %1073 = vst [vmem:[#allocation0 + $0xb2c] sm:$0xf0] %v4785_v50   ;;  %v4849_v50 = vld [vmem:[%s7688_s0 + $0x790] sm:$0xff]  }
 0x168   :  { %1077 = vst [vmem:[#allocation0 + $0xb28] sm:$0xf] %v4786_v51  }
 0x169   :  { %1079 = vst [vmem:[#allocation0 + $0xb34] sm:$0xf0] %v4786_v51   ;;  %v4850_v51 = vld [vmem:[%s7688_s0 + $0x798] sm:$0xff]  }
 0x16a   :  { %1083 = vst [vmem:[#allocation0 + $0xb40] sm:$0xf] %v4787_v52  }
 0x16b   :  { %1085 = vst [vmem:[#allocation0 + $0xb4c] sm:$0xf0] %v4787_v52   ;;  %v4851_v52 = vld [vmem:[%s7688_s0 + $0x7a0] sm:$0xff]  }
 0x16c   :  { %1089 = vst [vmem:[#allocation0 + $0xb48] sm:$0xf] %v4788_v53  }
 0x16d   :  { %1091 = vst [vmem:[#allocation0 + $0xb54] sm:$0xf0] %v4788_v53   ;;  %v4852_v53 = vld [vmem:[%s7688_s0 + $0x7a8] sm:$0xff]  }
 0x16e   :  { %1095 = vst [vmem:[#allocation0 + $0xb60] sm:$0xf] %v4789_v54  }
 0x16f   :  { %1097 = vst [vmem:[#allocation0 + $0xb6c] sm:$0xf0] %v4789_v54   ;;  %v4853_v54 = vld [vmem:[%s7688_s0 + $0x7b0] sm:$0xff]  }
 0x170   :  { %1101 = vst [vmem:[#allocation0 + $0xb68] sm:$0xf] %v4790_v55  }
 0x171   :  { %1103 = vst [vmem:[#allocation0 + $0xb74] sm:$0xf0] %v4790_v55   ;;  %v4854_v55 = vld [vmem:[%s7688_s0 + $0x7b8] sm:$0xff]  }
 0x172   :  { %1107 = vst [vmem:[#allocation0 + $0xb80] sm:$0xf] %v4791_v56  }
 0x173   :  { %1109 = vst [vmem:[#allocation0 + $0xb8c] sm:$0xf0] %v4791_v56   ;;  %v4855_v56 = vld [vmem:[%s7688_s0 + $0x7c0] sm:$0xff]  }
 0x174   :  { %1113 = vst [vmem:[#allocation0 + $0xb88] sm:$0xf] %v4792_v57  }
 0x175   :  { %1115 = vst [vmem:[#allocation0 + $0xb94] sm:$0xf0] %v4792_v57   ;;  %v4856_v57 = vld [vmem:[%s7688_s0 + $0x7c8] sm:$0xff]  }
 0x176   :  { %1119 = vst [vmem:[#allocation0 + $0xba0] sm:$0xf] %v4793_v58  }
 0x177   :  { %1121 = vst [vmem:[#allocation0 + $0xbac] sm:$0xf0] %v4793_v58   ;;  %v4857_v58 = vld [vmem:[%s7688_s0 + $0x7d0] sm:$0xff]  }
 0x178   :  { %1125 = vst [vmem:[#allocation0 + $0xba8] sm:$0xf] %v4794_v59  }
 0x179   :  { %1127 = vst [vmem:[#allocation0 + $0xbb4] sm:$0xf0] %v4794_v59   ;;  %v4858_v59 = vld [vmem:[%s7688_s0 + $0x7d8] sm:$0xff]  }
 0x17a   :  { %1131 = vst [vmem:[#allocation0 + $0xbc0] sm:$0xf] %v4795_v60  }
 0x17b   :  { %1133 = vst [vmem:[#allocation0 + $0xbcc] sm:$0xf0] %v4795_v60   ;;  %v4859_v60 = vld [vmem:[%s7688_s0 + $0x7e0] sm:$0xff]  }
 0x17c   :  { %1137 = vst [vmem:[#allocation0 + $0xbc8] sm:$0xf] %v4796_v61  }
 0x17d   :  { %1139 = vst [vmem:[#allocation0 + $0xbd4] sm:$0xf0] %v4796_v61   ;;  %v4860_v61 = vld [vmem:[%s7688_s0 + $0x7e8] sm:$0xff]  }
 0x17e   :  { %1143 = vst [vmem:[#allocation0 + $0xbe0] sm:$0xf] %v4797_v62  }
 0x17f   :  { %1145 = vst [vmem:[#allocation0 + $0xbec] sm:$0xf0] %v4797_v62   ;;  %v4861_v62 = vld [vmem:[%s7688_s0 + $0x7f0] sm:$0xff]  }
 0x180   :  { %1149 = vst [vmem:[#allocation0 + $0xbe8] sm:$0xf] %v4798_v63  }
 0x181   :  { %1151 = vst [vmem:[#allocation0 + $0xbf4] sm:$0xf0] %v4798_v63   ;;  %v4862_v63 = vld [vmem:[%s7688_s0 + $0x7f8] sm:$0xff]  }
 0x182   :  { %1155 = vst [vmem:[#allocation0 + $0xc00] sm:$0xf] %v4799_v0  }
 0x183   :  { %1157 = vst [vmem:[#allocation0 + $0xc0c] sm:$0xf0] %v4799_v0   ;;  %v1538_v0 = vld [vmem:[#allocation0] sm:$0xf] }
 0x184   :  { %1161 = vst [vmem:[#allocation0 + $0xc08] sm:$0xf] %v4800_v1  }
 0x185   :  { %1163 = vst [vmem:[#allocation0 + $0xc14] sm:$0xf0] %v4800_v1   ;;  %v1543_v1 = vld [vmem:[#allocation0 + $0x8] sm:$0xf] }
 0x186   :  { %1167 = vst [vmem:[#allocation0 + $0xc20] sm:$0xf] %v4801_v2  }
 0x187   :  { %1169 = vst [vmem:[#allocation0 + $0xc2c] sm:$0xf0] %v4801_v2   ;;  %v1549_v2 = vld [vmem:[#allocation0 + $0x10] sm:$0xf] }
 0x188   :  { %1173 = vst [vmem:[#allocation0 + $0xc28] sm:$0xf] %v4802_v3  }
 0x189   :  { %1175 = vst [vmem:[#allocation0 + $0xc34] sm:$0xf0] %v4802_v3   ;;  %v1555_v3 = vld [vmem:[#allocation0 + $0x18] sm:$0xf] }
 0x18a   :  { %1179 = vst [vmem:[#allocation0 + $0xc40] sm:$0xf] %v4803_v4  }
 0x18b   :  { %1181 = vst [vmem:[#allocation0 + $0xc4c] sm:$0xf0] %v4803_v4   ;;  %v1561_v4 = vld [vmem:[#allocation0 + $0x20] sm:$0xf] }
 0x18c   :  { %1185 = vst [vmem:[#allocation0 + $0xc48] sm:$0xf] %v4804_v5  }
 0x18d   :  { %1187 = vst [vmem:[#allocation0 + $0xc54] sm:$0xf0] %v4804_v5   ;;  %v1567_v5 = vld [vmem:[#allocation0 + $0x28] sm:$0xf] }
 0x18e   :  { %1191 = vst [vmem:[#allocation0 + $0xc60] sm:$0xf] %v4805_v6  }
 0x18f   :  { %1193 = vst [vmem:[#allocation0 + $0xc6c] sm:$0xf0] %v4805_v6   ;;  %v1573_v6 = vld [vmem:[#allocation0 + $0x30] sm:$0xf] }
 0x190   :  { %1197 = vst [vmem:[#allocation0 + $0xc68] sm:$0xf] %v4806_v7  }
 0x191   :  { %1199 = vst [vmem:[#allocation0 + $0xc74] sm:$0xf0] %v4806_v7   ;;  %v1579_v7 = vld [vmem:[#allocation0 + $0x38] sm:$0xf] }
 0x192   :  { %1203 = vst [vmem:[#allocation0 + $0xc80] sm:$0xf] %v4807_v8  }
 0x193   :  { %1205 = vst [vmem:[#allocation0 + $0xc8c] sm:$0xf0] %v4807_v8   ;;  %v1585_v8 = vld [vmem:[#allocation0 + $0x40] sm:$0xf] }
 0x194   :  { %1209 = vst [vmem:[#allocation0 + $0xc88] sm:$0xf] %v4808_v9  }
 0x195   :  { %1211 = vst [vmem:[#allocation0 + $0xc94] sm:$0xf0] %v4808_v9   ;;  %v1591_v9 = vld [vmem:[#allocation0 + $0x48] sm:$0xf] }
 0x196   :  { %1215 = vst [vmem:[#allocation0 + $0xca0] sm:$0xf] %v4809_v10  }
 0x197   :  { %1217 = vst [vmem:[#allocation0 + $0xcac] sm:$0xf0] %v4809_v10   ;;  %v1597_v10 = vld [vmem:[#allocation0 + $0x50] sm:$0xf] }
 0x198   :  { %1221 = vst [vmem:[#allocation0 + $0xca8] sm:$0xf] %v4810_v11  }
 0x199   :  { %1223 = vst [vmem:[#allocation0 + $0xcb4] sm:$0xf0] %v4810_v11   ;;  %v1603_v11 = vld [vmem:[#allocation0 + $0x58] sm:$0xf] }
 0x19a   :  { %1227 = vst [vmem:[#allocation0 + $0xcc0] sm:$0xf] %v4811_v12  }
 0x19b   :  { %1229 = vst [vmem:[#allocation0 + $0xccc] sm:$0xf0] %v4811_v12   ;;  %v1609_v12 = vld [vmem:[#allocation0 + $0x60] sm:$0xf] }
 0x19c   :  { %1233 = vst [vmem:[#allocation0 + $0xcc8] sm:$0xf] %v4812_v13  }
 0x19d   :  { %1235 = vst [vmem:[#allocation0 + $0xcd4] sm:$0xf0] %v4812_v13   ;;  %v1615_v13 = vld [vmem:[#allocation0 + $0x68] sm:$0xf] }
 0x19e   :  { %1239 = vst [vmem:[#allocation0 + $0xce0] sm:$0xf] %v4813_v14  }
 0x19f   :  { %1241 = vst [vmem:[#allocation0 + $0xcec] sm:$0xf0] %v4813_v14   ;;  %v1621_v14 = vld [vmem:[#allocation0 + $0x70] sm:$0xf] }
 0x1a0   :  { %1245 = vst [vmem:[#allocation0 + $0xce8] sm:$0xf] %v4814_v15  }
 0x1a1   :  { %1247 = vst [vmem:[#allocation0 + $0xcf4] sm:$0xf0] %v4814_v15   ;;  %v1627_v15 = vld [vmem:[#allocation0 + $0x78] sm:$0xf] }
 0x1a2   :  { %1251 = vst [vmem:[#allocation0 + $0xd00] sm:$0xf] %v4815_v16  }
 0x1a3   :  { %1253 = vst [vmem:[#allocation0 + $0xd0c] sm:$0xf0] %v4815_v16   ;;  %v1633_v16 = vld [vmem:[#allocation0 + $0x80] sm:$0xf] }
 0x1a4   :  { %1257 = vst [vmem:[#allocation0 + $0xd08] sm:$0xf] %v4816_v17  }
 0x1a5   :  { %1259 = vst [vmem:[#allocation0 + $0xd14] sm:$0xf0] %v4816_v17   ;;  %v1639_v17 = vld [vmem:[#allocation0 + $0x88] sm:$0xf] }
 0x1a6   :  { %1263 = vst [vmem:[#allocation0 + $0xd20] sm:$0xf] %v4817_v18  }
 0x1a7   :  { %1265 = vst [vmem:[#allocation0 + $0xd2c] sm:$0xf0] %v4817_v18   ;;  %v1645_v18 = vld [vmem:[#allocation0 + $0x90] sm:$0xf] }
 0x1a8   :  { %1269 = vst [vmem:[#allocation0 + $0xd28] sm:$0xf] %v4818_v19  }
 0x1a9   :  { %1271 = vst [vmem:[#allocation0 + $0xd34] sm:$0xf0] %v4818_v19   ;;  %v1651_v19 = vld [vmem:[#allocation0 + $0x98] sm:$0xf] }
 0x1aa   :  { %1275 = vst [vmem:[#allocation0 + $0xd40] sm:$0xf] %v4819_v20  }
 0x1ab   :  { %1277 = vst [vmem:[#allocation0 + $0xd4c] sm:$0xf0] %v4819_v20   ;;  %v1657_v20 = vld [vmem:[#allocation0 + $0xa0] sm:$0xf] }
 0x1ac   :  { %1281 = vst [vmem:[#allocation0 + $0xd48] sm:$0xf] %v4820_v21  }
 0x1ad   :  { %1283 = vst [vmem:[#allocation0 + $0xd54] sm:$0xf0] %v4820_v21   ;;  %v1663_v21 = vld [vmem:[#allocation0 + $0xa8] sm:$0xf] }
 0x1ae   :  { %1287 = vst [vmem:[#allocation0 + $0xd60] sm:$0xf] %v4821_v22  }
 0x1af   :  { %1289 = vst [vmem:[#allocation0 + $0xd6c] sm:$0xf0] %v4821_v22   ;;  %v1669_v22 = vld [vmem:[#allocation0 + $0xb0] sm:$0xf] }
 0x1b0   :  { %1293 = vst [vmem:[#allocation0 + $0xd68] sm:$0xf] %v4822_v23  }
 0x1b1   :  { %1295 = vst [vmem:[#allocation0 + $0xd74] sm:$0xf0] %v4822_v23   ;;  %v1675_v23 = vld [vmem:[#allocation0 + $0xb8] sm:$0xf] }
 0x1b2   :  { %1299 = vst [vmem:[#allocation0 + $0xd80] sm:$0xf] %v4823_v24  }
 0x1b3   :  { %1301 = vst [vmem:[#allocation0 + $0xd8c] sm:$0xf0] %v4823_v24   ;;  %v1681_v24 = vld [vmem:[#allocation0 + $0xc0] sm:$0xf] }
 0x1b4   :  { %1305 = vst [vmem:[#allocation0 + $0xd88] sm:$0xf] %v4824_v25  }
 0x1b5   :  { %1307 = vst [vmem:[#allocation0 + $0xd94] sm:$0xf0] %v4824_v25   ;;  %v1687_v25 = vld [vmem:[#allocation0 + $0xc8] sm:$0xf] }
 0x1b6   :  { %1311 = vst [vmem:[#allocation0 + $0xda0] sm:$0xf] %v4825_v26  }
 0x1b7   :  { %1313 = vst [vmem:[#allocation0 + $0xdac] sm:$0xf0] %v4825_v26   ;;  %v1693_v26 = vld [vmem:[#allocation0 + $0xd0] sm:$0xf] }
 0x1b8   :  { %1317 = vst [vmem:[#allocation0 + $0xda8] sm:$0xf] %v4826_v27  }
 0x1b9   :  { %1319 = vst [vmem:[#allocation0 + $0xdb4] sm:$0xf0] %v4826_v27   ;;  %v1699_v27 = vld [vmem:[#allocation0 + $0xd8] sm:$0xf] }
 0x1ba   :  { %1323 = vst [vmem:[#allocation0 + $0xdc0] sm:$0xf] %v4827_v28  }
 0x1bb   :  { %1325 = vst [vmem:[#allocation0 + $0xdcc] sm:$0xf0] %v4827_v28   ;;  %v1705_v28 = vld [vmem:[#allocation0 + $0xe0] sm:$0xf] }
 0x1bc   :  { %1329 = vst [vmem:[#allocation0 + $0xdc8] sm:$0xf] %v4828_v29  }
 0x1bd   :  { %1331 = vst [vmem:[#allocation0 + $0xdd4] sm:$0xf0] %v4828_v29   ;;  %v1711_v29 = vld [vmem:[#allocation0 + $0xe8] sm:$0xf] }
 0x1be   :  { %1335 = vst [vmem:[#allocation0 + $0xde0] sm:$0xf] %v4829_v30  }
 0x1bf   :  { %1337 = vst [vmem:[#allocation0 + $0xdec] sm:$0xf0] %v4829_v30   ;;  %v1717_v30 = vld [vmem:[#allocation0 + $0xf0] sm:$0xf] }
 0x1c0   :  { %1341 = vst [vmem:[#allocation0 + $0xde8] sm:$0xf] %v4830_v31  }
 0x1c1   :  { %1343 = vst [vmem:[#allocation0 + $0xdf4] sm:$0xf0] %v4830_v31   ;;  %v1723_v31 = vld [vmem:[#allocation0 + $0xf8] sm:$0xf] }
 0x1c2   :  { %1347 = vst [vmem:[#allocation0 + $0xe00] sm:$0xf] %v4831_v32  }
 0x1c3   :  { %1349 = vst [vmem:[#allocation0 + $0xe0c] sm:$0xf0] %v4831_v32   ;;  %v1729_v32 = vld [vmem:[#allocation0 + $0x100] sm:$0xf] }
 0x1c4   :  { %1353 = vst [vmem:[#allocation0 + $0xe08] sm:$0xf] %v4832_v33  }
 0x1c5   :  { %1355 = vst [vmem:[#allocation0 + $0xe14] sm:$0xf0] %v4832_v33   ;;  %v1735_v33 = vld [vmem:[#allocation0 + $0x108] sm:$0xf] }
 0x1c6   :  { %1359 = vst [vmem:[#allocation0 + $0xe20] sm:$0xf] %v4833_v34  }
 0x1c7   :  { %1361 = vst [vmem:[#allocation0 + $0xe2c] sm:$0xf0] %v4833_v34   ;;  %v1741_v34 = vld [vmem:[#allocation0 + $0x110] sm:$0xf] }
 0x1c8   :  { %1365 = vst [vmem:[#allocation0 + $0xe28] sm:$0xf] %v4834_v35  }
 0x1c9   :  { %1367 = vst [vmem:[#allocation0 + $0xe34] sm:$0xf0] %v4834_v35   ;;  %v1747_v35 = vld [vmem:[#allocation0 + $0x118] sm:$0xf] }
 0x1ca   :  { %1371 = vst [vmem:[#allocation0 + $0xe40] sm:$0xf] %v4835_v36  }
 0x1cb   :  { %1373 = vst [vmem:[#allocation0 + $0xe4c] sm:$0xf0] %v4835_v36   ;;  %v1753_v36 = vld [vmem:[#allocation0 + $0x120] sm:$0xf] }
 0x1cc   :  { %1377 = vst [vmem:[#allocation0 + $0xe48] sm:$0xf] %v4836_v37  }
 0x1cd   :  { %1379 = vst [vmem:[#allocation0 + $0xe54] sm:$0xf0] %v4836_v37   ;;  %v1759_v37 = vld [vmem:[#allocation0 + $0x128] sm:$0xf] }
 0x1ce   :  { %1383 = vst [vmem:[#allocation0 + $0xe60] sm:$0xf] %v4837_v38  }
 0x1cf   :  { %1385 = vst [vmem:[#allocation0 + $0xe6c] sm:$0xf0] %v4837_v38   ;;  %v1765_v38 = vld [vmem:[#allocation0 + $0x130] sm:$0xf] }
 0x1d0   :  { %1389 = vst [vmem:[#allocation0 + $0xe68] sm:$0xf] %v4838_v39  }
 0x1d1   :  { %1391 = vst [vmem:[#allocation0 + $0xe74] sm:$0xf0] %v4838_v39   ;;  %v1771_v39 = vld [vmem:[#allocation0 + $0x138] sm:$0xf] }
 0x1d2   :  { %1395 = vst [vmem:[#allocation0 + $0xe80] sm:$0xf] %v4839_v40  }
 0x1d3   :  { %1397 = vst [vmem:[#allocation0 + $0xe8c] sm:$0xf0] %v4839_v40   ;;  %v1777_v40 = vld [vmem:[#allocation0 + $0x140] sm:$0xf] }
 0x1d4   :  { %1401 = vst [vmem:[#allocation0 + $0xe88] sm:$0xf] %v4840_v41  }
 0x1d5   :  { %1403 = vst [vmem:[#allocation0 + $0xe94] sm:$0xf0] %v4840_v41   ;;  %v1783_v41 = vld [vmem:[#allocation0 + $0x148] sm:$0xf] }
 0x1d6   :  { %1407 = vst [vmem:[#allocation0 + $0xea0] sm:$0xf] %v4841_v42  }
 0x1d7   :  { %1409 = vst [vmem:[#allocation0 + $0xeac] sm:$0xf0] %v4841_v42   ;;  %v1789_v42 = vld [vmem:[#allocation0 + $0x150] sm:$0xf] }
 0x1d8   :  { %1413 = vst [vmem:[#allocation0 + $0xea8] sm:$0xf] %v4842_v43  }
 0x1d9   :  { %1415 = vst [vmem:[#allocation0 + $0xeb4] sm:$0xf0] %v4842_v43   ;;  %v1795_v43 = vld [vmem:[#allocation0 + $0x158] sm:$0xf] }
 0x1da   :  { %1419 = vst [vmem:[#allocation0 + $0xec0] sm:$0xf] %v4843_v44  }
 0x1db   :  { %1421 = vst [vmem:[#allocation0 + $0xecc] sm:$0xf0] %v4843_v44   ;;  %v1801_v44 = vld [vmem:[#allocation0 + $0x160] sm:$0xf] }
 0x1dc   :  { %1425 = vst [vmem:[#allocation0 + $0xec8] sm:$0xf] %v4844_v45  }
 0x1dd   :  { %1427 = vst [vmem:[#allocation0 + $0xed4] sm:$0xf0] %v4844_v45   ;;  %v1807_v45 = vld [vmem:[#allocation0 + $0x168] sm:$0xf] }
 0x1de   :  { %1431 = vst [vmem:[#allocation0 + $0xee0] sm:$0xf] %v4845_v46  }
 0x1df   :  { %1433 = vst [vmem:[#allocation0 + $0xeec] sm:$0xf0] %v4845_v46   ;;  %v1813_v46 = vld [vmem:[#allocation0 + $0x170] sm:$0xf] }
 0x1e0   :  { %1437 = vst [vmem:[#allocation0 + $0xee8] sm:$0xf] %v4846_v47  }
 0x1e1   :  { %1439 = vst [vmem:[#allocation0 + $0xef4] sm:$0xf0] %v4846_v47   ;;  %v1819_v47 = vld [vmem:[#allocation0 + $0x178] sm:$0xf] }
 0x1e2   :  { %1443 = vst [vmem:[#allocation0 + $0xf00] sm:$0xf] %v4847_v48  }
 0x1e3   :  { %1445 = vst [vmem:[#allocation0 + $0xf0c] sm:$0xf0] %v4847_v48   ;;  %v1825_v48 = vld [vmem:[#allocation0 + $0x180] sm:$0xf] }
 0x1e4   :  { %1449 = vst [vmem:[#allocation0 + $0xf08] sm:$0xf] %v4848_v49  }
 0x1e5   :  { %1451 = vst [vmem:[#allocation0 + $0xf14] sm:$0xf0] %v4848_v49   ;;  %v1831_v49 = vld [vmem:[#allocation0 + $0x188] sm:$0xf] }
 0x1e6   :  { %1455 = vst [vmem:[#allocation0 + $0xf20] sm:$0xf] %v4849_v50  }
 0x1e7   :  { %1457 = vst [vmem:[#allocation0 + $0xf2c] sm:$0xf0] %v4849_v50   ;;  %v1837_v50 = vld [vmem:[#allocation0 + $0x190] sm:$0xf] }
 0x1e8   :  { %1461 = vst [vmem:[#allocation0 + $0xf28] sm:$0xf] %v4850_v51  }
 0x1e9   :  { %1463 = vst [vmem:[#allocation0 + $0xf34] sm:$0xf0] %v4850_v51   ;;  %v1843_v51 = vld [vmem:[#allocation0 + $0x198] sm:$0xf] }
 0x1ea   :  { %1467 = vst [vmem:[#allocation0 + $0xf40] sm:$0xf] %v4851_v52  }
 0x1eb   :  { %1469 = vst [vmem:[#allocation0 + $0xf4c] sm:$0xf0] %v4851_v52   ;;  %v1849_v52 = vld [vmem:[#allocation0 + $0x1a0] sm:$0xf] }
 0x1ec   :  { %1473 = vst [vmem:[#allocation0 + $0xf48] sm:$0xf] %v4852_v53  }
 0x1ed   :  { %1475 = vst [vmem:[#allocation0 + $0xf54] sm:$0xf0] %v4852_v53   ;;  %v1855_v53 = vld [vmem:[#allocation0 + $0x1a8] sm:$0xf] }
 0x1ee   :  { %1479 = vst [vmem:[#allocation0 + $0xf60] sm:$0xf] %v4853_v54  }
 0x1ef   :  { %1481 = vst [vmem:[#allocation0 + $0xf6c] sm:$0xf0] %v4853_v54   ;;  %v1861_v54 = vld [vmem:[#allocation0 + $0x1b0] sm:$0xf] }
 0x1f0   :  { %1485 = vst [vmem:[#allocation0 + $0xf68] sm:$0xf] %v4854_v55  }
 0x1f1   :  { %1487 = vst [vmem:[#allocation0 + $0xf74] sm:$0xf0] %v4854_v55   ;;  %v1867_v55 = vld [vmem:[#allocation0 + $0x1b8] sm:$0xf] }
 0x1f2   :  { %1491 = vst [vmem:[#allocation0 + $0xf80] sm:$0xf] %v4855_v56  }
 0x1f3   :  { %1493 = vst [vmem:[#allocation0 + $0xf8c] sm:$0xf0] %v4855_v56   ;;  %v1873_v56 = vld [vmem:[#allocation0 + $0x1c0] sm:$0xf] }
 0x1f4   :  { %1497 = vst [vmem:[#allocation0 + $0xf88] sm:$0xf] %v4856_v57  }
 0x1f5   :  { %1499 = vst [vmem:[#allocation0 + $0xf94] sm:$0xf0] %v4856_v57   ;;  %v1879_v57 = vld [vmem:[#allocation0 + $0x1c8] sm:$0xf] }
 0x1f6   :  { %1503 = vst [vmem:[#allocation0 + $0xfa0] sm:$0xf] %v4857_v58  }
 0x1f7   :  { %1505 = vst [vmem:[#allocation0 + $0xfac] sm:$0xf0] %v4857_v58   ;;  %v1885_v58 = vld [vmem:[#allocation0 + $0x1d0] sm:$0xf] }
 0x1f8   :  { %1509 = vst [vmem:[#allocation0 + $0xfa8] sm:$0xf] %v4858_v59  }
 0x1f9   :  { %1511 = vst [vmem:[#allocation0 + $0xfb4] sm:$0xf0] %v4858_v59   ;;  %v1891_v59 = vld [vmem:[#allocation0 + $0x1d8] sm:$0xf] }
 0x1fa   :  { %1515 = vst [vmem:[#allocation0 + $0xfc0] sm:$0xf] %v4859_v60  }
 0x1fb   :  { %1517 = vst [vmem:[#allocation0 + $0xfcc] sm:$0xf0] %v4859_v60   ;;  %v1897_v60 = vld [vmem:[#allocation0 + $0x1e0] sm:$0xf] }
 0x1fc   :  { %1521 = vst [vmem:[#allocation0 + $0xfc8] sm:$0xf] %v4860_v61  }
 0x1fd   :  { %1523 = vst [vmem:[#allocation0 + $0xfd4] sm:$0xf0] %v4860_v61   ;;  %v1903_v61 = vld [vmem:[#allocation0 + $0x1e8] sm:$0xf] }
 0x1fe   :  { %1527 = vst [vmem:[#allocation0 + $0xfe0] sm:$0xf] %v4861_v62  }
 0x1ff   :  { %1529 = vst [vmem:[#allocation0 + $0xfec] sm:$0xf0] %v4861_v62   ;;  %v1909_v62 = vld [vmem:[#allocation0 + $0x1f0] sm:$0xf] }
 0x200   :  { %1533 = vst [vmem:[#allocation0 + $0xfe8] sm:$0xf] %v4862_v63  }
 0x201   :  { %1535 = vst [vmem:[#allocation0 + $0xff4] sm:$0xf0] %v4862_v63   ;;  %v1915_v63 = vld [vmem:[#allocation0 + $0x1f8] sm:$0xf] }
 0x202   :  { %1541 = vst [vmem:[%s7689_s1] sm:$0xf] %v1538_v0  ;;  %v1921_v0 = vld [vmem:[#allocation0 + $0x200] sm:$0xf] }
 0x203   :  { %4863 = vst [vmem:[%s7689_s1 + $0x4] sm:$0xf] %v1543_v1  ;;  %v1927_v1 = vld [vmem:[#allocation0 + $0x208] sm:$0xf] }
 0x204   :  { %4864 = vst [vmem:[%s7689_s1 + $0x8] sm:$0xf] %v1549_v2  ;;  %v1933_v2 = vld [vmem:[#allocation0 + $0x210] sm:$0xf] }
 0x205   :  { %4865 = vst [vmem:[%s7689_s1 + $0xc] sm:$0xf] %v1555_v3  ;;  %v1939_v3 = vld [vmem:[#allocation0 + $0x218] sm:$0xf] }
 0x206   :  { %4866 = vst [vmem:[%s7689_s1 + $0x10] sm:$0xf] %v1561_v4  ;;  %v1945_v4 = vld [vmem:[#allocation0 + $0x220] sm:$0xf] }
 0x207   :  { %4867 = vst [vmem:[%s7689_s1 + $0x14] sm:$0xf] %v1567_v5  ;;  %v1951_v5 = vld [vmem:[#allocation0 + $0x228] sm:$0xf] }
 0x208   :  { %4868 = vst [vmem:[%s7689_s1 + $0x18] sm:$0xf] %v1573_v6  ;;  %v1957_v6 = vld [vmem:[#allocation0 + $0x230] sm:$0xf] }
 0x209   :  { %4869 = vst [vmem:[%s7689_s1 + $0x1c] sm:$0xf] %v1579_v7  ;;  %v1963_v7 = vld [vmem:[#allocation0 + $0x238] sm:$0xf] }
 0x20a   :  { %4870 = vst [vmem:[%s7689_s1 + $0x20] sm:$0xf] %v1585_v8  ;;  %v1969_v8 = vld [vmem:[#allocation0 + $0x240] sm:$0xf] }
 0x20b   :  { %4871 = vst [vmem:[%s7689_s1 + $0x24] sm:$0xf] %v1591_v9  ;;  %v1975_v9 = vld [vmem:[#allocation0 + $0x248] sm:$0xf] }
 0x20c   :  { %4872 = vst [vmem:[%s7689_s1 + $0x28] sm:$0xf] %v1597_v10  ;;  %v1981_v10 = vld [vmem:[#allocation0 + $0x250] sm:$0xf] }
 0x20d   :  { %4873 = vst [vmem:[%s7689_s1 + $0x2c] sm:$0xf] %v1603_v11  ;;  %v1987_v11 = vld [vmem:[#allocation0 + $0x258] sm:$0xf] }
 0x20e   :  { %4874 = vst [vmem:[%s7689_s1 + $0x30] sm:$0xf] %v1609_v12  ;;  %v1993_v12 = vld [vmem:[#allocation0 + $0x260] sm:$0xf] }
 0x20f   :  { %4875 = vst [vmem:[%s7689_s1 + $0x34] sm:$0xf] %v1615_v13  ;;  %v1999_v13 = vld [vmem:[#allocation0 + $0x268] sm:$0xf] }
 0x210   :  { %4876 = vst [vmem:[%s7689_s1 + $0x38] sm:$0xf] %v1621_v14  ;;  %v2005_v14 = vld [vmem:[#allocation0 + $0x270] sm:$0xf] }
 0x211   :  { %4877 = vst [vmem:[%s7689_s1 + $0x3c] sm:$0xf] %v1627_v15  ;;  %v2011_v15 = vld [vmem:[#allocation0 + $0x278] sm:$0xf] }
 0x212   :  { %4878 = vst [vmem:[%s7689_s1 + $0x40] sm:$0xf] %v1633_v16  ;;  %v2017_v16 = vld [vmem:[#allocation0 + $0x280] sm:$0xf] }
 0x213   :  { %4879 = vst [vmem:[%s7689_s1 + $0x44] sm:$0xf] %v1639_v17  ;;  %v2023_v17 = vld [vmem:[#allocation0 + $0x288] sm:$0xf] }
 0x214   :  { %4880 = vst [vmem:[%s7689_s1 + $0x48] sm:$0xf] %v1645_v18  ;;  %v2029_v18 = vld [vmem:[#allocation0 + $0x290] sm:$0xf] }
 0x215   :  { %4881 = vst [vmem:[%s7689_s1 + $0x4c] sm:$0xf] %v1651_v19  ;;  %v2035_v19 = vld [vmem:[#allocation0 + $0x298] sm:$0xf] }
 0x216   :  { %4882 = vst [vmem:[%s7689_s1 + $0x50] sm:$0xf] %v1657_v20  ;;  %v2041_v20 = vld [vmem:[#allocation0 + $0x2a0] sm:$0xf] }
 0x217   :  { %4883 = vst [vmem:[%s7689_s1 + $0x54] sm:$0xf] %v1663_v21  ;;  %v2047_v21 = vld [vmem:[#allocation0 + $0x2a8] sm:$0xf] }
 0x218   :  { %4884 = vst [vmem:[%s7689_s1 + $0x58] sm:$0xf] %v1669_v22  ;;  %v2053_v22 = vld [vmem:[#allocation0 + $0x2b0] sm:$0xf] }
 0x219   :  { %4885 = vst [vmem:[%s7689_s1 + $0x5c] sm:$0xf] %v1675_v23  ;;  %v2059_v23 = vld [vmem:[#allocation0 + $0x2b8] sm:$0xf] }
 0x21a   :  { %4886 = vst [vmem:[%s7689_s1 + $0x60] sm:$0xf] %v1681_v24  ;;  %v2065_v24 = vld [vmem:[#allocation0 + $0x2c0] sm:$0xf] }
 0x21b   :  { %4887 = vst [vmem:[%s7689_s1 + $0x64] sm:$0xf] %v1687_v25  ;;  %v2071_v25 = vld [vmem:[#allocation0 + $0x2c8] sm:$0xf] }
 0x21c   :  { %4888 = vst [vmem:[%s7689_s1 + $0x68] sm:$0xf] %v1693_v26  ;;  %v2077_v26 = vld [vmem:[#allocation0 + $0x2d0] sm:$0xf] }
 0x21d   :  { %4889 = vst [vmem:[%s7689_s1 + $0x6c] sm:$0xf] %v1699_v27  ;;  %v2083_v27 = vld [vmem:[#allocation0 + $0x2d8] sm:$0xf] }
 0x21e   :  { %4890 = vst [vmem:[%s7689_s1 + $0x70] sm:$0xf] %v1705_v28  ;;  %v2089_v28 = vld [vmem:[#allocation0 + $0x2e0] sm:$0xf] }
 0x21f   :  { %4891 = vst [vmem:[%s7689_s1 + $0x74] sm:$0xf] %v1711_v29  ;;  %v2095_v29 = vld [vmem:[#allocation0 + $0x2e8] sm:$0xf] }
 0x220   :  { %4892 = vst [vmem:[%s7689_s1 + $0x78] sm:$0xf] %v1717_v30  ;;  %v2101_v30 = vld [vmem:[#allocation0 + $0x2f0] sm:$0xf] }
 0x221   :  { %4893 = vst [vmem:[%s7689_s1 + $0x7c] sm:$0xf] %v1723_v31  ;;  %v2107_v31 = vld [vmem:[#allocation0 + $0x2f8] sm:$0xf] }
 0x222   :  { %4894 = vst [vmem:[%s7689_s1 + $0x80] sm:$0xf] %v1729_v32  ;;  %v2113_v32 = vld [vmem:[#allocation0 + $0x300] sm:$0xf] }
 0x223   :  { %4895 = vst [vmem:[%s7689_s1 + $0x84] sm:$0xf] %v1735_v33  ;;  %v2119_v33 = vld [vmem:[#allocation0 + $0x308] sm:$0xf] }
 0x224   :  { %4896 = vst [vmem:[%s7689_s1 + $0x88] sm:$0xf] %v1741_v34  ;;  %v2125_v34 = vld [vmem:[#allocation0 + $0x310] sm:$0xf] }
 0x225   :  { %4897 = vst [vmem:[%s7689_s1 + $0x8c] sm:$0xf] %v1747_v35  ;;  %v2131_v35 = vld [vmem:[#allocation0 + $0x318] sm:$0xf] }
 0x226   :  { %4898 = vst [vmem:[%s7689_s1 + $0x90] sm:$0xf] %v1753_v36  ;;  %v2137_v36 = vld [vmem:[#allocation0 + $0x320] sm:$0xf] }
 0x227   :  { %4899 = vst [vmem:[%s7689_s1 + $0x94] sm:$0xf] %v1759_v37  ;;  %v2143_v37 = vld [vmem:[#allocation0 + $0x328] sm:$0xf] }
 0x228   :  { %4900 = vst [vmem:[%s7689_s1 + $0x98] sm:$0xf] %v1765_v38  ;;  %v2149_v38 = vld [vmem:[#allocation0 + $0x330] sm:$0xf] }
 0x229   :  { %4901 = vst [vmem:[%s7689_s1 + $0x9c] sm:$0xf] %v1771_v39  ;;  %v2155_v39 = vld [vmem:[#allocation0 + $0x338] sm:$0xf] }
 0x22a   :  { %4902 = vst [vmem:[%s7689_s1 + $0xa0] sm:$0xf] %v1777_v40  ;;  %v2161_v40 = vld [vmem:[#allocation0 + $0x340] sm:$0xf] }
 0x22b   :  { %4903 = vst [vmem:[%s7689_s1 + $0xa4] sm:$0xf] %v1783_v41  ;;  %v2167_v41 = vld [vmem:[#allocation0 + $0x348] sm:$0xf] }
 0x22c   :  { %4904 = vst [vmem:[%s7689_s1 + $0xa8] sm:$0xf] %v1789_v42  ;;  %v2173_v42 = vld [vmem:[#allocation0 + $0x350] sm:$0xf] }
 0x22d   :  { %4905 = vst [vmem:[%s7689_s1 + $0xac] sm:$0xf] %v1795_v43  ;;  %v2179_v43 = vld [vmem:[#allocation0 + $0x358] sm:$0xf] }
 0x22e   :  { %4906 = vst [vmem:[%s7689_s1 + $0xb0] sm:$0xf] %v1801_v44  ;;  %v2185_v44 = vld [vmem:[#allocation0 + $0x360] sm:$0xf] }
 0x22f   :  { %4907 = vst [vmem:[%s7689_s1 + $0xb4] sm:$0xf] %v1807_v45  ;;  %v2191_v45 = vld [vmem:[#allocation0 + $0x368] sm:$0xf] }
 0x230   :  { %4908 = vst [vmem:[%s7689_s1 + $0xb8] sm:$0xf] %v1813_v46  ;;  %v2197_v46 = vld [vmem:[#allocation0 + $0x370] sm:$0xf] }
 0x231   :  { %4909 = vst [vmem:[%s7689_s1 + $0xbc] sm:$0xf] %v1819_v47  ;;  %v2203_v47 = vld [vmem:[#allocation0 + $0x378] sm:$0xf] }
 0x232   :  { %4910 = vst [vmem:[%s7689_s1 + $0xc0] sm:$0xf] %v1825_v48  ;;  %v2209_v48 = vld [vmem:[#allocation0 + $0x380] sm:$0xf] }
 0x233   :  { %4911 = vst [vmem:[%s7689_s1 + $0xc4] sm:$0xf] %v1831_v49  ;;  %v2215_v49 = vld [vmem:[#allocation0 + $0x388] sm:$0xf] }
 0x234   :  { %4912 = vst [vmem:[%s7689_s1 + $0xc8] sm:$0xf] %v1837_v50  ;;  %v2221_v50 = vld [vmem:[#allocation0 + $0x390] sm:$0xf] }
 0x235   :  { %4913 = vst [vmem:[%s7689_s1 + $0xcc] sm:$0xf] %v1843_v51  ;;  %v2227_v51 = vld [vmem:[#allocation0 + $0x398] sm:$0xf] }
 0x236   :  { %4914 = vst [vmem:[%s7689_s1 + $0xd0] sm:$0xf] %v1849_v52  ;;  %v2233_v52 = vld [vmem:[#allocation0 + $0x3a0] sm:$0xf] }
 0x237   :  { %4915 = vst [vmem:[%s7689_s1 + $0xd4] sm:$0xf] %v1855_v53  ;;  %v2239_v53 = vld [vmem:[#allocation0 + $0x3a8] sm:$0xf] }
 0x238   :  { %4916 = vst [vmem:[%s7689_s1 + $0xd8] sm:$0xf] %v1861_v54  ;;  %v2245_v54 = vld [vmem:[#allocation0 + $0x3b0] sm:$0xf] }
 0x239   :  { %4917 = vst [vmem:[%s7689_s1 + $0xdc] sm:$0xf] %v1867_v55  ;;  %v2251_v55 = vld [vmem:[#allocation0 + $0x3b8] sm:$0xf] }
 0x23a   :  { %4918 = vst [vmem:[%s7689_s1 + $0xe0] sm:$0xf] %v1873_v56  ;;  %v2257_v56 = vld [vmem:[#allocation0 + $0x3c0] sm:$0xf] }
 0x23b   :  { %4919 = vst [vmem:[%s7689_s1 + $0xe4] sm:$0xf] %v1879_v57  ;;  %v2263_v57 = vld [vmem:[#allocation0 + $0x3c8] sm:$0xf] }
 0x23c   :  { %4920 = vst [vmem:[%s7689_s1 + $0xe8] sm:$0xf] %v1885_v58  ;;  %v2269_v58 = vld [vmem:[#allocation0 + $0x3d0] sm:$0xf] }
 0x23d   :  { %4921 = vst [vmem:[%s7689_s1 + $0xec] sm:$0xf] %v1891_v59  ;;  %v2275_v59 = vld [vmem:[#allocation0 + $0x3d8] sm:$0xf] }
 0x23e   :  { %4922 = vst [vmem:[%s7689_s1 + $0xf0] sm:$0xf] %v1897_v60  ;;  %v2281_v60 = vld [vmem:[#allocation0 + $0x3e0] sm:$0xf] }
 0x23f   :  { %4923 = vst [vmem:[%s7689_s1 + $0xf4] sm:$0xf] %v1903_v61  ;;  %v2287_v61 = vld [vmem:[#allocation0 + $0x3e8] sm:$0xf] }
 0x240   :  { %4924 = vst [vmem:[%s7689_s1 + $0xf8] sm:$0xf] %v1909_v62  ;;  %v2293_v62 = vld [vmem:[#allocation0 + $0x3f0] sm:$0xf] }
 0x241   :  { %4925 = vst [vmem:[%s7689_s1 + $0xfc] sm:$0xf] %v1915_v63  ;;  %v2299_v63 = vld [vmem:[#allocation0 + $0x3f8] sm:$0xf] }
 0x242   :  { %4926 = vst [vmem:[%s7689_s1 + $0x100] sm:$0xf] %v1921_v0  ;;  %v2305_v0 = vld [vmem:[#allocation0 + $0x400] sm:$0xf] }
 0x243   :  { %4927 = vst [vmem:[%s7689_s1 + $0x104] sm:$0xf] %v1927_v1  ;;  %v2311_v1 = vld [vmem:[#allocation0 + $0x408] sm:$0xf] }
 0x244   :  { %4928 = vst [vmem:[%s7689_s1 + $0x108] sm:$0xf] %v1933_v2  ;;  %v2317_v2 = vld [vmem:[#allocation0 + $0x410] sm:$0xf] }
 0x245   :  { %4929 = vst [vmem:[%s7689_s1 + $0x10c] sm:$0xf] %v1939_v3  ;;  %v2323_v3 = vld [vmem:[#allocation0 + $0x418] sm:$0xf] }
 0x246   :  { %4930 = vst [vmem:[%s7689_s1 + $0x110] sm:$0xf] %v1945_v4  ;;  %v2329_v4 = vld [vmem:[#allocation0 + $0x420] sm:$0xf] }
 0x247   :  { %4931 = vst [vmem:[%s7689_s1 + $0x114] sm:$0xf] %v1951_v5  ;;  %v2335_v5 = vld [vmem:[#allocation0 + $0x428] sm:$0xf] }
 0x248   :  { %4932 = vst [vmem:[%s7689_s1 + $0x118] sm:$0xf] %v1957_v6  ;;  %v2341_v6 = vld [vmem:[#allocation0 + $0x430] sm:$0xf] }
 0x249   :  { %4933 = vst [vmem:[%s7689_s1 + $0x11c] sm:$0xf] %v1963_v7  ;;  %v2347_v7 = vld [vmem:[#allocation0 + $0x438] sm:$0xf] }
 0x24a   :  { %4934 = vst [vmem:[%s7689_s1 + $0x120] sm:$0xf] %v1969_v8  ;;  %v2353_v8 = vld [vmem:[#allocation0 + $0x440] sm:$0xf] }
 0x24b   :  { %4935 = vst [vmem:[%s7689_s1 + $0x124] sm:$0xf] %v1975_v9  ;;  %v2359_v9 = vld [vmem:[#allocation0 + $0x448] sm:$0xf] }
 0x24c   :  { %4936 = vst [vmem:[%s7689_s1 + $0x128] sm:$0xf] %v1981_v10  ;;  %v2365_v10 = vld [vmem:[#allocation0 + $0x450] sm:$0xf] }
 0x24d   :  { %4937 = vst [vmem:[%s7689_s1 + $0x12c] sm:$0xf] %v1987_v11  ;;  %v2371_v11 = vld [vmem:[#allocation0 + $0x458] sm:$0xf] }
 0x24e   :  { %4938 = vst [vmem:[%s7689_s1 + $0x130] sm:$0xf] %v1993_v12  ;;  %v2377_v12 = vld [vmem:[#allocation0 + $0x460] sm:$0xf] }
 0x24f   :  { %4939 = vst [vmem:[%s7689_s1 + $0x134] sm:$0xf] %v1999_v13  ;;  %v2383_v13 = vld [vmem:[#allocation0 + $0x468] sm:$0xf] }
 0x250   :  { %4940 = vst [vmem:[%s7689_s1 + $0x138] sm:$0xf] %v2005_v14  ;;  %v2389_v14 = vld [vmem:[#allocation0 + $0x470] sm:$0xf] }
 0x251   :  { %4941 = vst [vmem:[%s7689_s1 + $0x13c] sm:$0xf] %v2011_v15  ;;  %v2395_v15 = vld [vmem:[#allocation0 + $0x478] sm:$0xf] }
 0x252   :  { %4942 = vst [vmem:[%s7689_s1 + $0x140] sm:$0xf] %v2017_v16  ;;  %v2401_v16 = vld [vmem:[#allocation0 + $0x480] sm:$0xf] }
 0x253   :  { %4943 = vst [vmem:[%s7689_s1 + $0x144] sm:$0xf] %v2023_v17  ;;  %v2407_v17 = vld [vmem:[#allocation0 + $0x488] sm:$0xf] }
 0x254   :  { %4944 = vst [vmem:[%s7689_s1 + $0x148] sm:$0xf] %v2029_v18  ;;  %v2413_v18 = vld [vmem:[#allocation0 + $0x490] sm:$0xf] }
 0x255   :  { %4945 = vst [vmem:[%s7689_s1 + $0x14c] sm:$0xf] %v2035_v19  ;;  %v2419_v19 = vld [vmem:[#allocation0 + $0x498] sm:$0xf] }
 0x256   :  { %4946 = vst [vmem:[%s7689_s1 + $0x150] sm:$0xf] %v2041_v20  ;;  %v2425_v20 = vld [vmem:[#allocation0 + $0x4a0] sm:$0xf] }
 0x257   :  { %4947 = vst [vmem:[%s7689_s1 + $0x154] sm:$0xf] %v2047_v21  ;;  %v2431_v21 = vld [vmem:[#allocation0 + $0x4a8] sm:$0xf] }
 0x258   :  { %4948 = vst [vmem:[%s7689_s1 + $0x158] sm:$0xf] %v2053_v22  ;;  %v2437_v22 = vld [vmem:[#allocation0 + $0x4b0] sm:$0xf] }
 0x259   :  { %4949 = vst [vmem:[%s7689_s1 + $0x15c] sm:$0xf] %v2059_v23  ;;  %v2443_v23 = vld [vmem:[#allocation0 + $0x4b8] sm:$0xf] }
 0x25a   :  { %4950 = vst [vmem:[%s7689_s1 + $0x160] sm:$0xf] %v2065_v24  ;;  %v2449_v24 = vld [vmem:[#allocation0 + $0x4c0] sm:$0xf] }
 0x25b   :  { %4951 = vst [vmem:[%s7689_s1 + $0x164] sm:$0xf] %v2071_v25  ;;  %v2455_v25 = vld [vmem:[#allocation0 + $0x4c8] sm:$0xf] }
 0x25c   :  { %4952 = vst [vmem:[%s7689_s1 + $0x168] sm:$0xf] %v2077_v26  ;;  %v2461_v26 = vld [vmem:[#allocation0 + $0x4d0] sm:$0xf] }
 0x25d   :  { %4953 = vst [vmem:[%s7689_s1 + $0x16c] sm:$0xf] %v2083_v27  ;;  %v2467_v27 = vld [vmem:[#allocation0 + $0x4d8] sm:$0xf] }
 0x25e   :  { %4954 = vst [vmem:[%s7689_s1 + $0x170] sm:$0xf] %v2089_v28  ;;  %v2473_v28 = vld [vmem:[#allocation0 + $0x4e0] sm:$0xf] }
 0x25f   :  { %4955 = vst [vmem:[%s7689_s1 + $0x174] sm:$0xf] %v2095_v29  ;;  %v2479_v29 = vld [vmem:[#allocation0 + $0x4e8] sm:$0xf] }
 0x260   :  { %4956 = vst [vmem:[%s7689_s1 + $0x178] sm:$0xf] %v2101_v30  ;;  %v2485_v30 = vld [vmem:[#allocation0 + $0x4f0] sm:$0xf] }
 0x261   :  { %4957 = vst [vmem:[%s7689_s1 + $0x17c] sm:$0xf] %v2107_v31  ;;  %v2491_v31 = vld [vmem:[#allocation0 + $0x4f8] sm:$0xf] }
 0x262   :  { %4958 = vst [vmem:[%s7689_s1 + $0x180] sm:$0xf] %v2113_v32  ;;  %v2497_v32 = vld [vmem:[#allocation0 + $0x500] sm:$0xf] }
 0x263   :  { %4959 = vst [vmem:[%s7689_s1 + $0x184] sm:$0xf] %v2119_v33  ;;  %v2503_v33 = vld [vmem:[#allocation0 + $0x508] sm:$0xf] }
 0x264   :  { %4960 = vst [vmem:[%s7689_s1 + $0x188] sm:$0xf] %v2125_v34  ;;  %v2509_v34 = vld [vmem:[#allocation0 + $0x510] sm:$0xf] }
 0x265   :  { %4961 = vst [vmem:[%s7689_s1 + $0x18c] sm:$0xf] %v2131_v35  ;;  %v2515_v35 = vld [vmem:[#allocation0 + $0x518] sm:$0xf] }
 0x266   :  { %4962 = vst [vmem:[%s7689_s1 + $0x190] sm:$0xf] %v2137_v36  ;;  %v2521_v36 = vld [vmem:[#allocation0 + $0x520] sm:$0xf] }
 0x267   :  { %4963 = vst [vmem:[%s7689_s1 + $0x194] sm:$0xf] %v2143_v37  ;;  %v2527_v37 = vld [vmem:[#allocation0 + $0x528] sm:$0xf] }
 0x268   :  { %4964 = vst [vmem:[%s7689_s1 + $0x198] sm:$0xf] %v2149_v38  ;;  %v2533_v38 = vld [vmem:[#allocation0 + $0x530] sm:$0xf] }
 0x269   :  { %4965 = vst [vmem:[%s7689_s1 + $0x19c] sm:$0xf] %v2155_v39  ;;  %v2539_v39 = vld [vmem:[#allocation0 + $0x538] sm:$0xf] }
 0x26a   :  { %4966 = vst [vmem:[%s7689_s1 + $0x1a0] sm:$0xf] %v2161_v40  ;;  %v2545_v40 = vld [vmem:[#allocation0 + $0x540] sm:$0xf] }
 0x26b   :  { %4967 = vst [vmem:[%s7689_s1 + $0x1a4] sm:$0xf] %v2167_v41  ;;  %v2551_v41 = vld [vmem:[#allocation0 + $0x548] sm:$0xf] }
 0x26c   :  { %4968 = vst [vmem:[%s7689_s1 + $0x1a8] sm:$0xf] %v2173_v42  ;;  %v2557_v42 = vld [vmem:[#allocation0 + $0x550] sm:$0xf] }
 0x26d   :  { %4969 = vst [vmem:[%s7689_s1 + $0x1ac] sm:$0xf] %v2179_v43  ;;  %v2563_v43 = vld [vmem:[#allocation0 + $0x558] sm:$0xf] }
 0x26e   :  { %4970 = vst [vmem:[%s7689_s1 + $0x1b0] sm:$0xf] %v2185_v44  ;;  %v2569_v44 = vld [vmem:[#allocation0 + $0x560] sm:$0xf] }
 0x26f   :  { %4971 = vst [vmem:[%s7689_s1 + $0x1b4] sm:$0xf] %v2191_v45  ;;  %v2575_v45 = vld [vmem:[#allocation0 + $0x568] sm:$0xf] }
 0x270   :  { %4972 = vst [vmem:[%s7689_s1 + $0x1b8] sm:$0xf] %v2197_v46  ;;  %v2581_v46 = vld [vmem:[#allocation0 + $0x570] sm:$0xf] }
 0x271   :  { %4973 = vst [vmem:[%s7689_s1 + $0x1bc] sm:$0xf] %v2203_v47  ;;  %v2587_v47 = vld [vmem:[#allocation0 + $0x578] sm:$0xf] }
 0x272   :  { %4974 = vst [vmem:[%s7689_s1 + $0x1c0] sm:$0xf] %v2209_v48  ;;  %v2593_v48 = vld [vmem:[#allocation0 + $0x580] sm:$0xf] }
 0x273   :  { %4975 = vst [vmem:[%s7689_s1 + $0x1c4] sm:$0xf] %v2215_v49  ;;  %v2599_v49 = vld [vmem:[#allocation0 + $0x588] sm:$0xf] }
 0x274   :  { %4976 = vst [vmem:[%s7689_s1 + $0x1c8] sm:$0xf] %v2221_v50  ;;  %v2605_v50 = vld [vmem:[#allocation0 + $0x590] sm:$0xf] }
 0x275   :  { %4977 = vst [vmem:[%s7689_s1 + $0x1cc] sm:$0xf] %v2227_v51  ;;  %v2611_v51 = vld [vmem:[#allocation0 + $0x598] sm:$0xf] }
 0x276   :  { %4978 = vst [vmem:[%s7689_s1 + $0x1d0] sm:$0xf] %v2233_v52  ;;  %v2617_v52 = vld [vmem:[#allocation0 + $0x5a0] sm:$0xf] }
 0x277   :  { %4979 = vst [vmem:[%s7689_s1 + $0x1d4] sm:$0xf] %v2239_v53  ;;  %v2623_v53 = vld [vmem:[#allocation0 + $0x5a8] sm:$0xf] }
 0x278   :  { %4980 = vst [vmem:[%s7689_s1 + $0x1d8] sm:$0xf] %v2245_v54  ;;  %v2629_v54 = vld [vmem:[#allocation0 + $0x5b0] sm:$0xf] }
 0x279   :  { %4981 = vst [vmem:[%s7689_s1 + $0x1dc] sm:$0xf] %v2251_v55  ;;  %v2635_v55 = vld [vmem:[#allocation0 + $0x5b8] sm:$0xf] }
 0x27a   :  { %4982 = vst [vmem:[%s7689_s1 + $0x1e0] sm:$0xf] %v2257_v56  ;;  %v2641_v56 = vld [vmem:[#allocation0 + $0x5c0] sm:$0xf] }
 0x27b   :  { %4983 = vst [vmem:[%s7689_s1 + $0x1e4] sm:$0xf] %v2263_v57  ;;  %v2647_v57 = vld [vmem:[#allocation0 + $0x5c8] sm:$0xf] }
 0x27c   :  { %4984 = vst [vmem:[%s7689_s1 + $0x1e8] sm:$0xf] %v2269_v58  ;;  %v2653_v58 = vld [vmem:[#allocation0 + $0x5d0] sm:$0xf] }
 0x27d   :  { %4985 = vst [vmem:[%s7689_s1 + $0x1ec] sm:$0xf] %v2275_v59  ;;  %v2659_v59 = vld [vmem:[#allocation0 + $0x5d8] sm:$0xf] }
 0x27e   :  { %4986 = vst [vmem:[%s7689_s1 + $0x1f0] sm:$0xf] %v2281_v60  ;;  %v2665_v60 = vld [vmem:[#allocation0 + $0x5e0] sm:$0xf] }
 0x27f   :  { %4987 = vst [vmem:[%s7689_s1 + $0x1f4] sm:$0xf] %v2287_v61  ;;  %v2671_v61 = vld [vmem:[#allocation0 + $0x5e8] sm:$0xf] }
 0x280   :  { %4988 = vst [vmem:[%s7689_s1 + $0x1f8] sm:$0xf] %v2293_v62  ;;  %v2677_v62 = vld [vmem:[#allocation0 + $0x5f0] sm:$0xf] }
 0x281   :  { %4989 = vst [vmem:[%s7689_s1 + $0x1fc] sm:$0xf] %v2299_v63  ;;  %v2683_v63 = vld [vmem:[#allocation0 + $0x5f8] sm:$0xf] }
 0x282   :  { %4990 = vst [vmem:[%s7689_s1 + $0x200] sm:$0xf] %v2305_v0  ;;  %v2689_v0 = vld [vmem:[#allocation0 + $0x600] sm:$0xf] }
 0x283   :  { %4991 = vst [vmem:[%s7689_s1 + $0x204] sm:$0xf] %v2311_v1  ;;  %v2695_v1 = vld [vmem:[#allocation0 + $0x608] sm:$0xf] }
 0x284   :  { %4992 = vst [vmem:[%s7689_s1 + $0x208] sm:$0xf] %v2317_v2  ;;  %v2701_v2 = vld [vmem:[#allocation0 + $0x610] sm:$0xf] }
 0x285   :  { %4993 = vst [vmem:[%s7689_s1 + $0x20c] sm:$0xf] %v2323_v3  ;;  %v2707_v3 = vld [vmem:[#allocation0 + $0x618] sm:$0xf] }
 0x286   :  { %4994 = vst [vmem:[%s7689_s1 + $0x210] sm:$0xf] %v2329_v4  ;;  %v2713_v4 = vld [vmem:[#allocation0 + $0x620] sm:$0xf] }
 0x287   :  { %4995 = vst [vmem:[%s7689_s1 + $0x214] sm:$0xf] %v2335_v5  ;;  %v2719_v5 = vld [vmem:[#allocation0 + $0x628] sm:$0xf] }
 0x288   :  { %4996 = vst [vmem:[%s7689_s1 + $0x218] sm:$0xf] %v2341_v6  ;;  %v2725_v6 = vld [vmem:[#allocation0 + $0x630] sm:$0xf] }
 0x289   :  { %4997 = vst [vmem:[%s7689_s1 + $0x21c] sm:$0xf] %v2347_v7  ;;  %v2731_v7 = vld [vmem:[#allocation0 + $0x638] sm:$0xf] }
 0x28a   :  { %4998 = vst [vmem:[%s7689_s1 + $0x220] sm:$0xf] %v2353_v8  ;;  %v2737_v8 = vld [vmem:[#allocation0 + $0x640] sm:$0xf] }
 0x28b   :  { %4999 = vst [vmem:[%s7689_s1 + $0x224] sm:$0xf] %v2359_v9  ;;  %v2743_v9 = vld [vmem:[#allocation0 + $0x648] sm:$0xf] }
 0x28c   :  { %5000 = vst [vmem:[%s7689_s1 + $0x228] sm:$0xf] %v2365_v10  ;;  %v2749_v10 = vld [vmem:[#allocation0 + $0x650] sm:$0xf] }
 0x28d   :  { %5001 = vst [vmem:[%s7689_s1 + $0x22c] sm:$0xf] %v2371_v11  ;;  %v2755_v11 = vld [vmem:[#allocation0 + $0x658] sm:$0xf] }
 0x28e   :  { %5002 = vst [vmem:[%s7689_s1 + $0x230] sm:$0xf] %v2377_v12  ;;  %v2761_v12 = vld [vmem:[#allocation0 + $0x660] sm:$0xf] }
 0x28f   :  { %5003 = vst [vmem:[%s7689_s1 + $0x234] sm:$0xf] %v2383_v13  ;;  %v2767_v13 = vld [vmem:[#allocation0 + $0x668] sm:$0xf] }
 0x290   :  { %5004 = vst [vmem:[%s7689_s1 + $0x238] sm:$0xf] %v2389_v14  ;;  %v2773_v14 = vld [vmem:[#allocation0 + $0x670] sm:$0xf] }
 0x291   :  { %5005 = vst [vmem:[%s7689_s1 + $0x23c] sm:$0xf] %v2395_v15  ;;  %v2779_v15 = vld [vmem:[#allocation0 + $0x678] sm:$0xf] }
 0x292   :  { %5006 = vst [vmem:[%s7689_s1 + $0x240] sm:$0xf] %v2401_v16  ;;  %v2785_v16 = vld [vmem:[#allocation0 + $0x680] sm:$0xf] }
 0x293   :  { %5007 = vst [vmem:[%s7689_s1 + $0x244] sm:$0xf] %v2407_v17  ;;  %v2791_v17 = vld [vmem:[#allocation0 + $0x688] sm:$0xf] }
 0x294   :  { %5008 = vst [vmem:[%s7689_s1 + $0x248] sm:$0xf] %v2413_v18  ;;  %v2797_v18 = vld [vmem:[#allocation0 + $0x690] sm:$0xf] }
 0x295   :  { %5009 = vst [vmem:[%s7689_s1 + $0x24c] sm:$0xf] %v2419_v19  ;;  %v2803_v19 = vld [vmem:[#allocation0 + $0x698] sm:$0xf] }
 0x296   :  { %5010 = vst [vmem:[%s7689_s1 + $0x250] sm:$0xf] %v2425_v20  ;;  %v2809_v20 = vld [vmem:[#allocation0 + $0x6a0] sm:$0xf] }
 0x297   :  { %5011 = vst [vmem:[%s7689_s1 + $0x254] sm:$0xf] %v2431_v21  ;;  %v2815_v21 = vld [vmem:[#allocation0 + $0x6a8] sm:$0xf] }
 0x298   :  { %5012 = vst [vmem:[%s7689_s1 + $0x258] sm:$0xf] %v2437_v22  ;;  %v2821_v22 = vld [vmem:[#allocation0 + $0x6b0] sm:$0xf] }
 0x299   :  { %5013 = vst [vmem:[%s7689_s1 + $0x25c] sm:$0xf] %v2443_v23  ;;  %v2827_v23 = vld [vmem:[#allocation0 + $0x6b8] sm:$0xf] }
 0x29a   :  { %5014 = vst [vmem:[%s7689_s1 + $0x260] sm:$0xf] %v2449_v24  ;;  %v2833_v24 = vld [vmem:[#allocation0 + $0x6c0] sm:$0xf] }
 0x29b   :  { %5015 = vst [vmem:[%s7689_s1 + $0x264] sm:$0xf] %v2455_v25  ;;  %v2839_v25 = vld [vmem:[#allocation0 + $0x6c8] sm:$0xf] }
 0x29c   :  { %5016 = vst [vmem:[%s7689_s1 + $0x268] sm:$0xf] %v2461_v26  ;;  %v2845_v26 = vld [vmem:[#allocation0 + $0x6d0] sm:$0xf] }
 0x29d   :  { %5017 = vst [vmem:[%s7689_s1 + $0x26c] sm:$0xf] %v2467_v27  ;;  %v2851_v27 = vld [vmem:[#allocation0 + $0x6d8] sm:$0xf] }
 0x29e   :  { %5018 = vst [vmem:[%s7689_s1 + $0x270] sm:$0xf] %v2473_v28  ;;  %v2857_v28 = vld [vmem:[#allocation0 + $0x6e0] sm:$0xf] }
 0x29f   :  { %5019 = vst [vmem:[%s7689_s1 + $0x274] sm:$0xf] %v2479_v29  ;;  %v2863_v29 = vld [vmem:[#allocation0 + $0x6e8] sm:$0xf] }
 0x2a0   :  { %5020 = vst [vmem:[%s7689_s1 + $0x278] sm:$0xf] %v2485_v30  ;;  %v2869_v30 = vld [vmem:[#allocation0 + $0x6f0] sm:$0xf] }
 0x2a1   :  { %5021 = vst [vmem:[%s7689_s1 + $0x27c] sm:$0xf] %v2491_v31  ;;  %v2875_v31 = vld [vmem:[#allocation0 + $0x6f8] sm:$0xf] }
 0x2a2   :  { %5022 = vst [vmem:[%s7689_s1 + $0x280] sm:$0xf] %v2497_v32  ;;  %v2881_v32 = vld [vmem:[#allocation0 + $0x700] sm:$0xf] }
 0x2a3   :  { %5023 = vst [vmem:[%s7689_s1 + $0x284] sm:$0xf] %v2503_v33  ;;  %v2887_v33 = vld [vmem:[#allocation0 + $0x708] sm:$0xf] }
 0x2a4   :  { %5024 = vst [vmem:[%s7689_s1 + $0x288] sm:$0xf] %v2509_v34  ;;  %v2893_v34 = vld [vmem:[#allocation0 + $0x710] sm:$0xf] }
 0x2a5   :  { %5025 = vst [vmem:[%s7689_s1 + $0x28c] sm:$0xf] %v2515_v35  ;;  %v2899_v35 = vld [vmem:[#allocation0 + $0x718] sm:$0xf] }
 0x2a6   :  { %5026 = vst [vmem:[%s7689_s1 + $0x290] sm:$0xf] %v2521_v36  ;;  %v2905_v36 = vld [vmem:[#allocation0 + $0x720] sm:$0xf] }
 0x2a7   :  { %5027 = vst [vmem:[%s7689_s1 + $0x294] sm:$0xf] %v2527_v37  ;;  %v2911_v37 = vld [vmem:[#allocation0 + $0x728] sm:$0xf] }
 0x2a8   :  { %5028 = vst [vmem:[%s7689_s1 + $0x298] sm:$0xf] %v2533_v38  ;;  %v2917_v38 = vld [vmem:[#allocation0 + $0x730] sm:$0xf] }
 0x2a9   :  { %5029 = vst [vmem:[%s7689_s1 + $0x29c] sm:$0xf] %v2539_v39  ;;  %v2923_v39 = vld [vmem:[#allocation0 + $0x738] sm:$0xf] }
 0x2aa   :  { %5030 = vst [vmem:[%s7689_s1 + $0x2a0] sm:$0xf] %v2545_v40  ;;  %v2929_v40 = vld [vmem:[#allocation0 + $0x740] sm:$0xf] }
 0x2ab   :  { %5031 = vst [vmem:[%s7689_s1 + $0x2a4] sm:$0xf] %v2551_v41  ;;  %v2935_v41 = vld [vmem:[#allocation0 + $0x748] sm:$0xf] }
 0x2ac   :  { %5032 = vst [vmem:[%s7689_s1 + $0x2a8] sm:$0xf] %v2557_v42  ;;  %v2941_v42 = vld [vmem:[#allocation0 + $0x750] sm:$0xf] }
 0x2ad   :  { %5033 = vst [vmem:[%s7689_s1 + $0x2ac] sm:$0xf] %v2563_v43  ;;  %v2947_v43 = vld [vmem:[#allocation0 + $0x758] sm:$0xf] }
 0x2ae   :  { %5034 = vst [vmem:[%s7689_s1 + $0x2b0] sm:$0xf] %v2569_v44  ;;  %v2953_v44 = vld [vmem:[#allocation0 + $0x760] sm:$0xf] }
 0x2af   :  { %5035 = vst [vmem:[%s7689_s1 + $0x2b4] sm:$0xf] %v2575_v45  ;;  %v2959_v45 = vld [vmem:[#allocation0 + $0x768] sm:$0xf] }
 0x2b0   :  { %5036 = vst [vmem:[%s7689_s1 + $0x2b8] sm:$0xf] %v2581_v46  ;;  %v2965_v46 = vld [vmem:[#allocation0 + $0x770] sm:$0xf] }
 0x2b1   :  { %5037 = vst [vmem:[%s7689_s1 + $0x2bc] sm:$0xf] %v2587_v47  ;;  %v2971_v47 = vld [vmem:[#allocation0 + $0x778] sm:$0xf] }
 0x2b2   :  { %5038 = vst [vmem:[%s7689_s1 + $0x2c0] sm:$0xf] %v2593_v48  ;;  %v2977_v48 = vld [vmem:[#allocation0 + $0x780] sm:$0xf] }
 0x2b3   :  { %5039 = vst [vmem:[%s7689_s1 + $0x2c4] sm:$0xf] %v2599_v49  ;;  %v2983_v49 = vld [vmem:[#allocation0 + $0x788] sm:$0xf] }
 0x2b4   :  { %5040 = vst [vmem:[%s7689_s1 + $0x2c8] sm:$0xf] %v2605_v50  ;;  %v2989_v50 = vld [vmem:[#allocation0 + $0x790] sm:$0xf] }
 0x2b5   :  { %5041 = vst [vmem:[%s7689_s1 + $0x2cc] sm:$0xf] %v2611_v51  ;;  %v2995_v51 = vld [vmem:[#allocation0 + $0x798] sm:$0xf] }
 0x2b6   :  { %5042 = vst [vmem:[%s7689_s1 + $0x2d0] sm:$0xf] %v2617_v52  ;;  %v3001_v52 = vld [vmem:[#allocation0 + $0x7a0] sm:$0xf] }
 0x2b7   :  { %5043 = vst [vmem:[%s7689_s1 + $0x2d4] sm:$0xf] %v2623_v53  ;;  %v3007_v53 = vld [vmem:[#allocation0 + $0x7a8] sm:$0xf] }
 0x2b8   :  { %5044 = vst [vmem:[%s7689_s1 + $0x2d8] sm:$0xf] %v2629_v54  ;;  %v3013_v54 = vld [vmem:[#allocation0 + $0x7b0] sm:$0xf] }
 0x2b9   :  { %5045 = vst [vmem:[%s7689_s1 + $0x2dc] sm:$0xf] %v2635_v55  ;;  %v3019_v55 = vld [vmem:[#allocation0 + $0x7b8] sm:$0xf] }
 0x2ba   :  { %5046 = vst [vmem:[%s7689_s1 + $0x2e0] sm:$0xf] %v2641_v56  ;;  %v3025_v56 = vld [vmem:[#allocation0 + $0x7c0] sm:$0xf] }
 0x2bb   :  { %5047 = vst [vmem:[%s7689_s1 + $0x2e4] sm:$0xf] %v2647_v57  ;;  %v3031_v57 = vld [vmem:[#allocation0 + $0x7c8] sm:$0xf] }
 0x2bc   :  { %5048 = vst [vmem:[%s7689_s1 + $0x2e8] sm:$0xf] %v2653_v58  ;;  %v3037_v58 = vld [vmem:[#allocation0 + $0x7d0] sm:$0xf] }
 0x2bd   :  { %5049 = vst [vmem:[%s7689_s1 + $0x2ec] sm:$0xf] %v2659_v59  ;;  %v3043_v59 = vld [vmem:[#allocation0 + $0x7d8] sm:$0xf] }
 0x2be   :  { %5050 = vst [vmem:[%s7689_s1 + $0x2f0] sm:$0xf] %v2665_v60  ;;  %v3049_v60 = vld [vmem:[#allocation0 + $0x7e0] sm:$0xf] }
 0x2bf   :  { %5051 = vst [vmem:[%s7689_s1 + $0x2f4] sm:$0xf] %v2671_v61  ;;  %v3055_v61 = vld [vmem:[#allocation0 + $0x7e8] sm:$0xf] }
 0x2c0   :  { %5052 = vst [vmem:[%s7689_s1 + $0x2f8] sm:$0xf] %v2677_v62  ;;  %v3061_v62 = vld [vmem:[#allocation0 + $0x7f0] sm:$0xf] }
 0x2c1   :  { %5053 = vst [vmem:[%s7689_s1 + $0x2fc] sm:$0xf] %v2683_v63  ;;  %v3067_v63 = vld [vmem:[#allocation0 + $0x7f8] sm:$0xf] }
 0x2c2   :  { %5054 = vst [vmem:[%s7689_s1 + $0x300] sm:$0xf] %v2689_v0  ;;  %v3073_v0 = vld [vmem:[#allocation0 + $0x800] sm:$0xf] }
 0x2c3   :  { %5055 = vst [vmem:[%s7689_s1 + $0x304] sm:$0xf] %v2695_v1  ;;  %v3079_v1 = vld [vmem:[#allocation0 + $0x808] sm:$0xf] }
 0x2c4   :  { %5056 = vst [vmem:[%s7689_s1 + $0x308] sm:$0xf] %v2701_v2  ;;  %v3085_v2 = vld [vmem:[#allocation0 + $0x810] sm:$0xf] }
 0x2c5   :  { %5057 = vst [vmem:[%s7689_s1 + $0x30c] sm:$0xf] %v2707_v3  ;;  %v3091_v3 = vld [vmem:[#allocation0 + $0x818] sm:$0xf] }
 0x2c6   :  { %5058 = vst [vmem:[%s7689_s1 + $0x310] sm:$0xf] %v2713_v4  ;;  %v3097_v4 = vld [vmem:[#allocation0 + $0x820] sm:$0xf] }
 0x2c7   :  { %5059 = vst [vmem:[%s7689_s1 + $0x314] sm:$0xf] %v2719_v5  ;;  %v3103_v5 = vld [vmem:[#allocation0 + $0x828] sm:$0xf] }
 0x2c8   :  { %5060 = vst [vmem:[%s7689_s1 + $0x318] sm:$0xf] %v2725_v6  ;;  %v3109_v6 = vld [vmem:[#allocation0 + $0x830] sm:$0xf] }
 0x2c9   :  { %5061 = vst [vmem:[%s7689_s1 + $0x31c] sm:$0xf] %v2731_v7  ;;  %v3115_v7 = vld [vmem:[#allocation0 + $0x838] sm:$0xf] }
 0x2ca   :  { %5062 = vst [vmem:[%s7689_s1 + $0x320] sm:$0xf] %v2737_v8  ;;  %v3121_v8 = vld [vmem:[#allocation0 + $0x840] sm:$0xf] }
 0x2cb   :  { %5063 = vst [vmem:[%s7689_s1 + $0x324] sm:$0xf] %v2743_v9  ;;  %v3127_v9 = vld [vmem:[#allocation0 + $0x848] sm:$0xf] }
 0x2cc   :  { %5064 = vst [vmem:[%s7689_s1 + $0x328] sm:$0xf] %v2749_v10  ;;  %v3133_v10 = vld [vmem:[#allocation0 + $0x850] sm:$0xf] }
 0x2cd   :  { %5065 = vst [vmem:[%s7689_s1 + $0x32c] sm:$0xf] %v2755_v11  ;;  %v3139_v11 = vld [vmem:[#allocation0 + $0x858] sm:$0xf] }
 0x2ce   :  { %5066 = vst [vmem:[%s7689_s1 + $0x330] sm:$0xf] %v2761_v12  ;;  %v3145_v12 = vld [vmem:[#allocation0 + $0x860] sm:$0xf] }
 0x2cf   :  { %5067 = vst [vmem:[%s7689_s1 + $0x334] sm:$0xf] %v2767_v13  ;;  %v3151_v13 = vld [vmem:[#allocation0 + $0x868] sm:$0xf] }
 0x2d0   :  { %5068 = vst [vmem:[%s7689_s1 + $0x338] sm:$0xf] %v2773_v14  ;;  %v3157_v14 = vld [vmem:[#allocation0 + $0x870] sm:$0xf] }
 0x2d1   :  { %5069 = vst [vmem:[%s7689_s1 + $0x33c] sm:$0xf] %v2779_v15  ;;  %v3163_v15 = vld [vmem:[#allocation0 + $0x878] sm:$0xf] }
 0x2d2   :  { %5070 = vst [vmem:[%s7689_s1 + $0x340] sm:$0xf] %v2785_v16  ;;  %v3169_v16 = vld [vmem:[#allocation0 + $0x880] sm:$0xf] }
 0x2d3   :  { %5071 = vst [vmem:[%s7689_s1 + $0x344] sm:$0xf] %v2791_v17  ;;  %v3175_v17 = vld [vmem:[#allocation0 + $0x888] sm:$0xf] }
 0x2d4   :  { %5072 = vst [vmem:[%s7689_s1 + $0x348] sm:$0xf] %v2797_v18  ;;  %v3181_v18 = vld [vmem:[#allocation0 + $0x890] sm:$0xf] }
 0x2d5   :  { %5073 = vst [vmem:[%s7689_s1 + $0x34c] sm:$0xf] %v2803_v19  ;;  %v3187_v19 = vld [vmem:[#allocation0 + $0x898] sm:$0xf] }
 0x2d6   :  { %5074 = vst [vmem:[%s7689_s1 + $0x350] sm:$0xf] %v2809_v20  ;;  %v3193_v20 = vld [vmem:[#allocation0 + $0x8a0] sm:$0xf] }
 0x2d7   :  { %5075 = vst [vmem:[%s7689_s1 + $0x354] sm:$0xf] %v2815_v21  ;;  %v3199_v21 = vld [vmem:[#allocation0 + $0x8a8] sm:$0xf] }
 0x2d8   :  { %5076 = vst [vmem:[%s7689_s1 + $0x358] sm:$0xf] %v2821_v22  ;;  %v3205_v22 = vld [vmem:[#allocation0 + $0x8b0] sm:$0xf] }
 0x2d9   :  { %5077 = vst [vmem:[%s7689_s1 + $0x35c] sm:$0xf] %v2827_v23  ;;  %v3211_v23 = vld [vmem:[#allocation0 + $0x8b8] sm:$0xf] }
 0x2da   :  { %5078 = vst [vmem:[%s7689_s1 + $0x360] sm:$0xf] %v2833_v24  ;;  %v3217_v24 = vld [vmem:[#allocation0 + $0x8c0] sm:$0xf] }
 0x2db   :  { %5079 = vst [vmem:[%s7689_s1 + $0x364] sm:$0xf] %v2839_v25  ;;  %v3223_v25 = vld [vmem:[#allocation0 + $0x8c8] sm:$0xf] }
 0x2dc   :  { %5080 = vst [vmem:[%s7689_s1 + $0x368] sm:$0xf] %v2845_v26  ;;  %v3229_v26 = vld [vmem:[#allocation0 + $0x8d0] sm:$0xf] }
 0x2dd   :  { %5081 = vst [vmem:[%s7689_s1 + $0x36c] sm:$0xf] %v2851_v27  ;;  %v3235_v27 = vld [vmem:[#allocation0 + $0x8d8] sm:$0xf] }
 0x2de   :  { %5082 = vst [vmem:[%s7689_s1 + $0x370] sm:$0xf] %v2857_v28  ;;  %v3241_v28 = vld [vmem:[#allocation0 + $0x8e0] sm:$0xf] }
 0x2df   :  { %5083 = vst [vmem:[%s7689_s1 + $0x374] sm:$0xf] %v2863_v29  ;;  %v3247_v29 = vld [vmem:[#allocation0 + $0x8e8] sm:$0xf] }
 0x2e0   :  { %5084 = vst [vmem:[%s7689_s1 + $0x378] sm:$0xf] %v2869_v30  ;;  %v3253_v30 = vld [vmem:[#allocation0 + $0x8f0] sm:$0xf] }
 0x2e1   :  { %5085 = vst [vmem:[%s7689_s1 + $0x37c] sm:$0xf] %v2875_v31  ;;  %v3259_v31 = vld [vmem:[#allocation0 + $0x8f8] sm:$0xf] }
 0x2e2   :  { %5086 = vst [vmem:[%s7689_s1 + $0x380] sm:$0xf] %v2881_v32  ;;  %v3265_v32 = vld [vmem:[#allocation0 + $0x900] sm:$0xf] }
 0x2e3   :  { %5087 = vst [vmem:[%s7689_s1 + $0x384] sm:$0xf] %v2887_v33  ;;  %v3271_v33 = vld [vmem:[#allocation0 + $0x908] sm:$0xf] }
 0x2e4   :  { %5088 = vst [vmem:[%s7689_s1 + $0x388] sm:$0xf] %v2893_v34  ;;  %v3277_v34 = vld [vmem:[#allocation0 + $0x910] sm:$0xf] }
 0x2e5   :  { %5089 = vst [vmem:[%s7689_s1 + $0x38c] sm:$0xf] %v2899_v35  ;;  %v3283_v35 = vld [vmem:[#allocation0 + $0x918] sm:$0xf] }
 0x2e6   :  { %5090 = vst [vmem:[%s7689_s1 + $0x390] sm:$0xf] %v2905_v36  ;;  %v3289_v36 = vld [vmem:[#allocation0 + $0x920] sm:$0xf] }
 0x2e7   :  { %5091 = vst [vmem:[%s7689_s1 + $0x394] sm:$0xf] %v2911_v37  ;;  %v3295_v37 = vld [vmem:[#allocation0 + $0x928] sm:$0xf] }
 0x2e8   :  { %5092 = vst [vmem:[%s7689_s1 + $0x398] sm:$0xf] %v2917_v38  ;;  %v3301_v38 = vld [vmem:[#allocation0 + $0x930] sm:$0xf] }
 0x2e9   :  { %5093 = vst [vmem:[%s7689_s1 + $0x39c] sm:$0xf] %v2923_v39  ;;  %v3307_v39 = vld [vmem:[#allocation0 + $0x938] sm:$0xf] }
 0x2ea   :  { %5094 = vst [vmem:[%s7689_s1 + $0x3a0] sm:$0xf] %v2929_v40  ;;  %v3313_v40 = vld [vmem:[#allocation0 + $0x940] sm:$0xf] }
 0x2eb   :  { %5095 = vst [vmem:[%s7689_s1 + $0x3a4] sm:$0xf] %v2935_v41  ;;  %v3319_v41 = vld [vmem:[#allocation0 + $0x948] sm:$0xf] }
 0x2ec   :  { %5096 = vst [vmem:[%s7689_s1 + $0x3a8] sm:$0xf] %v2941_v42  ;;  %v3325_v42 = vld [vmem:[#allocation0 + $0x950] sm:$0xf] }
 0x2ed   :  { %5097 = vst [vmem:[%s7689_s1 + $0x3ac] sm:$0xf] %v2947_v43  ;;  %v3331_v43 = vld [vmem:[#allocation0 + $0x958] sm:$0xf] }
 0x2ee   :  { %5098 = vst [vmem:[%s7689_s1 + $0x3b0] sm:$0xf] %v2953_v44  ;;  %v3337_v44 = vld [vmem:[#allocation0 + $0x960] sm:$0xf] }
 0x2ef   :  { %5099 = vst [vmem:[%s7689_s1 + $0x3b4] sm:$0xf] %v2959_v45  ;;  %v3343_v45 = vld [vmem:[#allocation0 + $0x968] sm:$0xf] }
 0x2f0   :  { %5100 = vst [vmem:[%s7689_s1 + $0x3b8] sm:$0xf] %v2965_v46  ;;  %v3349_v46 = vld [vmem:[#allocation0 + $0x970] sm:$0xf] }
 0x2f1   :  { %5101 = vst [vmem:[%s7689_s1 + $0x3bc] sm:$0xf] %v2971_v47  ;;  %v3355_v47 = vld [vmem:[#allocation0 + $0x978] sm:$0xf] }
 0x2f2   :  { %5102 = vst [vmem:[%s7689_s1 + $0x3c0] sm:$0xf] %v2977_v48  ;;  %v3361_v48 = vld [vmem:[#allocation0 + $0x980] sm:$0xf] }
 0x2f3   :  { %5103 = vst [vmem:[%s7689_s1 + $0x3c4] sm:$0xf] %v2983_v49  ;;  %v3367_v49 = vld [vmem:[#allocation0 + $0x988] sm:$0xf] }
 0x2f4   :  { %5104 = vst [vmem:[%s7689_s1 + $0x3c8] sm:$0xf] %v2989_v50  ;;  %v3373_v50 = vld [vmem:[#allocation0 + $0x990] sm:$0xf] }
 0x2f5   :  { %5105 = vst [vmem:[%s7689_s1 + $0x3cc] sm:$0xf] %v2995_v51  ;;  %v3379_v51 = vld [vmem:[#allocation0 + $0x998] sm:$0xf] }
 0x2f6   :  { %5106 = vst [vmem:[%s7689_s1 + $0x3d0] sm:$0xf] %v3001_v52  ;;  %v3385_v52 = vld [vmem:[#allocation0 + $0x9a0] sm:$0xf] }
 0x2f7   :  { %5107 = vst [vmem:[%s7689_s1 + $0x3d4] sm:$0xf] %v3007_v53  ;;  %v3391_v53 = vld [vmem:[#allocation0 + $0x9a8] sm:$0xf] }
 0x2f8   :  { %5108 = vst [vmem:[%s7689_s1 + $0x3d8] sm:$0xf] %v3013_v54  ;;  %v3397_v54 = vld [vmem:[#allocation0 + $0x9b0] sm:$0xf] }
 0x2f9   :  { %5109 = vst [vmem:[%s7689_s1 + $0x3dc] sm:$0xf] %v3019_v55  ;;  %v3403_v55 = vld [vmem:[#allocation0 + $0x9b8] sm:$0xf] }
 0x2fa   :  { %5110 = vst [vmem:[%s7689_s1 + $0x3e0] sm:$0xf] %v3025_v56  ;;  %v3409_v56 = vld [vmem:[#allocation0 + $0x9c0] sm:$0xf] }
 0x2fb   :  { %5111 = vst [vmem:[%s7689_s1 + $0x3e4] sm:$0xf] %v3031_v57  ;;  %v3415_v57 = vld [vmem:[#allocation0 + $0x9c8] sm:$0xf] }
 0x2fc   :  { %5112 = vst [vmem:[%s7689_s1 + $0x3e8] sm:$0xf] %v3037_v58  ;;  %v3421_v58 = vld [vmem:[#allocation0 + $0x9d0] sm:$0xf] }
 0x2fd   :  { %5113 = vst [vmem:[%s7689_s1 + $0x3ec] sm:$0xf] %v3043_v59  ;;  %v3427_v59 = vld [vmem:[#allocation0 + $0x9d8] sm:$0xf] }
 0x2fe   :  { %5114 = vst [vmem:[%s7689_s1 + $0x3f0] sm:$0xf] %v3049_v60  ;;  %v3433_v60 = vld [vmem:[#allocation0 + $0x9e0] sm:$0xf] }
 0x2ff   :  { %5115 = vst [vmem:[%s7689_s1 + $0x3f4] sm:$0xf] %v3055_v61  ;;  %v3439_v61 = vld [vmem:[#allocation0 + $0x9e8] sm:$0xf] }
 0x300   :  { %5116 = vst [vmem:[%s7689_s1 + $0x3f8] sm:$0xf] %v3061_v62  ;;  %v3445_v62 = vld [vmem:[#allocation0 + $0x9f0] sm:$0xf] }
 0x301   :  { %5117 = vst [vmem:[%s7689_s1 + $0x3fc] sm:$0xf] %v3067_v63  ;;  %v3451_v63 = vld [vmem:[#allocation0 + $0x9f8] sm:$0xf] }
 0x302   :  { %5118 = vst [vmem:[%s7689_s1 + $0x400] sm:$0xf] %v3073_v0  ;;  %v3457_v0 = vld [vmem:[#allocation0 + $0xa00] sm:$0xf] }
 0x303   :  { %5119 = vst [vmem:[%s7689_s1 + $0x404] sm:$0xf] %v3079_v1  ;;  %v3463_v1 = vld [vmem:[#allocation0 + $0xa08] sm:$0xf] }
 0x304   :  { %5120 = vst [vmem:[%s7689_s1 + $0x408] sm:$0xf] %v3085_v2  ;;  %v3469_v2 = vld [vmem:[#allocation0 + $0xa10] sm:$0xf] }
 0x305   :  { %5121 = vst [vmem:[%s7689_s1 + $0x40c] sm:$0xf] %v3091_v3  ;;  %v3475_v3 = vld [vmem:[#allocation0 + $0xa18] sm:$0xf] }
 0x306   :  { %5122 = vst [vmem:[%s7689_s1 + $0x410] sm:$0xf] %v3097_v4  ;;  %v3481_v4 = vld [vmem:[#allocation0 + $0xa20] sm:$0xf] }
 0x307   :  { %5123 = vst [vmem:[%s7689_s1 + $0x414] sm:$0xf] %v3103_v5  ;;  %v3487_v5 = vld [vmem:[#allocation0 + $0xa28] sm:$0xf] }
 0x308   :  { %5124 = vst [vmem:[%s7689_s1 + $0x418] sm:$0xf] %v3109_v6  ;;  %v3493_v6 = vld [vmem:[#allocation0 + $0xa30] sm:$0xf] }
 0x309   :  { %5125 = vst [vmem:[%s7689_s1 + $0x41c] sm:$0xf] %v3115_v7  ;;  %v3499_v7 = vld [vmem:[#allocation0 + $0xa38] sm:$0xf] }
 0x30a   :  { %5126 = vst [vmem:[%s7689_s1 + $0x420] sm:$0xf] %v3121_v8  ;;  %v3505_v8 = vld [vmem:[#allocation0 + $0xa40] sm:$0xf] }
 0x30b   :  { %5127 = vst [vmem:[%s7689_s1 + $0x424] sm:$0xf] %v3127_v9  ;;  %v3511_v9 = vld [vmem:[#allocation0 + $0xa48] sm:$0xf] }
 0x30c   :  { %5128 = vst [vmem:[%s7689_s1 + $0x428] sm:$0xf] %v3133_v10  ;;  %v3517_v10 = vld [vmem:[#allocation0 + $0xa50] sm:$0xf] }
 0x30d   :  { %5129 = vst [vmem:[%s7689_s1 + $0x42c] sm:$0xf] %v3139_v11  ;;  %v3523_v11 = vld [vmem:[#allocation0 + $0xa58] sm:$0xf] }
 0x30e   :  { %5130 = vst [vmem:[%s7689_s1 + $0x430] sm:$0xf] %v3145_v12  ;;  %v3529_v12 = vld [vmem:[#allocation0 + $0xa60] sm:$0xf] }
 0x30f   :  { %5131 = vst [vmem:[%s7689_s1 + $0x434] sm:$0xf] %v3151_v13  ;;  %v3535_v13 = vld [vmem:[#allocation0 + $0xa68] sm:$0xf] }
 0x310   :  { %5132 = vst [vmem:[%s7689_s1 + $0x438] sm:$0xf] %v3157_v14  ;;  %v3541_v14 = vld [vmem:[#allocation0 + $0xa70] sm:$0xf] }
 0x311   :  { %5133 = vst [vmem:[%s7689_s1 + $0x43c] sm:$0xf] %v3163_v15  ;;  %v3547_v15 = vld [vmem:[#allocation0 + $0xa78] sm:$0xf] }
 0x312   :  { %5134 = vst [vmem:[%s7689_s1 + $0x440] sm:$0xf] %v3169_v16  ;;  %v3553_v16 = vld [vmem:[#allocation0 + $0xa80] sm:$0xf] }
 0x313   :  { %5135 = vst [vmem:[%s7689_s1 + $0x444] sm:$0xf] %v3175_v17  ;;  %v3559_v17 = vld [vmem:[#allocation0 + $0xa88] sm:$0xf] }
 0x314   :  { %5136 = vst [vmem:[%s7689_s1 + $0x448] sm:$0xf] %v3181_v18  ;;  %v3565_v18 = vld [vmem:[#allocation0 + $0xa90] sm:$0xf] }
 0x315   :  { %5137 = vst [vmem:[%s7689_s1 + $0x44c] sm:$0xf] %v3187_v19  ;;  %v3571_v19 = vld [vmem:[#allocation0 + $0xa98] sm:$0xf] }
 0x316   :  { %5138 = vst [vmem:[%s7689_s1 + $0x450] sm:$0xf] %v3193_v20  ;;  %v3577_v20 = vld [vmem:[#allocation0 + $0xaa0] sm:$0xf] }
 0x317   :  { %5139 = vst [vmem:[%s7689_s1 + $0x454] sm:$0xf] %v3199_v21  ;;  %v3583_v21 = vld [vmem:[#allocation0 + $0xaa8] sm:$0xf] }
 0x318   :  { %5140 = vst [vmem:[%s7689_s1 + $0x458] sm:$0xf] %v3205_v22  ;;  %v3589_v22 = vld [vmem:[#allocation0 + $0xab0] sm:$0xf] }
 0x319   :  { %5141 = vst [vmem:[%s7689_s1 + $0x45c] sm:$0xf] %v3211_v23  ;;  %v3595_v23 = vld [vmem:[#allocation0 + $0xab8] sm:$0xf] }
 0x31a   :  { %5142 = vst [vmem:[%s7689_s1 + $0x460] sm:$0xf] %v3217_v24  ;;  %v3601_v24 = vld [vmem:[#allocation0 + $0xac0] sm:$0xf] }
 0x31b   :  { %5143 = vst [vmem:[%s7689_s1 + $0x464] sm:$0xf] %v3223_v25  ;;  %v3607_v25 = vld [vmem:[#allocation0 + $0xac8] sm:$0xf] }
 0x31c   :  { %5144 = vst [vmem:[%s7689_s1 + $0x468] sm:$0xf] %v3229_v26  ;;  %v3613_v26 = vld [vmem:[#allocation0 + $0xad0] sm:$0xf] }
 0x31d   :  { %5145 = vst [vmem:[%s7689_s1 + $0x46c] sm:$0xf] %v3235_v27  ;;  %v3619_v27 = vld [vmem:[#allocation0 + $0xad8] sm:$0xf] }
 0x31e   :  { %5146 = vst [vmem:[%s7689_s1 + $0x470] sm:$0xf] %v3241_v28  ;;  %v3625_v28 = vld [vmem:[#allocation0 + $0xae0] sm:$0xf] }
 0x31f   :  { %5147 = vst [vmem:[%s7689_s1 + $0x474] sm:$0xf] %v3247_v29  ;;  %v3631_v29 = vld [vmem:[#allocation0 + $0xae8] sm:$0xf] }
 0x320   :  { %5148 = vst [vmem:[%s7689_s1 + $0x478] sm:$0xf] %v3253_v30  ;;  %v3637_v30 = vld [vmem:[#allocation0 + $0xaf0] sm:$0xf] }
 0x321   :  { %5149 = vst [vmem:[%s7689_s1 + $0x47c] sm:$0xf] %v3259_v31  ;;  %v3643_v31 = vld [vmem:[#allocation0 + $0xaf8] sm:$0xf] }
 0x322   :  { %5150 = vst [vmem:[%s7689_s1 + $0x480] sm:$0xf] %v3265_v32  ;;  %v3649_v32 = vld [vmem:[#allocation0 + $0xb00] sm:$0xf] }
 0x323   :  { %5151 = vst [vmem:[%s7689_s1 + $0x484] sm:$0xf] %v3271_v33  ;;  %v3655_v33 = vld [vmem:[#allocation0 + $0xb08] sm:$0xf] }
 0x324   :  { %5152 = vst [vmem:[%s7689_s1 + $0x488] sm:$0xf] %v3277_v34  ;;  %v3661_v34 = vld [vmem:[#allocation0 + $0xb10] sm:$0xf] }
 0x325   :  { %5153 = vst [vmem:[%s7689_s1 + $0x48c] sm:$0xf] %v3283_v35  ;;  %v3667_v35 = vld [vmem:[#allocation0 + $0xb18] sm:$0xf] }
 0x326   :  { %5154 = vst [vmem:[%s7689_s1 + $0x490] sm:$0xf] %v3289_v36  ;;  %v3673_v36 = vld [vmem:[#allocation0 + $0xb20] sm:$0xf] }
 0x327   :  { %5155 = vst [vmem:[%s7689_s1 + $0x494] sm:$0xf] %v3295_v37  ;;  %v3679_v37 = vld [vmem:[#allocation0 + $0xb28] sm:$0xf] }
 0x328   :  { %5156 = vst [vmem:[%s7689_s1 + $0x498] sm:$0xf] %v3301_v38  ;;  %v3685_v38 = vld [vmem:[#allocation0 + $0xb30] sm:$0xf] }
 0x329   :  { %5157 = vst [vmem:[%s7689_s1 + $0x49c] sm:$0xf] %v3307_v39  ;;  %v3691_v39 = vld [vmem:[#allocation0 + $0xb38] sm:$0xf] }
 0x32a   :  { %5158 = vst [vmem:[%s7689_s1 + $0x4a0] sm:$0xf] %v3313_v40  ;;  %v3697_v40 = vld [vmem:[#allocation0 + $0xb40] sm:$0xf] }
 0x32b   :  { %5159 = vst [vmem:[%s7689_s1 + $0x4a4] sm:$0xf] %v3319_v41  ;;  %v3703_v41 = vld [vmem:[#allocation0 + $0xb48] sm:$0xf] }
 0x32c   :  { %5160 = vst [vmem:[%s7689_s1 + $0x4a8] sm:$0xf] %v3325_v42  ;;  %v3709_v42 = vld [vmem:[#allocation0 + $0xb50] sm:$0xf] }
 0x32d   :  { %5161 = vst [vmem:[%s7689_s1 + $0x4ac] sm:$0xf] %v3331_v43  ;;  %v3715_v43 = vld [vmem:[#allocation0 + $0xb58] sm:$0xf] }
 0x32e   :  { %5162 = vst [vmem:[%s7689_s1 + $0x4b0] sm:$0xf] %v3337_v44  ;;  %v3721_v44 = vld [vmem:[#allocation0 + $0xb60] sm:$0xf] }
 0x32f   :  { %5163 = vst [vmem:[%s7689_s1 + $0x4b4] sm:$0xf] %v3343_v45  ;;  %v3727_v45 = vld [vmem:[#allocation0 + $0xb68] sm:$0xf] }
 0x330   :  { %5164 = vst [vmem:[%s7689_s1 + $0x4b8] sm:$0xf] %v3349_v46  ;;  %v3733_v46 = vld [vmem:[#allocation0 + $0xb70] sm:$0xf] }
 0x331   :  { %5165 = vst [vmem:[%s7689_s1 + $0x4bc] sm:$0xf] %v3355_v47  ;;  %v3739_v47 = vld [vmem:[#allocation0 + $0xb78] sm:$0xf] }
 0x332   :  { %5166 = vst [vmem:[%s7689_s1 + $0x4c0] sm:$0xf] %v3361_v48  ;;  %v3745_v48 = vld [vmem:[#allocation0 + $0xb80] sm:$0xf] }
 0x333   :  { %5167 = vst [vmem:[%s7689_s1 + $0x4c4] sm:$0xf] %v3367_v49  ;;  %v3751_v49 = vld [vmem:[#allocation0 + $0xb88] sm:$0xf] }
 0x334   :  { %5168 = vst [vmem:[%s7689_s1 + $0x4c8] sm:$0xf] %v3373_v50  ;;  %v3757_v50 = vld [vmem:[#allocation0 + $0xb90] sm:$0xf] }
 0x335   :  { %5169 = vst [vmem:[%s7689_s1 + $0x4cc] sm:$0xf] %v3379_v51  ;;  %v3763_v51 = vld [vmem:[#allocation0 + $0xb98] sm:$0xf] }
 0x336   :  { %5170 = vst [vmem:[%s7689_s1 + $0x4d0] sm:$0xf] %v3385_v52  ;;  %v3769_v52 = vld [vmem:[#allocation0 + $0xba0] sm:$0xf] }
 0x337   :  { %5171 = vst [vmem:[%s7689_s1 + $0x4d4] sm:$0xf] %v3391_v53  ;;  %v3775_v53 = vld [vmem:[#allocation0 + $0xba8] sm:$0xf] }
 0x338   :  { %5172 = vst [vmem:[%s7689_s1 + $0x4d8] sm:$0xf] %v3397_v54  ;;  %v3781_v54 = vld [vmem:[#allocation0 + $0xbb0] sm:$0xf] }
 0x339   :  { %5173 = vst [vmem:[%s7689_s1 + $0x4dc] sm:$0xf] %v3403_v55  ;;  %v3787_v55 = vld [vmem:[#allocation0 + $0xbb8] sm:$0xf] }
 0x33a   :  { %5174 = vst [vmem:[%s7689_s1 + $0x4e0] sm:$0xf] %v3409_v56  ;;  %v3793_v56 = vld [vmem:[#allocation0 + $0xbc0] sm:$0xf] }
 0x33b   :  { %5175 = vst [vmem:[%s7689_s1 + $0x4e4] sm:$0xf] %v3415_v57  ;;  %v3799_v57 = vld [vmem:[#allocation0 + $0xbc8] sm:$0xf] }
 0x33c   :  { %5176 = vst [vmem:[%s7689_s1 + $0x4e8] sm:$0xf] %v3421_v58  ;;  %v3805_v58 = vld [vmem:[#allocation0 + $0xbd0] sm:$0xf] }
 0x33d   :  { %5177 = vst [vmem:[%s7689_s1 + $0x4ec] sm:$0xf] %v3427_v59  ;;  %v3811_v59 = vld [vmem:[#allocation0 + $0xbd8] sm:$0xf] }
 0x33e   :  { %5178 = vst [vmem:[%s7689_s1 + $0x4f0] sm:$0xf] %v3433_v60  ;;  %v3817_v60 = vld [vmem:[#allocation0 + $0xbe0] sm:$0xf] }
 0x33f   :  { %5179 = vst [vmem:[%s7689_s1 + $0x4f4] sm:$0xf] %v3439_v61  ;;  %v3823_v61 = vld [vmem:[#allocation0 + $0xbe8] sm:$0xf] }
 0x340   :  { %5180 = vst [vmem:[%s7689_s1 + $0x4f8] sm:$0xf] %v3445_v62  ;;  %v3829_v62 = vld [vmem:[#allocation0 + $0xbf0] sm:$0xf] }
 0x341   :  { %5181 = vst [vmem:[%s7689_s1 + $0x4fc] sm:$0xf] %v3451_v63  ;;  %v3835_v63 = vld [vmem:[#allocation0 + $0xbf8] sm:$0xf] }
 0x342   :  { %5182 = vst [vmem:[%s7689_s1 + $0x500] sm:$0xf] %v3457_v0  ;;  %v3841_v0 = vld [vmem:[#allocation0 + $0xc00] sm:$0xf] }
 0x343   :  { %5183 = vst [vmem:[%s7689_s1 + $0x504] sm:$0xf] %v3463_v1  ;;  %v3847_v1 = vld [vmem:[#allocation0 + $0xc08] sm:$0xf] }
 0x344   :  { %5184 = vst [vmem:[%s7689_s1 + $0x508] sm:$0xf] %v3469_v2  ;;  %v3853_v2 = vld [vmem:[#allocation0 + $0xc10] sm:$0xf] }
 0x345   :  { %5185 = vst [vmem:[%s7689_s1 + $0x50c] sm:$0xf] %v3475_v3  ;;  %v3859_v3 = vld [vmem:[#allocation0 + $0xc18] sm:$0xf] }
 0x346   :  { %5186 = vst [vmem:[%s7689_s1 + $0x510] sm:$0xf] %v3481_v4  ;;  %v3865_v4 = vld [vmem:[#allocation0 + $0xc20] sm:$0xf] }
 0x347   :  { %5187 = vst [vmem:[%s7689_s1 + $0x514] sm:$0xf] %v3487_v5  ;;  %v3871_v5 = vld [vmem:[#allocation0 + $0xc28] sm:$0xf] }
 0x348   :  { %5188 = vst [vmem:[%s7689_s1 + $0x518] sm:$0xf] %v3493_v6  ;;  %v3877_v6 = vld [vmem:[#allocation0 + $0xc30] sm:$0xf] }
 0x349   :  { %5189 = vst [vmem:[%s7689_s1 + $0x51c] sm:$0xf] %v3499_v7  ;;  %v3883_v7 = vld [vmem:[#allocation0 + $0xc38] sm:$0xf] }
 0x34a   :  { %5190 = vst [vmem:[%s7689_s1 + $0x520] sm:$0xf] %v3505_v8  ;;  %v3889_v8 = vld [vmem:[#allocation0 + $0xc40] sm:$0xf] }
 0x34b   :  { %5191 = vst [vmem:[%s7689_s1 + $0x524] sm:$0xf] %v3511_v9  ;;  %v3895_v9 = vld [vmem:[#allocation0 + $0xc48] sm:$0xf] }
 0x34c   :  { %5192 = vst [vmem:[%s7689_s1 + $0x528] sm:$0xf] %v3517_v10  ;;  %v3901_v10 = vld [vmem:[#allocation0 + $0xc50] sm:$0xf] }
 0x34d   :  { %5193 = vst [vmem:[%s7689_s1 + $0x52c] sm:$0xf] %v3523_v11  ;;  %v3907_v11 = vld [vmem:[#allocation0 + $0xc58] sm:$0xf] }
 0x34e   :  { %5194 = vst [vmem:[%s7689_s1 + $0x530] sm:$0xf] %v3529_v12  ;;  %v3913_v12 = vld [vmem:[#allocation0 + $0xc60] sm:$0xf] }
 0x34f   :  { %5195 = vst [vmem:[%s7689_s1 + $0x534] sm:$0xf] %v3535_v13  ;;  %v3919_v13 = vld [vmem:[#allocation0 + $0xc68] sm:$0xf] }
 0x350   :  { %5196 = vst [vmem:[%s7689_s1 + $0x538] sm:$0xf] %v3541_v14  ;;  %v3925_v14 = vld [vmem:[#allocation0 + $0xc70] sm:$0xf] }
 0x351   :  { %5197 = vst [vmem:[%s7689_s1 + $0x53c] sm:$0xf] %v3547_v15  ;;  %v3931_v15 = vld [vmem:[#allocation0 + $0xc78] sm:$0xf] }
 0x352   :  { %5198 = vst [vmem:[%s7689_s1 + $0x540] sm:$0xf] %v3553_v16  ;;  %v3937_v16 = vld [vmem:[#allocation0 + $0xc80] sm:$0xf] }
 0x353   :  { %5199 = vst [vmem:[%s7689_s1 + $0x544] sm:$0xf] %v3559_v17  ;;  %v3943_v17 = vld [vmem:[#allocation0 + $0xc88] sm:$0xf] }
 0x354   :  { %5200 = vst [vmem:[%s7689_s1 + $0x548] sm:$0xf] %v3565_v18  ;;  %v3949_v18 = vld [vmem:[#allocation0 + $0xc90] sm:$0xf] }
 0x355   :  { %5201 = vst [vmem:[%s7689_s1 + $0x54c] sm:$0xf] %v3571_v19  ;;  %v3955_v19 = vld [vmem:[#allocation0 + $0xc98] sm:$0xf] }
 0x356   :  { %5202 = vst [vmem:[%s7689_s1 + $0x550] sm:$0xf] %v3577_v20  ;;  %v3961_v20 = vld [vmem:[#allocation0 + $0xca0] sm:$0xf] }
 0x357   :  { %5203 = vst [vmem:[%s7689_s1 + $0x554] sm:$0xf] %v3583_v21  ;;  %v3967_v21 = vld [vmem:[#allocation0 + $0xca8] sm:$0xf] }
 0x358   :  { %5204 = vst [vmem:[%s7689_s1 + $0x558] sm:$0xf] %v3589_v22  ;;  %v3973_v22 = vld [vmem:[#allocation0 + $0xcb0] sm:$0xf] }
 0x359   :  { %5205 = vst [vmem:[%s7689_s1 + $0x55c] sm:$0xf] %v3595_v23  ;;  %v3979_v23 = vld [vmem:[#allocation0 + $0xcb8] sm:$0xf] }
 0x35a   :  { %5206 = vst [vmem:[%s7689_s1 + $0x560] sm:$0xf] %v3601_v24  ;;  %v3985_v24 = vld [vmem:[#allocation0 + $0xcc0] sm:$0xf] }
 0x35b   :  { %5207 = vst [vmem:[%s7689_s1 + $0x564] sm:$0xf] %v3607_v25  ;;  %v3991_v25 = vld [vmem:[#allocation0 + $0xcc8] sm:$0xf] }
 0x35c   :  { %5208 = vst [vmem:[%s7689_s1 + $0x568] sm:$0xf] %v3613_v26  ;;  %v3997_v26 = vld [vmem:[#allocation0 + $0xcd0] sm:$0xf] }
 0x35d   :  { %5209 = vst [vmem:[%s7689_s1 + $0x56c] sm:$0xf] %v3619_v27  ;;  %v4003_v27 = vld [vmem:[#allocation0 + $0xcd8] sm:$0xf] }
 0x35e   :  { %5210 = vst [vmem:[%s7689_s1 + $0x570] sm:$0xf] %v3625_v28  ;;  %v4009_v28 = vld [vmem:[#allocation0 + $0xce0] sm:$0xf] }
 0x35f   :  { %5211 = vst [vmem:[%s7689_s1 + $0x574] sm:$0xf] %v3631_v29  ;;  %v4015_v29 = vld [vmem:[#allocation0 + $0xce8] sm:$0xf] }
 0x360   :  { %5212 = vst [vmem:[%s7689_s1 + $0x578] sm:$0xf] %v3637_v30  ;;  %v4021_v30 = vld [vmem:[#allocation0 + $0xcf0] sm:$0xf] }
 0x361   :  { %5213 = vst [vmem:[%s7689_s1 + $0x57c] sm:$0xf] %v3643_v31  ;;  %v4027_v31 = vld [vmem:[#allocation0 + $0xcf8] sm:$0xf] }
 0x362   :  { %5214 = vst [vmem:[%s7689_s1 + $0x580] sm:$0xf] %v3649_v32  ;;  %v4033_v32 = vld [vmem:[#allocation0 + $0xd00] sm:$0xf] }
 0x363   :  { %5215 = vst [vmem:[%s7689_s1 + $0x584] sm:$0xf] %v3655_v33  ;;  %v4039_v33 = vld [vmem:[#allocation0 + $0xd08] sm:$0xf] }
 0x364   :  { %5216 = vst [vmem:[%s7689_s1 + $0x588] sm:$0xf] %v3661_v34  ;;  %v4045_v34 = vld [vmem:[#allocation0 + $0xd10] sm:$0xf] }
 0x365   :  { %5217 = vst [vmem:[%s7689_s1 + $0x58c] sm:$0xf] %v3667_v35  ;;  %v4051_v35 = vld [vmem:[#allocation0 + $0xd18] sm:$0xf] }
 0x366   :  { %5218 = vst [vmem:[%s7689_s1 + $0x590] sm:$0xf] %v3673_v36  ;;  %v4057_v36 = vld [vmem:[#allocation0 + $0xd20] sm:$0xf] }
 0x367   :  { %5219 = vst [vmem:[%s7689_s1 + $0x594] sm:$0xf] %v3679_v37  ;;  %v4063_v37 = vld [vmem:[#allocation0 + $0xd28] sm:$0xf] }
 0x368   :  { %5220 = vst [vmem:[%s7689_s1 + $0x598] sm:$0xf] %v3685_v38  ;;  %v4069_v38 = vld [vmem:[#allocation0 + $0xd30] sm:$0xf] }
 0x369   :  { %5221 = vst [vmem:[%s7689_s1 + $0x59c] sm:$0xf] %v3691_v39  ;;  %v4075_v39 = vld [vmem:[#allocation0 + $0xd38] sm:$0xf] }
 0x36a   :  { %5222 = vst [vmem:[%s7689_s1 + $0x5a0] sm:$0xf] %v3697_v40  ;;  %v4081_v40 = vld [vmem:[#allocation0 + $0xd40] sm:$0xf] }
 0x36b   :  { %5223 = vst [vmem:[%s7689_s1 + $0x5a4] sm:$0xf] %v3703_v41  ;;  %v4087_v41 = vld [vmem:[#allocation0 + $0xd48] sm:$0xf] }
 0x36c   :  { %5224 = vst [vmem:[%s7689_s1 + $0x5a8] sm:$0xf] %v3709_v42  ;;  %v4093_v42 = vld [vmem:[#allocation0 + $0xd50] sm:$0xf] }
 0x36d   :  { %5225 = vst [vmem:[%s7689_s1 + $0x5ac] sm:$0xf] %v3715_v43  ;;  %v4099_v43 = vld [vmem:[#allocation0 + $0xd58] sm:$0xf] }
 0x36e   :  { %5226 = vst [vmem:[%s7689_s1 + $0x5b0] sm:$0xf] %v3721_v44  ;;  %v4105_v44 = vld [vmem:[#allocation0 + $0xd60] sm:$0xf] }
 0x36f   :  { %5227 = vst [vmem:[%s7689_s1 + $0x5b4] sm:$0xf] %v3727_v45  ;;  %v4111_v45 = vld [vmem:[#allocation0 + $0xd68] sm:$0xf] }
 0x370   :  { %5228 = vst [vmem:[%s7689_s1 + $0x5b8] sm:$0xf] %v3733_v46  ;;  %v4117_v46 = vld [vmem:[#allocation0 + $0xd70] sm:$0xf] }
 0x371   :  { %5229 = vst [vmem:[%s7689_s1 + $0x5bc] sm:$0xf] %v3739_v47  ;;  %v4123_v47 = vld [vmem:[#allocation0 + $0xd78] sm:$0xf] }
 0x372   :  { %5230 = vst [vmem:[%s7689_s1 + $0x5c0] sm:$0xf] %v3745_v48  ;;  %v4129_v48 = vld [vmem:[#allocation0 + $0xd80] sm:$0xf] }
 0x373   :  { %5231 = vst [vmem:[%s7689_s1 + $0x5c4] sm:$0xf] %v3751_v49  ;;  %v4135_v49 = vld [vmem:[#allocation0 + $0xd88] sm:$0xf] }
 0x374   :  { %5232 = vst [vmem:[%s7689_s1 + $0x5c8] sm:$0xf] %v3757_v50  ;;  %v4141_v50 = vld [vmem:[#allocation0 + $0xd90] sm:$0xf] }
 0x375   :  { %5233 = vst [vmem:[%s7689_s1 + $0x5cc] sm:$0xf] %v3763_v51  ;;  %v4147_v51 = vld [vmem:[#allocation0 + $0xd98] sm:$0xf] }
 0x376   :  { %5234 = vst [vmem:[%s7689_s1 + $0x5d0] sm:$0xf] %v3769_v52  ;;  %v4153_v52 = vld [vmem:[#allocation0 + $0xda0] sm:$0xf] }
 0x377   :  { %5235 = vst [vmem:[%s7689_s1 + $0x5d4] sm:$0xf] %v3775_v53  ;;  %v4159_v53 = vld [vmem:[#allocation0 + $0xda8] sm:$0xf] }
 0x378   :  { %5236 = vst [vmem:[%s7689_s1 + $0x5d8] sm:$0xf] %v3781_v54  ;;  %v4165_v54 = vld [vmem:[#allocation0 + $0xdb0] sm:$0xf] }
 0x379   :  { %5237 = vst [vmem:[%s7689_s1 + $0x5dc] sm:$0xf] %v3787_v55  ;;  %v4171_v55 = vld [vmem:[#allocation0 + $0xdb8] sm:$0xf] }
 0x37a   :  { %5238 = vst [vmem:[%s7689_s1 + $0x5e0] sm:$0xf] %v3793_v56  ;;  %v4177_v56 = vld [vmem:[#allocation0 + $0xdc0] sm:$0xf] }
 0x37b   :  { %5239 = vst [vmem:[%s7689_s1 + $0x5e4] sm:$0xf] %v3799_v57  ;;  %v4183_v57 = vld [vmem:[#allocation0 + $0xdc8] sm:$0xf] }
 0x37c   :  { %5240 = vst [vmem:[%s7689_s1 + $0x5e8] sm:$0xf] %v3805_v58  ;;  %v4189_v58 = vld [vmem:[#allocation0 + $0xdd0] sm:$0xf] }
 0x37d   :  { %5241 = vst [vmem:[%s7689_s1 + $0x5ec] sm:$0xf] %v3811_v59  ;;  %v4195_v59 = vld [vmem:[#allocation0 + $0xdd8] sm:$0xf] }
 0x37e   :  { %5242 = vst [vmem:[%s7689_s1 + $0x5f0] sm:$0xf] %v3817_v60  ;;  %v4201_v60 = vld [vmem:[#allocation0 + $0xde0] sm:$0xf] }
 0x37f   :  { %5243 = vst [vmem:[%s7689_s1 + $0x5f4] sm:$0xf] %v3823_v61  ;;  %v4207_v61 = vld [vmem:[#allocation0 + $0xde8] sm:$0xf] }
 0x380   :  { %5244 = vst [vmem:[%s7689_s1 + $0x5f8] sm:$0xf] %v3829_v62  ;;  %v4213_v62 = vld [vmem:[#allocation0 + $0xdf0] sm:$0xf] }
 0x381   :  { %5245 = vst [vmem:[%s7689_s1 + $0x5fc] sm:$0xf] %v3835_v63  ;;  %v4219_v63 = vld [vmem:[#allocation0 + $0xdf8] sm:$0xf] }
 0x382   :  { %5246 = vst [vmem:[%s7689_s1 + $0x600] sm:$0xf] %v3841_v0  ;;  %v4225_v0 = vld [vmem:[#allocation0 + $0xe00] sm:$0xf] }
 0x383   :  { %5247 = vst [vmem:[%s7689_s1 + $0x604] sm:$0xf] %v3847_v1  ;;  %v4231_v1 = vld [vmem:[#allocation0 + $0xe08] sm:$0xf] }
 0x384   :  { %5248 = vst [vmem:[%s7689_s1 + $0x608] sm:$0xf] %v3853_v2  ;;  %v4237_v2 = vld [vmem:[#allocation0 + $0xe10] sm:$0xf] }
 0x385   :  { %5249 = vst [vmem:[%s7689_s1 + $0x60c] sm:$0xf] %v3859_v3  ;;  %v4243_v3 = vld [vmem:[#allocation0 + $0xe18] sm:$0xf] }
 0x386   :  { %5250 = vst [vmem:[%s7689_s1 + $0x610] sm:$0xf] %v3865_v4  ;;  %v4249_v4 = vld [vmem:[#allocation0 + $0xe20] sm:$0xf] }
 0x387   :  { %5251 = vst [vmem:[%s7689_s1 + $0x614] sm:$0xf] %v3871_v5  ;;  %v4255_v5 = vld [vmem:[#allocation0 + $0xe28] sm:$0xf] }
 0x388   :  { %5252 = vst [vmem:[%s7689_s1 + $0x618] sm:$0xf] %v3877_v6  ;;  %v4261_v6 = vld [vmem:[#allocation0 + $0xe30] sm:$0xf] }
 0x389   :  { %5253 = vst [vmem:[%s7689_s1 + $0x61c] sm:$0xf] %v3883_v7  ;;  %v4267_v7 = vld [vmem:[#allocation0 + $0xe38] sm:$0xf] }
 0x38a   :  { %5254 = vst [vmem:[%s7689_s1 + $0x620] sm:$0xf] %v3889_v8  ;;  %v4273_v8 = vld [vmem:[#allocation0 + $0xe40] sm:$0xf] }
 0x38b   :  { %5255 = vst [vmem:[%s7689_s1 + $0x624] sm:$0xf] %v3895_v9  ;;  %v4279_v9 = vld [vmem:[#allocation0 + $0xe48] sm:$0xf] }
 0x38c   :  { %5256 = vst [vmem:[%s7689_s1 + $0x628] sm:$0xf] %v3901_v10  ;;  %v4285_v10 = vld [vmem:[#allocation0 + $0xe50] sm:$0xf] }
 0x38d   :  { %5257 = vst [vmem:[%s7689_s1 + $0x62c] sm:$0xf] %v3907_v11  ;;  %v4291_v11 = vld [vmem:[#allocation0 + $0xe58] sm:$0xf] }
 0x38e   :  { %5258 = vst [vmem:[%s7689_s1 + $0x630] sm:$0xf] %v3913_v12  ;;  %v4297_v12 = vld [vmem:[#allocation0 + $0xe60] sm:$0xf] }
 0x38f   :  { %5259 = vst [vmem:[%s7689_s1 + $0x634] sm:$0xf] %v3919_v13  ;;  %v4303_v13 = vld [vmem:[#allocation0 + $0xe68] sm:$0xf] }
 0x390   :  { %5260 = vst [vmem:[%s7689_s1 + $0x638] sm:$0xf] %v3925_v14  ;;  %v4309_v14 = vld [vmem:[#allocation0 + $0xe70] sm:$0xf] }
 0x391   :  { %5261 = vst [vmem:[%s7689_s1 + $0x63c] sm:$0xf] %v3931_v15  ;;  %v4315_v15 = vld [vmem:[#allocation0 + $0xe78] sm:$0xf] }
 0x392   :  { %5262 = vst [vmem:[%s7689_s1 + $0x640] sm:$0xf] %v3937_v16  ;;  %v4321_v16 = vld [vmem:[#allocation0 + $0xe80] sm:$0xf] }
 0x393   :  { %5263 = vst [vmem:[%s7689_s1 + $0x644] sm:$0xf] %v3943_v17  ;;  %v4327_v17 = vld [vmem:[#allocation0 + $0xe88] sm:$0xf] }
 0x394   :  { %5264 = vst [vmem:[%s7689_s1 + $0x648] sm:$0xf] %v3949_v18  ;;  %v4333_v18 = vld [vmem:[#allocation0 + $0xe90] sm:$0xf] }
 0x395   :  { %5265 = vst [vmem:[%s7689_s1 + $0x64c] sm:$0xf] %v3955_v19  ;;  %v4339_v19 = vld [vmem:[#allocation0 + $0xe98] sm:$0xf] }
 0x396   :  { %5266 = vst [vmem:[%s7689_s1 + $0x650] sm:$0xf] %v3961_v20  ;;  %v4345_v20 = vld [vmem:[#allocation0 + $0xea0] sm:$0xf] }
 0x397   :  { %5267 = vst [vmem:[%s7689_s1 + $0x654] sm:$0xf] %v3967_v21  ;;  %v4351_v21 = vld [vmem:[#allocation0 + $0xea8] sm:$0xf] }
 0x398   :  { %5268 = vst [vmem:[%s7689_s1 + $0x658] sm:$0xf] %v3973_v22  ;;  %v4357_v22 = vld [vmem:[#allocation0 + $0xeb0] sm:$0xf] }
 0x399   :  { %5269 = vst [vmem:[%s7689_s1 + $0x65c] sm:$0xf] %v3979_v23  ;;  %v4363_v23 = vld [vmem:[#allocation0 + $0xeb8] sm:$0xf] }
 0x39a   :  { %5270 = vst [vmem:[%s7689_s1 + $0x660] sm:$0xf] %v3985_v24  ;;  %v4369_v24 = vld [vmem:[#allocation0 + $0xec0] sm:$0xf] }
 0x39b   :  { %5271 = vst [vmem:[%s7689_s1 + $0x664] sm:$0xf] %v3991_v25  ;;  %v4375_v25 = vld [vmem:[#allocation0 + $0xec8] sm:$0xf] }
 0x39c   :  { %5272 = vst [vmem:[%s7689_s1 + $0x668] sm:$0xf] %v3997_v26  ;;  %v4381_v26 = vld [vmem:[#allocation0 + $0xed0] sm:$0xf] }
 0x39d   :  { %5273 = vst [vmem:[%s7689_s1 + $0x66c] sm:$0xf] %v4003_v27  ;;  %v4387_v27 = vld [vmem:[#allocation0 + $0xed8] sm:$0xf] }
 0x39e   :  { %5274 = vst [vmem:[%s7689_s1 + $0x670] sm:$0xf] %v4009_v28  ;;  %v4393_v28 = vld [vmem:[#allocation0 + $0xee0] sm:$0xf] }
 0x39f   :  { %5275 = vst [vmem:[%s7689_s1 + $0x674] sm:$0xf] %v4015_v29  ;;  %v4399_v29 = vld [vmem:[#allocation0 + $0xee8] sm:$0xf] }
 0x3a0   :  { %5276 = vst [vmem:[%s7689_s1 + $0x678] sm:$0xf] %v4021_v30  ;;  %v4405_v30 = vld [vmem:[#allocation0 + $0xef0] sm:$0xf] }
 0x3a1   :  { %5277 = vst [vmem:[%s7689_s1 + $0x67c] sm:$0xf] %v4027_v31  ;;  %v4411_v31 = vld [vmem:[#allocation0 + $0xef8] sm:$0xf] }
 0x3a2   :  { %5278 = vst [vmem:[%s7689_s1 + $0x680] sm:$0xf] %v4033_v32  ;;  %v4417_v32 = vld [vmem:[#allocation0 + $0xf00] sm:$0xf] }
 0x3a3   :  { %5279 = vst [vmem:[%s7689_s1 + $0x684] sm:$0xf] %v4039_v33  ;;  %v4423_v33 = vld [vmem:[#allocation0 + $0xf08] sm:$0xf] }
 0x3a4   :  { %5280 = vst [vmem:[%s7689_s1 + $0x688] sm:$0xf] %v4045_v34  ;;  %v4429_v34 = vld [vmem:[#allocation0 + $0xf10] sm:$0xf] }
 0x3a5   :  { %5281 = vst [vmem:[%s7689_s1 + $0x68c] sm:$0xf] %v4051_v35  ;;  %v4435_v35 = vld [vmem:[#allocation0 + $0xf18] sm:$0xf] }
 0x3a6   :  { %5282 = vst [vmem:[%s7689_s1 + $0x690] sm:$0xf] %v4057_v36  ;;  %v4441_v36 = vld [vmem:[#allocation0 + $0xf20] sm:$0xf] }
 0x3a7   :  { %5283 = vst [vmem:[%s7689_s1 + $0x694] sm:$0xf] %v4063_v37  ;;  %v4447_v37 = vld [vmem:[#allocation0 + $0xf28] sm:$0xf] }
 0x3a8   :  { %5284 = vst [vmem:[%s7689_s1 + $0x698] sm:$0xf] %v4069_v38  ;;  %v4453_v38 = vld [vmem:[#allocation0 + $0xf30] sm:$0xf] }
 0x3a9   :  { %5285 = vst [vmem:[%s7689_s1 + $0x69c] sm:$0xf] %v4075_v39  ;;  %v4459_v39 = vld [vmem:[#allocation0 + $0xf38] sm:$0xf] }
 0x3aa   :  { %5286 = vst [vmem:[%s7689_s1 + $0x6a0] sm:$0xf] %v4081_v40  ;;  %v4465_v40 = vld [vmem:[#allocation0 + $0xf40] sm:$0xf] }
 0x3ab   :  { %5287 = vst [vmem:[%s7689_s1 + $0x6a4] sm:$0xf] %v4087_v41  ;;  %v4471_v41 = vld [vmem:[#allocation0 + $0xf48] sm:$0xf] }
 0x3ac   :  { %5288 = vst [vmem:[%s7689_s1 + $0x6a8] sm:$0xf] %v4093_v42  ;;  %v4477_v42 = vld [vmem:[#allocation0 + $0xf50] sm:$0xf] }
 0x3ad   :  { %5289 = vst [vmem:[%s7689_s1 + $0x6ac] sm:$0xf] %v4099_v43  ;;  %v4483_v43 = vld [vmem:[#allocation0 + $0xf58] sm:$0xf] }
 0x3ae   :  { %5290 = vst [vmem:[%s7689_s1 + $0x6b0] sm:$0xf] %v4105_v44  ;;  %v4489_v44 = vld [vmem:[#allocation0 + $0xf60] sm:$0xf] }
 0x3af   :  { %5291 = vst [vmem:[%s7689_s1 + $0x6b4] sm:$0xf] %v4111_v45  ;;  %v4495_v45 = vld [vmem:[#allocation0 + $0xf68] sm:$0xf] }
 0x3b0   :  { %5292 = vst [vmem:[%s7689_s1 + $0x6b8] sm:$0xf] %v4117_v46  ;;  %v4501_v46 = vld [vmem:[#allocation0 + $0xf70] sm:$0xf] }
 0x3b1   :  { %5293 = vst [vmem:[%s7689_s1 + $0x6bc] sm:$0xf] %v4123_v47  ;;  %v4507_v47 = vld [vmem:[#allocation0 + $0xf78] sm:$0xf] }
 0x3b2   :  { %5294 = vst [vmem:[%s7689_s1 + $0x6c0] sm:$0xf] %v4129_v48  ;;  %v4513_v48 = vld [vmem:[#allocation0 + $0xf80] sm:$0xf] }
 0x3b3   :  { %5295 = vst [vmem:[%s7689_s1 + $0x6c4] sm:$0xf] %v4135_v49  ;;  %v4519_v49 = vld [vmem:[#allocation0 + $0xf88] sm:$0xf] }
 0x3b4   :  { %5296 = vst [vmem:[%s7689_s1 + $0x6c8] sm:$0xf] %v4141_v50  ;;  %v4525_v50 = vld [vmem:[#allocation0 + $0xf90] sm:$0xf] }
 0x3b5   :  { %5297 = vst [vmem:[%s7689_s1 + $0x6cc] sm:$0xf] %v4147_v51  ;;  %v4531_v51 = vld [vmem:[#allocation0 + $0xf98] sm:$0xf] }
 0x3b6   :  { %5298 = vst [vmem:[%s7689_s1 + $0x6d0] sm:$0xf] %v4153_v52  ;;  %v4537_v52 = vld [vmem:[#allocation0 + $0xfa0] sm:$0xf] }
 0x3b7   :  { %5299 = vst [vmem:[%s7689_s1 + $0x6d4] sm:$0xf] %v4159_v53  ;;  %v4543_v53 = vld [vmem:[#allocation0 + $0xfa8] sm:$0xf] }
 0x3b8   :  { %5300 = vst [vmem:[%s7689_s1 + $0x6d8] sm:$0xf] %v4165_v54  ;;  %v4549_v54 = vld [vmem:[#allocation0 + $0xfb0] sm:$0xf] }
 0x3b9   :  { %5301 = vst [vmem:[%s7689_s1 + $0x6dc] sm:$0xf] %v4171_v55  ;;  %v4555_v55 = vld [vmem:[#allocation0 + $0xfb8] sm:$0xf] }
 0x3ba   :  { %5302 = vst [vmem:[%s7689_s1 + $0x6e0] sm:$0xf] %v4177_v56  ;;  %v4561_v56 = vld [vmem:[#allocation0 + $0xfc0] sm:$0xf] }
 0x3bb   :  { %5303 = vst [vmem:[%s7689_s1 + $0x6e4] sm:$0xf] %v4183_v57  ;;  %v4567_v57 = vld [vmem:[#allocation0 + $0xfc8] sm:$0xf] }
 0x3bc   :  { %5304 = vst [vmem:[%s7689_s1 + $0x6e8] sm:$0xf] %v4189_v58  ;;  %v4573_v58 = vld [vmem:[#allocation0 + $0xfd0] sm:$0xf] }
 0x3bd   :  { %5305 = vst [vmem:[%s7689_s1 + $0x6ec] sm:$0xf] %v4195_v59  ;;  %v4579_v59 = vld [vmem:[#allocation0 + $0xfd8] sm:$0xf] }
 0x3be   :  { %5306 = vst [vmem:[%s7689_s1 + $0x6f0] sm:$0xf] %v4201_v60  ;;  %v4585_v60 = vld [vmem:[#allocation0 + $0xfe0] sm:$0xf] }
 0x3bf   :  { %5307 = vst [vmem:[%s7689_s1 + $0x6f4] sm:$0xf] %v4207_v61  ;;  %v4591_v61 = vld [vmem:[#allocation0 + $0xfe8] sm:$0xf] }
 0x3c0   :  { %5308 = vst [vmem:[%s7689_s1 + $0x6f8] sm:$0xf] %v4213_v62  ;;  %v4597_v62 = vld [vmem:[#allocation0 + $0xff0] sm:$0xf] }
 0x3c1   :  { %5309 = vst [vmem:[%s7689_s1 + $0x6fc] sm:$0xf] %v4219_v63  ;;  %v4603_v63 = vld [vmem:[#allocation0 + $0xff8] sm:$0xf] }
 0x3c2   :  { %5310 = vst [vmem:[%s7689_s1 + $0x700] sm:$0xf] %v4225_v0 }
 0x3c3   :  { %5311 = vst [vmem:[%s7689_s1 + $0x704] sm:$0xf] %v4231_v1 }
 0x3c4   :  { %5312 = vst [vmem:[%s7689_s1 + $0x708] sm:$0xf] %v4237_v2 }
 0x3c5   :  { %5313 = vst [vmem:[%s7689_s1 + $0x70c] sm:$0xf] %v4243_v3 }
 0x3c6   :  { %5314 = vst [vmem:[%s7689_s1 + $0x710] sm:$0xf] %v4249_v4 }
 0x3c7   :  { %5315 = vst [vmem:[%s7689_s1 + $0x714] sm:$0xf] %v4255_v5 }
 0x3c8   :  { %5316 = vst [vmem:[%s7689_s1 + $0x718] sm:$0xf] %v4261_v6 }
 0x3c9   :  { %5317 = vst [vmem:[%s7689_s1 + $0x71c] sm:$0xf] %v4267_v7 }
 0x3ca   :  { %5318 = vst [vmem:[%s7689_s1 + $0x720] sm:$0xf] %v4273_v8 }
 0x3cb   :  { %5319 = vst [vmem:[%s7689_s1 + $0x724] sm:$0xf] %v4279_v9 }
 0x3cc   :  { %5320 = vst [vmem:[%s7689_s1 + $0x728] sm:$0xf] %v4285_v10 }
 0x3cd   :  { %5321 = vst [vmem:[%s7689_s1 + $0x72c] sm:$0xf] %v4291_v11 }
 0x3ce   :  { %5322 = vst [vmem:[%s7689_s1 + $0x730] sm:$0xf] %v4297_v12 }
 0x3cf   :  { %5323 = vst [vmem:[%s7689_s1 + $0x734] sm:$0xf] %v4303_v13 }
 0x3d0   :  { %5324 = vst [vmem:[%s7689_s1 + $0x738] sm:$0xf] %v4309_v14 }
 0x3d1   :  { %5325 = vst [vmem:[%s7689_s1 + $0x73c] sm:$0xf] %v4315_v15 }
 0x3d2   :  { %5326 = vst [vmem:[%s7689_s1 + $0x740] sm:$0xf] %v4321_v16 }
 0x3d3   :  { %5327 = vst [vmem:[%s7689_s1 + $0x744] sm:$0xf] %v4327_v17 }
 0x3d4   :  { %5328 = vst [vmem:[%s7689_s1 + $0x748] sm:$0xf] %v4333_v18 }
 0x3d5   :  { %5329 = vst [vmem:[%s7689_s1 + $0x74c] sm:$0xf] %v4339_v19 }
 0x3d6   :  { %5330 = vst [vmem:[%s7689_s1 + $0x750] sm:$0xf] %v4345_v20 }
 0x3d7   :  { %5331 = vst [vmem:[%s7689_s1 + $0x754] sm:$0xf] %v4351_v21 }
 0x3d8   :  { %5332 = vst [vmem:[%s7689_s1 + $0x758] sm:$0xf] %v4357_v22 }
 0x3d9   :  { %5333 = vst [vmem:[%s7689_s1 + $0x75c] sm:$0xf] %v4363_v23 }
 0x3da   :  { %5334 = vst [vmem:[%s7689_s1 + $0x760] sm:$0xf] %v4369_v24 }
 0x3db   :  { %5335 = vst [vmem:[%s7689_s1 + $0x764] sm:$0xf] %v4375_v25 }
 0x3dc   :  { %5336 = vst [vmem:[%s7689_s1 + $0x768] sm:$0xf] %v4381_v26 }
 0x3dd   :  { %5337 = vst [vmem:[%s7689_s1 + $0x76c] sm:$0xf] %v4387_v27 }
 0x3de   :  { %5338 = vst [vmem:[%s7689_s1 + $0x770] sm:$0xf] %v4393_v28 }
 0x3df   :  { %5339 = vst [vmem:[%s7689_s1 + $0x774] sm:$0xf] %v4399_v29 }
 0x3e0   :  { %5340 = vst [vmem:[%s7689_s1 + $0x778] sm:$0xf] %v4405_v30 }
 0x3e1   :  { %5341 = vst [vmem:[%s7689_s1 + $0x77c] sm:$0xf] %v4411_v31 }
 0x3e2   :  { %5342 = vst [vmem:[%s7689_s1 + $0x780] sm:$0xf] %v4417_v32 }
 0x3e3   :  { %5343 = vst [vmem:[%s7689_s1 + $0x784] sm:$0xf] %v4423_v33 }
 0x3e4   :  { %5344 = vst [vmem:[%s7689_s1 + $0x788] sm:$0xf] %v4429_v34 }
 0x3e5   :  { %5345 = vst [vmem:[%s7689_s1 + $0x78c] sm:$0xf] %v4435_v35 }
 0x3e6   :  { %5346 = vst [vmem:[%s7689_s1 + $0x790] sm:$0xf] %v4441_v36 }
 0x3e7   :  { %5347 = vst [vmem:[%s7689_s1 + $0x794] sm:$0xf] %v4447_v37 }
 0x3e8   :  { %5348 = vst [vmem:[%s7689_s1 + $0x798] sm:$0xf] %v4453_v38 }
 0x3e9   :  { %5349 = vst [vmem:[%s7689_s1 + $0x79c] sm:$0xf] %v4459_v39 }
 0x3ea   :  { %5350 = vst [vmem:[%s7689_s1 + $0x7a0] sm:$0xf] %v4465_v40 }
 0x3eb   :  { %5351 = vst [vmem:[%s7689_s1 + $0x7a4] sm:$0xf] %v4471_v41 }
 0x3ec   :  { %5352 = vst [vmem:[%s7689_s1 + $0x7a8] sm:$0xf] %v4477_v42 }
 0x3ed   :  { %5353 = vst [vmem:[%s7689_s1 + $0x7ac] sm:$0xf] %v4483_v43 }
 0x3ee   :  { %5354 = vst [vmem:[%s7689_s1 + $0x7b0] sm:$0xf] %v4489_v44 }
 0x3ef   :  { %5355 = vst [vmem:[%s7689_s1 + $0x7b4] sm:$0xf] %v4495_v45 }
 0x3f0   :  { %5356 = vst [vmem:[%s7689_s1 + $0x7b8] sm:$0xf] %v4501_v46 }
 0x3f1   :  { %5357 = vst [vmem:[%s7689_s1 + $0x7bc] sm:$0xf] %v4507_v47 }
 0x3f2   :  { %5358 = vst [vmem:[%s7689_s1 + $0x7c0] sm:$0xf] %v4513_v48 }
 0x3f3   :  { %5359 = vst [vmem:[%s7689_s1 + $0x7c4] sm:$0xf] %v4519_v49 }
 0x3f4   :  { %5360 = vst [vmem:[%s7689_s1 + $0x7c8] sm:$0xf] %v4525_v50 }
 0x3f5   :  { %5361 = vst [vmem:[%s7689_s1 + $0x7cc] sm:$0xf] %v4531_v51 }
 0x3f6   :  { %5362 = vst [vmem:[%s7689_s1 + $0x7d0] sm:$0xf] %v4537_v52 }
 0x3f7   :  { %5363 = vst [vmem:[%s7689_s1 + $0x7d4] sm:$0xf] %v4543_v53 }
 0x3f8   :  { %5364 = vst [vmem:[%s7689_s1 + $0x7d8] sm:$0xf] %v4549_v54 }
 0x3f9   :  { %5365 = vst [vmem:[%s7689_s1 + $0x7dc] sm:$0xf] %v4555_v55 }
 0x3fa   :  { %5366 = vst [vmem:[%s7689_s1 + $0x7e0] sm:$0xf] %v4561_v56 }
 0x3fb   :  { %5367 = vst [vmem:[%s7689_s1 + $0x7e4] sm:$0xf] %v4567_v57 }
 0x3fc   :  { %5368 = vst [vmem:[%s7689_s1 + $0x7e8] sm:$0xf] %v4573_v58 }
 0x3fd   :  { %5369 = vst [vmem:[%s7689_s1 + $0x7ec] sm:$0xf] %v4579_v59 }
 0x3fe   :  { %5370 = vst [vmem:[%s7689_s1 + $0x7f0] sm:$0xf] %v4585_v60 }
 0x3ff   :  { %5371 = vst [vmem:[%s7689_s1 + $0x7f4] sm:$0xf] %v4591_v61 }
 0x400   :  { %5372 = vst [vmem:[%s7689_s1 + $0x7f8] sm:$0xf] %v4597_v62 }
 0x401   :  { %5373 = vst [vmem:[%s7689_s1 + $0x7fc] sm:$0xf] %v4603_v63 }

// kernel: frame_enc_forward.1
= control target key start
LH: loop header
LB: loop body
LE: loop exit
PB: predicated region body
PF: predicated region fallthrough
CT: control target
= control target key end

     0   :  { %s8264_s0 = inlined_call_operand.vmem [shape: f32[2,4,64], index: 0, kind: input, shape index: {}]   ;;  %s8265_s1 = inlined_call_operand.vmem [shape: f32[64,256], index: 1, kind: input, shape index: {}]   ;;  %s8266_s2 = inlined_call_operand.vmem [shape: f32[1,256], index: 2, kind: input, shape index: {}]   ;;  %s8267_s3 = inlined_call_operand.vmem [shape: f32[3,256,256], index: 3, kind: input, shape index: {}]   ;;  %s8268_s4 = inlined_call_operand.vmem [shape: f32[1,256], index: 4, kind: input, shape index: {}]   ;;  %s8269_s5 = inlined_call_operand.vmem [shape: f32[1,256], index: 5, kind: input, shape index: {}]   ;;  %s8270_s6 = inlined_call_operand.vmem [shape: f32[3,256,256], index: 6, kind: input, shape index: {}]   ;;  %s8271_s7 = inlined_call_operand.vmem [shape: f32[1,256], index: 7, kind: input, shape index: {}]   ;;  %s8272_s8 = inlined_call_operand.vmem [shape: f32[1,256], index: 8, kind: input, shape index: {}]   ;;  %s8273_s9 = inlined_call_operand.vmem [shape: f32[4,256,768], index: 9, kind: input, shape index: {}]   ;;  %s8274_s10 = inlined_call_operand.vmem [shape: f32[1,768], index: 10, kind: input, shape index: {}]   ;;  %s8275_s11 = inlined_call_operand.hbm [shape: f32[2,1,512], index: 11, kind: output, shape index: {0}]   ;;  %s8276_s12 = inlined_call_operand.hbm [shape: f32[2,1,256], index: 12, kind: output, shape index: {1}]  }
   0x1   :  { %8280 = sst [smem:[#allocation12_spill]] %s8264_s0 }
   0x2   :  { %8281 = sst [smem:[#allocation13_spill]] %s8265_s1 }
   0x3   :  { %18 = vsyncpa [#allocation4], 0 }
   0x4   :  { %20 = vsyncpa [#allocation4 + $0x1], 0 }
   0x5   :  { %21 = vsyncpa [#allocation6], 0 }
   0x6   :  { %23 = vsyncpa [#allocation6 + $0x1], 0  ;;  %s4483_s21 = smov 0   ;;  %s4485_s22 = smov 0  }
   0x7   :  { %s4487_s23 = smov 0   ;;  %s4489_s24 = smov 0  }
   0x8 LB: > { %8282 = sst [smem:[#allocation9_spill]] %s4411_s23  ;;  %s4504_s25 = sadd.s32 4294967295, %s4415_s24   ;;  %s4415_s24 = sphi %s4489_s24, %s8293_s24   ;;  %s4411_s23 = sphi %s4487_s23, %s8295_s23   ;;  %s4407_s22 = sphi %s4485_s22, %s8297_s22   ;;  %s4403_s21 = sphi %s4483_s21, %s8296_s21  }
   0x9   : > { %s3429_s26 = sadd.s32 4294967294, %s4415_s24   ;;  %s4508_s27 = sadd.s32 1, %s4415_s24  }
   0xa   : > { %8283 = sst [smem:[#allocation10_spill]] %s4508_s27  ;;  %s272_s28 = sadd.s32 1, %s4411_s23 }
   0xb   : > { %s269_s29 = ssub.s32 %s4415_s24, %s4508_s27  ;;  %p282_p0 = scmp.ne.s32.totalorder %s4411_s23, %s4407_s22 }
   0xc   : > { %p270_p1 = scmp.eq.s32.totalorder %s269_s29, 0  ;;  %p283_p2 = scmp.eq.s32.totalorder %s4504_s25, 1 }
   0xd   : > { %p288_p3 = scmp.ne.s32.totalorder %s4407_s22, %s4403_s21  ;;  %p289_p4 = scmp.eq.s32.totalorder %s3429_s26, 1 }
   0xe   : > { %s4519_s30 = scalar_select %p270_p1, %s4411_s23, %s272_s28  }
   0xf   : > { %p4521_p5 = por %p283_p2, %p282_p0  ;;  %p4525_p6 = por %p289_p4, %p288_p3 }
  0x10   : > { %8284 = sst [smem:[#allocation11_spill]] %s4519_s30  ;;  %p3432_p7 = scmp.ge.s32.totalorder %s4415_s24, 1 }
  0x11   : > { %p370_p8 = scmp.lt.s32.totalorder %s4415_s24, 3 }
  0x13   : > { %p371_p9 = pnand %p3432_p7, %p370_p8 }
  0x14   : > { %s8287_s1 = sld [smem:[#allocation13_spill]] (!%p371_p9)  ;;  %p416_p10 = scmp.lt.s32.totalorder (!%p371_p9), %s4504_s25, 1 }
  0x15   : > { %374 = sbr.rel (%p371_p9) target bundleno = 1053 (0x41d), region = 64  ;;  %s8288_s0 = sld [smem:[#allocation12_spill]] (!%p371_p9) }
  0x16   : > { %s4273_s30 = sshll.u32 (!%p371_p9), %s4504_s25, 1  ;;  %s4341_s23 = scalar_lea.hbm (!%p371_p9), %s8276_s12, 4 }
  0x17   : > { %s3332_s27 = scalar_lea.hbm (!%p371_p9), %s8276_s12, %s4273_s30 }
  0x1a   : > { %v435_v0 = vld [vmem:[%s8287_s1 + $0x70] sm:$0xff]  ;;  %v436_v1 = vld [vmem:[%s8287_s1 + $0x78] sm:$0xff]  ;;  %v433_v2 = vld [vmem:[%s8287_s1 + $0x60] sm:$0xff]  ;;  %s417_s17 = scalar_select %p416_p10, %s4504_s25, 1  ;;  %vm443_vm0 = vcmask 523264   ;;  %vm1916_vm6 = vcmask 1040384  }
  0x1b   : > { %455 = vmatpush.msra.mxu0 %v435_v0  ;;  %475 = vmatpush.msra.mxu1 %v436_v1  ;;  %v434_v3 = vld [vmem:[%s8287_s1 + $0x68] sm:$0xff]  ;;  %v431_v4 = vld [vmem:[%s8287_s1 + $0x50] sm:$0xff]  ;;  %v432_v5 = vld [vmem:[%s8287_s1 + $0x58] sm:$0xff]  ;;  %vm1918_vm7 = vcmask 1041408   ;;  %vm1920_vm8 = vcmask 1043459   ;;  %vm1922_vm9 = vcmask 1044483  }
  0x1c   : > { %v429_v6 = vld [vmem:[%s8287_s1 + $0x40] sm:$0xff]  ;;  %v430_v7 = vld [vmem:[%s8287_s1 + $0x48] sm:$0xff]  ;;  %v3468_v8 = vld [vmem:[%s8267_s3 + $0x2f0] sm:$0xff]  ;;  %s3435_s26 = sshll.u32 %s417_s17, 2  ;;  %vm1924_vm10 = vcmask 1042432   ;;  %s8179_s17 = sand.u32 1, %s4407_s22  }
  0x1d   : > { %456 = vmatpush.msra.mxu0 %v433_v2  ;;  %476 = vmatpush.msra.mxu1 %v434_v3  ;;  %v3500_v9 = vld [vmem:[%s8267_s3 + $0x3f0] sm:$0xff]  ;;  %v428_v11 = vld [vmem:[%s8287_s1 + $0x38] sm:$0xff]  ;;  %v425_v12 = vld [vmem:[%s8287_s1 + $0x20] sm:$0xff]  ;;  %s419_s19 = scalar_lea.vmem %s8288_s0, %s3435_s26  ;;  %s3434_s29 = sshll.u32 %s8179_s17, 1 }
  0x1e   : > { %v427_v10 = vld [vmem:[%s8287_s1 + $0x30] sm:$0xff]  ;;  %643 = vmatpush.msra.mxu2 %v3468_v8  ;;  %663 = vmatpush.msra.mxu3 %v3500_v9  ;;  %v3466_v13 = vld [vmem:[%s8267_s3 + $0x2e0] sm:$0xff]  ;;  %v426_v15 = vld [vmem:[%s8287_s1 + $0x28] sm:$0xff]  ;;  %s3433_s15 = sshll.u32 %s8179_s17, 2  ;;  %s415_s20 = scalar_lea.vmem [#allocation5], %s3434_s29 }
  0x1f   : > { %457 = vmatpush.msra.mxu0 %v431_v4  ;;  %477 = vmatpush.msra.mxu1 %v432_v5  ;;  %v3498_v14 = vld [vmem:[%s8267_s3 + $0x3e0] sm:$0xff]  ;;  %v3464_v16 = vld [vmem:[%s8267_s3 + $0x2d0] sm:$0xff]  ;;  %v424_v20 = vld [vmem:[%s8287_s1 + $0x18] sm:$0xff]  ;;  %s3334_s28 = sshll.u32 %s415_s20, 4  ;;  %s3336_s0 = sshll.u32 %s3332_s27, 4  ;;  %s3335_s28 = int_to_ptr.vmem [resolvable:$true] %s3334_s28  ;;  %s3337_s0 = int_to_ptr.hbm [resolvable:$true] %s3336_s0 }
  0x20   : > { %644 = vmatpush.msra.mxu2 %v3466_v13  ;;  %664 = vmatpush.msra.mxu3 %v3498_v14  ;;  %v3496_v17 = vld [vmem:[%s8267_s3 + $0x3d0] sm:$0xff]  ;;  %v3462_v18 = vld [vmem:[%s8267_s3 + $0x2c0] sm:$0xff]  ;;  %v422_v25 = vld [vmem:[%s8287_s1 + $0x8] sm:$0xff]  ;;  %s408_s30 = scalar_lea.vmem [#allocation3], %s3433_s15  ;;  %s3308_s29 = scalar_lea.sflag [#allocation6], %s8179_s17 }
  0x21   : > { %458 = vmatpush.msra.mxu0 %v429_v6  ;;  %478 = vmatpush.msra.mxu1 %v430_v7  ;;  %v423_v19 = vld [vmem:[%s8287_s1 + $0x10] sm:$0xff]  ;;  %v3494_v21 = vld [vmem:[%s8267_s3 + $0x3c0] sm:$0xff]  ;;  %v3469_v27 = vld [vmem:[%s8267_s3 + $0x2f8] sm:$0xff]  ;;  %s3320_s16 = sshll.u32 %s408_s30, 4  ;;  %s4335_s15 = sshra.s32 %s3337_s0, 4  ;;  %s8214_s16 = int_to_ptr.vmem [resolvable:$true] %s3320_s16  ;;  %s4336_s15 = int_to_ptr.hbm [resolvable:$true] %s4335_s15 }
  0x22   : > { %645 = vmatpush.msra.mxu2 %v3464_v16  ;;  %665 = vmatpush.msra.mxu3 %v3496_v17  ;;  %v3460_v22 = vld [vmem:[%s8267_s3 + $0x2b0] sm:$0xff]  ;;  %v421_v24 = vld [vmem:[%s8287_s1] sm:$0xff]  ;;  %v3501_v28 = vld [vmem:[%s8267_s3 + $0x3f8] sm:$0xff]  ;;  %p4342_p0 = scmp.lt.s32.totalorder %s4336_s15, %s8276_s12 }
  0x23   : > { %459 = vmatpush.msra.mxu0 %v427_v10  ;;  %479 = vmatpush.msra.mxu1 %v428_v11  ;;  %v3492_v23 = vld [vmem:[%s8267_s3 + $0x3b0] sm:$0xff]  ;;  %v420_v26 = vld [vmem:[%s419_s19] sm:$0xf]  ;;  %v3467_v31 = vld [vmem:[%s8267_s3 + $0x2e8] sm:$0xff]  ;;  %s4272_s19 = sshll.u32 %s4504_s25, 2 }
  0x24   : > { %646 = vmatpush.msra.mxu2 %v3462_v18  ;;  %666 = vmatpush.msra.mxu3 %v3494_v21  ;;  %v3458_v29 = vld [vmem:[%s8267_s3 + $0x2a0] sm:$0xff]  ;;  %v3499_v32 = vld [vmem:[%s8267_s3 + $0x3e8] sm:$0xff]  ;;  %v3456_v33 = vld [vmem:[%s8267_s3 + $0x290] sm:$0xff]  ;;  %s3318_s25 = scalar_lea.hbm %s8275_s11, %s4272_s19  ;;  %s4337_s19 = scalar_lea.hbm %s4336_s15, 2 }
  0x25   : > { %460 = vmatpush.msra.mxu0 %v425_v12  ;;  %480 = vmatpush.msra.mxu1 %v426_v15  ;;  %v3490_v30 = vld [vmem:[%s8267_s3 + $0x3a0] sm:$0xff]  ;;  %v3488_v34 = vld [vmem:[%s8267_s3 + $0x390] sm:$0xff]  ;;  %v3465_v35 = vld [vmem:[%s8267_s3 + $0x2d8] sm:$0xff]  ;;  %s3322_s26 = sshll.u32 %s3318_s25, 4  ;;  %p4338_p11 = scmp.ne.s32.totalorder %s4336_s15, %s4337_s19  ;;  %s8216_s26 = int_to_ptr.hbm [resolvable:$true] %s3322_s26 }
  0x26   : > { %647 = vmatpush.msra.mxu2 %v3460_v22  ;;  %667 = vmatpush.msra.mxu3 %v3492_v23  ;;  %v3497_v36 = vld [vmem:[%s8267_s3 + $0x3d8] sm:$0xff]  ;;  %v3454_v37 = vld [vmem:[%s8267_s3 + $0x280] sm:$0xff]  ;;  %v3463_v39 = vld [vmem:[%s8267_s3 + $0x2c8] sm:$0xff]  ;;  %p4343_p1 = scmp.lt.s32.totalorder %s4341_s23, %s4337_s19 }
  0x27   : > { %461 = vmatpush.msra.mxu0 %v423_v19  ;;  %481 = vmatpush.msra.mxu1 %v424_v20  ;;  %v3486_v38 = vld [vmem:[%s8267_s3 + $0x380] sm:$0xff]  ;;  %v3495_v40 = vld [vmem:[%s8267_s3 + $0x3c8] sm:$0xff]  ;;  %v3452_v41 = vld [vmem:[%s8267_s3 + $0x270] sm:$0xff]  ;;  %p4339_p12 = pnand %p4338_p11, %p4521_p5 }
  0x28   : > { %648 = vmatpush.msra.mxu2 %v3458_v29  ;;  %668 = vmatpush.msra.mxu3 %v3490_v30  ;;  %v3484_v42 = vld [vmem:[%s8267_s3 + $0x370] sm:$0xff]  ;;  %v3461_v43 = vld [vmem:[%s8267_s3 + $0x2b8] sm:$0xff]  ;;  %v3450_v45 = vld [vmem:[%s8267_s3 + $0x260] sm:$0xff]  ;;  %p4344_p2 = por %p4343_p1, %p4342_p0 }
  0x29   : > { %462 = vmatpush.msra.mxu0 %v421_v24  ;;  %482 = vmatpush.msra.mxu1 %v422_v25  ;;  %v3493_v44 = vld [vmem:[%s8267_s3 + $0x3b8] sm:$0xff]  ;;  %v3482_v46 = vld [vmem:[%s8267_s3 + $0x360] sm:$0xff]  ;;  %v3459_v47 = vld [vmem:[%s8267_s3 + $0x2a8] sm:$0xff]  ;;  %p4340_p13 = pneg %p4339_p12 }
  0x2a   : > { %3436 = vmatmul.msk.f32.vlgmr.msra.gmra.mxu0 %vm443_vm0, %v420_v26  ;;  %3437 = vmatmul.msk.f32.vlgmr.msra.gmra.mxu1 %vm443_vm0, %v420_v26  ;;  %v3491_v48 = vld [vmem:[%s8267_s3 + $0x3a8] sm:$0xff]  ;;  %v3448_v49 = vld [vmem:[%s8267_s3 + $0x250] sm:$0xff]  ;;  %v3457_v51 = vld [vmem:[%s8267_s3 + $0x298] sm:$0xff] }
  0x2b   : > { %683 = vmatpush.msrb.mxu0 %v3469_v27  ;;  %703 = vmatpush.msrb.mxu1 %v3501_v28  ;;  %v3480_v50 = vld [vmem:[%s8267_s3 + $0x350] sm:$0xff]  ;;  %v3489_v52 = vld [vmem:[%s8267_s3 + $0x398] sm:$0xff]  ;;  %v3446_v53 = vld [vmem:[%s8267_s3 + $0x240] sm:$0xff]  ;;  %p4345_p3 = pnand %p4344_p2, %p4340_p13 }
  0x2c   : > { %649 = vmatpush.msra.mxu2 %v3456_v33  ;;  %669 = vmatpush.msra.mxu3 %v3488_v34  ;;  %v3478_v54 = vld [vmem:[%s8267_s3 + $0x340] sm:$0xff]  ;;  %v3455_v55 = vld [vmem:[%s8267_s3 + $0x288] sm:$0xff]  ;;  %v3444_v57 = vld [vmem:[%s8267_s3 + $0x230] sm:$0xff] }
  0x2d   : > { %684 = vmatpush.msrb.mxu0 %v3467_v31  ;;  %704 = vmatpush.msrb.mxu1 %v3499_v32  ;;  %v3487_v56 = vld [vmem:[%s8267_s3 + $0x388] sm:$0xff]  ;;  %v3476_v58 = vld [vmem:[%s8267_s3 + $0x330] sm:$0xff]  ;;  %v3453_v59 = vld [vmem:[%s8267_s3 + $0x278] sm:$0xff] }
  0x2e   : > { %650 = vmatpush.msra.mxu2 %v3454_v37  ;;  %670 = vmatpush.msra.mxu3 %v3486_v38  ;;  %v3485_v60 = vld [vmem:[%s8267_s3 + $0x378] sm:$0xff]  ;;  %v3442_v61 = vld [vmem:[%s8267_s3 + $0x220] sm:$0xff]  ;;  %v3451_v63 = vld [vmem:[%s8267_s3 + $0x268] sm:$0xff] }
  0x2f   : > { %685 = vmatpush.msrb.mxu0 %v3465_v35  ;;  %705 = vmatpush.msrb.mxu1 %v3497_v36  ;;  %v3474_v62 = vld [vmem:[%s8267_s3 + $0x320] sm:$0xff]  ;;  %v3483_v0 = vld [vmem:[%s8267_s3 + $0x368] sm:$0xff]  ;;  %v3440_v1 = vld [vmem:[%s8267_s3 + $0x210] sm:$0xff] }
  0x30   : > { %651 = vmatpush.msra.mxu2 %v3452_v41  ;;  %671 = vmatpush.msra.mxu3 %v3484_v42  ;;  %v3472_v2 = vld [vmem:[%s8267_s3 + $0x310] sm:$0xff]  ;;  %v3449_v3 = vld [vmem:[%s8267_s3 + $0x258] sm:$0xff]  ;;  %v3438_v5 = vld [vmem:[%s8267_s3 + $0x200] sm:$0xff] }
  0x31   : > { %686 = vmatpush.msrb.mxu0 %v3463_v39  ;;  %706 = vmatpush.msrb.mxu1 %v3495_v40  ;;  %v3481_v4 = vld [vmem:[%s8267_s3 + $0x358] sm:$0xff]  ;;  %v3470_v6 = vld [vmem:[%s8267_s3 + $0x300] sm:$0xff]  ;;  %v3447_v7 = vld [vmem:[%s8267_s3 + $0x248] sm:$0xff] }
  0x32   : > { %652 = vmatpush.msra.mxu2 %v3450_v45  ;;  %672 = vmatpush.msra.mxu3 %v3482_v46  ;;  %v3479_v8 = vld [vmem:[%s8267_s3 + $0x348] sm:$0xff]  ;;  %v536_v9 = vld [vmem:[%s8267_s3 + $0xf0] sm:$0xff]  ;;  %v3445_v11 = vld [vmem:[%s8267_s3 + $0x238] sm:$0xff] }
  0x33   : > { %687 = vmatpush.msrb.mxu0 %v3461_v43  ;;  %707 = vmatpush.msrb.mxu1 %v3493_v44  ;;  %v568_v10 = vld [vmem:[%s8267_s3 + $0x1f0] sm:$0xff]  ;;  %v3477_v12 = vld [vmem:[%s8267_s3 + $0x338] sm:$0xff]  ;;  %v534_v13 = vld [vmem:[%s8267_s3 + $0xe0] sm:$0xff] }
  0x34   : > { %653 = vmatpush.msra.mxu2 %v3448_v49  ;;  %673 = vmatpush.msra.mxu3 %v3480_v50  ;;  %v566_v14 = vld [vmem:[%s8267_s3 + $0x1e0] sm:$0xff]  ;;  %v3443_v15 = vld [vmem:[%s8267_s3 + $0x228] sm:$0xff]  ;;  %v532_v17 = vld [vmem:[%s8267_s3 + $0xd0] sm:$0xff] }
  0x35   : > { %688 = vmatpush.msrb.mxu0 %v3459_v47  ;;  %708 = vmatpush.msrb.mxu1 %v3491_v48  ;;  %v3475_v16 = vld [vmem:[%s8267_s3 + $0x328] sm:$0xff]  ;;  %v564_v18 = vld [vmem:[%s8267_s3 + $0x1d0] sm:$0xff]  ;;  %v3441_v19 = vld [vmem:[%s8267_s3 + $0x218] sm:$0xff] }
  0x36   : > { %654 = vmatpush.msra.mxu2 %v3446_v53  ;;  %674 = vmatpush.msra.mxu3 %v3478_v54  ;;  %v3473_v20 = vld [vmem:[%s8267_s3 + $0x318] sm:$0xff]  ;;  %v530_v21 = vld [vmem:[%s8267_s3 + $0xc0] sm:$0xff]  ;;  %v3439_v23 = vld [vmem:[%s8267_s3 + $0x208] sm:$0xff] }
  0x37   : > { %689 = vmatpush.msrb.mxu0 %v3457_v51  ;;  %709 = vmatpush.msrb.mxu1 %v3489_v52  ;;  %v562_v22 = vld [vmem:[%s8267_s3 + $0x1c0] sm:$0xff]  ;;  %v3471_v24 = vld [vmem:[%s8267_s3 + $0x308] sm:$0xff]  ;;  %v537_v25 = vld [vmem:[%s8267_s3 + $0xf8] sm:$0xff] }
  0x38   : > { %655 = vmatpush.msra.mxu2 %v3444_v57  ;;  %675 = vmatpush.msra.mxu3 %v3476_v58  ;;  %v569_v26 = vld [vmem:[%s8267_s3 + $0x1f8] sm:$0xff]  ;;  %v528_v27 = vld [vmem:[%s8267_s3 + $0xb0] sm:$0xff]  ;;  %v535_v29 = vld [vmem:[%s8267_s3 + $0xe8] sm:$0xff] }
  0x39   : > { %690 = vmatpush.msrb.mxu0 %v3455_v55  ;;  %710 = vmatpush.msrb.mxu1 %v3487_v56  ;;  %v560_v28 = vld [vmem:[%s8267_s3 + $0x1b0] sm:$0xff]  ;;  %v567_v30 = vld [vmem:[%s8267_s3 + $0x1e8] sm:$0xff]  ;;  %v526_v31 = vld [vmem:[%s8267_s3 + $0xa0] sm:$0xff] }
  0x3a   : > { %656 = vmatpush.msra.mxu2 %v3442_v61  ;;  %676 = vmatpush.msra.mxu3 %v3474_v62  ;;  %v558_v32 = vld [vmem:[%s8267_s3 + $0x1a0] sm:$0xff]  ;;  %v533_v33 = vld [vmem:[%s8267_s3 + $0xd8] sm:$0xff]  ;;  %v524_v35 = vld [vmem:[%s8267_s3 + $0x90] sm:$0xff]  ;;  %v487_v61 = vlaneseq }
  0x3b   : > { %691 = vmatpush.msrb.mxu0 %v3453_v59  ;;  %711 = vmatpush.msrb.mxu1 %v3485_v60  ;;  %v565_v34 = vld [vmem:[%s8267_s3 + $0x1d8] sm:$0xff]  ;;  %v556_v36 = vld [vmem:[%s8267_s3 + $0x190] sm:$0xff]  ;;  %v531_v37 = vld [vmem:[%s8267_s3 + $0xc8] sm:$0xff] }
  0x3c   : > { %657 = vmatpush.msra.mxu2 %v3440_v1  ;;  %677 = vmatpush.msra.mxu3 %v3472_v2  ;;  %v563_v38 = vld [vmem:[%s8267_s3 + $0x1c8] sm:$0xff]  ;;  %v522_v39 = vld [vmem:[%s8267_s3 + $0x80] sm:$0xff]  ;;  %v529_v41 = vld [vmem:[%s8267_s3 + $0xb8] sm:$0xff]  ;;  %vm4927_vm1 = vcmp.lt.s32.totalorder %v487_v61, 256  ;;  %vm8210_vm11 = vcmp.lt.s32.totalorder %v487_v61, 512 }
  0x3d   : > { %692 = vmatpush.msrb.mxu0 %v3451_v63  ;;  %712 = vmatpush.msrb.mxu1 %v3483_v0  ;;  %v554_v40 = vld [vmem:[%s8267_s3 + $0x180] sm:$0xff]  ;;  %v561_v42 = vld [vmem:[%s8267_s3 + $0x1b8] sm:$0xff]  ;;  %v527_v43 = vld [vmem:[%s8267_s3 + $0xa8] sm:$0xff] }
  0x3e   : > { %658 = vmatpush.msra.mxu2 %v3438_v5  ;;  %678 = vmatpush.msra.mxu3 %v3470_v6  ;;  %v559_v44 = vld [vmem:[%s8267_s3 + $0x1a8] sm:$0xff]  ;;  %v525_v45 = vld [vmem:[%s8267_s3 + $0x98] sm:$0xff]  ;;  %v520_v49 = vld [vmem:[%s8267_s3 + $0x70] sm:$0xff] }
  0x3f   : > { %693 = vmatpush.msrb.mxu0 %v3449_v3  ;;  %713 = vmatpush.msrb.mxu1 %v3481_v4  ;;  %v557_v46 = vld [vmem:[%s8267_s3 + $0x198] sm:$0xff]  ;;  %v523_v47 = vld [vmem:[%s8267_s3 + $0x88] sm:$0xff]  ;;  %v552_v50 = vld [vmem:[%s8267_s3 + $0x170] sm:$0xff] }
  0x40   : > { %723 = vmatpush.msrb.mxu2 %v536_v9  ;;  %743 = vmatpush.msrb.mxu3 %v568_v10  ;;  %v555_v48 = vld [vmem:[%s8267_s3 + $0x188] sm:$0xff]  ;;  %v521_v51 = vld [vmem:[%s8267_s3 + $0x78] sm:$0xff]  ;;  %v518_v53 = vld [vmem:[%s8267_s3 + $0x60] sm:$0xff] }
  0x41   : > { %694 = vmatpush.msrb.mxu0 %v3447_v7  ;;  %714 = vmatpush.msrb.mxu1 %v3479_v8  ;;  %v553_v52 = vld [vmem:[%s8267_s3 + $0x178] sm:$0xff]  ;;  %v550_v54 = vld [vmem:[%s8267_s3 + $0x160] sm:$0xff]  ;;  %v519_v55 = vld [vmem:[%s8267_s3 + $0x68] sm:$0xff]  ;;  %v4417_v8 = vmov 0.0  }
  0x42   : > { %724 = vmatpush.msrb.mxu2 %v534_v13  ;;  %744 = vmatpush.msrb.mxu3 %v566_v14  ;;  %v551_v56 = vld [vmem:[%s8267_s3 + $0x168] sm:$0xff]  ;;  %v516_v57 = vld [vmem:[%s8267_s3 + $0x50] sm:$0xff]  ;;  %v517_v59 = vld [vmem:[%s8267_s3 + $0x58] sm:$0xff]  ;;  %491 = vst.msk [vmem:[#allocation2] ss:$8 sm:$0x3] %vm4927_vm1, %v4417_v8 }
  0x43   : > { %695 = vmatpush.msrb.mxu0 %v3445_v11  ;;  %715 = vmatpush.msrb.mxu1 %v3477_v12  ;;  %v548_v58 = vld [vmem:[%s8267_s3 + $0x150] sm:$0xff]  ;;  %v549_v60 = vld [vmem:[%s8267_s3 + $0x158] sm:$0xff]  ;;  %v514_v62 = vld [vmem:[%s8267_s3 + $0x40] sm:$0xff]  ;;  %494 = vst.msk [vmem:[#allocation2 + $0x5] ss:$8 sm:$0x3] %vm4927_vm1, %v4417_v8 }
  0x44   : > { %725 = vmatpush.msrb.mxu2 %v532_v17  ;;  %745 = vmatpush.msrb.mxu3 %v564_v18  ;;  %v546_v63 = vld [vmem:[%s8267_s3 + $0x140] sm:$0xff]  ;;  %v515_v0 = vld [vmem:[%s8267_s3 + $0x48] sm:$0xff]  ;;  %v512_v2 = vld [vmem:[%s8267_s3 + $0x30] sm:$0xff] }
  0x45   : > { %696 = vmatpush.msrb.mxu0 %v3443_v15  ;;  %716 = vmatpush.msrb.mxu1 %v3475_v16  ;;  %v547_v1 = vld [vmem:[%s8267_s3 + $0x148] sm:$0xff]  ;;  %v544_v3 = vld [vmem:[%s8267_s3 + $0x130] sm:$0xff]  ;;  %v513_v5 = vld [vmem:[%s8267_s3 + $0x38] sm:$0xff] }
  0x46   : > { %726 = vmatpush.msrb.mxu2 %v530_v21  ;;  %746 = vmatpush.msrb.mxu3 %v562_v22  ;;  %v545_v6 = vld [vmem:[%s8267_s3 + $0x138] sm:$0xff]  ;;  %v510_v7 = vld [vmem:[%s8267_s3 + $0x20] sm:$0xff]  ;;  %v511_v10 = vld [vmem:[%s8267_s3 + $0x28] sm:$0xff] }
  0x47   : > { %697 = vmatpush.msrb.mxu0 %v3441_v19  ;;  %717 = vmatpush.msrb.mxu1 %v3473_v20  ;;  %v542_v9 = vld [vmem:[%s8267_s3 + $0x120] sm:$0xff]  ;;  %v543_v11 = vld [vmem:[%s8267_s3 + $0x128] sm:$0xff]  ;;  %v508_v12 = vld [vmem:[%s8267_s3 + $0x10] sm:$0xff] }
  0x48   : > { %727 = vmatpush.msrb.mxu2 %v528_v27  ;;  %747 = vmatpush.msrb.mxu3 %v560_v28  ;;  %v540_v13 = vld [vmem:[%s8267_s3 + $0x110] sm:$0xff]  ;;  %v509_v14 = vld [vmem:[%s8267_s3 + $0x18] sm:$0xff]  ;;  %v506_v16 = vld [vmem:[%s8267_s3] sm:$0xff] }
  0x49   : > { %698 = vmatpush.msrb.mxu0 %v3439_v23  ;;  %718 = vmatpush.msrb.mxu1 %v3471_v24  ;;  %v541_v15 = vld [vmem:[%s8267_s3 + $0x118] sm:$0xff]  ;;  %v538_v17 = vld [vmem:[%s8267_s3 + $0x100] sm:$0xff]  ;;  %v507_v18 = vld [vmem:[%s8267_s3 + $0x8] sm:$0xff] }
  0x4a   : > { %728 = vmatpush.msrb.mxu2 %v526_v31  ;;  %748 = vmatpush.msrb.mxu3 %v558_v32  ;;  %v539_v19 = vld [vmem:[%s8267_s3 + $0x108] sm:$0xff]  ;;  %v437_v20 = vld [vmem:[%s8266_s2] sm:$0x3] }
  0x4b   : > { %763 = vmatpush.msra.mxu0 %v537_v25  ;;  %783 = vmatpush.msra.mxu1 %v569_v26  ;;  %v439_v21 = vperm.slane %v437_v20, 0  ;;  %v440_v22 = vperm.slane %v437_v20, 1  ;;  %v3542_v20 = vld [vmem:[%s8267_s3 + $0x540] sm:$0xff] }
  0x4c   : > { %729 = vmatpush.msrb.mxu2 %v524_v35  ;;  %749 = vmatpush.msrb.mxu3 %v556_v36  ;;  %v3532_v35 = vld [vmem:[%s8267_s3 + $0x4f0] sm:$0xff] }
  0x4d   : > { %764 = vmatpush.msra.mxu0 %v535_v29  ;;  %784 = vmatpush.msra.mxu1 %v567_v30  ;;  %v3564_v36 = vld [vmem:[%s8267_s3 + $0x5f0] sm:$0xff] }
  0x4e   : > { %730 = vmatpush.msrb.mxu2 %v522_v39  ;;  %750 = vmatpush.msrb.mxu3 %v554_v40  ;;  %v3530_v39 = vld [vmem:[%s8267_s3 + $0x4e0] sm:$0xff] }
  0x4f   : > { %765 = vmatpush.msra.mxu0 %v533_v33  ;;  %785 = vmatpush.msra.mxu1 %v565_v34  ;;  %v3562_v40 = vld [vmem:[%s8267_s3 + $0x5e0] sm:$0xff] }
  0x50   : > { %731 = vmatpush.msrb.mxu2 %v520_v49  ;;  %751 = vmatpush.msrb.mxu3 %v552_v50  ;;  %v3526_v49 = vld [vmem:[%s8267_s3 + $0x4c0] sm:$0xff] }
  0x51   : > { %766 = vmatpush.msra.mxu0 %v531_v37  ;;  %786 = vmatpush.msra.mxu1 %v563_v38  ;;  %v3533_v37 = vld [vmem:[%s8267_s3 + $0x4f8] sm:$0xff]  ;;  %v3558_v50 = vld [vmem:[%s8267_s3 + $0x5c0] sm:$0xff] }
  0x52   : > { %732 = vmatpush.msrb.mxu2 %v518_v53  ;;  %752 = vmatpush.msrb.mxu3 %v550_v54  ;;  %v3565_v38 = vld [vmem:[%s8267_s3 + $0x5f8] sm:$0xff]  ;;  %v3524_v53 = vld [vmem:[%s8267_s3 + $0x4b0] sm:$0xff] }
  0x53   : > { %767 = vmatpush.msra.mxu0 %v529_v41  ;;  %787 = vmatpush.msra.mxu1 %v561_v42  ;;  %v3531_v41 = vld [vmem:[%s8267_s3 + $0x4e8] sm:$0xff]  ;;  %v3556_v54 = vld [vmem:[%s8267_s3 + $0x5b0] sm:$0xff] }
  0x54   : > { %733 = vmatpush.msrb.mxu2 %v516_v57  ;;  %753 = vmatpush.msrb.mxu3 %v548_v58  ;;  %v3563_v42 = vld [vmem:[%s8267_s3 + $0x5e8] sm:$0xff]  ;;  %v3522_v57 = vld [vmem:[%s8267_s3 + $0x4a0] sm:$0xff] }
  0x55   : > { %768 = vmatpush.msra.mxu0 %v527_v43  ;;  %788 = vmatpush.msra.mxu1 %v559_v44  ;;  %v3528_v43 = vld [vmem:[%s8267_s3 + $0x4d0] sm:$0xff]  ;;  %v3554_v58 = vld [vmem:[%s8267_s3 + $0x5a0] sm:$0xff] }
  0x56   : > { %734 = vmatpush.msrb.mxu2 %v514_v62  ;;  %754 = vmatpush.msrb.mxu3 %v546_v63  ;;  %v3560_v44 = vld [vmem:[%s8267_s3 + $0x5d0] sm:$0xff] }
  0x57   : > { %769 = vmatpush.msra.mxu0 %v525_v45  ;;  %789 = vmatpush.msra.mxu1 %v557_v46  ;;  %v3520_v62 = vld [vmem:[%s8267_s3 + $0x490] sm:$0xff] }
  0x58   : > { %735 = vmatpush.msrb.mxu2 %v512_v2  ;;  %755 = vmatpush.msrb.mxu3 %v544_v3  ;;  %v3552_v63 = vld [vmem:[%s8267_s3 + $0x590] sm:$0xff]  ;;  %v3518_v2 = vld [vmem:[%s8267_s3 + $0x480] sm:$0xff] }
  0x59   : > { %770 = vmatpush.msra.mxu0 %v523_v47  ;;  %790 = vmatpush.msra.mxu1 %v555_v48  ;;  %v3529_v47 = vld [vmem:[%s8267_s3 + $0x4d8] sm:$0xff]  ;;  %v3550_v3 = vld [vmem:[%s8267_s3 + $0x580] sm:$0xff] }
  0x5a   : > { %736 = vmatpush.msrb.mxu2 %v510_v7  ;;  %756 = vmatpush.msrb.mxu3 %v542_v9  ;;  %v3561_v48 = vld [vmem:[%s8267_s3 + $0x5d8] sm:$0xff]  ;;  %v3516_v7 = vld [vmem:[%s8267_s3 + $0x470] sm:$0xff] }
  0x5b   : > { %771 = vmatpush.msra.mxu0 %v521_v51  ;;  %791 = vmatpush.msra.mxu1 %v553_v52  ;;  %v3527_v51 = vld [vmem:[%s8267_s3 + $0x4c8] sm:$0xff]  ;;  %v3517_v9 = vld [vmem:[%s8267_s3 + $0x478] sm:$0xff] }
  0x5c   : > { %737 = vmatpush.msrb.mxu2 %v508_v12  ;;  %757 = vmatpush.msrb.mxu3 %v540_v13  ;;  %v3559_v52 = vld [vmem:[%s8267_s3 + $0x5c8] sm:$0xff]  ;;  %v3546_v12 = vld [vmem:[%s8267_s3 + $0x560] sm:$0xff] }
  0x5d   : > { %772 = vmatpush.msra.mxu0 %v519_v55  ;;  %792 = vmatpush.msra.mxu1 %v551_v56  ;;  %v3525_v55 = vld [vmem:[%s8267_s3 + $0x4b8] sm:$0xff]  ;;  %v3515_v13 = vld [vmem:[%s8267_s3 + $0x468] sm:$0xff] }
  0x5e   : > { %738 = vmatpush.msrb.mxu2 %v506_v16  ;;  %758 = vmatpush.msrb.mxu3 %v538_v17  ;;  %v3557_v56 = vld [vmem:[%s8267_s3 + $0x5b8] sm:$0xff]  ;;  %v3544_v16 = vld [vmem:[%s8267_s3 + $0x550] sm:$0xff] }
  0x5f   : > { %773 = vmatpush.msra.mxu0 %v517_v59  ;;  %793 = vmatpush.msra.mxu1 %v549_v60  ;;  %v3523_v59 = vld [vmem:[%s8267_s3 + $0x4a8] sm:$0xff]  ;;  %v3513_v17 = vld [vmem:[%s8267_s3 + $0x458] sm:$0xff] }
  0x60   : > { %v3555_v60 = vld [vmem:[%s8267_s3 + $0x5a8] sm:$0xff] }
  0x61   : > { %774 = vmatpush.msra.mxu0 %v515_v0  ;;  %794 = vmatpush.msra.mxu1 %v547_v1  ;;  %v3521_v0 = vld [vmem:[%s8267_s3 + $0x498] sm:$0xff] }
  0x62   : > { %v3553_v1 = vld [vmem:[%s8267_s3 + $0x598] sm:$0xff] }
  0x63   : > { %775 = vmatpush.msra.mxu0 %v513_v5  ;;  %795 = vmatpush.msra.mxu1 %v545_v6  ;;  %v3519_v5 = vld [vmem:[%s8267_s3 + $0x488] sm:$0xff] }
  0x64   : > { %v3551_v6 = vld [vmem:[%s8267_s3 + $0x588] sm:$0xff] }
  0x65   : > { %776 = vmatpush.msra.mxu0 %v511_v10  ;;  %796 = vmatpush.msra.mxu1 %v543_v11  ;;  %v3549_v10 = vld [vmem:[%s8267_s3 + $0x578] sm:$0xff]  ;;  %v3514_v11 = vld [vmem:[%s8267_s3 + $0x460] sm:$0xff] }
  0x67   : > { %777 = vmatpush.msra.mxu0 %v509_v14  ;;  %797 = vmatpush.msra.mxu1 %v541_v15  ;;  %v3547_v14 = vld [vmem:[%s8267_s3 + $0x568] sm:$0xff]  ;;  %v3512_v15 = vld [vmem:[%s8267_s3 + $0x450] sm:$0xff] }
  0x69   : > { %778 = vmatpush.msra.mxu0 %v507_v18  ;;  %798 = vmatpush.msra.mxu1 %v539_v19  ;;  %v3545_v18 = vld [vmem:[%s8267_s3 + $0x558] sm:$0xff]  ;;  %v3510_v19 = vld [vmem:[%s8267_s3 + $0x440] sm:$0xff] }
  0xa7   : > { %v464_v23 = vpop.f32.mrf.mxu0  ;;  %v484_v24 = vpop.f32.mrf.mxu1 }
  0xa8   : > { %v4982_v25 = vadd.f32 %v464_v23, %v439_v21  ;;  %v4984_v26 = vadd.f32 %v484_v24, %v440_v22  ;;  %v3511_v21 = vld [vmem:[%s8267_s3 + $0x448] sm:$0xff]  ;;  %v3508_v23 = vld [vmem:[%s8267_s3 + $0x430] sm:$0xff] }
  0xa9   : > { %v3543_v22 = vld [vmem:[%s8267_s3 + $0x548] sm:$0xff]  ;;  %v3540_v24 = vld [vmem:[%s8267_s3 + $0x530] sm:$0xff] }
  0xaa   : > { %v498_v27 = vrot.slane %v4982_v25, 7  ;;  %v499_v28 = vrot.slane %v4984_v26, 7 }
  0xac   : > { %502 = vst [vmem:[#allocation2] sm:$0x1e] %v498_v27  ;;  %v3509_v27 = vld [vmem:[%s8267_s3 + $0x438] sm:$0xff] }
  0xad   : > { %503 = vst [vmem:[#allocation2 + $0x8] sm:$0x1e] %v499_v28  ;;  %v3541_v28 = vld [vmem:[%s8267_s3 + $0x538] sm:$0xff] }
  0xb3   : > { %v570_v29 = vld [vmem:[#allocation2] sm:$0x1e] }
  0xb4   : > { %v504_v30 = vld [vmem:[#allocation2] sm:$0xf]  ;;  %v639_v31 = vrot.slane %v570_v29, 1  ;;  %v571_v32 = vld [vmem:[#allocation2 + $0x8] sm:$0x1e] }
  0xb5   : > { %v505_v33 = vld [vmem:[#allocation2 + $0x8] sm:$0xf]  ;;  %v640_v34 = vrot.slane %v571_v32, 1  ;;  %v5021_v45 = vld [vmem:[#allocation2] sm:$0x3c] }
  0xb6   : > { %982 = vst.msk [vmem:[#allocation2] ss:$8 sm:$0x3] %vm4927_vm1, %v4417_v8  ;;  %659 = vmatmul.f32.vlgmr.msra.gmra.mxu2 %v639_v31  ;;  %699 = vmatmul.f32.vlgmr.msrb.gmra.mxu0 %v639_v31  ;;  %v5023_v46 = vld [vmem:[#allocation2 + $0x8] sm:$0x3c]  ;;  %v3506_v29 = vld [vmem:[%s8267_s3 + $0x420] sm:$0xff] }
  0xb7   : > { %679 = vmatmul.f32.vlgmr.msra.gmra.mxu3 %v640_v34  ;;  %719 = vmatmul.f32.vlgmr.msrb.gmra.mxu1 %v640_v34  ;;  %984 = vst.msk [vmem:[#allocation2 + $0x5] ss:$8 sm:$0x3] %vm4927_vm1, %v4417_v8  ;;  %v3548_v8 = vld [vmem:[%s8267_s3 + $0x570] sm:$0xff]  ;;  %v3507_v31 = vld [vmem:[%s8267_s3 + $0x428] sm:$0xff] }
  0xb8   : > { %876 = vmatpush.msra.mxu2 %v3532_v35  ;;  %896 = vmatpush.msra.mxu3 %v3564_v36  ;;  %v3539_v32 = vld [vmem:[%s8267_s3 + $0x528] sm:$0xff]  ;;  %v3536_v34 = vld [vmem:[%s8267_s3 + $0x510] sm:$0xff]  ;;  %v3505_v35 = vld [vmem:[%s8267_s3 + $0x418] sm:$0xff] }
  0xb9   : > { %916 = vmatpush.msrb.mxu0 %v3533_v37  ;;  %936 = vmatpush.msrb.mxu1 %v3565_v38  ;;  %v3537_v36 = vld [vmem:[%s8267_s3 + $0x518] sm:$0xff]  ;;  %v3502_v37 = vld [vmem:[%s8267_s3 + $0x400] sm:$0xff] }
  0xba   : > { %877 = vmatpush.msra.mxu2 %v3530_v39  ;;  %897 = vmatpush.msra.mxu3 %v3562_v40  ;;  %v3534_v38 = vld [vmem:[%s8267_s3 + $0x500] sm:$0xff]  ;;  %v3503_v39 = vld [vmem:[%s8267_s3 + $0x408] sm:$0xff] }
  0xbb   : > { %917 = vmatpush.msrb.mxu0 %v3531_v41  ;;  %937 = vmatpush.msrb.mxu1 %v3563_v42  ;;  %v3535_v40 = vld [vmem:[%s8267_s3 + $0x508] sm:$0xff]  ;;  %v872_v41 = vrot.slane %v5021_v45, 2  ;;  %v873_v42 = vrot.slane %v5023_v46, 2  ;;  %v3626_v45 = vld [vmem:[%s8270_s6 + $0x3e0] sm:$0xff] }
  0xbc   : > { %878 = vmatpush.msra.mxu2 %v3528_v43  ;;  %898 = vmatpush.msra.mxu3 %v3560_v44  ;;  %v3628_v43 = vld [vmem:[%s8270_s6 + $0x3f0] sm:$0xff]  ;;  %v3629_v44 = vld [vmem:[%s8270_s6 + $0x3f8] sm:$0xff]  ;;  %v3627_v46 = vld [vmem:[%s8270_s6 + $0x3e8] sm:$0xff] }
  0xbd   : > { %918 = vmatpush.msrb.mxu0 %v3529_v47  ;;  %938 = vmatpush.msrb.mxu1 %v3561_v48  ;;  %v3624_v47 = vld [vmem:[%s8270_s6 + $0x3d0] sm:$0xff]  ;;  %v3625_v48 = vld [vmem:[%s8270_s6 + $0x3d8] sm:$0xff] }
  0xbe   : > { %879 = vmatpush.msra.mxu2 %v3526_v49  ;;  %899 = vmatpush.msra.mxu3 %v3558_v50  ;;  %v3596_v49 = vld [vmem:[%s8270_s6 + $0x2f0] sm:$0xff]  ;;  %v3622_v50 = vld [vmem:[%s8270_s6 + $0x3c0] sm:$0xff] }
  0xbf   : > { %919 = vmatpush.msrb.mxu0 %v3527_v51  ;;  %939 = vmatpush.msrb.mxu1 %v3559_v52  ;;  %v3597_v51 = vld [vmem:[%s8270_s6 + $0x2f8] sm:$0xff]  ;;  %v3623_v52 = vld [vmem:[%s8270_s6 + $0x3c8] sm:$0xff] }
  0xc0   : > { %739 = vmatmul.f32.vlgmr.msrb.gmra.mxu2 %v504_v30  ;;  %759 = vmatmul.f32.vlgmr.msrb.gmra.mxu3 %v505_v33 }
  0xc1   : > { %779 = vmatmul.f32.vlgmr.msra.gmra.mxu0 %v504_v30  ;;  %799 = vmatmul.f32.vlgmr.msra.gmra.mxu1 %v505_v33  ;;  %v3538_v30 = vld [vmem:[%s8267_s3 + $0x520] sm:$0xff]  ;;  %v3504_v33 = vld [vmem:[%s8267_s3 + $0x410] sm:$0xff] }
  0xc2   : > { %880 = vmatpush.msra.mxu2 %v3524_v53  ;;  %900 = vmatpush.msra.mxu3 %v3556_v54  ;;  %v3594_v53 = vld [vmem:[%s8270_s6 + $0x2e0] sm:$0xff]  ;;  %v3620_v54 = vld [vmem:[%s8270_s6 + $0x3b0] sm:$0xff] }
  0xc3   : > { %920 = vmatpush.msrb.mxu0 %v3525_v55  ;;  %940 = vmatpush.msrb.mxu1 %v3557_v56  ;;  %v3595_v55 = vld [vmem:[%s8270_s6 + $0x2e8] sm:$0xff]  ;;  %v3621_v56 = vld [vmem:[%s8270_s6 + $0x3b8] sm:$0xff] }
  0xc4   : > { %881 = vmatpush.msra.mxu2 %v3522_v57  ;;  %901 = vmatpush.msra.mxu3 %v3554_v58  ;;  %v3592_v57 = vld [vmem:[%s8270_s6 + $0x2d0] sm:$0xff]  ;;  %v3618_v58 = vld [vmem:[%s8270_s6 + $0x3a0] sm:$0xff] }
  0xc5   : > { %921 = vmatpush.msrb.mxu0 %v3523_v59  ;;  %941 = vmatpush.msrb.mxu1 %v3555_v60  ;;  %v3593_v59 = vld [vmem:[%s8270_s6 + $0x2d8] sm:$0xff]  ;;  %v3619_v60 = vld [vmem:[%s8270_s6 + $0x3a8] sm:$0xff] }
  0xc6   : > { %882 = vmatpush.msra.mxu2 %v3520_v62  ;;  %902 = vmatpush.msra.mxu3 %v3552_v63  ;;  %v3590_v62 = vld [vmem:[%s8270_s6 + $0x2c0] sm:$0xff]  ;;  %v3616_v63 = vld [vmem:[%s8270_s6 + $0x390] sm:$0xff] }
  0xc7   : > { %922 = vmatpush.msrb.mxu0 %v3521_v0  ;;  %942 = vmatpush.msrb.mxu1 %v3553_v1  ;;  %v3591_v0 = vld [vmem:[%s8270_s6 + $0x2c8] sm:$0xff]  ;;  %v3617_v1 = vld [vmem:[%s8270_s6 + $0x398] sm:$0xff] }
  0xc8   : > { %883 = vmatpush.msra.mxu2 %v3518_v2  ;;  %903 = vmatpush.msra.mxu3 %v3550_v3  ;;  %v3588_v2 = vld [vmem:[%s8270_s6 + $0x2b0] sm:$0xff]  ;;  %v3614_v3 = vld [vmem:[%s8270_s6 + $0x380] sm:$0xff] }
  0xc9   : > { %923 = vmatpush.msrb.mxu0 %v3519_v5  ;;  %943 = vmatpush.msrb.mxu1 %v3551_v6  ;;  %v3589_v5 = vld [vmem:[%s8270_s6 + $0x2b8] sm:$0xff]  ;;  %v3615_v6 = vld [vmem:[%s8270_s6 + $0x388] sm:$0xff] }
  0xca   : > { %884 = vmatpush.msra.mxu2 %v3516_v7  ;;  %904 = vmatpush.msra.mxu3 %v3548_v8  ;;  %v3586_v7 = vld [vmem:[%s8270_s6 + $0x2a0] sm:$0xff]  ;;  %v3612_v8 = vld [vmem:[%s8270_s6 + $0x370] sm:$0xff] }
  0xcb   : > { %924 = vmatpush.msrb.mxu0 %v3517_v9  ;;  %944 = vmatpush.msrb.mxu1 %v3549_v10  ;;  %v3587_v9 = vld [vmem:[%s8270_s6 + $0x2a8] sm:$0xff]  ;;  %v3613_v10 = vld [vmem:[%s8270_s6 + $0x378] sm:$0xff] }
  0xcc   : > { %885 = vmatpush.msra.mxu2 %v3514_v11  ;;  %905 = vmatpush.msra.mxu3 %v3546_v12  ;;  %v3584_v11 = vld [vmem:[%s8270_s6 + $0x290] sm:$0xff]  ;;  %v3610_v12 = vld [vmem:[%s8270_s6 + $0x360] sm:$0xff] }
  0xcd   : > { %925 = vmatpush.msrb.mxu0 %v3515_v13  ;;  %945 = vmatpush.msrb.mxu1 %v3547_v14  ;;  %v3585_v13 = vld [vmem:[%s8270_s6 + $0x298] sm:$0xff]  ;;  %v3611_v14 = vld [vmem:[%s8270_s6 + $0x368] sm:$0xff] }
  0xce   : > { %886 = vmatpush.msra.mxu2 %v3512_v15  ;;  %906 = vmatpush.msra.mxu3 %v3544_v16  ;;  %v3582_v15 = vld [vmem:[%s8270_s6 + $0x280] sm:$0xff]  ;;  %v3608_v16 = vld [vmem:[%s8270_s6 + $0x350] sm:$0xff] }
  0xcf   : > { %926 = vmatpush.msrb.mxu0 %v3513_v17  ;;  %946 = vmatpush.msrb.mxu1 %v3545_v18  ;;  %v3583_v17 = vld [vmem:[%s8270_s6 + $0x288] sm:$0xff]  ;;  %v3609_v18 = vld [vmem:[%s8270_s6 + $0x358] sm:$0xff] }
  0xd0   : > { %887 = vmatpush.msra.mxu2 %v3510_v19  ;;  %907 = vmatpush.msra.mxu3 %v3542_v20  ;;  %v3580_v19 = vld [vmem:[%s8270_s6 + $0x270] sm:$0xff]  ;;  %v3606_v20 = vld [vmem:[%s8270_s6 + $0x340] sm:$0xff] }
  0xd1   : > { %927 = vmatpush.msrb.mxu0 %v3511_v21  ;;  %947 = vmatpush.msrb.mxu1 %v3543_v22  ;;  %v3581_v21 = vld [vmem:[%s8270_s6 + $0x278] sm:$0xff]  ;;  %v3607_v22 = vld [vmem:[%s8270_s6 + $0x348] sm:$0xff] }
  0xd2   : > { %888 = vmatpush.msra.mxu2 %v3508_v23  ;;  %908 = vmatpush.msra.mxu3 %v3540_v24  ;;  %v3578_v23 = vld [vmem:[%s8270_s6 + $0x260] sm:$0xff]  ;;  %v3604_v24 = vld [vmem:[%s8270_s6 + $0x330] sm:$0xff] }
  0xd3   : > { %928 = vmatpush.msrb.mxu0 %v3509_v27  ;;  %948 = vmatpush.msrb.mxu1 %v3541_v28  ;;  %v3579_v27 = vld [vmem:[%s8270_s6 + $0x268] sm:$0xff]  ;;  %v3605_v28 = vld [vmem:[%s8270_s6 + $0x338] sm:$0xff] }
  0xd4   : > { %889 = vmatpush.msra.mxu2 %v3506_v29  ;;  %909 = vmatpush.msra.mxu3 %v3538_v30  ;;  %v3576_v29 = vld [vmem:[%s8270_s6 + $0x250] sm:$0xff]  ;;  %v3602_v30 = vld [vmem:[%s8270_s6 + $0x320] sm:$0xff] }
  0xd5   : > { %929 = vmatpush.msrb.mxu0 %v3507_v31  ;;  %949 = vmatpush.msrb.mxu1 %v3539_v32  ;;  %v3577_v31 = vld [vmem:[%s8270_s6 + $0x258] sm:$0xff]  ;;  %v3603_v32 = vld [vmem:[%s8270_s6 + $0x328] sm:$0xff] }
  0xd6   : > { %890 = vmatpush.msra.mxu2 %v3504_v33  ;;  %910 = vmatpush.msra.mxu3 %v3536_v34  ;;  %v3574_v33 = vld [vmem:[%s8270_s6 + $0x240] sm:$0xff]  ;;  %v3600_v34 = vld [vmem:[%s8270_s6 + $0x310] sm:$0xff] }
  0xd7   : > { %930 = vmatpush.msrb.mxu0 %v3505_v35  ;;  %950 = vmatpush.msrb.mxu1 %v3537_v36  ;;  %v3575_v35 = vld [vmem:[%s8270_s6 + $0x248] sm:$0xff]  ;;  %v3601_v36 = vld [vmem:[%s8270_s6 + $0x318] sm:$0xff] }
  0xd8   : > { %891 = vmatpush.msra.mxu2 %v3502_v37  ;;  %911 = vmatpush.msra.mxu3 %v3534_v38  ;;  %v3572_v37 = vld [vmem:[%s8270_s6 + $0x230] sm:$0xff]  ;;  %v3598_v38 = vld [vmem:[%s8270_s6 + $0x300] sm:$0xff] }
  0xd9   : > { %931 = vmatpush.msrb.mxu0 %v3503_v39  ;;  %951 = vmatpush.msrb.mxu1 %v3535_v40  ;;  %v3573_v39 = vld [vmem:[%s8270_s6 + $0x238] sm:$0xff]  ;;  %v3599_v40 = vld [vmem:[%s8270_s6 + $0x308] sm:$0xff] }
  0xda   : > { %892 = vmatmul.f32.vlgmr.msra.gmra.mxu2 %v872_v41  ;;  %912 = vmatmul.f32.vlgmr.msra.gmra.mxu3 %v873_v42 }
  0xdb   : > { %932 = vmatmul.f32.vlgmr.msrb.gmra.mxu0 %v872_v41  ;;  %952 = vmatmul.f32.vlgmr.msrb.gmra.mxu1 %v873_v42  ;;  %v1058_v41 = vld [vmem:[%s8270_s6 + $0x1f0] sm:$0xff]  ;;  %v1059_v42 = vld [vmem:[%s8270_s6 + $0x1f8] sm:$0xff] }
  0xdc   : > { %1153 = vmatpush.msrb.mxu3 %v3628_v43  ;;  %1193 = vmatpush.msra.mxu1 %v3629_v44  ;;  %v3570_v43 = vld [vmem:[%s8270_s6 + $0x220] sm:$0xff]  ;;  %v3571_v44 = vld [vmem:[%s8270_s6 + $0x228] sm:$0xff] }
  0xdd   : > { %1133 = vmatpush.msrb.mxu2 %v3596_v49  ;;  %1173 = vmatpush.msra.mxu0 %v3597_v51  ;;  %v1054_v49 = vld [vmem:[%s8270_s6 + $0x1d0] sm:$0xff]  ;;  %v3566_v51 = vld [vmem:[%s8270_s6 + $0x200] sm:$0xff] }
  0xde   : > { %1154 = vmatpush.msrb.mxu3 %v3626_v45  ;;  %1194 = vmatpush.msra.mxu1 %v3627_v46  ;;  %v1056_v45 = vld [vmem:[%s8270_s6 + $0x1e0] sm:$0xff]  ;;  %v1057_v46 = vld [vmem:[%s8270_s6 + $0x1e8] sm:$0xff] }
  0xdf   : > { %1134 = vmatpush.msrb.mxu2 %v3594_v53  ;;  %1174 = vmatpush.msra.mxu0 %v3595_v55  ;;  %v1026_v53 = vld [vmem:[%s8270_s6 + $0xf0] sm:$0xff]  ;;  %v1027_v55 = vld [vmem:[%s8270_s6 + $0xf8] sm:$0xff] }
  0xe0   : > { %1155 = vmatpush.msrb.mxu3 %v3624_v47  ;;  %1195 = vmatpush.msra.mxu1 %v3625_v48  ;;  %v3568_v47 = vld [vmem:[%s8270_s6 + $0x210] sm:$0xff]  ;;  %v3569_v48 = vld [vmem:[%s8270_s6 + $0x218] sm:$0xff] }
  0xe1   : > { %1135 = vmatpush.msrb.mxu2 %v3592_v57  ;;  %1175 = vmatpush.msra.mxu0 %v3593_v59  ;;  %v1024_v57 = vld [vmem:[%s8270_s6 + $0xe0] sm:$0xff]  ;;  %v1025_v59 = vld [vmem:[%s8270_s6 + $0xe8] sm:$0xff] }
  0xe2   : > { %1156 = vmatpush.msrb.mxu3 %v3622_v50  ;;  %1196 = vmatpush.msra.mxu1 %v3623_v52  ;;  %v1055_v50 = vld [vmem:[%s8270_s6 + $0x1d8] sm:$0xff]  ;;  %v3567_v52 = vld [vmem:[%s8270_s6 + $0x208] sm:$0xff] }
  0xe3   : > { %1136 = vmatpush.msrb.mxu2 %v3590_v62  ;;  %1176 = vmatpush.msra.mxu0 %v3591_v0  ;;  %v1022_v62 = vld [vmem:[%s8270_s6 + $0xd0] sm:$0xff]  ;;  %v1023_v0 = vld [vmem:[%s8270_s6 + $0xd8] sm:$0xff] }
  0xe4   : > { %1157 = vmatpush.msrb.mxu3 %v3620_v54  ;;  %1197 = vmatpush.msra.mxu1 %v3621_v56  ;;  %v1052_v54 = vld [vmem:[%s8270_s6 + $0x1c0] sm:$0xff]  ;;  %v1053_v56 = vld [vmem:[%s8270_s6 + $0x1c8] sm:$0xff] }
  0xe5   : > { %1137 = vmatpush.msrb.mxu2 %v3588_v2  ;;  %1177 = vmatpush.msra.mxu0 %v3589_v5  ;;  %v1020_v2 = vld [vmem:[%s8270_s6 + $0xc0] sm:$0xff]  ;;  %v1021_v5 = vld [vmem:[%s8270_s6 + $0xc8] sm:$0xff] }
  0xe6   : > { %1158 = vmatpush.msrb.mxu3 %v3618_v58  ;;  %1198 = vmatpush.msra.mxu1 %v3619_v60  ;;  %v1050_v58 = vld [vmem:[%s8270_s6 + $0x1b0] sm:$0xff]  ;;  %v1051_v60 = vld [vmem:[%s8270_s6 + $0x1b8] sm:$0xff] }
  0xe7   : > { %1138 = vmatpush.msrb.mxu2 %v3586_v7  ;;  %1178 = vmatpush.msra.mxu0 %v3587_v9  ;;  %v1018_v7 = vld [vmem:[%s8270_s6 + $0xb0] sm:$0xff]  ;;  %v1019_v9 = vld [vmem:[%s8270_s6 + $0xb8] sm:$0xff] }
  0xe8   : > { %1159 = vmatpush.msrb.mxu3 %v3616_v63  ;;  %1199 = vmatpush.msra.mxu1 %v3617_v1  ;;  %v1048_v63 = vld [vmem:[%s8270_s6 + $0x1a0] sm:$0xff]  ;;  %v1049_v1 = vld [vmem:[%s8270_s6 + $0x1a8] sm:$0xff] }
  0xe9   : > { %1139 = vmatpush.msrb.mxu2 %v3584_v11  ;;  %1179 = vmatpush.msra.mxu0 %v3585_v13  ;;  %v1016_v11 = vld [vmem:[%s8270_s6 + $0xa0] sm:$0xff]  ;;  %v1017_v13 = vld [vmem:[%s8270_s6 + $0xa8] sm:$0xff] }
  0xea   : > { %1160 = vmatpush.msrb.mxu3 %v3614_v3  ;;  %1200 = vmatpush.msra.mxu1 %v3615_v6  ;;  %v1046_v3 = vld [vmem:[%s8270_s6 + $0x190] sm:$0xff]  ;;  %v1047_v6 = vld [vmem:[%s8270_s6 + $0x198] sm:$0xff] }
  0xeb   : > { %1140 = vmatpush.msrb.mxu2 %v3582_v15  ;;  %1180 = vmatpush.msra.mxu0 %v3583_v17  ;;  %v1014_v15 = vld [vmem:[%s8270_s6 + $0x90] sm:$0xff]  ;;  %v1015_v17 = vld [vmem:[%s8270_s6 + $0x98] sm:$0xff] }
  0xec   : > { %1161 = vmatpush.msrb.mxu3 %v3612_v8  ;;  %1201 = vmatpush.msra.mxu1 %v3613_v10  ;;  %v1044_v8 = vld [vmem:[%s8270_s6 + $0x180] sm:$0xff]  ;;  %v1045_v10 = vld [vmem:[%s8270_s6 + $0x188] sm:$0xff] }
  0xed   : > { %1141 = vmatpush.msrb.mxu2 %v3580_v19  ;;  %1181 = vmatpush.msra.mxu0 %v3581_v21  ;;  %v1012_v21 = vld [vmem:[%s8270_s6 + $0x80] sm:$0xff] }
  0xee   : > { %1162 = vmatpush.msrb.mxu3 %v3610_v12  ;;  %1202 = vmatpush.msra.mxu1 %v3611_v14  ;;  %v1042_v12 = vld [vmem:[%s8270_s6 + $0x170] sm:$0xff]  ;;  %v1043_v14 = vld [vmem:[%s8270_s6 + $0x178] sm:$0xff] }
  0xef   : > { %1142 = vmatpush.msrb.mxu2 %v3578_v23  ;;  %1182 = vmatpush.msra.mxu0 %v3579_v27  ;;  %v1013_v23 = vld [vmem:[%s8270_s6 + $0x88] sm:$0xff]  ;;  %v1010_v27 = vld [vmem:[%s8270_s6 + $0x70] sm:$0xff] }
  0xf0   : > { %1163 = vmatpush.msrb.mxu3 %v3608_v16  ;;  %1203 = vmatpush.msra.mxu1 %v3609_v18  ;;  %v1040_v16 = vld [vmem:[%s8270_s6 + $0x160] sm:$0xff]  ;;  %v1041_v18 = vld [vmem:[%s8270_s6 + $0x168] sm:$0xff] }
  0xf1   : > { %1143 = vmatpush.msrb.mxu2 %v3576_v29  ;;  %1183 = vmatpush.msra.mxu0 %v3577_v31  ;;  %v1011_v29 = vld [vmem:[%s8270_s6 + $0x78] sm:$0xff]  ;;  %v1008_v31 = vld [vmem:[%s8270_s6 + $0x60] sm:$0xff] }
  0xf2   : > { %1164 = vmatpush.msrb.mxu3 %v3606_v20  ;;  %1204 = vmatpush.msra.mxu1 %v3607_v22  ;;  %v1038_v22 = vld [vmem:[%s8270_s6 + $0x150] sm:$0xff] }
  0xf3   : > { %1144 = vmatpush.msrb.mxu2 %v3574_v33  ;;  %1184 = vmatpush.msra.mxu0 %v3575_v35  ;;  %v1009_v33 = vld [vmem:[%s8270_s6 + $0x68] sm:$0xff] }
  0xf4   : > { %1165 = vmatpush.msrb.mxu3 %v3604_v24  ;;  %1205 = vmatpush.msra.mxu1 %v3605_v28  ;;  %v1039_v24 = vld [vmem:[%s8270_s6 + $0x158] sm:$0xff]  ;;  %v1036_v28 = vld [vmem:[%s8270_s6 + $0x140] sm:$0xff] }
  0xf5   : > { %1145 = vmatpush.msrb.mxu2 %v3572_v37  ;;  %1185 = vmatpush.msra.mxu0 %v3573_v39  ;;  %v1006_v37 = vld [vmem:[%s8270_s6 + $0x50] sm:$0xff]  ;;  %v1007_v39 = vld [vmem:[%s8270_s6 + $0x58] sm:$0xff] }
  0xf6   : > { %1166 = vmatpush.msrb.mxu3 %v3602_v30  ;;  %1206 = vmatpush.msra.mxu1 %v3603_v32  ;;  %v1037_v30 = vld [vmem:[%s8270_s6 + $0x148] sm:$0xff]  ;;  %v1034_v32 = vld [vmem:[%s8270_s6 + $0x130] sm:$0xff] }
  0xf7   : > { %1146 = vmatpush.msrb.mxu2 %v3570_v43  ;;  %1186 = vmatpush.msra.mxu0 %v3571_v44  ;;  %v1005_v43 = vld [vmem:[%s8270_s6 + $0x48] sm:$0xff]  ;;  %v1031_v44 = vld [vmem:[%s8270_s6 + $0x118] sm:$0xff] }
  0xf8   : > { %1167 = vmatpush.msrb.mxu3 %v3600_v34  ;;  %1207 = vmatpush.msra.mxu1 %v3601_v36  ;;  %v1035_v36 = vld [vmem:[%s8270_s6 + $0x138] sm:$0xff] }
  0xf9   : > { %1147 = vmatpush.msrb.mxu2 %v3568_v47  ;;  %1187 = vmatpush.msra.mxu0 %v3569_v48 }
  0xfa   : > { %1168 = vmatpush.msrb.mxu3 %v3598_v38  ;;  %1208 = vmatpush.msra.mxu1 %v3599_v40  ;;  %v1032_v38 = vld [vmem:[%s8270_s6 + $0x120] sm:$0xff]  ;;  %v1033_v40 = vld [vmem:[%s8270_s6 + $0x128] sm:$0xff] }
  0xfb   : > { %1148 = vmatpush.msrb.mxu2 %v3566_v51  ;;  %1188 = vmatpush.msra.mxu0 %v3567_v52  ;;  %v1000_v52 = vld [vmem:[%s8270_s6 + $0x20] sm:$0xff] }
  0xfc   : > { %1233 = vmatpush.msra.mxu3 %v1058_v41  ;;  %1273 = vmatpush.msrb.mxu1 %v1059_v42  ;;  %v1004_v41 = vld [vmem:[%s8270_s6 + $0x40] sm:$0xff]  ;;  %v1030_v42 = vld [vmem:[%s8270_s6 + $0x110] sm:$0xff] }
  0xfd   : > { %1213 = vmatpush.msra.mxu2 %v1026_v53  ;;  %1253 = vmatpush.msrb.mxu0 %v1027_v55  ;;  %v1001_v53 = vld [vmem:[%s8270_s6 + $0x28] sm:$0xff] }
  0xfe   : > { %1234 = vmatpush.msra.mxu3 %v1056_v45  ;;  %1274 = vmatpush.msrb.mxu1 %v1057_v46  ;;  %v1002_v45 = vld [vmem:[%s8270_s6 + $0x30] sm:$0xff]  ;;  %v1028_v46 = vld [vmem:[%s8270_s6 + $0x100] sm:$0xff] }
  0xff   : > { %1214 = vmatpush.msra.mxu2 %v1024_v57  ;;  %1254 = vmatpush.msrb.mxu0 %v1025_v59  ;;  %v998_v57 = vld [vmem:[%s8270_s6 + $0x10] sm:$0xff]  ;;  %v958_v59 = vld [vmem:[%s8268_s4] sm:$0x3] }
 0x100   : > { %1235 = vmatpush.msra.mxu3 %v1054_v49  ;;  %1275 = vmatpush.msrb.mxu1 %v1055_v50  ;;  %v1003_v49 = vld [vmem:[%s8270_s6 + $0x38] sm:$0xff]  ;;  %v1029_v50 = vld [vmem:[%s8270_s6 + $0x108] sm:$0xff] }
 0x101   : > { %1215 = vmatpush.msra.mxu2 %v1022_v62  ;;  %1255 = vmatpush.msrb.mxu0 %v1023_v0  ;;  %v997_v62 = vld [vmem:[%s8270_s6 + $0x8] sm:$0xff] }
 0x102   : > { %1236 = vmatpush.msra.mxu3 %v1052_v54  ;;  %1276 = vmatpush.msrb.mxu1 %v1053_v56 }
 0x103   : > { %1216 = vmatpush.msra.mxu2 %v1020_v2  ;;  %1256 = vmatpush.msrb.mxu0 %v1021_v5  ;;  %v966_v2 = vld [vmem:[%s8269_s5] sm:$0x3] }
 0x104   : > { %1237 = vmatpush.msra.mxu3 %v1050_v58  ;;  %1277 = vmatpush.msrb.mxu1 %v1051_v60  ;;  %v999_v58 = vld [vmem:[%s8270_s6 + $0x18] sm:$0xff]  ;;  %v996_v60 = vld [vmem:[%s8270_s6] sm:$0xff] }
 0x105   : > { %1217 = vmatpush.msra.mxu2 %v1018_v7  ;;  %1257 = vmatpush.msrb.mxu0 %v1019_v9  ;;  %v969_v9 = vperm.slane %v966_v2, 1 }
 0x106   : > { %1238 = vmatpush.msra.mxu3 %v1048_v63  ;;  %1278 = vmatpush.msrb.mxu1 %v1049_v1 }
 0x107   : > { %1218 = vmatpush.msra.mxu2 %v1016_v11  ;;  %1258 = vmatpush.msrb.mxu0 %v1017_v13 }
 0x108   : > { %1239 = vmatpush.msra.mxu3 %v1046_v3  ;;  %1279 = vmatpush.msrb.mxu1 %v1047_v6  ;;  %v961_v6 = vperm.slane %v958_v59, 1 }
 0x109   : > { %1219 = vmatpush.msra.mxu2 %v1014_v15  ;;  %1259 = vmatpush.msrb.mxu0 %v1015_v17  ;;  %v960_v15 = vperm.slane %v958_v59, 0  ;;  %v3653_v59 = vld [vmem:[%s8270_s6 + $0x4b8] sm:$0xff] }
 0x10a   : > { %1240 = vmatpush.msra.mxu3 %v1044_v8  ;;  %1280 = vmatpush.msrb.mxu1 %v1045_v10 }
 0x10b   : > { %1220 = vmatpush.msra.mxu2 %v1012_v21  ;;  %1260 = vmatpush.msrb.mxu0 %v1013_v23 }
 0x10c   : > { %1241 = vmatpush.msra.mxu3 %v1042_v12  ;;  %1281 = vmatpush.msrb.mxu1 %v1043_v14 }
 0x10d   : > { %1221 = vmatpush.msra.mxu2 %v1010_v27  ;;  %1261 = vmatpush.msrb.mxu0 %v1011_v29 }
 0x10e   : > { %1242 = vmatpush.msra.mxu3 %v1040_v16  ;;  %1282 = vmatpush.msrb.mxu1 %v1041_v18  ;;  %v968_v18 = vperm.slane %v966_v2, 0  ;;  %v3648_v2 = vld [vmem:[%s8270_s6 + $0x490] sm:$0xff] }
 0x10f   : > { %1222 = vmatpush.msra.mxu2 %v1008_v31  ;;  %1262 = vmatpush.msrb.mxu0 %v1009_v33  ;;  %v3693_v33 = vld [vmem:[%s8270_s6 + $0x5f8] sm:$0xff] }
 0x110   : > { %1243 = vmatpush.msra.mxu3 %v1038_v22  ;;  %1283 = vmatpush.msrb.mxu1 %v1039_v24 }
 0x111   : > { %1223 = vmatpush.msra.mxu2 %v1006_v37  ;;  %1263 = vmatpush.msrb.mxu0 %v1007_v39  ;;  %v3660_v39 = vld [vmem:[%s8270_s6 + $0x4f0] sm:$0xff] }
 0x112   : > { %1244 = vmatpush.msra.mxu3 %v1036_v28  ;;  %1284 = vmatpush.msrb.mxu1 %v1037_v30 }
 0x113   : > { %1224 = vmatpush.msra.mxu2 %v1004_v41  ;;  %1264 = vmatpush.msrb.mxu0 %v1005_v43  ;;  %v3661_v41 = vld [vmem:[%s8270_s6 + $0x4f8] sm:$0xff]  ;;  %v3658_v43 = vld [vmem:[%s8270_s6 + $0x4e0] sm:$0xff] }
 0x114   : > { %1245 = vmatpush.msra.mxu3 %v1034_v32  ;;  %1285 = vmatpush.msrb.mxu1 %v1035_v36  ;;  %v3692_v32 = vld [vmem:[%s8270_s6 + $0x5f0] sm:$0xff]  ;;  %v3689_v36 = vld [vmem:[%s8270_s6 + $0x5d8] sm:$0xff] }
 0x115   : > { %1225 = vmatpush.msra.mxu2 %v1002_v45  ;;  %1265 = vmatpush.msrb.mxu0 %v1003_v49  ;;  %v3682_v49 = vld [vmem:[%s8270_s6 + $0x5a0] sm:$0xff] }
 0x116   : > { %1246 = vmatpush.msra.mxu3 %v1032_v38  ;;  %1286 = vmatpush.msrb.mxu1 %v1033_v40  ;;  %v3686_v40 = vld [vmem:[%s8270_s6 + $0x5c0] sm:$0xff] }
 0x117   : > { %1226 = vmatpush.msra.mxu2 %v1000_v52  ;;  %1266 = vmatpush.msrb.mxu0 %v1001_v53  ;;  %v3654_v52 = vld [vmem:[%s8270_s6 + $0x4c0] sm:$0xff]  ;;  %v3680_v53 = vld [vmem:[%s8270_s6 + $0x590] sm:$0xff] }
 0x118   : > { %1247 = vmatpush.msra.mxu3 %v1030_v42  ;;  %1287 = vmatpush.msrb.mxu1 %v1031_v44  ;;  %v3687_v42 = vld [vmem:[%s8270_s6 + $0x5c8] sm:$0xff]  ;;  %v3684_v44 = vld [vmem:[%s8270_s6 + $0x5b0] sm:$0xff] }
 0x119   : > { %1227 = vmatpush.msra.mxu2 %v998_v57  ;;  %1267 = vmatpush.msrb.mxu0 %v999_v58  ;;  %v3678_v57 = vld [vmem:[%s8270_s6 + $0x580] sm:$0xff] }
 0x11a   : > { %1248 = vmatpush.msra.mxu3 %v1028_v46  ;;  %1288 = vmatpush.msrb.mxu1 %v1029_v50  ;;  %v3659_v46 = vld [vmem:[%s8270_s6 + $0x4e8] sm:$0xff]  ;;  %v3657_v50 = vld [vmem:[%s8270_s6 + $0x4d8] sm:$0xff] }
 0x11b   : > { %1228 = vmatpush.msra.mxu2 %v996_v60  ;;  %1268 = vmatpush.msrb.mxu0 %v997_v62  ;;  %v3679_v60 = vld [vmem:[%s8270_s6 + $0x588] sm:$0xff]  ;;  %v3650_v62 = vld [vmem:[%s8270_s6 + $0x4a0] sm:$0xff] }
 0x133   : > { %v700_v19 = vpop.f32.mrf.mxu0 }
 0x134   : > { %v720_v20 = vpop.f32.mrf.mxu1 }
 0x135   : > { %v721_v51 = vadd.f32 %v720_v20, %v700_v19 }
 0x139   : > { %v660_v34 = vpop.f32.mrf.mxu2 }
 0x13a   : > { %v680_v35 = vpop.f32.mrf.mxu3 }
 0x13b   : > { %v681_v63 = vadd.f32 %v680_v35, %v660_v34  ;;  %v3691_v34 = vld [vmem:[%s8270_s6 + $0x5e8] sm:$0xff]  ;;  %v3688_v35 = vld [vmem:[%s8270_s6 + $0x5d0] sm:$0xff] }
 0x13e   : > { %v780_v47 = vpop.f32.mrf.mxu0  ;;  %v800_v48 = vpop.f32.mrf.mxu1 }
 0x13f   : > { %v781_v54 = vadd.f32 %v780_v47, %v721_v51  ;;  %v3685_v47 = vld [vmem:[%s8270_s6 + $0x5b8] sm:$0xff]  ;;  %v3683_v51 = vld [vmem:[%s8270_s6 + $0x5a8] sm:$0xff] }
 0x141   : > { %v801_v3 = vadd.f32 %v800_v48, %v781_v54  ;;  %v3656_v48 = vld [vmem:[%s8270_s6 + $0x4d0] sm:$0xff]  ;;  %v3655_v54 = vld [vmem:[%s8270_s6 + $0x4c8] sm:$0xff] }
 0x143   : > { %v740_v55 = vpop.f32.mrf.mxu2  ;;  %v760_v56 = vpop.f32.mrf.mxu3 }
 0x144   : > { %v741_v7 = vadd.f32 %v740_v55, %v681_v63  ;;  %v3681_v55 = vld [vmem:[%s8270_s6 + $0x598] sm:$0xff]  ;;  %v3676_v63 = vld [vmem:[%s8270_s6 + $0x570] sm:$0xff] }
 0x146   : > { %v761_v13 = vadd.f32 %v760_v56, %v741_v7  ;;  %v3652_v56 = vld [vmem:[%s8270_s6 + $0x4b0] sm:$0xff]  ;;  %v3646_v7 = vld [vmem:[%s8270_s6 + $0x480] sm:$0xff] }
 0x158   : > { %v933_v0 = vpop.f32.mrf.mxu0  ;;  %v953_v1 = vpop.f32.mrf.mxu1 }
 0x159   : > { %v954_v5 = vadd.f32 %v953_v1, %v933_v0  ;;  %v3651_v0 = vld [vmem:[%s8270_s6 + $0x4a8] sm:$0xff]  ;;  %v3677_v1 = vld [vmem:[%s8270_s6 + $0x578] sm:$0xff] }
 0x15b   : > { %v957_v8 = vadd.f32 %v954_v5, %v801_v3  ;;  %v3674_v3 = vld [vmem:[%s8270_s6 + $0x560] sm:$0xff]  ;;  %v3649_v5 = vld [vmem:[%s8270_s6 + $0x498] sm:$0xff] }
 0x15d   : > { %v965_v10 = vmul.f32 %v961_v6, %v957_v8  ;;  %v893_v11 = vpop.f32.mrf.mxu2  ;;  %v913_v12 = vpop.f32.mrf.mxu3  ;;  %v3675_v6 = vld [vmem:[%s8270_s6 + $0x568] sm:$0xff]  ;;  %v3672_v8 = vld [vmem:[%s8270_s6 + $0x550] sm:$0xff] }
 0x15e   : > { %v914_v14 = vadd.f32 %v913_v12, %v893_v11  ;;  %v3644_v11 = vld [vmem:[%s8270_s6 + $0x470] sm:$0xff]  ;;  %v3670_v12 = vld [vmem:[%s8270_s6 + $0x540] sm:$0xff] }
 0x15f   : > { %v973_v16 = vadd.f32 %v969_v9, %v965_v10  ;;  %v3647_v9 = vld [vmem:[%s8270_s6 + $0x488] sm:$0xff]  ;;  %v3673_v10 = vld [vmem:[%s8270_s6 + $0x558] sm:$0xff] }
 0x160   : > { %v956_v17 = vadd.f32 %v914_v14, %v761_v13  ;;  %v3645_v13 = vld [vmem:[%s8270_s6 + $0x478] sm:$0xff]  ;;  %v3671_v14 = vld [vmem:[%s8270_s6 + $0x548] sm:$0xff] }
 0x161   : > { %v975_v19 = vadd.f32 %v973_v16, %v4984_v26  ;;  %v3668_v16 = vld [vmem:[%s8270_s6 + $0x530] sm:$0xff] }
 0x162   : > { %v964_v20 = vmul.f32 %v960_v15, %v956_v17  ;;  %v3642_v15 = vld [vmem:[%s8270_s6 + $0x460] sm:$0xff]  ;;  %v3643_v17 = vld [vmem:[%s8270_s6 + $0x468] sm:$0xff] }
 0x163   : > { %vm977_vm2 = vcmp.ge.f32.partialorder %v975_v19, 0.0  ;;  %v979_v21 = vmul.f32 0.2, %v975_v19 }
 0x164   : > { %v972_v22 = vadd.f32 %v968_v18, %v964_v20  ;;  %v3669_v18 = vld [vmem:[%s8270_s6 + $0x538] sm:$0xff]  ;;  %v3666_v20 = vld [vmem:[%s8270_s6 + $0x520] sm:$0xff] }
 0x165   : > { %v5583_v23 = vsel %vm977_vm2, %v975_v19, %v979_v21  ;;  %v3640_v19 = vld [vmem:[%s8270_s6 + $0x450] sm:$0xff]  ;;  %v3641_v21 = vld [vmem:[%s8270_s6 + $0x458] sm:$0xff] }
 0x166   : > { %v989_v24 = vrot.slane %v5583_v23, 7  ;;  %v974_v27 = vadd.f32 %v972_v22, %v4982_v25  ;;  %v3690_v25 = vld [vmem:[%s8270_s6 + $0x5e0] sm:$0xff]  ;;  %v3667_v22 = vld [vmem:[%s8270_s6 + $0x528] sm:$0xff] }
 0x168   : > { %993 = vst [vmem:[#allocation2 + $0x8] sm:$0x1e] %v989_v24  ;;  %vm976_vm3 = vcmp.ge.f32.partialorder %v974_v27, 0.0  ;;  %v978_v28 = vmul.f32 0.2, %v974_v27  ;;  %v3638_v24 = vld [vmem:[%s8270_s6 + $0x440] sm:$0xff] }
 0x16a   : > { %v5587_v29 = vsel %vm976_vm3, %v974_v27, %v978_v28  ;;  %v3664_v27 = vld [vmem:[%s8270_s6 + $0x510] sm:$0xff]  ;;  %v3639_v28 = vld [vmem:[%s8270_s6 + $0x448] sm:$0xff] }
 0x16b   : > { %v988_v30 = vrot.slane %v5587_v29, 7 }
 0x16d   : > { %992 = vst [vmem:[#allocation2] sm:$0x1e] %v988_v30  ;;  %v3665_v30 = vld [vmem:[%s8270_s6 + $0x518] sm:$0xff] }
 0x16f   : > { %v1061_v31 = vld [vmem:[#allocation2 + $0x8] sm:$0x1e] }
 0x170   : > { %v1130_v26 = vrot.slane %v1061_v31, 1  ;;  %v995_v45 = vld [vmem:[#allocation2 + $0x8] sm:$0xf]  ;;  %v3636_v31 = vld [vmem:[%s8270_s6 + $0x430] sm:$0xff] }
 0x172   : > { %1169 = vmatmul.f32.vlgmr.msrb.gmra.mxu3 %v1130_v26  ;;  %1209 = vmatmul.f32.vlgmr.msra.gmra.mxu1 %v1130_v26  ;;  %v3662_v26 = vld [vmem:[%s8270_s6 + $0x500] sm:$0xff] }
 0x173   : > { %1386 = vmatpush.msrb.mxu3 %v3692_v32  ;;  %1426 = vmatpush.msra.mxu1 %v3693_v33  ;;  %v1294_v32 = vld [vmem:[#allocation2 + $0x8] sm:$0x3c]  ;;  %v3637_v33 = vld [vmem:[%s8270_s6 + $0x438] sm:$0xff] }
 0x174   : > { %v1060_v37 = vld [vmem:[#allocation2] sm:$0x1e] }
 0x175   : > { %1387 = vmatpush.msrb.mxu3 %v3690_v25  ;;  %1427 = vmatpush.msra.mxu1 %v3691_v34  ;;  %v1129_v38 = vrot.slane %v1060_v37, 1  ;;  %v994_v58 = vld [vmem:[#allocation2] sm:$0xf]  ;;  %v3663_v25 = vld [vmem:[%s8270_s6 + $0x508] sm:$0xff]  ;;  %v1363_v34 = vrot.slane %v1294_v32, 2  ;;  %v1659_v37 = vld [vmem:[%s8273_s9 + $0x5d0] sm:$0xff] }
 0x176   : > { %v1504_v32 = vld [vmem:[%s8273_s9 + $0xf8] sm:$0xff] }
 0x177   : > { %1388 = vmatpush.msrb.mxu3 %v3688_v35  ;;  %1428 = vmatpush.msra.mxu1 %v3689_v36  ;;  %v3634_v35 = vld [vmem:[%s8270_s6 + $0x420] sm:$0xff]  ;;  %v3635_v36 = vld [vmem:[%s8270_s6 + $0x428] sm:$0xff] }
 0x178   : > { %1149 = vmatmul.f32.vlgmr.msrb.gmra.mxu2 %v1129_v38  ;;  %1189 = vmatmul.f32.vlgmr.msra.gmra.mxu0 %v1129_v38  ;;  %v1660_v38 = vld [vmem:[%s8273_s9 + $0x5d8] sm:$0xff] }
 0x179   : > { %1366 = vmatpush.msrb.mxu2 %v3660_v39  ;;  %1389 = vmatpush.msrb.mxu3 %v3686_v40  ;;  %v3632_v39 = vld [vmem:[%s8270_s6 + $0x410] sm:$0xff]  ;;  %v3633_v40 = vld [vmem:[%s8270_s6 + $0x418] sm:$0xff] }
 0x17a   : > { %1406 = vmatpush.msra.mxu0 %v3661_v41  ;;  %1429 = vmatpush.msra.mxu1 %v3687_v42  ;;  %v1293_v41 = vld [vmem:[#allocation2] sm:$0x3c] }
 0x17b   : > { %1249 = vmatmul.f32.vlgmr.msra.gmra.mxu3 %v995_v45  ;;  %1289 = vmatmul.f32.vlgmr.msrb.gmra.mxu1 %v995_v45  ;;  %v1653_v42 = vld [vmem:[%s8273_s9 + $0x5a0] sm:$0xff]  ;;  %v3631_v45 = vld [vmem:[%s8270_s6 + $0x408] sm:$0xff] }
 0x17c   : > { %1367 = vmatpush.msrb.mxu2 %v3658_v43  ;;  %1390 = vmatpush.msrb.mxu3 %v3684_v44  ;;  %v1654_v43 = vld [vmem:[%s8273_s9 + $0x5a8] sm:$0xff]  ;;  %v3630_v44 = vld [vmem:[%s8270_s6 + $0x400] sm:$0xff] }
 0x17d   : > { %1407 = vmatpush.msra.mxu0 %v3659_v46  ;;  %1430 = vmatpush.msra.mxu1 %v3685_v47  ;;  %v1362_v46 = vrot.slane %v1293_v41, 2  ;;  %v1647_v47 = vld [vmem:[%s8273_s9 + $0x570] sm:$0xff]  ;;  %v1661_v41 = vld [vmem:[%s8273_s9 + $0x5e0] sm:$0xff] }
 0x17e   : > { %1368 = vmatpush.msrb.mxu2 %v3656_v48  ;;  %1391 = vmatpush.msrb.mxu3 %v3682_v49  ;;  %v1648_v48 = vld [vmem:[%s8273_s9 + $0x578] sm:$0xff]  ;;  %v1563_v49 = vld [vmem:[%s8273_s9 + $0x2d0] sm:$0xff] }
 0x17f   : > { %1408 = vmatpush.msra.mxu0 %v3657_v50  ;;  %1431 = vmatpush.msra.mxu1 %v3683_v51  ;;  %v1564_v50 = vld [vmem:[%s8273_s9 + $0x2d8] sm:$0xff]  ;;  %v1641_v51 = vld [vmem:[%s8273_s9 + $0x540] sm:$0xff] }
 0x180   : > { %1369 = vmatpush.msrb.mxu2 %v3654_v52  ;;  %1392 = vmatpush.msrb.mxu3 %v3680_v53  ;;  %v1642_v52 = vld [vmem:[%s8273_s9 + $0x548] sm:$0xff]  ;;  %v1557_v53 = vld [vmem:[%s8273_s9 + $0x2a0] sm:$0xff] }
 0x181   : > { %1409 = vmatpush.msra.mxu0 %v3655_v54  ;;  %1432 = vmatpush.msra.mxu1 %v3681_v55  ;;  %v1558_v54 = vld [vmem:[%s8273_s9 + $0x2a8] sm:$0xff]  ;;  %v1635_v55 = vld [vmem:[%s8273_s9 + $0x510] sm:$0xff] }
 0x182   : > { %1229 = vmatmul.f32.vlgmr.msra.gmra.mxu2 %v994_v58  ;;  %1269 = vmatmul.f32.vlgmr.msrb.gmra.mxu0 %v994_v58  ;;  %v1552_v58 = vld [vmem:[%s8273_s9 + $0x278] sm:$0xff] }
 0x183   : > { %1370 = vmatpush.msrb.mxu2 %v3652_v56  ;;  %1393 = vmatpush.msrb.mxu3 %v3678_v57  ;;  %v1636_v56 = vld [vmem:[%s8273_s9 + $0x518] sm:$0xff]  ;;  %v1551_v57 = vld [vmem:[%s8273_s9 + $0x270] sm:$0xff] }
 0x184   : > { %1410 = vmatpush.msra.mxu0 %v3653_v59  ;;  %1433 = vmatpush.msra.mxu1 %v3679_v60  ;;  %v1629_v59 = vld [vmem:[%s8273_s9 + $0x4e0] sm:$0xff]  ;;  %v1630_v60 = vld [vmem:[%s8273_s9 + $0x4e8] sm:$0xff] }
 0x185   : > { %1371 = vmatpush.msrb.mxu2 %v3650_v62  ;;  %1394 = vmatpush.msrb.mxu3 %v3676_v63  ;;  %v1545_v62 = vld [vmem:[%s8273_s9 + $0x240] sm:$0xff]  ;;  %v1623_v63 = vld [vmem:[%s8273_s9 + $0x4b0] sm:$0xff] }
 0x186   : > { %1411 = vmatpush.msra.mxu0 %v3651_v0  ;;  %1434 = vmatpush.msra.mxu1 %v3677_v1  ;;  %v1546_v0 = vld [vmem:[%s8273_s9 + $0x248] sm:$0xff]  ;;  %v1624_v1 = vld [vmem:[%s8273_s9 + $0x4b8] sm:$0xff] }
 0x187   : > { %1372 = vmatpush.msrb.mxu2 %v3648_v2  ;;  %1395 = vmatpush.msrb.mxu3 %v3674_v3  ;;  %v1539_v2 = vld [vmem:[%s8273_s9 + $0x210] sm:$0xff]  ;;  %v1617_v3 = vld [vmem:[%s8273_s9 + $0x480] sm:$0xff] }
 0x188   : > { %1412 = vmatpush.msra.mxu0 %v3649_v5  ;;  %1435 = vmatpush.msra.mxu1 %v3675_v6  ;;  %v1540_v5 = vld [vmem:[%s8273_s9 + $0x218] sm:$0xff]  ;;  %v1618_v6 = vld [vmem:[%s8273_s9 + $0x488] sm:$0xff] }
 0x189   : > { %1373 = vmatpush.msrb.mxu2 %v3646_v7  ;;  %1396 = vmatpush.msrb.mxu3 %v3672_v8  ;;  %v1533_v7 = vld [vmem:[%s8273_s9 + $0x1e0] sm:$0xff]  ;;  %v1611_v8 = vld [vmem:[%s8273_s9 + $0x450] sm:$0xff] }
 0x18a   : > { %1413 = vmatpush.msra.mxu0 %v3647_v9  ;;  %1436 = vmatpush.msra.mxu1 %v3673_v10  ;;  %v1534_v9 = vld [vmem:[%s8273_s9 + $0x1e8] sm:$0xff]  ;;  %v1612_v10 = vld [vmem:[%s8273_s9 + $0x458] sm:$0xff] }
 0x18b   : > { %1374 = vmatpush.msrb.mxu2 %v3644_v11  ;;  %1397 = vmatpush.msrb.mxu3 %v3670_v12  ;;  %v1527_v11 = vld [vmem:[%s8273_s9 + $0x1b0] sm:$0xff]  ;;  %v1605_v12 = vld [vmem:[%s8273_s9 + $0x420] sm:$0xff] }
 0x18c   : > { %1414 = vmatpush.msra.mxu0 %v3645_v13  ;;  %1437 = vmatpush.msra.mxu1 %v3671_v14  ;;  %v1528_v13 = vld [vmem:[%s8273_s9 + $0x1b8] sm:$0xff]  ;;  %v1606_v14 = vld [vmem:[%s8273_s9 + $0x428] sm:$0xff] }
 0x18d   : > { %1375 = vmatpush.msrb.mxu2 %v3642_v15  ;;  %1398 = vmatpush.msrb.mxu3 %v3668_v16  ;;  %v1521_v15 = vld [vmem:[%s8273_s9 + $0x180] sm:$0xff]  ;;  %v1599_v16 = vld [vmem:[%s8273_s9 + $0x3f0] sm:$0xff] }
 0x18e   : > { %1415 = vmatpush.msra.mxu0 %v3643_v17  ;;  %1438 = vmatpush.msra.mxu1 %v3669_v18  ;;  %v1522_v17 = vld [vmem:[%s8273_s9 + $0x188] sm:$0xff]  ;;  %v1600_v18 = vld [vmem:[%s8273_s9 + $0x3f8] sm:$0xff] }
 0x18f   : > { %1376 = vmatpush.msrb.mxu2 %v3640_v19  ;;  %1399 = vmatpush.msrb.mxu3 %v3666_v20  ;;  %v1515_v19 = vld [vmem:[%s8273_s9 + $0x150] sm:$0xff]  ;;  %v1593_v20 = vld [vmem:[%s8273_s9 + $0x3c0] sm:$0xff] }
 0x190   : > { %1416 = vmatpush.msra.mxu0 %v3641_v21  ;;  %1439 = vmatpush.msra.mxu1 %v3667_v22  ;;  %v1516_v21 = vld [vmem:[%s8273_s9 + $0x158] sm:$0xff]  ;;  %v1594_v22 = vld [vmem:[%s8273_s9 + $0x3c8] sm:$0xff] }
 0x191   : > { %1377 = vmatpush.msrb.mxu2 %v3638_v24  ;;  %1400 = vmatpush.msrb.mxu3 %v3664_v27  ;;  %v1509_v24 = vld [vmem:[%s8273_s9 + $0x120] sm:$0xff]  ;;  %v1587_v27 = vld [vmem:[%s8273_s9 + $0x390] sm:$0xff] }
 0x192   : > { %1417 = vmatpush.msra.mxu0 %v3639_v28  ;;  %1440 = vmatpush.msra.mxu1 %v3665_v30  ;;  %v1510_v28 = vld [vmem:[%s8273_s9 + $0x128] sm:$0xff]  ;;  %v1588_v30 = vld [vmem:[%s8273_s9 + $0x398] sm:$0xff] }
 0x193   : > { %1378 = vmatpush.msrb.mxu2 %v3636_v31  ;;  %1401 = vmatpush.msrb.mxu3 %v3662_v26  ;;  %v1503_v31 = vld [vmem:[%s8273_s9 + $0xf0] sm:$0xff]  ;;  %v1581_v26 = vld [vmem:[%s8273_s9 + $0x360] sm:$0xff] }
 0x194   : > { %1418 = vmatpush.msra.mxu0 %v3637_v33  ;;  %1441 = vmatpush.msra.mxu1 %v3663_v25  ;;  %v1582_v33 = vld [vmem:[%s8273_s9 + $0x368] sm:$0xff]  ;;  %v1497_v25 = vld [vmem:[%s8273_s9 + $0xc0] sm:$0xff] }
 0x195   : > { %1402 = vmatmul.f32.vlgmr.msrb.gmra.mxu3 %v1363_v34  ;;  %1442 = vmatmul.f32.vlgmr.msra.gmra.mxu1 %v1363_v34  ;;  %v1575_v34 = vld [vmem:[%s8273_s9 + $0x330] sm:$0xff] }
 0x196   : > { %1379 = vmatpush.msrb.mxu2 %v3634_v35  ;;  %1419 = vmatpush.msra.mxu0 %v3635_v36  ;;  %v1498_v35 = vld [vmem:[%s8273_s9 + $0xc8] sm:$0xff]  ;;  %v1576_v36 = vld [vmem:[%s8273_s9 + $0x338] sm:$0xff] }
 0x197   : > { %1685 = vmatpush.msra.mxu3 %v1659_v37  ;;  %1725 = vmatpush.msrb.mxu1 %v1660_v38  ;;  %v1491_v37 = vld [vmem:[%s8273_s9 + $0x90] sm:$0xff]  ;;  %v1569_v38 = vld [vmem:[%s8273_s9 + $0x300] sm:$0xff] }
 0x198   : > { %1380 = vmatpush.msrb.mxu2 %v3632_v39  ;;  %1420 = vmatpush.msra.mxu0 %v3633_v40  ;;  %v1492_v39 = vld [vmem:[%s8273_s9 + $0x98] sm:$0xff]  ;;  %v1570_v40 = vld [vmem:[%s8273_s9 + $0x308] sm:$0xff] }
 0x199   : > { %1686 = vmatpush.msra.mxu3 %v1653_v42  ;;  %1726 = vmatpush.msrb.mxu1 %v1654_v43  ;;  %v1662_v42 = vld [vmem:[%s8273_s9 + $0x5e8] sm:$0xff]  ;;  %v1485_v43 = vld [vmem:[%s8273_s9 + $0x60] sm:$0xff] }
 0x19a   : > { %1381 = vmatpush.msrb.mxu2 %v3630_v44  ;;  %1421 = vmatpush.msra.mxu0 %v3631_v45  ;;  %v1486_v44 = vld [vmem:[%s8273_s9 + $0x68] sm:$0xff]  ;;  %v1655_v45 = vld [vmem:[%s8273_s9 + $0x5b0] sm:$0xff] }
 0x19b   : > { %1382 = vmatmul.f32.vlgmr.msrb.gmra.mxu2 %v1362_v46  ;;  %1422 = vmatmul.f32.vlgmr.msra.gmra.mxu0 %v1362_v46  ;;  %v1656_v46 = vld [vmem:[%s8273_s9 + $0x5b8] sm:$0xff] }
 0x19c   : > { %1687 = vmatpush.msra.mxu3 %v1647_v47  ;;  %1727 = vmatpush.msrb.mxu1 %v1648_v48  ;;  %v1479_v47 = vld [vmem:[%s8273_s9 + $0x30] sm:$0xff]  ;;  %v1480_v48 = vld [vmem:[%s8273_s9 + $0x38] sm:$0xff] }
 0x19d   : > { %1665 = vmatpush.msra.mxu2 %v1563_v49  ;;  %1705 = vmatpush.msrb.mxu0 %v1564_v50  ;;  %v1649_v49 = vld [vmem:[%s8273_s9 + $0x580] sm:$0xff]  ;;  %v1650_v50 = vld [vmem:[%s8273_s9 + $0x588] sm:$0xff] }
 0x19e   : > { %1688 = vmatpush.msra.mxu3 %v1641_v51  ;;  %1728 = vmatpush.msrb.mxu1 %v1642_v52  ;;  %v1473_v51 = vld [vmem:[%s8273_s9] sm:$0xff]  ;;  %v1474_v52 = vld [vmem:[%s8273_s9 + $0x8] sm:$0xff] }
 0x19f   : > { %1666 = vmatpush.msra.mxu2 %v1557_v53  ;;  %1706 = vmatpush.msrb.mxu0 %v1558_v54  ;;  %v1565_v53 = vld [vmem:[%s8273_s9 + $0x2e0] sm:$0xff]  ;;  %v1643_v54 = vld [vmem:[%s8273_s9 + $0x550] sm:$0xff] }
 0x1a0   : > { %1689 = vmatpush.msra.mxu3 %v1635_v55  ;;  %1729 = vmatpush.msrb.mxu1 %v1636_v56  ;;  %v1566_v55 = vld [vmem:[%s8273_s9 + $0x2e8] sm:$0xff]  ;;  %v1644_v56 = vld [vmem:[%s8273_s9 + $0x558] sm:$0xff] }
 0x1a1   : > { %1667 = vmatpush.msra.mxu2 %v1551_v57  ;;  %1707 = vmatpush.msrb.mxu0 %v1552_v58  ;;  %v1559_v57 = vld [vmem:[%s8273_s9 + $0x2b0] sm:$0xff]  ;;  %v1637_v58 = vld [vmem:[%s8273_s9 + $0x520] sm:$0xff] }
 0x1a2   : > { %1690 = vmatpush.msra.mxu3 %v1629_v59  ;;  %1730 = vmatpush.msrb.mxu1 %v1630_v60  ;;  %v1560_v59 = vld [vmem:[%s8273_s9 + $0x2b8] sm:$0xff]  ;;  %v1638_v60 = vld [vmem:[%s8273_s9 + $0x528] sm:$0xff] }
 0x1a3   : > { %1668 = vmatpush.msra.mxu2 %v1545_v62  ;;  %1708 = vmatpush.msrb.mxu0 %v1546_v0  ;;  %v1553_v62 = vld [vmem:[%s8273_s9 + $0x280] sm:$0xff]  ;;  %v1554_v0 = vld [vmem:[%s8273_s9 + $0x288] sm:$0xff] }
 0x1a4   : > { %1691 = vmatpush.msra.mxu3 %v1623_v63  ;;  %1731 = vmatpush.msrb.mxu1 %v1624_v1  ;;  %v1631_v63 = vld [vmem:[%s8273_s9 + $0x4f0] sm:$0xff]  ;;  %v1632_v1 = vld [vmem:[%s8273_s9 + $0x4f8] sm:$0xff] }
 0x1a5   : > { %1669 = vmatpush.msra.mxu2 %v1539_v2  ;;  %1709 = vmatpush.msrb.mxu0 %v1540_v5  ;;  %v1547_v2 = vld [vmem:[%s8273_s9 + $0x250] sm:$0xff]  ;;  %v1548_v5 = vld [vmem:[%s8273_s9 + $0x258] sm:$0xff] }
 0x1a6   : > { %1692 = vmatpush.msra.mxu3 %v1617_v3  ;;  %1732 = vmatpush.msrb.mxu1 %v1618_v6  ;;  %v1625_v3 = vld [vmem:[%s8273_s9 + $0x4c0] sm:$0xff]  ;;  %v1626_v6 = vld [vmem:[%s8273_s9 + $0x4c8] sm:$0xff] }
 0x1a7   : > { %1670 = vmatpush.msra.mxu2 %v1533_v7  ;;  %1710 = vmatpush.msrb.mxu0 %v1534_v9  ;;  %v1541_v7 = vld [vmem:[%s8273_s9 + $0x220] sm:$0xff]  ;;  %v1542_v9 = vld [vmem:[%s8273_s9 + $0x228] sm:$0xff] }
 0x1a8   : > { %1693 = vmatpush.msra.mxu3 %v1611_v8  ;;  %1733 = vmatpush.msrb.mxu1 %v1612_v10  ;;  %v1619_v8 = vld [vmem:[%s8273_s9 + $0x490] sm:$0xff]  ;;  %v1620_v10 = vld [vmem:[%s8273_s9 + $0x498] sm:$0xff] }
 0x1a9   : > { %1671 = vmatpush.msra.mxu2 %v1527_v11  ;;  %1711 = vmatpush.msrb.mxu0 %v1528_v13  ;;  %v1535_v11 = vld [vmem:[%s8273_s9 + $0x1f0] sm:$0xff]  ;;  %v1536_v13 = vld [vmem:[%s8273_s9 + $0x1f8] sm:$0xff] }
 0x1aa   : > { %1694 = vmatpush.msra.mxu3 %v1605_v12  ;;  %1734 = vmatpush.msrb.mxu1 %v1606_v14  ;;  %v1613_v12 = vld [vmem:[%s8273_s9 + $0x460] sm:$0xff]  ;;  %v1614_v14 = vld [vmem:[%s8273_s9 + $0x468] sm:$0xff] }
 0x1ab   : > { %1672 = vmatpush.msra.mxu2 %v1521_v15  ;;  %1712 = vmatpush.msrb.mxu0 %v1522_v17  ;;  %v1529_v15 = vld [vmem:[%s8273_s9 + $0x1c0] sm:$0xff]  ;;  %v1530_v17 = vld [vmem:[%s8273_s9 + $0x1c8] sm:$0xff] }
 0x1ac   : > { %1695 = vmatpush.msra.mxu3 %v1599_v16  ;;  %1735 = vmatpush.msrb.mxu1 %v1600_v18  ;;  %v1607_v16 = vld [vmem:[%s8273_s9 + $0x430] sm:$0xff]  ;;  %v1608_v18 = vld [vmem:[%s8273_s9 + $0x438] sm:$0xff] }
 0x1ad   : > { %1673 = vmatpush.msra.mxu2 %v1515_v19  ;;  %1713 = vmatpush.msrb.mxu0 %v1516_v21  ;;  %v1523_v19 = vld [vmem:[%s8273_s9 + $0x190] sm:$0xff]  ;;  %v1524_v21 = vld [vmem:[%s8273_s9 + $0x198] sm:$0xff] }
 0x1ae   : > { %1696 = vmatpush.msra.mxu3 %v1593_v20  ;;  %1736 = vmatpush.msrb.mxu1 %v1594_v22  ;;  %v1601_v20 = vld [vmem:[%s8273_s9 + $0x400] sm:$0xff]  ;;  %v1602_v22 = vld [vmem:[%s8273_s9 + $0x408] sm:$0xff] }
 0x1af   : > { %1674 = vmatpush.msra.mxu2 %v1509_v24  ;;  %1714 = vmatpush.msrb.mxu0 %v1510_v28  ;;  %v1517_v24 = vld [vmem:[%s8273_s9 + $0x160] sm:$0xff]  ;;  %v1518_v28 = vld [vmem:[%s8273_s9 + $0x168] sm:$0xff] }
 0x1b0   : > { %1697 = vmatpush.msra.mxu3 %v1587_v27  ;;  %1737 = vmatpush.msrb.mxu1 %v1588_v30  ;;  %v1595_v27 = vld [vmem:[%s8273_s9 + $0x3d0] sm:$0xff]  ;;  %v1596_v30 = vld [vmem:[%s8273_s9 + $0x3d8] sm:$0xff] }
 0x1b1   : > { %1675 = vmatpush.msra.mxu2 %v1503_v31  ;;  %1715 = vmatpush.msrb.mxu0 %v1504_v32  ;;  %v1511_v31 = vld [vmem:[%s8273_s9 + $0x130] sm:$0xff]  ;;  %v1512_v32 = vld [vmem:[%s8273_s9 + $0x138] sm:$0xff] }
 0x1b2   : > { %1698 = vmatpush.msra.mxu3 %v1581_v26  ;;  %1738 = vmatpush.msrb.mxu1 %v1582_v33  ;;  %v1589_v26 = vld [vmem:[%s8273_s9 + $0x3a0] sm:$0xff]  ;;  %v1590_v33 = vld [vmem:[%s8273_s9 + $0x3a8] sm:$0xff] }
 0x1b3   : > { %1676 = vmatpush.msra.mxu2 %v1497_v25  ;;  %1716 = vmatpush.msrb.mxu0 %v1498_v35  ;;  %v1505_v25 = vld [vmem:[%s8273_s9 + $0x100] sm:$0xff]  ;;  %v1506_v35 = vld [vmem:[%s8273_s9 + $0x108] sm:$0xff] }
 0x1b4   : > { %1699 = vmatpush.msra.mxu3 %v1575_v34  ;;  %1739 = vmatpush.msrb.mxu1 %v1576_v36  ;;  %v1583_v34 = vld [vmem:[%s8273_s9 + $0x370] sm:$0xff]  ;;  %v1584_v36 = vld [vmem:[%s8273_s9 + $0x378] sm:$0xff] }
 0x1b5   : > { %1677 = vmatpush.msra.mxu2 %v1491_v37  ;;  %1717 = vmatpush.msrb.mxu0 %v1492_v39  ;;  %v1499_v37 = vld [vmem:[%s8273_s9 + $0xd0] sm:$0xff]  ;;  %v1500_v39 = vld [vmem:[%s8273_s9 + $0xd8] sm:$0xff] }
 0x1b6   : > { %1700 = vmatpush.msra.mxu3 %v1569_v38  ;;  %1740 = vmatpush.msrb.mxu1 %v1570_v40  ;;  %v1577_v38 = vld [vmem:[%s8273_s9 + $0x340] sm:$0xff]  ;;  %v1578_v40 = vld [vmem:[%s8273_s9 + $0x348] sm:$0xff] }
 0x1b7   : > { %1678 = vmatpush.msra.mxu2 %v1485_v43  ;;  %1718 = vmatpush.msrb.mxu0 %v1486_v44  ;;  %v1494_v43 = vld [vmem:[%s8273_s9 + $0xa8] sm:$0xff]  ;;  %v1572_v44 = vld [vmem:[%s8273_s9 + $0x318] sm:$0xff] }
 0x1b8   : > { %1765 = vmatpush.msrb.mxu3 %v1661_v41  ;;  %1805 = vmatpush.msra.mxu1 %v1662_v42  ;;  %v1493_v41 = vld [vmem:[%s8273_s9 + $0xa0] sm:$0xff]  ;;  %v1571_v42 = vld [vmem:[%s8273_s9 + $0x310] sm:$0xff] }
 0x1b9   : > { %1679 = vmatpush.msra.mxu2 %v1479_v47  ;;  %1719 = vmatpush.msrb.mxu0 %v1480_v48  ;;  %v1487_v47 = vld [vmem:[%s8273_s9 + $0x70] sm:$0xff]  ;;  %v1488_v48 = vld [vmem:[%s8273_s9 + $0x78] sm:$0xff] }
 0x1ba   : > { %1766 = vmatpush.msrb.mxu3 %v1655_v45  ;;  %1806 = vmatpush.msra.mxu1 %v1656_v46 }
 0x1bb   : > { %1680 = vmatpush.msra.mxu2 %v1473_v51  ;;  %1720 = vmatpush.msrb.mxu0 %v1474_v52  ;;  %v1475_v51 = vld [vmem:[%s8273_s9 + $0x10] sm:$0xff]  ;;  %v1476_v52 = vld [vmem:[%s8273_s9 + $0x18] sm:$0xff] }
 0x1bc   : > { %1767 = vmatpush.msrb.mxu3 %v1649_v49  ;;  %1807 = vmatpush.msra.mxu1 %v1650_v50  ;;  %v1481_v49 = vld [vmem:[%s8273_s9 + $0x40] sm:$0xff]  ;;  %v1482_v50 = vld [vmem:[%s8273_s9 + $0x48] sm:$0xff] }
 0x1bd   : > { %1745 = vmatpush.msrb.mxu2 %v1565_v53  ;;  %1785 = vmatpush.msra.mxu0 %v1566_v55 }
 0x1be   : > { %1768 = vmatpush.msrb.mxu3 %v1643_v54  ;;  %1808 = vmatpush.msra.mxu1 %v1644_v56 }
 0x1bf   : > { %1746 = vmatpush.msrb.mxu2 %v1559_v57  ;;  %1786 = vmatpush.msra.mxu0 %v1560_v59 }
 0x1c0   : > { %1769 = vmatpush.msrb.mxu3 %v1637_v58  ;;  %1809 = vmatpush.msra.mxu1 %v1638_v60 }
 0x1c1   : > { %1747 = vmatpush.msrb.mxu2 %v1553_v62  ;;  %1787 = vmatpush.msra.mxu0 %v1554_v0  ;;  %v1448_v62 = vld [vmem:[%s8271_s7] sm:$0x3] }
 0x1c2   : > { %1770 = vmatpush.msrb.mxu3 %v1631_v63  ;;  %1810 = vmatpush.msra.mxu1 %v1632_v1  ;;  %v1456_v1 = vld [vmem:[%s8272_s8] sm:$0x3] }
 0x1c3   : > { %1748 = vmatpush.msrb.mxu2 %v1547_v2  ;;  %1788 = vmatpush.msra.mxu0 %v1548_v5 }
 0x1c4   : > { %1771 = vmatpush.msrb.mxu3 %v1625_v3  ;;  %1811 = vmatpush.msra.mxu1 %v1626_v6  ;;  %v1451_v6 = vperm.slane %v1448_v62, 1 }
 0x1c5   : > { %1749 = vmatpush.msrb.mxu2 %v1541_v7  ;;  %1789 = vmatpush.msra.mxu0 %v1542_v9  ;;  %v1459_v9 = vperm.slane %v1456_v1, 1 }
 0x1c6   : > { %1772 = vmatpush.msrb.mxu3 %v1619_v8  ;;  %1812 = vmatpush.msra.mxu1 %v1620_v10 }
 0x1c7   : > { %1750 = vmatpush.msrb.mxu2 %v1535_v11  ;;  %1790 = vmatpush.msra.mxu0 %v1536_v13 }
 0x1c8   : > { %1773 = vmatpush.msrb.mxu3 %v1613_v12  ;;  %1813 = vmatpush.msra.mxu1 %v1614_v14 }
 0x1c9   : > { %1751 = vmatpush.msrb.mxu2 %v1529_v15  ;;  %1791 = vmatpush.msra.mxu0 %v1530_v17 }
 0x1ca   : > { %1774 = vmatpush.msrb.mxu3 %v1607_v16  ;;  %1814 = vmatpush.msra.mxu1 %v1608_v18  ;;  %v1450_v16 = vperm.slane %v1448_v62, 0  ;;  %v1525_v62 = vld [vmem:[%s8273_s9 + $0x1a0] sm:$0xff] }
 0x1cb   : > { %1752 = vmatpush.msrb.mxu2 %v1523_v19  ;;  %1792 = vmatpush.msra.mxu0 %v1524_v21  ;;  %v1458_v19 = vperm.slane %v1456_v1, 0  ;;  %v1604_v1 = vld [vmem:[%s8273_s9 + $0x418] sm:$0xff] }
 0x1cc   : > { %1775 = vmatpush.msrb.mxu3 %v1601_v20  ;;  %1815 = vmatpush.msra.mxu1 %v1602_v22  ;;  %v1663_v22 = vld [vmem:[%s8273_s9 + $0x5f0] sm:$0xff] }
 0x1cd   : > { %1753 = vmatpush.msrb.mxu2 %v1517_v24  ;;  %1793 = vmatpush.msra.mxu0 %v1518_v28  ;;  %v1664_v24 = vld [vmem:[%s8273_s9 + $0x5f8] sm:$0xff] }
 0x1ce   : > { %1776 = vmatpush.msrb.mxu3 %v1595_v27  ;;  %1816 = vmatpush.msra.mxu1 %v1596_v30  ;;  %v1658_v30 = vld [vmem:[%s8273_s9 + $0x5c8] sm:$0xff] }
 0x1cf   : > { %1754 = vmatpush.msrb.mxu2 %v1511_v31  ;;  %1794 = vmatpush.msra.mxu0 %v1512_v32  ;;  %v1652_v32 = vld [vmem:[%s8273_s9 + $0x598] sm:$0xff] }
 0x1d0   : > { %1777 = vmatpush.msrb.mxu3 %v1589_v26  ;;  %1817 = vmatpush.msra.mxu1 %v1590_v33  ;;  %v1651_v26 = vld [vmem:[%s8273_s9 + $0x590] sm:$0xff] }
 0x1d1   : > { %1755 = vmatpush.msrb.mxu2 %v1505_v25  ;;  %1795 = vmatpush.msra.mxu0 %v1506_v35  ;;  %v1567_v25 = vld [vmem:[%s8273_s9 + $0x2f0] sm:$0xff]  ;;  %v1568_v35 = vld [vmem:[%s8273_s9 + $0x2f8] sm:$0xff] }
 0x1d2   : > { %1778 = vmatpush.msrb.mxu3 %v1583_v34  ;;  %1818 = vmatpush.msra.mxu1 %v1584_v36  ;;  %v1646_v36 = vld [vmem:[%s8273_s9 + $0x568] sm:$0xff] }
 0x1d3   : > { %1756 = vmatpush.msrb.mxu2 %v1499_v37  ;;  %1796 = vmatpush.msra.mxu0 %v1500_v39  ;;  %v1561_v37 = vld [vmem:[%s8273_s9 + $0x2c0] sm:$0xff]  ;;  %v1562_v39 = vld [vmem:[%s8273_s9 + $0x2c8] sm:$0xff] }
 0x1d4   : > { %1779 = vmatpush.msrb.mxu3 %v1577_v38  ;;  %1819 = vmatpush.msra.mxu1 %v1578_v40  ;;  %v1639_v38 = vld [vmem:[%s8273_s9 + $0x530] sm:$0xff]  ;;  %v1640_v40 = vld [vmem:[%s8273_s9 + $0x538] sm:$0xff] }
 0x1d5   : > { %1757 = vmatpush.msrb.mxu2 %v1493_v41  ;;  %1797 = vmatpush.msra.mxu0 %v1494_v43  ;;  %v1555_v41 = vld [vmem:[%s8273_s9 + $0x290] sm:$0xff]  ;;  %v1556_v43 = vld [vmem:[%s8273_s9 + $0x298] sm:$0xff] }
 0x1d6   : > { %1780 = vmatpush.msrb.mxu3 %v1571_v42  ;;  %1820 = vmatpush.msra.mxu1 %v1572_v44  ;;  %v1633_v42 = vld [vmem:[%s8273_s9 + $0x500] sm:$0xff]  ;;  %v1634_v44 = vld [vmem:[%s8273_s9 + $0x508] sm:$0xff] }
 0x1d7   : > { %1758 = vmatpush.msrb.mxu2 %v1487_v47  ;;  %1798 = vmatpush.msra.mxu0 %v1488_v48  ;;  %v1550_v47 = vld [vmem:[%s8273_s9 + $0x268] sm:$0xff]  ;;  %v1628_v48 = vld [vmem:[%s8273_s9 + $0x4d8] sm:$0xff] }
 0x1d9   : > { %1759 = vmatpush.msrb.mxu2 %v1481_v49  ;;  %1799 = vmatpush.msra.mxu0 %v1482_v50  ;;  %v1543_v49 = vld [vmem:[%s8273_s9 + $0x230] sm:$0xff]  ;;  %v1621_v50 = vld [vmem:[%s8273_s9 + $0x4a0] sm:$0xff] }
 0x1db   : > { %1760 = vmatpush.msrb.mxu2 %v1475_v51  ;;  %1800 = vmatpush.msra.mxu0 %v1476_v52  ;;  %v1544_v51 = vld [vmem:[%s8273_s9 + $0x238] sm:$0xff]  ;;  %v1622_v52 = vld [vmem:[%s8273_s9 + $0x4a8] sm:$0xff] }
 0x1ef   : > { %v1210_v45 = vpop.f32.mrf.mxu1 }
 0x1f5   : > { %v1190_v46 = vpop.f32.mrf.mxu0  ;;  %v1170_v53 = vpop.f32.mrf.mxu3 }
 0x1f6   : > { %v1211_v57 = vadd.f32 %v1210_v45, %v1190_v46  ;;  %v1549_v45 = vld [vmem:[%s8273_s9 + $0x260] sm:$0xff]  ;;  %v1627_v46 = vld [vmem:[%s8273_s9 + $0x4d0] sm:$0xff] }
 0x1f8   : > { %v1290_v55 = vpop.f32.mrf.mxu1 }
 0x1fb   : > { %v1150_v54 = vpop.f32.mrf.mxu2 }
 0x1fc   : > { %v1171_v2 = vadd.f32 %v1170_v53, %v1150_v54  ;;  %v1537_v53 = vld [vmem:[%s8273_s9 + $0x200] sm:$0xff]  ;;  %v1615_v54 = vld [vmem:[%s8273_s9 + $0x470] sm:$0xff] }
 0x1fe   : > { %v1250_v59 = vpop.f32.mrf.mxu3 }
 0x1ff   : > { %v1270_v56 = vpop.f32.mrf.mxu0 }
 0x200   : > { %v1271_v58 = vadd.f32 %v1270_v56, %v1211_v57  ;;  %v1616_v56 = vld [vmem:[%s8273_s9 + $0x478] sm:$0xff]  ;;  %v1531_v57 = vld [vmem:[%s8273_s9 + $0x1d0] sm:$0xff] }
 0x202   : > { %v1291_v3 = vadd.f32 %v1290_v55, %v1271_v58  ;;  %v1538_v55 = vld [vmem:[%s8273_s9 + $0x208] sm:$0xff]  ;;  %v1609_v58 = vld [vmem:[%s8273_s9 + $0x440] sm:$0xff] }
 0x205   : > { %v1230_v60 = vpop.f32.mrf.mxu2 }
 0x206   : > { %v1231_v7 = vadd.f32 %v1230_v60, %v1171_v2  ;;  %v1610_v60 = vld [vmem:[%s8273_s9 + $0x448] sm:$0xff]  ;;  %v1519_v2 = vld [vmem:[%s8273_s9 + $0x170] sm:$0xff] }
 0x208   : > { %v1251_v13 = vadd.f32 %v1250_v59, %v1231_v7  ;;  %v1532_v59 = vld [vmem:[%s8273_s9 + $0x1d8] sm:$0xff]  ;;  %v1513_v7 = vld [vmem:[%s8273_s9 + $0x140] sm:$0xff] }
 0x212   : > { %v1443_v63 = vpop.f32.mrf.mxu1 }
 0x218   : > { %v1423_v0 = vpop.f32.mrf.mxu0  ;;  %v1403_v11 = vpop.f32.mrf.mxu3 }
 0x219   : > { %v1444_v5 = vadd.f32 %v1443_v63, %v1423_v0  ;;  %v1603_v63 = vld [vmem:[%s8273_s9 + $0x410] sm:$0xff]  ;;  %v1526_v0 = vld [vmem:[%s8273_s9 + $0x1a8] sm:$0xff] }
 0x21b   : > { %v1447_v8 = vadd.f32 %v1444_v5, %v1291_v3  ;;  %v1597_v3 = vld [vmem:[%s8273_s9 + $0x3e0] sm:$0xff]  ;;  %v1520_v5 = vld [vmem:[%s8273_s9 + $0x178] sm:$0xff] }
 0x21d   : > { %v1455_v10 = vmul.f32 %v1451_v6, %v1447_v8  ;;  %v1598_v6 = vld [vmem:[%s8273_s9 + $0x3e8] sm:$0xff]  ;;  %v1591_v8 = vld [vmem:[%s8273_s9 + $0x3b0] sm:$0xff] }
 0x21e   : > { %v1383_v12 = vpop.f32.mrf.mxu2 }
 0x21f   : > { %v1463_v14 = vadd.f32 %v1459_v9, %v1455_v10  ;;  %v1404_v15 = vadd.f32 %v1403_v11, %v1383_v12  ;;  %v1514_v9 = vld [vmem:[%s8273_s9 + $0x148] sm:$0xff]  ;;  %v1592_v10 = vld [vmem:[%s8273_s9 + $0x3b8] sm:$0xff]  ;;  %v1507_v11 = vld [vmem:[%s8273_s9 + $0x110] sm:$0xff] }
 0x220   : > { %v1585_v12 = vld [vmem:[%s8273_s9 + $0x380] sm:$0xff] }
 0x221   : > { %v1465_v17 = vadd.f32 %v1463_v14, %v5583_v23  ;;  %v1446_v18 = vadd.f32 %v1404_v15, %v1251_v13  ;;  %v1657_v23 = vld [vmem:[%s8273_s9 + $0x5c0] sm:$0xff]  ;;  %v1508_v13 = vld [vmem:[%s8273_s9 + $0x118] sm:$0xff]  ;;  %v1586_v14 = vld [vmem:[%s8273_s9 + $0x388] sm:$0xff] }
 0x222   : > { %v1501_v15 = vld [vmem:[%s8273_s9 + $0xe0] sm:$0xff] }
 0x223   : > { %vm1467_vm4 = vcmp.ge.f32.partialorder %v1465_v17, 0.0  ;;  %v1469_v20 = vmul.f32 0.2, %v1465_v17  ;;  %v1454_v21 = vmul.f32 %v1450_v16, %v1446_v18  ;;  %v1579_v16 = vld [vmem:[%s8273_s9 + $0x350] sm:$0xff]  ;;  %v1580_v18 = vld [vmem:[%s8273_s9 + $0x358] sm:$0xff] }
 0x225   : > { %v6179_v27 = vsel %vm1467_vm4, %v1465_v17, %v1469_v20  ;;  %v1462_v28 = vadd.f32 %v1458_v19, %v1454_v21  ;;  %v1502_v17 = vld [vmem:[%s8273_s9 + $0xe8] sm:$0xff]  ;;  %v1495_v19 = vld [vmem:[%s8273_s9 + $0xb0] sm:$0xff]  ;;  %v1573_v20 = vld [vmem:[%s8273_s9 + $0x320] sm:$0xff] }
 0x226   : > { %1701 = vmatmul.f32.vlgmr.msra.gmra.mxu3 %v6179_v27  ;;  %1741 = vmatmul.f32.vlgmr.msrb.gmra.mxu1 %v6179_v27  ;;  %v1496_v21 = vld [vmem:[%s8273_s9 + $0xb8] sm:$0xff] }
 0x227   : > { %v1464_v31 = vadd.f32 %v1462_v28, %v5587_v29  ;;  %1845 = vmatpush.msra.mxu3 %v1663_v22  ;;  %1885 = vmatpush.msrb.mxu1 %v1664_v24  ;;  %v1645_v29 = vld [vmem:[%s8273_s9 + $0x560] sm:$0xff]  ;;  %v1574_v22 = vld [vmem:[%s8273_s9 + $0x328] sm:$0xff]  ;;  %v3880_v24 = vld [vmem:[%s8273_s9 + $0xbd0] sm:$0xff] }
 0x228   : > { %v3881_v28 = vld [vmem:[%s8273_s9 + $0xbd8] sm:$0xff] }
 0x229   : > { %vm1466_vm5 = vcmp.ge.f32.partialorder %v1464_v31, 0.0  ;;  %v1468_v33 = vmul.f32 0.2, %v1464_v31  ;;  %1846 = vmatpush.msra.mxu3 %v1657_v23  ;;  %1886 = vmatpush.msrb.mxu1 %v1658_v30  ;;  %v1489_v23 = vld [vmem:[%s8273_s9 + $0x80] sm:$0xff]  ;;  %v1490_v30 = vld [vmem:[%s8273_s9 + $0x88] sm:$0xff] }
 0x22b   : > { %v6202_v34 = vsel %vm1466_vm5, %v1464_v31, %v1468_v33  ;;  %1847 = vmatpush.msra.mxu3 %v1651_v26  ;;  %1887 = vmatpush.msrb.mxu1 %v1652_v32  ;;  %v3874_v31 = vld [vmem:[%s8273_s9 + $0xba0] sm:$0xff]  ;;  %v3875_v26 = vld [vmem:[%s8273_s9 + $0xba8] sm:$0xff]  ;;  %v1483_v32 = vld [vmem:[%s8273_s9 + $0x50] sm:$0xff] }
 0x22c   : > { %1681 = vmatmul.f32.vlgmr.msra.gmra.mxu2 %v6202_v34  ;;  %1721 = vmatmul.f32.vlgmr.msrb.gmra.mxu0 %v6202_v34  ;;  %v1484_v33 = vld [vmem:[%s8273_s9 + $0x58] sm:$0xff] }
 0x22d   : > { %1825 = vmatpush.msra.mxu2 %v1567_v25  ;;  %1848 = vmatpush.msra.mxu3 %v1645_v29  ;;  %v3868_v25 = vld [vmem:[%s8273_s9 + $0xb70] sm:$0xff]  ;;  %v3869_v29 = vld [vmem:[%s8273_s9 + $0xb78] sm:$0xff] }
 0x22e   : > { %1865 = vmatpush.msrb.mxu0 %v1568_v35  ;;  %1888 = vmatpush.msrb.mxu1 %v1646_v36  ;;  %v1477_v35 = vld [vmem:[%s8273_s9 + $0x20] sm:$0xff]  ;;  %v1478_v36 = vld [vmem:[%s8273_s9 + $0x28] sm:$0xff] }
 0x22f   : > { %1781 = vmatmul.f32.vlgmr.msrb.gmra.mxu3 %v6179_v27  ;;  %1821 = vmatmul.f32.vlgmr.msra.gmra.mxu1 %v6179_v27 }
 0x230   : > { %1826 = vmatpush.msra.mxu2 %v1561_v37  ;;  %1849 = vmatpush.msra.mxu3 %v1639_v38  ;;  %v3784_v37 = vld [vmem:[%s8273_s9 + $0x8d0] sm:$0xff]  ;;  %v3862_v38 = vld [vmem:[%s8273_s9 + $0xb40] sm:$0xff] }
 0x231   : > { %1866 = vmatpush.msrb.mxu0 %v1562_v39  ;;  %1889 = vmatpush.msrb.mxu1 %v1640_v40  ;;  %v3785_v39 = vld [vmem:[%s8273_s9 + $0x8d8] sm:$0xff]  ;;  %v3863_v40 = vld [vmem:[%s8273_s9 + $0xb48] sm:$0xff] }
 0x232   : > { %1827 = vmatpush.msra.mxu2 %v1555_v41  ;;  %1850 = vmatpush.msra.mxu3 %v1633_v42  ;;  %v3778_v41 = vld [vmem:[%s8273_s9 + $0x8a0] sm:$0xff]  ;;  %v3856_v42 = vld [vmem:[%s8273_s9 + $0xb10] sm:$0xff] }
 0x233   : > { %1867 = vmatpush.msrb.mxu0 %v1556_v43  ;;  %1890 = vmatpush.msrb.mxu1 %v1634_v44  ;;  %v3779_v43 = vld [vmem:[%s8273_s9 + $0x8a8] sm:$0xff]  ;;  %v3857_v44 = vld [vmem:[%s8273_s9 + $0xb18] sm:$0xff] }
 0x234   : > { %1828 = vmatpush.msra.mxu2 %v1549_v45  ;;  %1851 = vmatpush.msra.mxu3 %v1627_v46  ;;  %v3772_v45 = vld [vmem:[%s8273_s9 + $0x870] sm:$0xff]  ;;  %v3850_v46 = vld [vmem:[%s8273_s9 + $0xae0] sm:$0xff] }
 0x235   : > { %1868 = vmatpush.msrb.mxu0 %v1550_v47  ;;  %1891 = vmatpush.msrb.mxu1 %v1628_v48  ;;  %v3773_v47 = vld [vmem:[%s8273_s9 + $0x878] sm:$0xff]  ;;  %v3851_v48 = vld [vmem:[%s8273_s9 + $0xae8] sm:$0xff] }
 0x236   : > { %1761 = vmatmul.f32.vlgmr.msrb.gmra.mxu2 %v6202_v34  ;;  %1801 = vmatmul.f32.vlgmr.msra.gmra.mxu0 %v6202_v34 }
 0x237   : > { %1829 = vmatpush.msra.mxu2 %v1543_v49  ;;  %1852 = vmatpush.msra.mxu3 %v1621_v50  ;;  %v3766_v49 = vld [vmem:[%s8273_s9 + $0x840] sm:$0xff]  ;;  %v3844_v50 = vld [vmem:[%s8273_s9 + $0xab0] sm:$0xff] }
 0x238   : > { %1869 = vmatpush.msrb.mxu0 %v1544_v51  ;;  %1892 = vmatpush.msrb.mxu1 %v1622_v52  ;;  %v3767_v51 = vld [vmem:[%s8273_s9 + $0x848] sm:$0xff]  ;;  %v3845_v52 = vld [vmem:[%s8273_s9 + $0xab8] sm:$0xff] }
 0x239   : > { %1830 = vmatpush.msra.mxu2 %v1537_v53  ;;  %1853 = vmatpush.msra.mxu3 %v1615_v54  ;;  %v3760_v53 = vld [vmem:[%s8273_s9 + $0x810] sm:$0xff]  ;;  %v3838_v54 = vld [vmem:[%s8273_s9 + $0xa80] sm:$0xff] }
 0x23a   : > { %1870 = vmatpush.msrb.mxu0 %v1538_v55  ;;  %1893 = vmatpush.msrb.mxu1 %v1616_v56  ;;  %v3761_v55 = vld [vmem:[%s8273_s9 + $0x818] sm:$0xff]  ;;  %v3839_v56 = vld [vmem:[%s8273_s9 + $0xa88] sm:$0xff] }
 0x23b   : > { %1831 = vmatpush.msra.mxu2 %v1531_v57  ;;  %1854 = vmatpush.msra.mxu3 %v1609_v58  ;;  %v3754_v57 = vld [vmem:[%s8273_s9 + $0x7e0] sm:$0xff]  ;;  %v3832_v58 = vld [vmem:[%s8273_s9 + $0xa50] sm:$0xff] }
 0x23c   : > { %1871 = vmatpush.msrb.mxu0 %v1532_v59  ;;  %1894 = vmatpush.msrb.mxu1 %v1610_v60  ;;  %v3755_v59 = vld [vmem:[%s8273_s9 + $0x7e8] sm:$0xff]  ;;  %v3833_v60 = vld [vmem:[%s8273_s9 + $0xa58] sm:$0xff] }
 0x23d   : > { %1832 = vmatpush.msra.mxu2 %v1525_v62  ;;  %1855 = vmatpush.msra.mxu3 %v1603_v63  ;;  %v3748_v62 = vld [vmem:[%s8273_s9 + $0x7b0] sm:$0xff]  ;;  %v3826_v63 = vld [vmem:[%s8273_s9 + $0xa20] sm:$0xff] }
 0x23e   : > { %1872 = vmatpush.msrb.mxu0 %v1526_v0  ;;  %1895 = vmatpush.msrb.mxu1 %v1604_v1  ;;  %v3749_v0 = vld [vmem:[%s8273_s9 + $0x7b8] sm:$0xff]  ;;  %v3827_v1 = vld [vmem:[%s8273_s9 + $0xa28] sm:$0xff] }
 0x23f   : > { %1833 = vmatpush.msra.mxu2 %v1519_v2  ;;  %1856 = vmatpush.msra.mxu3 %v1597_v3  ;;  %v3742_v2 = vld [vmem:[%s8273_s9 + $0x780] sm:$0xff]  ;;  %v3820_v3 = vld [vmem:[%s8273_s9 + $0x9f0] sm:$0xff] }
 0x240   : > { %1873 = vmatpush.msrb.mxu0 %v1520_v5  ;;  %1896 = vmatpush.msrb.mxu1 %v1598_v6  ;;  %v3743_v5 = vld [vmem:[%s8273_s9 + $0x788] sm:$0xff]  ;;  %v3821_v6 = vld [vmem:[%s8273_s9 + $0x9f8] sm:$0xff] }
 0x241   : > { %1834 = vmatpush.msra.mxu2 %v1513_v7  ;;  %1857 = vmatpush.msra.mxu3 %v1591_v8  ;;  %v3736_v7 = vld [vmem:[%s8273_s9 + $0x750] sm:$0xff]  ;;  %v3814_v8 = vld [vmem:[%s8273_s9 + $0x9c0] sm:$0xff] }
 0x242   : > { %1874 = vmatpush.msrb.mxu0 %v1514_v9  ;;  %1897 = vmatpush.msrb.mxu1 %v1592_v10  ;;  %v3737_v9 = vld [vmem:[%s8273_s9 + $0x758] sm:$0xff]  ;;  %v3815_v10 = vld [vmem:[%s8273_s9 + $0x9c8] sm:$0xff] }
 0x243   : > { %1835 = vmatpush.msra.mxu2 %v1507_v11  ;;  %1858 = vmatpush.msra.mxu3 %v1585_v12  ;;  %v3730_v11 = vld [vmem:[%s8273_s9 + $0x720] sm:$0xff]  ;;  %v3808_v12 = vld [vmem:[%s8273_s9 + $0x990] sm:$0xff] }
 0x244   : > { %1875 = vmatpush.msrb.mxu0 %v1508_v13  ;;  %1898 = vmatpush.msrb.mxu1 %v1586_v14  ;;  %v3731_v13 = vld [vmem:[%s8273_s9 + $0x728] sm:$0xff]  ;;  %v3809_v14 = vld [vmem:[%s8273_s9 + $0x998] sm:$0xff] }
 0x245   : > { %1836 = vmatpush.msra.mxu2 %v1501_v15  ;;  %1859 = vmatpush.msra.mxu3 %v1579_v16  ;;  %v3724_v15 = vld [vmem:[%s8273_s9 + $0x6f0] sm:$0xff]  ;;  %v3802_v16 = vld [vmem:[%s8273_s9 + $0x960] sm:$0xff] }
 0x246   : > { %1876 = vmatpush.msrb.mxu0 %v1502_v17  ;;  %1899 = vmatpush.msrb.mxu1 %v1580_v18  ;;  %v3725_v17 = vld [vmem:[%s8273_s9 + $0x6f8] sm:$0xff]  ;;  %v3803_v18 = vld [vmem:[%s8273_s9 + $0x968] sm:$0xff] }
 0x247   : > { %1837 = vmatpush.msra.mxu2 %v1495_v19  ;;  %1860 = vmatpush.msra.mxu3 %v1573_v20  ;;  %v3718_v19 = vld [vmem:[%s8273_s9 + $0x6c0] sm:$0xff]  ;;  %v3796_v20 = vld [vmem:[%s8273_s9 + $0x930] sm:$0xff] }
 0x248   : > { %1877 = vmatpush.msrb.mxu0 %v1496_v21  ;;  %1900 = vmatpush.msrb.mxu1 %v1574_v22  ;;  %v3719_v21 = vld [vmem:[%s8273_s9 + $0x6c8] sm:$0xff]  ;;  %v3797_v22 = vld [vmem:[%s8273_s9 + $0x938] sm:$0xff] }
 0x249   : > { %1861 = vmatmul.f32.vlgmr.msra.gmra.mxu3 %v6179_v27  ;;  %1901 = vmatmul.f32.vlgmr.msrb.gmra.mxu1 %v6179_v27 }
 0x24a   : > { %2147 = vmatpush.msrb.mxu3 %v3880_v24  ;;  %2187 = vmatpush.msra.mxu1 %v3881_v28  ;;  %v3712_v24 = vld [vmem:[%s8273_s9 + $0x690] sm:$0xff]  ;;  %v3790_v28 = vld [vmem:[%s8273_s9 + $0x900] sm:$0xff] }
 0x24b   : > { %1838 = vmatpush.msra.mxu2 %v1489_v23  ;;  %1878 = vmatpush.msrb.mxu0 %v1490_v30  ;;  %v3713_v23 = vld [vmem:[%s8273_s9 + $0x698] sm:$0xff]  ;;  %v3791_v30 = vld [vmem:[%s8273_s9 + $0x908] sm:$0xff] }
 0x24c   : > { %2148 = vmatpush.msrb.mxu3 %v3874_v31  ;;  %2188 = vmatpush.msra.mxu1 %v3875_v26  ;;  %v6557_v31 = vrot.slane %v6179_v27, 1  ;;  %v3882_v26 = vld [vmem:[%s8273_s9 + $0xbe0] sm:$0xff] }
 0x24d   : > { %1839 = vmatpush.msra.mxu2 %v1483_v32  ;;  %1879 = vmatpush.msrb.mxu0 %v1484_v33  ;;  %v3883_v32 = vld [vmem:[%s8273_s9 + $0xbe8] sm:$0xff]  ;;  %v3706_v33 = vld [vmem:[%s8273_s9 + $0x660] sm:$0xff] }
 0x24e   : > { %2149 = vmatpush.msrb.mxu3 %v3868_v25  ;;  %2189 = vmatpush.msra.mxu1 %v3869_v29  ;;  %v3707_v25 = vld [vmem:[%s8273_s9 + $0x668] sm:$0xff]  ;;  %v3876_v29 = vld [vmem:[%s8273_s9 + $0xbb0] sm:$0xff] }
 0x24f   : > { %1840 = vmatpush.msra.mxu2 %v1477_v35  ;;  %1880 = vmatpush.msrb.mxu0 %v1478_v36  ;;  %v3877_v35 = vld [vmem:[%s8273_s9 + $0xbb8] sm:$0xff]  ;;  %v3700_v36 = vld [vmem:[%s8273_s9 + $0x630] sm:$0xff] }
 0x250   : > { %1841 = vmatmul.f32.vlgmr.msra.gmra.mxu2 %v6202_v34  ;;  %1881 = vmatmul.f32.vlgmr.msrb.gmra.mxu0 %v6202_v34 }
 0x251   : > { %2127 = vmatpush.msrb.mxu2 %v3784_v37  ;;  %2150 = vmatpush.msrb.mxu3 %v3862_v38  ;;  %v3701_v37 = vld [vmem:[%s8273_s9 + $0x638] sm:$0xff]  ;;  %v3870_v38 = vld [vmem:[%s8273_s9 + $0xb80] sm:$0xff] }
 0x252   : > { %2167 = vmatpush.msra.mxu0 %v3785_v39  ;;  %2190 = vmatpush.msra.mxu1 %v3863_v40  ;;  %v3871_v39 = vld [vmem:[%s8273_s9 + $0xb88] sm:$0xff]  ;;  %v3694_v40 = vld [vmem:[%s8273_s9 + $0x600] sm:$0xff] }
 0x253   : > { %2128 = vmatpush.msrb.mxu2 %v3778_v41  ;;  %2151 = vmatpush.msrb.mxu3 %v3856_v42  ;;  %v3695_v41 = vld [vmem:[%s8273_s9 + $0x608] sm:$0xff]  ;;  %v6598_v42 = vrot.slane %v6202_v34, 1 }
 0x254   : > { %2168 = vmatpush.msra.mxu0 %v3779_v43  ;;  %2191 = vmatpush.msra.mxu1 %v3857_v44  ;;  %v3786_v43 = vld [vmem:[%s8273_s9 + $0x8e0] sm:$0xff]  ;;  %v3864_v44 = vld [vmem:[%s8273_s9 + $0xb50] sm:$0xff] }
 0x255   : > { %2129 = vmatpush.msrb.mxu2 %v3772_v45  ;;  %2152 = vmatpush.msrb.mxu3 %v3850_v46  ;;  %v3787_v45 = vld [vmem:[%s8273_s9 + $0x8e8] sm:$0xff]  ;;  %v3865_v46 = vld [vmem:[%s8273_s9 + $0xb58] sm:$0xff] }
 0x256   : > { %2169 = vmatpush.msra.mxu0 %v3773_v47  ;;  %2192 = vmatpush.msra.mxu1 %v3851_v48  ;;  %v3780_v47 = vld [vmem:[%s8273_s9 + $0x8b0] sm:$0xff]  ;;  %v3858_v48 = vld [vmem:[%s8273_s9 + $0xb20] sm:$0xff] }
 0x257   : > { %2130 = vmatpush.msrb.mxu2 %v3766_v49  ;;  %2153 = vmatpush.msrb.mxu3 %v3844_v50  ;;  %v3781_v49 = vld [vmem:[%s8273_s9 + $0x8b8] sm:$0xff]  ;;  %v3859_v50 = vld [vmem:[%s8273_s9 + $0xb28] sm:$0xff] }
 0x258   : > { %2170 = vmatpush.msra.mxu0 %v3767_v51  ;;  %2193 = vmatpush.msra.mxu1 %v3845_v52  ;;  %v3774_v51 = vld [vmem:[%s8273_s9 + $0x880] sm:$0xff]  ;;  %v3852_v52 = vld [vmem:[%s8273_s9 + $0xaf0] sm:$0xff] }
 0x259   : > { %2131 = vmatpush.msrb.mxu2 %v3760_v53  ;;  %2154 = vmatpush.msrb.mxu3 %v3838_v54  ;;  %v3775_v53 = vld [vmem:[%s8273_s9 + $0x888] sm:$0xff]  ;;  %v3853_v54 = vld [vmem:[%s8273_s9 + $0xaf8] sm:$0xff] }
 0x25a   : > { %2171 = vmatpush.msra.mxu0 %v3761_v55  ;;  %2194 = vmatpush.msra.mxu1 %v3839_v56  ;;  %v3768_v55 = vld [vmem:[%s8273_s9 + $0x850] sm:$0xff]  ;;  %v3846_v56 = vld [vmem:[%s8273_s9 + $0xac0] sm:$0xff] }
 0x25b   : > { %2132 = vmatpush.msrb.mxu2 %v3754_v57  ;;  %2155 = vmatpush.msrb.mxu3 %v3832_v58  ;;  %v3769_v57 = vld [vmem:[%s8273_s9 + $0x858] sm:$0xff]  ;;  %v3847_v58 = vld [vmem:[%s8273_s9 + $0xac8] sm:$0xff] }
 0x25c   : > { %2172 = vmatpush.msra.mxu0 %v3755_v59  ;;  %2195 = vmatpush.msra.mxu1 %v3833_v60  ;;  %v3762_v59 = vld [vmem:[%s8273_s9 + $0x820] sm:$0xff]  ;;  %v3840_v60 = vld [vmem:[%s8273_s9 + $0xa90] sm:$0xff] }
 0x25d   : > { %2133 = vmatpush.msrb.mxu2 %v3748_v62  ;;  %2156 = vmatpush.msrb.mxu3 %v3826_v63  ;;  %v3763_v62 = vld [vmem:[%s8273_s9 + $0x828] sm:$0xff]  ;;  %v3841_v63 = vld [vmem:[%s8273_s9 + $0xa98] sm:$0xff] }
 0x25e   : > { %2173 = vmatpush.msra.mxu0 %v3749_v0  ;;  %2196 = vmatpush.msra.mxu1 %v3827_v1  ;;  %v3756_v0 = vld [vmem:[%s8273_s9 + $0x7f0] sm:$0xff]  ;;  %v3834_v1 = vld [vmem:[%s8273_s9 + $0xa60] sm:$0xff] }
 0x25f   : > { %2134 = vmatpush.msrb.mxu2 %v3742_v2  ;;  %2157 = vmatpush.msrb.mxu3 %v3820_v3  ;;  %v3757_v2 = vld [vmem:[%s8273_s9 + $0x7f8] sm:$0xff]  ;;  %v3835_v3 = vld [vmem:[%s8273_s9 + $0xa68] sm:$0xff] }
 0x260   : > { %2174 = vmatpush.msra.mxu0 %v3743_v5  ;;  %2197 = vmatpush.msra.mxu1 %v3821_v6  ;;  %v3750_v5 = vld [vmem:[%s8273_s9 + $0x7c0] sm:$0xff]  ;;  %v3828_v6 = vld [vmem:[%s8273_s9 + $0xa30] sm:$0xff] }
 0x261   : > { %2135 = vmatpush.msrb.mxu2 %v3736_v7  ;;  %2158 = vmatpush.msrb.mxu3 %v3814_v8  ;;  %v3751_v7 = vld [vmem:[%s8273_s9 + $0x7c8] sm:$0xff]  ;;  %v3829_v8 = vld [vmem:[%s8273_s9 + $0xa38] sm:$0xff] }
 0x262   : > { %2175 = vmatpush.msra.mxu0 %v3737_v9  ;;  %2198 = vmatpush.msra.mxu1 %v3815_v10  ;;  %v3744_v9 = vld [vmem:[%s8273_s9 + $0x790] sm:$0xff]  ;;  %v3822_v10 = vld [vmem:[%s8273_s9 + $0xa00] sm:$0xff] }
 0x263   : > { %2136 = vmatpush.msrb.mxu2 %v3730_v11  ;;  %2159 = vmatpush.msrb.mxu3 %v3808_v12  ;;  %v3745_v11 = vld [vmem:[%s8273_s9 + $0x798] sm:$0xff]  ;;  %v3823_v12 = vld [vmem:[%s8273_s9 + $0xa08] sm:$0xff] }
 0x264   : > { %2176 = vmatpush.msra.mxu0 %v3731_v13  ;;  %2199 = vmatpush.msra.mxu1 %v3809_v14  ;;  %v3738_v13 = vld [vmem:[%s8273_s9 + $0x760] sm:$0xff]  ;;  %v3816_v14 = vld [vmem:[%s8273_s9 + $0x9d0] sm:$0xff] }
 0x265   : > { %2137 = vmatpush.msrb.mxu2 %v3724_v15  ;;  %2160 = vmatpush.msrb.mxu3 %v3802_v16  ;;  %v3739_v15 = vld [vmem:[%s8273_s9 + $0x768] sm:$0xff]  ;;  %v3817_v16 = vld [vmem:[%s8273_s9 + $0x9d8] sm:$0xff] }
 0x266   : > { %2177 = vmatpush.msra.mxu0 %v3725_v17  ;;  %2200 = vmatpush.msra.mxu1 %v3803_v18  ;;  %v3732_v17 = vld [vmem:[%s8273_s9 + $0x730] sm:$0xff]  ;;  %v3810_v18 = vld [vmem:[%s8273_s9 + $0x9a0] sm:$0xff] }
 0x267   : > { %2138 = vmatpush.msrb.mxu2 %v3718_v19  ;;  %2161 = vmatpush.msrb.mxu3 %v3796_v20  ;;  %v3733_v19 = vld [vmem:[%s8273_s9 + $0x738] sm:$0xff]  ;;  %v3811_v20 = vld [vmem:[%s8273_s9 + $0x9a8] sm:$0xff] }
 0x268   : > { %2178 = vmatpush.msra.mxu0 %v3719_v21  ;;  %2201 = vmatpush.msra.mxu1 %v3797_v22  ;;  %v3726_v21 = vld [vmem:[%s8273_s9 + $0x700] sm:$0xff]  ;;  %v3804_v22 = vld [vmem:[%s8273_s9 + $0x970] sm:$0xff] }
 0x269   : > { %2139 = vmatpush.msrb.mxu2 %v3712_v24  ;;  %2162 = vmatpush.msrb.mxu3 %v3790_v28  ;;  %v3727_v24 = vld [vmem:[%s8273_s9 + $0x708] sm:$0xff]  ;;  %v3805_v28 = vld [vmem:[%s8273_s9 + $0x978] sm:$0xff] }
 0x26a   : > { %2179 = vmatpush.msra.mxu0 %v3713_v23  ;;  %2202 = vmatpush.msra.mxu1 %v3791_v30  ;;  %v3720_v23 = vld [vmem:[%s8273_s9 + $0x6d0] sm:$0xff]  ;;  %v3798_v30 = vld [vmem:[%s8273_s9 + $0x940] sm:$0xff] }
 0x26b   : > { %2163 = vmatmul.f32.vlgmr.msrb.gmra.mxu3 %v6557_v31  ;;  %2203 = vmatmul.f32.vlgmr.msra.gmra.mxu1 %v6557_v31 }
 0x26c   : > { %2227 = vmatpush.msra.mxu3 %v3882_v26  ;;  %2267 = vmatpush.msrb.mxu1 %v3883_v32  ;;  %v3721_v26 = vld [vmem:[%s8273_s9 + $0x6d8] sm:$0xff]  ;;  %v3799_v32 = vld [vmem:[%s8273_s9 + $0x948] sm:$0xff] }
 0x26d   : > { %2140 = vmatpush.msrb.mxu2 %v3706_v33  ;;  %2180 = vmatpush.msra.mxu0 %v3707_v25  ;;  %v3714_v33 = vld [vmem:[%s8273_s9 + $0x6a0] sm:$0xff]  ;;  %v3792_v25 = vld [vmem:[%s8273_s9 + $0x910] sm:$0xff] }
 0x26e   : > { %2228 = vmatpush.msra.mxu3 %v3876_v29  ;;  %2268 = vmatpush.msrb.mxu1 %v3877_v35  ;;  %v3715_v29 = vld [vmem:[%s8273_s9 + $0x6a8] sm:$0xff]  ;;  %v3793_v35 = vld [vmem:[%s8273_s9 + $0x918] sm:$0xff] }
 0x26f   : > { %2141 = vmatpush.msrb.mxu2 %v3700_v36  ;;  %2181 = vmatpush.msra.mxu0 %v3701_v37  ;;  %v3884_v36 = vld [vmem:[%s8273_s9 + $0xbf0] sm:$0xff]  ;;  %v3885_v37 = vld [vmem:[%s8273_s9 + $0xbf8] sm:$0xff] }
 0x270   : > { %2229 = vmatpush.msra.mxu3 %v3870_v38  ;;  %2269 = vmatpush.msrb.mxu1 %v3871_v39  ;;  %v3708_v38 = vld [vmem:[%s8273_s9 + $0x670] sm:$0xff]  ;;  %v3709_v39 = vld [vmem:[%s8273_s9 + $0x678] sm:$0xff] }
 0x271   : > { %2142 = vmatpush.msrb.mxu2 %v3694_v40  ;;  %2182 = vmatpush.msra.mxu0 %v3695_v41  ;;  %v3878_v40 = vld [vmem:[%s8273_s9 + $0xbc0] sm:$0xff]  ;;  %v3879_v41 = vld [vmem:[%s8273_s9 + $0xbc8] sm:$0xff] }
 0x272   : > { %2143 = vmatmul.f32.vlgmr.msrb.gmra.mxu2 %v6598_v42  ;;  %2183 = vmatmul.f32.vlgmr.msra.gmra.mxu0 %v6598_v42 }
 0x273   : > { %2207 = vmatpush.msra.mxu2 %v3786_v43  ;;  %2230 = vmatpush.msra.mxu3 %v3864_v44  ;;  %v3702_v43 = vld [vmem:[%s8273_s9 + $0x640] sm:$0xff]  ;;  %v3703_v44 = vld [vmem:[%s8273_s9 + $0x648] sm:$0xff] }
 0x274   : > { %2247 = vmatpush.msrb.mxu0 %v3787_v45  ;;  %2270 = vmatpush.msrb.mxu1 %v3865_v46  ;;  %v3872_v45 = vld [vmem:[%s8273_s9 + $0xb90] sm:$0xff]  ;;  %v3873_v46 = vld [vmem:[%s8273_s9 + $0xb98] sm:$0xff] }
 0x275   : > { %2208 = vmatpush.msra.mxu2 %v3780_v47  ;;  %2231 = vmatpush.msra.mxu3 %v3858_v48  ;;  %v3696_v47 = vld [vmem:[%s8273_s9 + $0x610] sm:$0xff]  ;;  %v3697_v48 = vld [vmem:[%s8273_s9 + $0x618] sm:$0xff] }
 0x276   : > { %2248 = vmatpush.msrb.mxu0 %v3781_v49  ;;  %2271 = vmatpush.msrb.mxu1 %v3859_v50  ;;  %v3788_v49 = vld [vmem:[%s8273_s9 + $0x8f0] sm:$0xff]  ;;  %v3866_v50 = vld [vmem:[%s8273_s9 + $0xb60] sm:$0xff] }
 0x277   : > { %2209 = vmatpush.msra.mxu2 %v3774_v51  ;;  %2232 = vmatpush.msra.mxu3 %v3852_v52  ;;  %v3789_v51 = vld [vmem:[%s8273_s9 + $0x8f8] sm:$0xff]  ;;  %v3867_v52 = vld [vmem:[%s8273_s9 + $0xb68] sm:$0xff] }
 0x278   : > { %2249 = vmatpush.msrb.mxu0 %v3775_v53  ;;  %2272 = vmatpush.msrb.mxu1 %v3853_v54  ;;  %v3782_v53 = vld [vmem:[%s8273_s9 + $0x8c0] sm:$0xff]  ;;  %v3860_v54 = vld [vmem:[%s8273_s9 + $0xb30] sm:$0xff] }
 0x279   : > { %2210 = vmatpush.msra.mxu2 %v3768_v55  ;;  %2233 = vmatpush.msra.mxu3 %v3846_v56  ;;  %v3783_v55 = vld [vmem:[%s8273_s9 + $0x8c8] sm:$0xff]  ;;  %v3861_v56 = vld [vmem:[%s8273_s9 + $0xb38] sm:$0xff] }
 0x27a   : > { %2250 = vmatpush.msrb.mxu0 %v3769_v57  ;;  %2273 = vmatpush.msrb.mxu1 %v3847_v58  ;;  %v3776_v57 = vld [vmem:[%s8273_s9 + $0x890] sm:$0xff]  ;;  %v3854_v58 = vld [vmem:[%s8273_s9 + $0xb00] sm:$0xff] }
 0x27b   : > { %2211 = vmatpush.msra.mxu2 %v3762_v59  ;;  %2234 = vmatpush.msra.mxu3 %v3840_v60  ;;  %v3777_v59 = vld [vmem:[%s8273_s9 + $0x898] sm:$0xff]  ;;  %v3855_v60 = vld [vmem:[%s8273_s9 + $0xb08] sm:$0xff] }
 0x27c   : > { %2251 = vmatpush.msrb.mxu0 %v3763_v62  ;;  %2274 = vmatpush.msrb.mxu1 %v3841_v63  ;;  %v3770_v62 = vld [vmem:[%s8273_s9 + $0x860] sm:$0xff]  ;;  %v3848_v63 = vld [vmem:[%s8273_s9 + $0xad0] sm:$0xff] }
 0x27d   : > { %2212 = vmatpush.msra.mxu2 %v3756_v0  ;;  %2235 = vmatpush.msra.mxu3 %v3834_v1  ;;  %v3771_v0 = vld [vmem:[%s8273_s9 + $0x868] sm:$0xff]  ;;  %v3849_v1 = vld [vmem:[%s8273_s9 + $0xad8] sm:$0xff] }
 0x27e   : > { %2252 = vmatpush.msrb.mxu0 %v3757_v2  ;;  %2275 = vmatpush.msrb.mxu1 %v3835_v3  ;;  %v3764_v2 = vld [vmem:[%s8273_s9 + $0x830] sm:$0xff]  ;;  %v3842_v3 = vld [vmem:[%s8273_s9 + $0xaa0] sm:$0xff] }
 0x27f   : > { %2213 = vmatpush.msra.mxu2 %v3750_v5  ;;  %2236 = vmatpush.msra.mxu3 %v3828_v6  ;;  %v3765_v5 = vld [vmem:[%s8273_s9 + $0x838] sm:$0xff]  ;;  %v3843_v6 = vld [vmem:[%s8273_s9 + $0xaa8] sm:$0xff] }
 0x280   : > { %2253 = vmatpush.msrb.mxu0 %v3751_v7  ;;  %2276 = vmatpush.msrb.mxu1 %v3829_v8  ;;  %v3758_v7 = vld [vmem:[%s8273_s9 + $0x800] sm:$0xff]  ;;  %v3836_v8 = vld [vmem:[%s8273_s9 + $0xa70] sm:$0xff] }
 0x281   : > { %2214 = vmatpush.msra.mxu2 %v3744_v9  ;;  %2237 = vmatpush.msra.mxu3 %v3822_v10  ;;  %v3759_v9 = vld [vmem:[%s8273_s9 + $0x808] sm:$0xff]  ;;  %v3837_v10 = vld [vmem:[%s8273_s9 + $0xa78] sm:$0xff] }
 0x282   : > { %2254 = vmatpush.msrb.mxu0 %v3745_v11  ;;  %2277 = vmatpush.msrb.mxu1 %v3823_v12  ;;  %v3752_v11 = vld [vmem:[%s8273_s9 + $0x7d0] sm:$0xff]  ;;  %v3830_v12 = vld [vmem:[%s8273_s9 + $0xa40] sm:$0xff] }
 0x283   : > { %2215 = vmatpush.msra.mxu2 %v3738_v13  ;;  %2238 = vmatpush.msra.mxu3 %v3816_v14  ;;  %v3753_v13 = vld [vmem:[%s8273_s9 + $0x7d8] sm:$0xff]  ;;  %v3831_v14 = vld [vmem:[%s8273_s9 + $0xa48] sm:$0xff] }
 0x284   : > { %2255 = vmatpush.msrb.mxu0 %v3739_v15  ;;  %2278 = vmatpush.msrb.mxu1 %v3817_v16  ;;  %v3746_v15 = vld [vmem:[%s8273_s9 + $0x7a0] sm:$0xff]  ;;  %v3824_v16 = vld [vmem:[%s8273_s9 + $0xa10] sm:$0xff] }
 0x285   : > { %2216 = vmatpush.msra.mxu2 %v3732_v17  ;;  %2239 = vmatpush.msra.mxu3 %v3810_v18  ;;  %v3747_v17 = vld [vmem:[%s8273_s9 + $0x7a8] sm:$0xff]  ;;  %v3825_v18 = vld [vmem:[%s8273_s9 + $0xa18] sm:$0xff] }
 0x286   : > { %2256 = vmatpush.msrb.mxu0 %v3733_v19  ;;  %2279 = vmatpush.msrb.mxu1 %v3811_v20  ;;  %v3740_v19 = vld [vmem:[%s8273_s9 + $0x770] sm:$0xff]  ;;  %v3818_v20 = vld [vmem:[%s8273_s9 + $0x9e0] sm:$0xff] }
 0x287   : > { %2217 = vmatpush.msra.mxu2 %v3726_v21  ;;  %2240 = vmatpush.msra.mxu3 %v3804_v22  ;;  %v3741_v21 = vld [vmem:[%s8273_s9 + $0x778] sm:$0xff]  ;;  %v3819_v22 = vld [vmem:[%s8273_s9 + $0x9e8] sm:$0xff] }
 0x288   : > { %2257 = vmatpush.msrb.mxu0 %v3727_v24  ;;  %2280 = vmatpush.msrb.mxu1 %v3805_v28  ;;  %v3734_v24 = vld [vmem:[%s8273_s9 + $0x740] sm:$0xff]  ;;  %v3812_v28 = vld [vmem:[%s8273_s9 + $0x9b0] sm:$0xff] }
 0x289   : > { %2218 = vmatpush.msra.mxu2 %v3720_v23  ;;  %2241 = vmatpush.msra.mxu3 %v3798_v30  ;;  %v3735_v23 = vld [vmem:[%s8273_s9 + $0x748] sm:$0xff]  ;;  %v3813_v30 = vld [vmem:[%s8273_s9 + $0x9b8] sm:$0xff] }
 0x28a   : > { %2258 = vmatpush.msrb.mxu0 %v3721_v26  ;;  %2281 = vmatpush.msrb.mxu1 %v3799_v32  ;;  %v3728_v26 = vld [vmem:[%s8273_s9 + $0x710] sm:$0xff]  ;;  %v3806_v32 = vld [vmem:[%s8273_s9 + $0x980] sm:$0xff] }
 0x28b   : > { %2219 = vmatpush.msra.mxu2 %v3714_v33  ;;  %2242 = vmatpush.msra.mxu3 %v3792_v25  ;;  %v3729_v33 = vld [vmem:[%s8273_s9 + $0x718] sm:$0xff]  ;;  %v3807_v25 = vld [vmem:[%s8273_s9 + $0x988] sm:$0xff] }
 0x28c   : > { %2259 = vmatpush.msrb.mxu0 %v3715_v29  ;;  %2282 = vmatpush.msrb.mxu1 %v3793_v35  ;;  %v3722_v29 = vld [vmem:[%s8273_s9 + $0x6e0] sm:$0xff]  ;;  %v3800_v35 = vld [vmem:[%s8273_s9 + $0x950] sm:$0xff] }
 0x28d   : > { %2243 = vmatmul.f32.vlgmr.msra.gmra.mxu3 %v6557_v31  ;;  %2283 = vmatmul.f32.vlgmr.msrb.gmra.mxu1 %v6557_v31 }
 0x28e   : > { %2307 = vmatpush.msrb.mxu3 %v3884_v36  ;;  %2347 = vmatpush.msra.mxu1 %v3885_v37  ;;  %v3723_v36 = vld [vmem:[%s8273_s9 + $0x6e8] sm:$0xff]  ;;  %v3801_v37 = vld [vmem:[%s8273_s9 + $0x958] sm:$0xff] }
 0x28f   : > { %2220 = vmatpush.msra.mxu2 %v3708_v38  ;;  %2260 = vmatpush.msrb.mxu0 %v3709_v39 }
 0x290   : > { %2308 = vmatpush.msrb.mxu3 %v3878_v40  ;;  %2348 = vmatpush.msra.mxu1 %v3879_v41  ;;  %v3716_v40 = vld [vmem:[%s8273_s9 + $0x6b0] sm:$0xff]  ;;  %v3794_v41 = vld [vmem:[%s8273_s9 + $0x920] sm:$0xff] }
 0x291   : > { %2221 = vmatpush.msra.mxu2 %v3702_v43  ;;  %2261 = vmatpush.msrb.mxu0 %v3703_v44  ;;  %v3717_v44 = vld [vmem:[%s8273_s9 + $0x6b8] sm:$0xff] }
 0x292   : > { %2309 = vmatpush.msrb.mxu3 %v3872_v45  ;;  %2349 = vmatpush.msra.mxu1 %v3873_v46  ;;  %v3795_v45 = vld [vmem:[%s8273_s9 + $0x928] sm:$0xff]  ;;  %v4072_v46 = vld [vmem:[%s8273_s9 + $0x11d0] sm:$0xff] }
 0x293   : > { %2222 = vmatpush.msra.mxu2 %v3696_v47  ;;  %2262 = vmatpush.msrb.mxu0 %v3697_v48  ;;  %v4073_v47 = vld [vmem:[%s8273_s9 + $0x11d8] sm:$0xff]  ;;  %v3710_v48 = vld [vmem:[%s8273_s9 + $0x680] sm:$0xff] }
 0x294   : > { %2223 = vmatmul.f32.vlgmr.msra.gmra.mxu2 %v6598_v42  ;;  %2263 = vmatmul.f32.vlgmr.msrb.gmra.mxu0 %v6598_v42 }
 0x295   : > { %2287 = vmatpush.msrb.mxu2 %v3788_v49  ;;  %2310 = vmatpush.msrb.mxu3 %v3866_v50  ;;  %v3711_v49 = vld [vmem:[%s8273_s9 + $0x688] sm:$0xff]  ;;  %v4066_v50 = vld [vmem:[%s8273_s9 + $0x11a0] sm:$0xff] }
 0x296   : > { %2327 = vmatpush.msra.mxu0 %v3789_v51  ;;  %2350 = vmatpush.msra.mxu1 %v3867_v52  ;;  %v4067_v51 = vld [vmem:[%s8273_s9 + $0x11a8] sm:$0xff] }
 0x297   : > { %2288 = vmatpush.msrb.mxu2 %v3782_v53  ;;  %2311 = vmatpush.msrb.mxu3 %v3860_v54  ;;  %v3704_v54 = vld [vmem:[%s8273_s9 + $0x650] sm:$0xff] }
 0x298   : > { %2328 = vmatpush.msra.mxu0 %v3783_v55  ;;  %2351 = vmatpush.msra.mxu1 %v3861_v56 }
 0x299   : > { %2289 = vmatpush.msrb.mxu2 %v3776_v57  ;;  %2312 = vmatpush.msrb.mxu3 %v3854_v58  ;;  %v4060_v57 = vld [vmem:[%s8273_s9 + $0x1170] sm:$0xff]  ;;  %v4061_v58 = vld [vmem:[%s8273_s9 + $0x1178] sm:$0xff] }
 0x29a   : > { %2329 = vmatpush.msra.mxu0 %v3777_v59  ;;  %2352 = vmatpush.msra.mxu1 %v3855_v60  ;;  %v3698_v59 = vld [vmem:[%s8273_s9 + $0x620] sm:$0xff]  ;;  %v3699_v60 = vld [vmem:[%s8273_s9 + $0x628] sm:$0xff] }
 0x29b   : > { %2290 = vmatpush.msrb.mxu2 %v3770_v62  ;;  %2313 = vmatpush.msrb.mxu3 %v3848_v63 }
 0x29c   : > { %2330 = vmatpush.msra.mxu0 %v3771_v0  ;;  %2353 = vmatpush.msra.mxu1 %v3849_v1  ;;  %v3976_v1 = vld [vmem:[%s8273_s9 + $0xed0] sm:$0xff] }
 0x29d   : > { %2291 = vmatpush.msrb.mxu2 %v3764_v2  ;;  %2314 = vmatpush.msrb.mxu3 %v3842_v3  ;;  %v4054_v2 = vld [vmem:[%s8273_s9 + $0x1140] sm:$0xff] }
 0x29e   : > { %2331 = vmatpush.msra.mxu0 %v3765_v5  ;;  %2354 = vmatpush.msra.mxu1 %v3843_v6  ;;  %v3977_v5 = vld [vmem:[%s8273_s9 + $0xed8] sm:$0xff]  ;;  %v4055_v6 = vld [vmem:[%s8273_s9 + $0x1148] sm:$0xff] }
 0x29f   : > { %2292 = vmatpush.msrb.mxu2 %v3758_v7  ;;  %2315 = vmatpush.msrb.mxu3 %v3836_v8  ;;  %v3970_v7 = vld [vmem:[%s8273_s9 + $0xea0] sm:$0xff]  ;;  %v4048_v8 = vld [vmem:[%s8273_s9 + $0x1110] sm:$0xff] }
 0x2a0   : > { %2332 = vmatpush.msra.mxu0 %v3759_v9  ;;  %2355 = vmatpush.msra.mxu1 %v3837_v10  ;;  %v3971_v9 = vld [vmem:[%s8273_s9 + $0xea8] sm:$0xff]  ;;  %v4049_v10 = vld [vmem:[%s8273_s9 + $0x1118] sm:$0xff] }
 0x2a1   : > { %2293 = vmatpush.msrb.mxu2 %v3752_v11  ;;  %2316 = vmatpush.msrb.mxu3 %v3830_v12  ;;  %v4042_v11 = vld [vmem:[%s8273_s9 + $0x10e0] sm:$0xff]  ;;  %v3965_v12 = vld [vmem:[%s8273_s9 + $0xe78] sm:$0xff] }
 0x2a2   : > { %2333 = vmatpush.msra.mxu0 %v3753_v13  ;;  %2356 = vmatpush.msra.mxu1 %v3831_v14  ;;  %v4043_v13 = vld [vmem:[%s8273_s9 + $0x10e8] sm:$0xff] }
 0x2a3   : > { %2294 = vmatpush.msrb.mxu2 %v3746_v15  ;;  %2317 = vmatpush.msrb.mxu3 %v3824_v16  ;;  %v1742_v38 = vpop.f32.mrf.mxu1  ;;  %v3958_v16 = vld [vmem:[%s8273_s9 + $0xe40] sm:$0xff] }
 0x2a4   : > { %2334 = vmatpush.msra.mxu0 %v3747_v17  ;;  %2357 = vmatpush.msra.mxu1 %v3825_v18  ;;  %v4036_v17 = vld [vmem:[%s8273_s9 + $0x10b0] sm:$0xff] }
 0x2a5   : > { %2295 = vmatpush.msrb.mxu2 %v3740_v19  ;;  %2318 = vmatpush.msrb.mxu3 %v3818_v20  ;;  %v3959_v19 = vld [vmem:[%s8273_s9 + $0xe48] sm:$0xff]  ;;  %v4037_v20 = vld [vmem:[%s8273_s9 + $0x10b8] sm:$0xff] }
 0x2a6   : > { %2335 = vmatpush.msra.mxu0 %v3741_v21  ;;  %2358 = vmatpush.msra.mxu1 %v3819_v22  ;;  %v3952_v21 = vld [vmem:[%s8273_s9 + $0xe10] sm:$0xff]  ;;  %v4030_v22 = vld [vmem:[%s8273_s9 + $0x1080] sm:$0xff] }
 0x2a7   : > { %2296 = vmatpush.msrb.mxu2 %v3734_v24  ;;  %2319 = vmatpush.msrb.mxu3 %v3812_v28  ;;  %v3953_v28 = vld [vmem:[%s8273_s9 + $0xe18] sm:$0xff] }
 0x2a8   : > { %2336 = vmatpush.msra.mxu0 %v3735_v23  ;;  %2359 = vmatpush.msra.mxu1 %v3813_v30  ;;  %v4031_v23 = vld [vmem:[%s8273_s9 + $0x1088] sm:$0xff]  ;;  %v3946_v30 = vld [vmem:[%s8273_s9 + $0xde0] sm:$0xff] }
 0x2a9   : > { %2297 = vmatpush.msrb.mxu2 %v3728_v26  ;;  %2320 = vmatpush.msrb.mxu3 %v3806_v32  ;;  %v1722_v39 = vpop.f32.mrf.mxu0  ;;  %v1702_v52 = vpop.f32.mrf.mxu3  ;;  %v4024_v26 = vld [vmem:[%s8273_s9 + $0x1050] sm:$0xff] }
 0x2aa   : > { %2337 = vmatpush.msra.mxu0 %v3729_v33  ;;  %2360 = vmatpush.msra.mxu1 %v3807_v25  ;;  %v1743_v43 = vadd.f32 %v1742_v38, %v1722_v39  ;;  %v3947_v33 = vld [vmem:[%s8273_s9 + $0xde8] sm:$0xff]  ;;  %v4025_v25 = vld [vmem:[%s8273_s9 + $0x1058] sm:$0xff]  ;;  %v3934_v38 = vld [vmem:[%s8273_s9 + $0xd80] sm:$0xff] }
 0x2ab   : > { %2298 = vmatpush.msrb.mxu2 %v3722_v29  ;;  %2321 = vmatpush.msrb.mxu3 %v3800_v35  ;;  %v3940_v29 = vld [vmem:[%s8273_s9 + $0xdb0] sm:$0xff]  ;;  %v4018_v35 = vld [vmem:[%s8273_s9 + $0x1020] sm:$0xff] }
 0x2ac   : > { %2338 = vmatpush.msra.mxu0 %v3723_v36  ;;  %2361 = vmatpush.msra.mxu1 %v3801_v37  ;;  %v1911_v55 = vrot.slane %v1743_v43, 7  ;;  %v1822_v63 = vpop.f32.mrf.mxu1  ;;  %v3941_v36 = vld [vmem:[%s8273_s9 + $0xdb8] sm:$0xff]  ;;  %v4019_v37 = vld [vmem:[%s8273_s9 + $0x1028] sm:$0xff]  ;;  %v4012_v39 = vld [vmem:[%s8273_s9 + $0xff0] sm:$0xff] }
 0x2ad   : > { %2299 = vmatpush.msrb.mxu2 %v3716_v40  ;;  %2322 = vmatpush.msrb.mxu3 %v3794_v41  ;;  %v3935_v40 = vld [vmem:[%s8273_s9 + $0xd88] sm:$0xff]  ;;  %v4013_v41 = vld [vmem:[%s8273_s9 + $0xff8] sm:$0xff]  ;;  %v3928_v43 = vld [vmem:[%s8273_s9 + $0xd50] sm:$0xff] }
 0x2ae   : > { %2339 = vmatpush.msra.mxu0 %v3717_v44  ;;  %2362 = vmatpush.msra.mxu1 %v3795_v45  ;;  %v4006_v44 = vld [vmem:[%s8273_s9 + $0xfc0] sm:$0xff]  ;;  %v3929_v45 = vld [vmem:[%s8273_s9 + $0xd58] sm:$0xff] }
 0x2af   : > { %2323 = vmatmul.f32.vlgmr.msrb.gmra.mxu3 %v6557_v31  ;;  %2363 = vmatmul.f32.vlgmr.msra.gmra.mxu1 %v6557_v31  ;;  %v1682_v53 = vpop.f32.mrf.mxu2  ;;  %v3705_v31 = vld [vmem:[%s8273_s9 + $0x658] sm:$0xff] }
 0x2b0   : > { %2602 = vmatpush.msra.mxu3 %v4072_v46  ;;  %2642 = vmatpush.msrb.mxu1 %v4073_v47  ;;  %v1703_v56 = vadd.f32 %v1702_v52, %v1682_v53  ;;  %v4007_v46 = vld [vmem:[%s8273_s9 + $0xfc8] sm:$0xff]  ;;  %v3922_v47 = vld [vmem:[%s8273_s9 + $0xd20] sm:$0xff]  ;;  %v3917_v53 = vld [vmem:[%s8273_s9 + $0xcf8] sm:$0xff] }
 0x2b1   : > { %2300 = vmatpush.msrb.mxu2 %v3710_v48  ;;  %2340 = vmatpush.msra.mxu0 %v3711_v49  ;;  %v4000_v48 = vld [vmem:[%s8273_s9 + $0xf90] sm:$0xff]  ;;  %v3923_v49 = vld [vmem:[%s8273_s9 + $0xd28] sm:$0xff]  ;;  %v3994_v52 = vld [vmem:[%s8273_s9 + $0xf60] sm:$0xff] }
 0x2b2   : > { %2603 = vmatpush.msra.mxu3 %v4066_v50  ;;  %2643 = vmatpush.msrb.mxu1 %v4067_v51  ;;  %v1917_v62 = vsel %vm1916_vm6, %v1703_v56, %v1911_v55  ;;  %v1782_v14 = vpop.f32.mrf.mxu3  ;;  %v4001_v50 = vld [vmem:[%s8273_s9 + $0xf98] sm:$0xff]  ;;  %v3916_v51 = vld [vmem:[%s8273_s9 + $0xcf0] sm:$0xff]  ;;  %v3911_v56 = vld [vmem:[%s8273_s9 + $0xcc8] sm:$0xff] }
 0x2b3   : > { %2301 = vmatpush.msrb.mxu2 %v3704_v54  ;;  %2341 = vmatpush.msra.mxu0 %v3705_v31  ;;  %v1802_v0 = vpop.f32.mrf.mxu0  ;;  %v3995_v54 = vld [vmem:[%s8273_s9 + $0xf68] sm:$0xff]  ;;  %v3910_v31 = vld [vmem:[%s8273_s9 + $0xcc0] sm:$0xff]  ;;  %v3988_v55 = vld [vmem:[%s8273_s9 + $0xf30] sm:$0xff] }
 0x2b4   : > { %2604 = vmatpush.msra.mxu3 %v4060_v57  ;;  %2644 = vmatpush.msrb.mxu1 %v4061_v58  ;;  %v6999_v3 = vadd.f32 %v1822_v63, %v1802_v0  ;;  %v3989_v57 = vld [vmem:[%s8273_s9 + $0xf38] sm:$0xff]  ;;  %v3904_v58 = vld [vmem:[%s8273_s9 + $0xc90] sm:$0xff] }
 0x2b5   : > { %2302 = vmatpush.msrb.mxu2 %v3698_v59  ;;  %2342 = vmatpush.msra.mxu0 %v3699_v60  ;;  %v3982_v59 = vld [vmem:[%s8273_s9 + $0xf00] sm:$0xff]  ;;  %v3905_v60 = vld [vmem:[%s8273_s9 + $0xc98] sm:$0xff] }
 0x2b6   : > { %2303 = vmatmul.f32.vlgmr.msrb.gmra.mxu2 %v6598_v42  ;;  %2343 = vmatmul.f32.vlgmr.msra.gmra.mxu0 %v6598_v42  ;;  %v3964_v42 = vld [vmem:[%s8273_s9 + $0xe70] sm:$0xff] }
 0x2b7   : > { %2582 = vmatpush.msra.mxu2 %v3976_v1  ;;  %2605 = vmatpush.msra.mxu3 %v4054_v2  ;;  %v7157_v2 = vrot.slane %v6179_v27, 2 }
 0x2b8   : > { %2622 = vmatpush.msrb.mxu0 %v3977_v5  ;;  %2645 = vmatpush.msrb.mxu1 %v4055_v6  ;;  %v4074_v5 = vld [vmem:[%s8273_s9 + $0x11e0] sm:$0xff]  ;;  %v4075_v6 = vld [vmem:[%s8273_s9 + $0x11e8] sm:$0xff] }
 0x2b9   : > { %2583 = vmatpush.msra.mxu2 %v3970_v7  ;;  %2606 = vmatpush.msra.mxu3 %v4048_v8  ;;  %v1762_v15 = vpop.f32.mrf.mxu2  ;;  %v3898_v7 = vld [vmem:[%s8273_s9 + $0xc60] sm:$0xff]  ;;  %v3899_v8 = vld [vmem:[%s8273_s9 + $0xc68] sm:$0xff] }
 0x2ba   : > { %2623 = vmatpush.msrb.mxu0 %v3971_v9  ;;  %2646 = vmatpush.msrb.mxu1 %v4049_v10  ;;  %v1783_v18 = vadd.f32 %v1782_v14, %v1762_v15  ;;  %v4068_v9 = vld [vmem:[%s8273_s9 + $0x11b0] sm:$0xff]  ;;  %v4069_v10 = vld [vmem:[%s8273_s9 + $0x11b8] sm:$0xff] }
 0x2bb   : > { %2584 = vmatpush.msra.mxu2 %v3964_v42  ;;  %2607 = vmatpush.msra.mxu3 %v4042_v11  ;;  %v3892_v42 = vld [vmem:[%s8273_s9 + $0xc30] sm:$0xff]  ;;  %v3893_v11 = vld [vmem:[%s8273_s9 + $0xc38] sm:$0xff] }
 0x2bc   : > { %2624 = vmatpush.msrb.mxu0 %v3965_v12  ;;  %2647 = vmatpush.msrb.mxu1 %v4043_v13  ;;  %v1912_v24 = vrot.slane %v1783_v18, 6  ;;  %v4062_v12 = vld [vmem:[%s8273_s9 + $0x1180] sm:$0xff]  ;;  %v4063_v13 = vld [vmem:[%s8273_s9 + $0x1188] sm:$0xff] }
 0x2bd   : > { %2585 = vmatpush.msra.mxu2 %v3958_v16  ;;  %2608 = vmatpush.msra.mxu3 %v4036_v17  ;;  %v3886_v16 = vld [vmem:[%s8273_s9 + $0xc00] sm:$0xff]  ;;  %v3887_v17 = vld [vmem:[%s8273_s9 + $0xc08] sm:$0xff] }
 0x2be   : > { %2625 = vmatpush.msrb.mxu0 %v3959_v19  ;;  %2648 = vmatpush.msrb.mxu1 %v4037_v20  ;;  %v7064_v32 = vsel %vm1918_vm7, %v1917_v62, %v1912_v24  ;;  %v3983_v62 = vld [vmem:[%s8273_s9 + $0xf08] sm:$0xff]  ;;  %v1913_v19 = vrot.slane %v6999_v3, 5  ;;  %v7199_v20 = vrot.slane %v6202_v34, 2 }
 0x2bf   : > { %2586 = vmatpush.msra.mxu2 %v3952_v21  ;;  %2609 = vmatpush.msra.mxu3 %v4030_v22  ;;  %v3978_v21 = vld [vmem:[%s8273_s9 + $0xee0] sm:$0xff]  ;;  %v4056_v22 = vld [vmem:[%s8273_s9 + $0x1150] sm:$0xff]  ;;  %v3979_v3 = vld [vmem:[%s8273_s9 + $0xee8] sm:$0xff] }
 0x2c0   : > { %2626 = vmatpush.msrb.mxu0 %v3953_v28  ;;  %2649 = vmatpush.msrb.mxu1 %v4031_v23  ;;  %v4057_v28 = vld [vmem:[%s8273_s9 + $0x1158] sm:$0xff] }
 0x2c1   : > { %2587 = vmatpush.msra.mxu2 %v3946_v30  ;;  %2610 = vmatpush.msra.mxu3 %v4024_v26  ;;  %v3972_v30 = vld [vmem:[%s8273_s9 + $0xeb0] sm:$0xff]  ;;  %v4050_v26 = vld [vmem:[%s8273_s9 + $0x1120] sm:$0xff] }
 0x2c2   : > { %2627 = vmatpush.msrb.mxu0 %v3947_v33  ;;  %2650 = vmatpush.msrb.mxu1 %v4025_v25  ;;  %v3973_v25 = vld [vmem:[%s8273_s9 + $0xeb8] sm:$0xff] }
 0x2c3   : > { %2588 = vmatpush.msra.mxu2 %v3940_v29  ;;  %2611 = vmatpush.msra.mxu3 %v4018_v35  ;;  %v4051_v29 = vld [vmem:[%s8273_s9 + $0x1128] sm:$0xff] }
 0x2c4   : > { %2628 = vmatpush.msrb.mxu0 %v3941_v36  ;;  %2651 = vmatpush.msrb.mxu1 %v4019_v37  ;;  %v3966_v36 = vld [vmem:[%s8273_s9 + $0xe80] sm:$0xff]  ;;  %v4044_v37 = vld [vmem:[%s8273_s9 + $0x10f0] sm:$0xff] }
 0x2c5   : > { %2589 = vmatpush.msra.mxu2 %v3934_v38  ;;  %2612 = vmatpush.msra.mxu3 %v4012_v39  ;;  %v3967_v39 = vld [vmem:[%s8273_s9 + $0xe88] sm:$0xff] }
 0x2c6   : > { %2629 = vmatpush.msrb.mxu0 %v3935_v40  ;;  %2652 = vmatpush.msrb.mxu1 %v4013_v41  ;;  %v1902_v63 = vpop.f32.mrf.mxu1  ;;  %v4045_v40 = vld [vmem:[%s8273_s9 + $0x10f8] sm:$0xff]  ;;  %v3960_v41 = vld [vmem:[%s8273_s9 + $0xe50] sm:$0xff] }
 0x2c7   : > { %2590 = vmatpush.msra.mxu2 %v3928_v43  ;;  %2613 = vmatpush.msra.mxu3 %v4006_v44  ;;  %v3961_v43 = vld [vmem:[%s8273_s9 + $0xe58] sm:$0xff]  ;;  %v4039_v44 = vld [vmem:[%s8273_s9 + $0x10c8] sm:$0xff] }
 0x2c8   : > { %2630 = vmatpush.msrb.mxu0 %v3929_v45  ;;  %2653 = vmatpush.msrb.mxu1 %v4007_v46  ;;  %v3954_v45 = vld [vmem:[%s8273_s9 + $0xe20] sm:$0xff]  ;;  %v4032_v46 = vld [vmem:[%s8273_s9 + $0x1090] sm:$0xff] }
 0x2c9   : > { %2591 = vmatpush.msra.mxu2 %v3922_v47  ;;  %2614 = vmatpush.msra.mxu3 %v4000_v48  ;;  %v3955_v47 = vld [vmem:[%s8273_s9 + $0xe28] sm:$0xff]  ;;  %v4033_v48 = vld [vmem:[%s8273_s9 + $0x1098] sm:$0xff] }
 0x2ca   : > { %2631 = vmatpush.msrb.mxu0 %v3923_v49  ;;  %2654 = vmatpush.msrb.mxu1 %v4001_v50  ;;  %v3948_v49 = vld [vmem:[%s8273_s9 + $0xdf0] sm:$0xff]  ;;  %v4026_v50 = vld [vmem:[%s8273_s9 + $0x1060] sm:$0xff] }
 0x2cb   : > { %2592 = vmatpush.msra.mxu2 %v3916_v51  ;;  %2615 = vmatpush.msra.mxu3 %v3994_v52  ;;  %v3949_v51 = vld [vmem:[%s8273_s9 + $0xdf8] sm:$0xff]  ;;  %v4027_v52 = vld [vmem:[%s8273_s9 + $0x1068] sm:$0xff] }
 0x2cc   : > { %2632 = vmatpush.msrb.mxu0 %v3917_v53  ;;  %2655 = vmatpush.msrb.mxu1 %v3995_v54  ;;  %v1862_v14 = vpop.f32.mrf.mxu3  ;;  %v3942_v53 = vld [vmem:[%s8273_s9 + $0xdc0] sm:$0xff]  ;;  %v4020_v54 = vld [vmem:[%s8273_s9 + $0x1030] sm:$0xff] }
 0x2cd   : > { %2593 = vmatpush.msra.mxu2 %v3910_v31  ;;  %2616 = vmatpush.msra.mxu3 %v3988_v55  ;;  %v1882_v0 = vpop.f32.mrf.mxu0  ;;  %v3943_v31 = vld [vmem:[%s8273_s9 + $0xdc8] sm:$0xff]  ;;  %v4021_v55 = vld [vmem:[%s8273_s9 + $0x1038] sm:$0xff] }
 0x2ce   : > { %2633 = vmatpush.msrb.mxu0 %v3911_v56  ;;  %2656 = vmatpush.msrb.mxu1 %v3989_v57  ;;  %v1903_v1 = vadd.f32 %v1902_v63, %v1882_v0  ;;  %v3936_v56 = vld [vmem:[%s8273_s9 + $0xd90] sm:$0xff]  ;;  %v4014_v57 = vld [vmem:[%s8273_s9 + $0x1000] sm:$0xff]  ;;  %v3931_v63 = vld [vmem:[%s8273_s9 + $0xd68] sm:$0xff] }
 0x2cf   : > { %2594 = vmatpush.msra.mxu2 %v3904_v58  ;;  %2617 = vmatpush.msra.mxu3 %v3982_v59  ;;  %v3937_v58 = vld [vmem:[%s8273_s9 + $0xd98] sm:$0xff]  ;;  %v4015_v59 = vld [vmem:[%s8273_s9 + $0x1008] sm:$0xff] }
 0x2d0   : > { %2634 = vmatpush.msrb.mxu0 %v3905_v60  ;;  %2657 = vmatpush.msrb.mxu1 %v3983_v62  ;;  %v1915_v23 = vrot.slane %v1903_v1, 3  ;;  %v3930_v60 = vld [vmem:[%s8273_s9 + $0xd60] sm:$0xff]  ;;  %v4008_v62 = vld [vmem:[%s8273_s9 + $0xfd0] sm:$0xff]  ;;  %v4009_v0 = vld [vmem:[%s8273_s9 + $0xfd8] sm:$0xff] }
 0x2d1   : > { %2618 = vmatmul.f32.vlgmr.msra.gmra.mxu3 %v7157_v2  ;;  %2658 = vmatmul.f32.vlgmr.msrb.gmra.mxu1 %v7157_v2  ;;  %v3924_v1 = vld [vmem:[%s8273_s9 + $0xd30] sm:$0xff] }
 0x2d2   : > { %2682 = vmatpush.msrb.mxu3 %v4074_v5  ;;  %2722 = vmatpush.msra.mxu1 %v4075_v6  ;;  %v4002_v5 = vld [vmem:[%s8273_s9 + $0xfa0] sm:$0xff]  ;;  %v3925_v6 = vld [vmem:[%s8273_s9 + $0xd38] sm:$0xff] }
 0x2d3   : > { %2595 = vmatpush.msra.mxu2 %v3898_v7  ;;  %2635 = vmatpush.msrb.mxu0 %v3899_v8  ;;  %v1842_v15 = vpop.f32.mrf.mxu2  ;;  %v4003_v7 = vld [vmem:[%s8273_s9 + $0xfa8] sm:$0xff]  ;;  %v3918_v8 = vld [vmem:[%s8273_s9 + $0xd00] sm:$0xff] }
 0x2d4   : > { %2683 = vmatpush.msrb.mxu3 %v4068_v9  ;;  %2723 = vmatpush.msra.mxu1 %v4069_v10  ;;  %v1863_v18 = vadd.f32 %v1862_v14, %v1842_v15  ;;  %v3996_v9 = vld [vmem:[%s8273_s9 + $0xf70] sm:$0xff]  ;;  %v3919_v10 = vld [vmem:[%s8273_s9 + $0xd08] sm:$0xff]  ;;  %v3906_v15 = vld [vmem:[%s8273_s9 + $0xca0] sm:$0xff] }
 0x2d5   : > { %2596 = vmatpush.msra.mxu2 %v3892_v42  ;;  %2636 = vmatpush.msrb.mxu0 %v3893_v11  ;;  %v3997_v42 = vld [vmem:[%s8273_s9 + $0xf78] sm:$0xff]  ;;  %v3912_v11 = vld [vmem:[%s8273_s9 + $0xcd0] sm:$0xff]  ;;  %v3991_v14 = vld [vmem:[%s8273_s9 + $0xf48] sm:$0xff] }
 0x2d6   : > { %2684 = vmatpush.msrb.mxu3 %v4062_v12  ;;  %2724 = vmatpush.msra.mxu1 %v4063_v13  ;;  %v1914_v24 = vrot.slane %v1863_v18, 4  ;;  %v3990_v12 = vld [vmem:[%s8273_s9 + $0xf40] sm:$0xff]  ;;  %v3913_v13 = vld [vmem:[%s8273_s9 + $0xcd8] sm:$0xff] }
 0x2d7   : > { %2597 = vmatpush.msra.mxu2 %v3886_v16  ;;  %2637 = vmatpush.msrb.mxu0 %v3887_v17  ;;  %v3984_v16 = vld [vmem:[%s8273_s9 + $0xf10] sm:$0xff]  ;;  %v3907_v17 = vld [vmem:[%s8273_s9 + $0xca8] sm:$0xff]  ;;  %v3985_v18 = vld [vmem:[%s8273_s9 + $0xf18] sm:$0xff] }
 0x2d8   : > { %2598 = vmatmul.f32.vlgmr.msra.gmra.mxu2 %v7199_v20  ;;  %2638 = vmatmul.f32.vlgmr.msrb.gmra.mxu0 %v7199_v20  ;;  %v1921_v33 = vsel %vm1920_vm8, %v1913_v19, %v1914_v24  ;;  %v4076_v19 = vld [vmem:[%s8273_s9 + $0x11f0] sm:$0xff]  ;;  %v3901_v24 = vld [vmem:[%s8273_s9 + $0xc78] sm:$0xff] }
 0x2d9   : > { %2662 = vmatpush.msrb.mxu2 %v3978_v21  ;;  %2685 = vmatpush.msrb.mxu3 %v4056_v22  ;;  %v1923_v35 = vsel %vm1922_vm9, %v1921_v33, %v1915_v23  ;;  %v4077_v21 = vld [vmem:[%s8273_s9 + $0x11f8] sm:$0xff]  ;;  %v3900_v22 = vld [vmem:[%s8273_s9 + $0xc70] sm:$0xff]  ;;  %v3894_v23 = vld [vmem:[%s8273_s9 + $0xc40] sm:$0xff] }
 0x2da   : > { %2702 = vmatpush.msra.mxu0 %v3979_v3  ;;  %2725 = vmatpush.msra.mxu1 %v4057_v28  ;;  %v7237_v38 = vsel %vm1924_vm10, %v7064_v32, %v1923_v35  ;;  %v4038_v32 = vld [vmem:[%s8273_s9 + $0x10c0] sm:$0xff]  ;;  %v4071_v28 = vld [vmem:[%s8273_s9 + $0x11c8] sm:$0xff]  ;;  %v4065_v33 = vld [vmem:[%s8273_s9 + $0x1198] sm:$0xff] }
 0x2db   : > { %2663 = vmatpush.msrb.mxu2 %v3972_v30  ;;  %2686 = vmatpush.msrb.mxu3 %v4050_v26  ;;  %v4070_v3 = vld [vmem:[%s8273_s9 + $0x11c0] sm:$0xff]  ;;  %v3895_v30 = vld [vmem:[%s8273_s9 + $0xc48] sm:$0xff]  ;;  %v4064_v26 = vld [vmem:[%s8273_s9 + $0x1190] sm:$0xff] }
 0x2dc   : > { %2703 = vmatpush.msra.mxu0 %v3973_v25  ;;  %2726 = vmatpush.msra.mxu1 %v4051_v29  ;;  %v3888_v25 = vld [vmem:[%s8273_s9 + $0xc10] sm:$0xff]  ;;  %v3889_v29 = vld [vmem:[%s8273_s9 + $0xc18] sm:$0xff] }
 0x2dd   : > { %2664 = vmatpush.msrb.mxu2 %v3966_v36  ;;  %2687 = vmatpush.msrb.mxu3 %v4044_v37  ;;  %v3980_v35 = vld [vmem:[%s8273_s9 + $0xef0] sm:$0xff]  ;;  %v4058_v36 = vld [vmem:[%s8273_s9 + $0x1160] sm:$0xff]  ;;  %v3981_v37 = vld [vmem:[%s8273_s9 + $0xef8] sm:$0xff] }
 0x2de   : > { %2704 = vmatpush.msra.mxu0 %v3967_v39  ;;  %2727 = vmatpush.msra.mxu1 %v4045_v40  ;;  %v4059_v39 = vld [vmem:[%s8273_s9 + $0x1168] sm:$0xff]  ;;  %v3974_v40 = vld [vmem:[%s8273_s9 + $0xec0] sm:$0xff] }
 0x2df   : > { %2665 = vmatpush.msrb.mxu2 %v3960_v41  ;;  %2688 = vmatpush.msrb.mxu3 %v4038_v32  ;;  %v4052_v41 = vld [vmem:[%s8273_s9 + $0x1130] sm:$0xff]  ;;  %v3975_v32 = vld [vmem:[%s8273_s9 + $0xec8] sm:$0xff] }
 0x2e0   : > { %2705 = vmatpush.msra.mxu0 %v3961_v43  ;;  %2728 = vmatpush.msra.mxu1 %v4039_v44  ;;  %v4053_v43 = vld [vmem:[%s8273_s9 + $0x1138] sm:$0xff]  ;;  %v3968_v44 = vld [vmem:[%s8273_s9 + $0xe90] sm:$0xff] }
 0x2e1   : > { %2666 = vmatpush.msrb.mxu2 %v3954_v45  ;;  %2689 = vmatpush.msrb.mxu3 %v4032_v46  ;;  %v4046_v45 = vld [vmem:[%s8273_s9 + $0x1100] sm:$0xff]  ;;  %v3969_v46 = vld [vmem:[%s8273_s9 + $0xe98] sm:$0xff] }
 0x2e2   : > { %2706 = vmatpush.msra.mxu0 %v3955_v47  ;;  %2729 = vmatpush.msra.mxu1 %v4033_v48  ;;  %v4047_v47 = vld [vmem:[%s8273_s9 + $0x1108] sm:$0xff]  ;;  %v3962_v48 = vld [vmem:[%s8273_s9 + $0xe60] sm:$0xff] }
 0x2e3   : > { %2667 = vmatpush.msrb.mxu2 %v3948_v49  ;;  %2690 = vmatpush.msrb.mxu3 %v4026_v50  ;;  %v4040_v49 = vld [vmem:[%s8273_s9 + $0x10d0] sm:$0xff]  ;;  %v3963_v50 = vld [vmem:[%s8273_s9 + $0xe68] sm:$0xff] }
 0x2e4   : > { %2707 = vmatpush.msra.mxu0 %v3949_v51  ;;  %2730 = vmatpush.msra.mxu1 %v4027_v52  ;;  %v4041_v51 = vld [vmem:[%s8273_s9 + $0x10d8] sm:$0xff]  ;;  %v3956_v52 = vld [vmem:[%s8273_s9 + $0xe30] sm:$0xff] }
 0x2e5   : > { %2668 = vmatpush.msrb.mxu2 %v3942_v53  ;;  %2691 = vmatpush.msrb.mxu3 %v4020_v54  ;;  %v4034_v53 = vld [vmem:[%s8273_s9 + $0x10a0] sm:$0xff]  ;;  %v3957_v54 = vld [vmem:[%s8273_s9 + $0xe38] sm:$0xff] }
 0x2e6   : > { %2708 = vmatpush.msra.mxu0 %v3943_v31  ;;  %2731 = vmatpush.msra.mxu1 %v4021_v55  ;;  %v4035_v31 = vld [vmem:[%s8273_s9 + $0x10a8] sm:$0xff]  ;;  %v3950_v55 = vld [vmem:[%s8273_s9 + $0xe00] sm:$0xff] }
 0x2e7   : > { %2669 = vmatpush.msrb.mxu2 %v3936_v56  ;;  %2692 = vmatpush.msrb.mxu3 %v4014_v57  ;;  %v4028_v56 = vld [vmem:[%s8273_s9 + $0x1070] sm:$0xff]  ;;  %v3951_v57 = vld [vmem:[%s8273_s9 + $0xe08] sm:$0xff] }
 0x2e8   : > { %2709 = vmatpush.msra.mxu0 %v3937_v58  ;;  %2732 = vmatpush.msra.mxu1 %v4015_v59  ;;  %v4029_v58 = vld [vmem:[%s8273_s9 + $0x1078] sm:$0xff]  ;;  %v3944_v59 = vld [vmem:[%s8273_s9 + $0xdd0] sm:$0xff] }
 0x2e9   : > { %2670 = vmatpush.msrb.mxu2 %v3930_v60  ;;  %2693 = vmatpush.msrb.mxu3 %v4008_v62  ;;  %v4022_v60 = vld [vmem:[%s8273_s9 + $0x1040] sm:$0xff]  ;;  %v3945_v62 = vld [vmem:[%s8273_s9 + $0xdd8] sm:$0xff] }
 0x2ea   : > { %2710 = vmatpush.msra.mxu0 %v3931_v63  ;;  %2733 = vmatpush.msra.mxu1 %v4009_v0  ;;  %v4023_v63 = vld [vmem:[%s8273_s9 + $0x1048] sm:$0xff]  ;;  %v3938_v0 = vld [vmem:[%s8273_s9 + $0xda0] sm:$0xff] }
 0x2eb   : > { %2671 = vmatpush.msrb.mxu2 %v3924_v1  ;;  %2694 = vmatpush.msrb.mxu3 %v4002_v5  ;;  %v4016_v1 = vld [vmem:[%s8273_s9 + $0x1010] sm:$0xff]  ;;  %v3939_v5 = vld [vmem:[%s8273_s9 + $0xda8] sm:$0xff] }
 0x2ec   : > { %2711 = vmatpush.msra.mxu0 %v3925_v6  ;;  %2734 = vmatpush.msra.mxu1 %v4003_v7  ;;  %v4017_v6 = vld [vmem:[%s8273_s9 + $0x1018] sm:$0xff]  ;;  %v3932_v7 = vld [vmem:[%s8273_s9 + $0xd70] sm:$0xff] }
 0x2ed   : > { %2672 = vmatpush.msrb.mxu2 %v3918_v8  ;;  %2695 = vmatpush.msrb.mxu3 %v3996_v9  ;;  %v4010_v8 = vld [vmem:[%s8273_s9 + $0xfe0] sm:$0xff]  ;;  %v3933_v9 = vld [vmem:[%s8273_s9 + $0xd78] sm:$0xff] }
 0x2ee   : > { %2712 = vmatpush.msra.mxu0 %v3919_v10  ;;  %2735 = vmatpush.msra.mxu1 %v3997_v42  ;;  %v4011_v10 = vld [vmem:[%s8273_s9 + $0xfe8] sm:$0xff]  ;;  %v3926_v42 = vld [vmem:[%s8273_s9 + $0xd40] sm:$0xff] }
 0x2ef   : > { %2673 = vmatpush.msrb.mxu2 %v3912_v11  ;;  %2696 = vmatpush.msrb.mxu3 %v3990_v12  ;;  %v4004_v11 = vld [vmem:[%s8273_s9 + $0xfb0] sm:$0xff]  ;;  %v3927_v12 = vld [vmem:[%s8273_s9 + $0xd48] sm:$0xff] }
 0x2f0   : > { %2713 = vmatpush.msra.mxu0 %v3913_v13  ;;  %2736 = vmatpush.msra.mxu1 %v3991_v14  ;;  %v4005_v13 = vld [vmem:[%s8273_s9 + $0xfb8] sm:$0xff]  ;;  %v3920_v14 = vld [vmem:[%s8273_s9 + $0xd10] sm:$0xff] }
 0x2f1   : > { %2674 = vmatpush.msrb.mxu2 %v3906_v15  ;;  %2697 = vmatpush.msrb.mxu3 %v3984_v16  ;;  %v3998_v15 = vld [vmem:[%s8273_s9 + $0xf80] sm:$0xff]  ;;  %v3921_v16 = vld [vmem:[%s8273_s9 + $0xd18] sm:$0xff] }
 0x2f2   : > { %2714 = vmatpush.msra.mxu0 %v3907_v17  ;;  %2737 = vmatpush.msra.mxu1 %v3985_v18  ;;  %v3999_v17 = vld [vmem:[%s8273_s9 + $0xf88] sm:$0xff]  ;;  %v3914_v18 = vld [vmem:[%s8273_s9 + $0xce0] sm:$0xff] }
 0x2f3   : > { %2698 = vmatmul.f32.vlgmr.msrb.gmra.mxu3 %v7157_v2  ;;  %2738 = vmatmul.f32.vlgmr.msra.gmra.mxu1 %v7157_v2 }
 0x2f4   : > { %2762 = vmatpush.msra.mxu3 %v4076_v19  ;;  %2802 = vmatpush.msrb.mxu1 %v4077_v21  ;;  %v3992_v19 = vld [vmem:[%s8273_s9 + $0xf50] sm:$0xff]  ;;  %v3915_v21 = vld [vmem:[%s8273_s9 + $0xce8] sm:$0xff] }
 0x2f5   : > { %2675 = vmatpush.msrb.mxu2 %v3900_v22  ;;  %2715 = vmatpush.msra.mxu0 %v3901_v24  ;;  %v3993_v22 = vld [vmem:[%s8273_s9 + $0xf58] sm:$0xff]  ;;  %v3908_v24 = vld [vmem:[%s8273_s9 + $0xcb0] sm:$0xff] }
 0x2f6   : > { %2763 = vmatpush.msra.mxu3 %v4070_v3  ;;  %2803 = vmatpush.msrb.mxu1 %v4071_v28  ;;  %v3986_v3 = vld [vmem:[%s8273_s9 + $0xf20] sm:$0xff]  ;;  %v3909_v28 = vld [vmem:[%s8273_s9 + $0xcb8] sm:$0xff] }
 0x2f7   : > { %2676 = vmatpush.msrb.mxu2 %v3894_v23  ;;  %2716 = vmatpush.msra.mxu0 %v3895_v30  ;;  %v3987_v23 = vld [vmem:[%s8273_s9 + $0xf28] sm:$0xff]  ;;  %v4264_v30 = vld [vmem:[%s8273_s9 + $0x17d0] sm:$0xff] }
 0x2f8   : > { %2764 = vmatpush.msra.mxu3 %v4064_v26  ;;  %2804 = vmatpush.msrb.mxu1 %v4065_v33  ;;  %v4265_v26 = vld [vmem:[%s8273_s9 + $0x17d8] sm:$0xff]  ;;  %v3902_v33 = vld [vmem:[%s8273_s9 + $0xc80] sm:$0xff] }
 0x2f9   : > { %2677 = vmatpush.msrb.mxu2 %v3888_v25  ;;  %2717 = vmatpush.msra.mxu0 %v3889_v29  ;;  %v3903_v25 = vld [vmem:[%s8273_s9 + $0xc88] sm:$0xff]  ;;  %v4258_v29 = vld [vmem:[%s8273_s9 + $0x17a0] sm:$0xff] }
 0x2fa   : > { %2678 = vmatmul.f32.vlgmr.msrb.gmra.mxu2 %v7199_v20  ;;  %2718 = vmatmul.f32.vlgmr.msra.gmra.mxu0 %v7199_v20 }
 0x2fb   : > { %2742 = vmatpush.msra.mxu2 %v3980_v35  ;;  %2765 = vmatpush.msra.mxu3 %v4058_v36  ;;  %v4259_v35 = vld [vmem:[%s8273_s9 + $0x17a8] sm:$0xff]  ;;  %v3896_v36 = vld [vmem:[%s8273_s9 + $0xc50] sm:$0xff] }
 0x2fc   : > { %2782 = vmatpush.msrb.mxu0 %v3981_v37  ;;  %2805 = vmatpush.msrb.mxu1 %v4059_v39  ;;  %v3897_v37 = vld [vmem:[%s8273_s9 + $0xc58] sm:$0xff] }
 0x2fd   : > { %2743 = vmatpush.msra.mxu2 %v3974_v40  ;;  %2766 = vmatpush.msra.mxu3 %v4052_v41  ;;  %v4253_v39 = vld [vmem:[%s8273_s9 + $0x1778] sm:$0xff]  ;;  %v3890_v40 = vld [vmem:[%s8273_s9 + $0xc20] sm:$0xff]  ;;  %v3891_v41 = vld [vmem:[%s8273_s9 + $0xc28] sm:$0xff] }
 0x2fe   : > { %2783 = vmatpush.msrb.mxu0 %v3975_v32  ;;  %2806 = vmatpush.msrb.mxu1 %v4053_v43  ;;  %v4168_v32 = vld [vmem:[%s8273_s9 + $0x14d0] sm:$0xff]  ;;  %v4246_v43 = vld [vmem:[%s8273_s9 + $0x1740] sm:$0xff] }
 0x2ff   : > { %2744 = vmatpush.msra.mxu2 %v3968_v44  ;;  %2767 = vmatpush.msra.mxu3 %v4046_v45  ;;  %v4169_v44 = vld [vmem:[%s8273_s9 + $0x14d8] sm:$0xff]  ;;  %v4247_v45 = vld [vmem:[%s8273_s9 + $0x1748] sm:$0xff] }
 0x300   : > { %2784 = vmatpush.msrb.mxu0 %v3969_v46  ;;  %2807 = vmatpush.msrb.mxu1 %v4047_v47  ;;  %v4162_v46 = vld [vmem:[%s8273_s9 + $0x14a0] sm:$0xff]  ;;  %v4240_v47 = vld [vmem:[%s8273_s9 + $0x1710] sm:$0xff] }
 0x301   : > { %2745 = vmatpush.msra.mxu2 %v3962_v48  ;;  %2768 = vmatpush.msra.mxu3 %v4040_v49  ;;  %v4163_v48 = vld [vmem:[%s8273_s9 + $0x14a8] sm:$0xff]  ;;  %v4241_v49 = vld [vmem:[%s8273_s9 + $0x1718] sm:$0xff] }
 0x302   : > { %2785 = vmatpush.msrb.mxu0 %v3963_v50  ;;  %2808 = vmatpush.msrb.mxu1 %v4041_v51  ;;  %v4234_v50 = vld [vmem:[%s8273_s9 + $0x16e0] sm:$0xff]  ;;  %v4157_v51 = vld [vmem:[%s8273_s9 + $0x1478] sm:$0xff] }
 0x303   : > { %2746 = vmatpush.msra.mxu2 %v3956_v52  ;;  %2769 = vmatpush.msra.mxu3 %v4034_v53  ;;  %v4235_v52 = vld [vmem:[%s8273_s9 + $0x16e8] sm:$0xff]  ;;  %v4150_v53 = vld [vmem:[%s8273_s9 + $0x1440] sm:$0xff] }
 0x304   : > { %2786 = vmatpush.msrb.mxu0 %v3957_v54  ;;  %2809 = vmatpush.msrb.mxu1 %v4035_v31  ;;  %v4228_v54 = vld [vmem:[%s8273_s9 + $0x16b0] sm:$0xff]  ;;  %v4151_v31 = vld [vmem:[%s8273_s9 + $0x1448] sm:$0xff] }
 0x305   : > { %2747 = vmatpush.msra.mxu2 %v3950_v55  ;;  %2770 = vmatpush.msra.mxu3 %v4028_v56  ;;  %v4229_v55 = vld [vmem:[%s8273_s9 + $0x16b8] sm:$0xff]  ;;  %v4144_v56 = vld [vmem:[%s8273_s9 + $0x1410] sm:$0xff] }
 0x306   : > { %2787 = vmatpush.msrb.mxu0 %v3951_v57  ;;  %2810 = vmatpush.msrb.mxu1 %v4029_v58  ;;  %v4222_v57 = vld [vmem:[%s8273_s9 + $0x1680] sm:$0xff]  ;;  %v4145_v58 = vld [vmem:[%s8273_s9 + $0x1418] sm:$0xff] }
 0x307   : > { %2748 = vmatpush.msra.mxu2 %v3944_v59  ;;  %2771 = vmatpush.msra.mxu3 %v4022_v60  ;;  %v4223_v59 = vld [vmem:[%s8273_s9 + $0x1688] sm:$0xff]  ;;  %v4138_v60 = vld [vmem:[%s8273_s9 + $0x13e0] sm:$0xff] }
 0x308   : > { %2788 = vmatpush.msrb.mxu0 %v3945_v62  ;;  %2811 = vmatpush.msrb.mxu1 %v4023_v63  ;;  %v4216_v62 = vld [vmem:[%s8273_s9 + $0x1650] sm:$0xff]  ;;  %v4139_v63 = vld [vmem:[%s8273_s9 + $0x13e8] sm:$0xff] }
 0x309   : > { %2749 = vmatpush.msra.mxu2 %v3938_v0  ;;  %2772 = vmatpush.msra.mxu3 %v4016_v1  ;;  %v4217_v0 = vld [vmem:[%s8273_s9 + $0x1658] sm:$0xff]  ;;  %v4132_v1 = vld [vmem:[%s8273_s9 + $0x13b0] sm:$0xff] }
 0x30a   : > { %2789 = vmatpush.msrb.mxu0 %v3939_v5  ;;  %2812 = vmatpush.msrb.mxu1 %v4017_v6  ;;  %v4210_v5 = vld [vmem:[%s8273_s9 + $0x1620] sm:$0xff]  ;;  %v4133_v6 = vld [vmem:[%s8273_s9 + $0x13b8] sm:$0xff] }
 0x30b   : > { %2750 = vmatpush.msra.mxu2 %v3932_v7  ;;  %2773 = vmatpush.msra.mxu3 %v4010_v8  ;;  %v4211_v7 = vld [vmem:[%s8273_s9 + $0x1628] sm:$0xff]  ;;  %v4126_v8 = vld [vmem:[%s8273_s9 + $0x1380] sm:$0xff] }
 0x30c   : > { %2790 = vmatpush.msrb.mxu0 %v3933_v9  ;;  %2813 = vmatpush.msrb.mxu1 %v4011_v10  ;;  %v4204_v9 = vld [vmem:[%s8273_s9 + $0x15f0] sm:$0xff]  ;;  %v4127_v10 = vld [vmem:[%s8273_s9 + $0x1388] sm:$0xff] }
 0x30d   : > { %2751 = vmatpush.msra.mxu2 %v3926_v42  ;;  %2774 = vmatpush.msra.mxu3 %v4004_v11  ;;  %v4205_v42 = vld [vmem:[%s8273_s9 + $0x15f8] sm:$0xff]  ;;  %v4120_v11 = vld [vmem:[%s8273_s9 + $0x1350] sm:$0xff] }
 0x30e   : > { %2791 = vmatpush.msrb.mxu0 %v3927_v12  ;;  %2814 = vmatpush.msrb.mxu1 %v4005_v13  ;;  %v4198_v12 = vld [vmem:[%s8273_s9 + $0x15c0] sm:$0xff]  ;;  %v4121_v13 = vld [vmem:[%s8273_s9 + $0x1358] sm:$0xff] }
 0x30f   : > { %2752 = vmatpush.msra.mxu2 %v3920_v14  ;;  %2775 = vmatpush.msra.mxu3 %v3998_v15  ;;  %v4199_v14 = vld [vmem:[%s8273_s9 + $0x15c8] sm:$0xff]  ;;  %v4114_v15 = vld [vmem:[%s8273_s9 + $0x1320] sm:$0xff] }
 0x310   : > { %2792 = vmatpush.msrb.mxu0 %v3921_v16  ;;  %2815 = vmatpush.msrb.mxu1 %v3999_v17  ;;  %v4192_v16 = vld [vmem:[%s8273_s9 + $0x1590] sm:$0xff]  ;;  %v4115_v17 = vld [vmem:[%s8273_s9 + $0x1328] sm:$0xff] }
 0x311   : > { %2753 = vmatpush.msra.mxu2 %v3914_v18  ;;  %2776 = vmatpush.msra.mxu3 %v3992_v19  ;;  %v4193_v18 = vld [vmem:[%s8273_s9 + $0x1598] sm:$0xff]  ;;  %v4108_v19 = vld [vmem:[%s8273_s9 + $0x12f0] sm:$0xff] }
 0x312   : > { %2793 = vmatpush.msrb.mxu0 %v3915_v21  ;;  %2816 = vmatpush.msrb.mxu1 %v3993_v22  ;;  %v4186_v21 = vld [vmem:[%s8273_s9 + $0x1560] sm:$0xff]  ;;  %v4109_v22 = vld [vmem:[%s8273_s9 + $0x12f8] sm:$0xff] }
 0x313   : > { %2754 = vmatpush.msra.mxu2 %v3908_v24  ;;  %2777 = vmatpush.msra.mxu3 %v3986_v3  ;;  %v4187_v24 = vld [vmem:[%s8273_s9 + $0x1568] sm:$0xff]  ;;  %v4102_v3 = vld [vmem:[%s8273_s9 + $0x12c0] sm:$0xff] }
 0x314   : > { %2794 = vmatpush.msrb.mxu0 %v3909_v28  ;;  %2817 = vmatpush.msrb.mxu1 %v3987_v23  ;;  %v4180_v28 = vld [vmem:[%s8273_s9 + $0x1530] sm:$0xff]  ;;  %v4103_v23 = vld [vmem:[%s8273_s9 + $0x12c8] sm:$0xff] }
 0x315   : > { %2778 = vmatmul.f32.vlgmr.msra.gmra.mxu3 %v7157_v2  ;;  %2818 = vmatmul.f32.vlgmr.msrb.gmra.mxu1 %v7157_v2  ;;  %v4252_v2 = vld [vmem:[%s8273_s9 + $0x1770] sm:$0xff] }
 0x316   : > { %3057 = vmatpush.msrb.mxu3 %v4264_v30  ;;  %3097 = vmatpush.msra.mxu1 %v4265_v26  ;;  %v4181_v30 = vld [vmem:[%s8273_s9 + $0x1538] sm:$0xff]  ;;  %v4096_v26 = vld [vmem:[%s8273_s9 + $0x1290] sm:$0xff] }
 0x317   : > { %2755 = vmatpush.msra.mxu2 %v3902_v33  ;;  %2795 = vmatpush.msrb.mxu0 %v3903_v25  ;;  %v4174_v33 = vld [vmem:[%s8273_s9 + $0x1500] sm:$0xff]  ;;  %v4097_v25 = vld [vmem:[%s8273_s9 + $0x1298] sm:$0xff] }
 0x318   : > { %3058 = vmatpush.msrb.mxu3 %v4258_v29  ;;  %3098 = vmatpush.msra.mxu1 %v4259_v35  ;;  %v4175_v29 = vld [vmem:[%s8273_s9 + $0x1508] sm:$0xff]  ;;  %v7758_v35 = vrot.slane %v6179_v27, 3  ;;  %v4260_v27 = vld [vmem:[%s8273_s9 + $0x17b0] sm:$0xff] }
 0x319   : > { %2756 = vmatpush.msra.mxu2 %v3896_v36  ;;  %2796 = vmatpush.msrb.mxu0 %v3897_v37  ;;  %v4266_v36 = vld [vmem:[%s8273_s9 + $0x17e0] sm:$0xff]  ;;  %v4267_v37 = vld [vmem:[%s8273_s9 + $0x17e8] sm:$0xff] }
 0x31a   : > { %3059 = vmatpush.msrb.mxu3 %v4252_v2  ;;  %3099 = vmatpush.msra.mxu1 %v4253_v39  ;;  %v4090_v2 = vld [vmem:[%s8273_s9 + $0x1260] sm:$0xff]  ;;  %v4091_v39 = vld [vmem:[%s8273_s9 + $0x1268] sm:$0xff] }
 0x31b   : > { %2757 = vmatpush.msra.mxu2 %v3890_v40  ;;  %2797 = vmatpush.msrb.mxu0 %v3891_v41  ;;  %v4261_v40 = vld [vmem:[%s8273_s9 + $0x17b8] sm:$0xff]  ;;  %v4084_v41 = vld [vmem:[%s8273_s9 + $0x1230] sm:$0xff] }
 0x31c   : > { %2758 = vmatmul.f32.vlgmr.msra.gmra.mxu2 %v7199_v20  ;;  %2798 = vmatmul.f32.vlgmr.msrb.gmra.mxu0 %v7199_v20  ;;  %v4156_v20 = vld [vmem:[%s8273_s9 + $0x1470] sm:$0xff] }
 0x31d   : > { %3037 = vmatpush.msrb.mxu2 %v4168_v32  ;;  %3060 = vmatpush.msrb.mxu3 %v4246_v43  ;;  %v4085_v32 = vld [vmem:[%s8273_s9 + $0x1238] sm:$0xff]  ;;  %v4254_v43 = vld [vmem:[%s8273_s9 + $0x1780] sm:$0xff] }
 0x31e   : > { %3077 = vmatpush.msra.mxu0 %v4169_v44  ;;  %3100 = vmatpush.msra.mxu1 %v4247_v45  ;;  %v4255_v44 = vld [vmem:[%s8273_s9 + $0x1788] sm:$0xff]  ;;  %v4078_v45 = vld [vmem:[%s8273_s9 + $0x1200] sm:$0xff] }
 0x31f   : > { %3038 = vmatpush.msrb.mxu2 %v4162_v46  ;;  %3061 = vmatpush.msrb.mxu3 %v4240_v47  ;;  %v4079_v46 = vld [vmem:[%s8273_s9 + $0x1208] sm:$0xff]  ;;  %v7799_v47 = vrot.slane %v6202_v34, 3  ;;  %v4164_v34 = vld [vmem:[%s8273_s9 + $0x14b0] sm:$0xff] }
 0x320   : > { %3078 = vmatpush.msra.mxu0 %v4163_v48  ;;  %3101 = vmatpush.msra.mxu1 %v4241_v49  ;;  %v4170_v48 = vld [vmem:[%s8273_s9 + $0x14e0] sm:$0xff]  ;;  %v4248_v49 = vld [vmem:[%s8273_s9 + $0x1750] sm:$0xff] }
 0x321   : > { %3039 = vmatpush.msrb.mxu2 %v4156_v20  ;;  %3062 = vmatpush.msrb.mxu3 %v4234_v50  ;;  %v4171_v20 = vld [vmem:[%s8273_s9 + $0x14e8] sm:$0xff]  ;;  %v4249_v50 = vld [vmem:[%s8273_s9 + $0x1758] sm:$0xff] }
 0x322   : > { %3079 = vmatpush.msra.mxu0 %v4157_v51  ;;  %3102 = vmatpush.msra.mxu1 %v4235_v52  ;;  %v4242_v51 = vld [vmem:[%s8273_s9 + $0x1720] sm:$0xff]  ;;  %v4165_v52 = vld [vmem:[%s8273_s9 + $0x14b8] sm:$0xff] }
 0x323   : > { %3040 = vmatpush.msrb.mxu2 %v4150_v53  ;;  %3063 = vmatpush.msrb.mxu3 %v4228_v54  ;;  %v4243_v53 = vld [vmem:[%s8273_s9 + $0x1728] sm:$0xff]  ;;  %v4158_v54 = vld [vmem:[%s8273_s9 + $0x1480] sm:$0xff] }
 0x324   : > { %3080 = vmatpush.msra.mxu0 %v4151_v31  ;;  %3103 = vmatpush.msra.mxu1 %v4229_v55  ;;  %v4236_v31 = vld [vmem:[%s8273_s9 + $0x16f0] sm:$0xff]  ;;  %v4159_v55 = vld [vmem:[%s8273_s9 + $0x1488] sm:$0xff] }
 0x325   : > { %3041 = vmatpush.msrb.mxu2 %v4144_v56  ;;  %3064 = vmatpush.msrb.mxu3 %v4222_v57  ;;  %v4237_v56 = vld [vmem:[%s8273_s9 + $0x16f8] sm:$0xff]  ;;  %v4152_v57 = vld [vmem:[%s8273_s9 + $0x1450] sm:$0xff] }
 0x326   : > { %3081 = vmatpush.msra.mxu0 %v4145_v58  ;;  %3104 = vmatpush.msra.mxu1 %v4223_v59  ;;  %v4230_v58 = vld [vmem:[%s8273_s9 + $0x16c0] sm:$0xff]  ;;  %v4153_v59 = vld [vmem:[%s8273_s9 + $0x1458] sm:$0xff] }
 0x327   : > { %3042 = vmatpush.msrb.mxu2 %v4138_v60  ;;  %3065 = vmatpush.msrb.mxu3 %v4216_v62  ;;  %v4231_v60 = vld [vmem:[%s8273_s9 + $0x16c8] sm:$0xff]  ;;  %v4146_v62 = vld [vmem:[%s8273_s9 + $0x1420] sm:$0xff] }
 0x328   : > { %3082 = vmatpush.msra.mxu0 %v4139_v63  ;;  %3105 = vmatpush.msra.mxu1 %v4217_v0  ;;  %v4224_v63 = vld [vmem:[%s8273_s9 + $0x1690] sm:$0xff]  ;;  %v4147_v0 = vld [vmem:[%s8273_s9 + $0x1428] sm:$0xff] }
 0x329   : > { %3043 = vmatpush.msrb.mxu2 %v4132_v1  ;;  %3066 = vmatpush.msrb.mxu3 %v4210_v5  ;;  %v4225_v1 = vld [vmem:[%s8273_s9 + $0x1698] sm:$0xff]  ;;  %v4140_v5 = vld [vmem:[%s8273_s9 + $0x13f0] sm:$0xff] }
 0x32a   : > { %3083 = vmatpush.msra.mxu0 %v4133_v6  ;;  %3106 = vmatpush.msra.mxu1 %v4211_v7  ;;  %v4218_v6 = vld [vmem:[%s8273_s9 + $0x1660] sm:$0xff]  ;;  %v4141_v7 = vld [vmem:[%s8273_s9 + $0x13f8] sm:$0xff] }
 0x32b   : > { %3044 = vmatpush.msrb.mxu2 %v4126_v8  ;;  %3067 = vmatpush.msrb.mxu3 %v4204_v9  ;;  %v4219_v8 = vld [vmem:[%s8273_s9 + $0x1668] sm:$0xff]  ;;  %v4134_v9 = vld [vmem:[%s8273_s9 + $0x13c0] sm:$0xff] }
 0x32c   : > { %3084 = vmatpush.msra.mxu0 %v4127_v10  ;;  %3107 = vmatpush.msra.mxu1 %v4205_v42  ;;  %v4212_v10 = vld [vmem:[%s8273_s9 + $0x1630] sm:$0xff]  ;;  %v4135_v42 = vld [vmem:[%s8273_s9 + $0x13c8] sm:$0xff] }
 0x32d   : > { %3045 = vmatpush.msrb.mxu2 %v4120_v11  ;;  %3068 = vmatpush.msrb.mxu3 %v4198_v12  ;;  %v4213_v11 = vld [vmem:[%s8273_s9 + $0x1638] sm:$0xff]  ;;  %v4128_v12 = vld [vmem:[%s8273_s9 + $0x1390] sm:$0xff] }
 0x32e   : > { %3085 = vmatpush.msra.mxu0 %v4121_v13  ;;  %3108 = vmatpush.msra.mxu1 %v4199_v14  ;;  %v4206_v13 = vld [vmem:[%s8273_s9 + $0x1600] sm:$0xff]  ;;  %v4129_v14 = vld [vmem:[%s8273_s9 + $0x1398] sm:$0xff] }
 0x32f   : > { %3046 = vmatpush.msrb.mxu2 %v4114_v15  ;;  %3069 = vmatpush.msrb.mxu3 %v4192_v16  ;;  %v4207_v15 = vld [vmem:[%s8273_s9 + $0x1608] sm:$0xff]  ;;  %v4122_v16 = vld [vmem:[%s8273_s9 + $0x1360] sm:$0xff] }
 0x330   : > { %3086 = vmatpush.msra.mxu0 %v4115_v17  ;;  %3109 = vmatpush.msra.mxu1 %v4193_v18  ;;  %v4200_v17 = vld [vmem:[%s8273_s9 + $0x15d0] sm:$0xff]  ;;  %v4123_v18 = vld [vmem:[%s8273_s9 + $0x1368] sm:$0xff] }
 0x331   : > { %3047 = vmatpush.msrb.mxu2 %v4108_v19  ;;  %3070 = vmatpush.msrb.mxu3 %v4186_v21  ;;  %v4201_v19 = vld [vmem:[%s8273_s9 + $0x15d8] sm:$0xff]  ;;  %v4116_v21 = vld [vmem:[%s8273_s9 + $0x1330] sm:$0xff] }
 0x332   : > { %3087 = vmatpush.msra.mxu0 %v4109_v22  ;;  %3110 = vmatpush.msra.mxu1 %v4187_v24  ;;  %v4194_v22 = vld [vmem:[%s8273_s9 + $0x15a0] sm:$0xff]  ;;  %v4117_v24 = vld [vmem:[%s8273_s9 + $0x1338] sm:$0xff] }
 0x333   : > { %3048 = vmatpush.msrb.mxu2 %v4102_v3  ;;  %3071 = vmatpush.msrb.mxu3 %v4180_v28  ;;  %v4195_v3 = vld [vmem:[%s8273_s9 + $0x15a8] sm:$0xff]  ;;  %v4110_v28 = vld [vmem:[%s8273_s9 + $0x1300] sm:$0xff] }
 0x334   : > { %3088 = vmatpush.msra.mxu0 %v4103_v23  ;;  %3111 = vmatpush.msra.mxu1 %v4181_v30  ;;  %v4188_v23 = vld [vmem:[%s8273_s9 + $0x1570] sm:$0xff]  ;;  %v4111_v30 = vld [vmem:[%s8273_s9 + $0x1308] sm:$0xff] }
 0x335   : > { %3049 = vmatpush.msrb.mxu2 %v4096_v26  ;;  %3072 = vmatpush.msrb.mxu3 %v4174_v33  ;;  %v4189_v26 = vld [vmem:[%s8273_s9 + $0x1578] sm:$0xff]  ;;  %v4104_v33 = vld [vmem:[%s8273_s9 + $0x12d0] sm:$0xff] }
 0x336   : > { %3089 = vmatpush.msra.mxu0 %v4097_v25  ;;  %3112 = vmatpush.msra.mxu1 %v4175_v29  ;;  %v4182_v25 = vld [vmem:[%s8273_s9 + $0x1540] sm:$0xff]  ;;  %v4105_v29 = vld [vmem:[%s8273_s9 + $0x12d8] sm:$0xff] }
 0x337   : > { %3073 = vmatmul.f32.vlgmr.msrb.gmra.mxu3 %v7758_v35  ;;  %3113 = vmatmul.f32.vlgmr.msra.gmra.mxu1 %v7758_v35 }
 0x338   : > { %3137 = vmatpush.msra.mxu3 %v4266_v36  ;;  %3177 = vmatpush.msrb.mxu1 %v4267_v37  ;;  %v4183_v36 = vld [vmem:[%s8273_s9 + $0x1548] sm:$0xff]  ;;  %v4098_v37 = vld [vmem:[%s8273_s9 + $0x12a0] sm:$0xff] }
 0x339   : > { %3050 = vmatpush.msrb.mxu2 %v4090_v2  ;;  %3090 = vmatpush.msra.mxu0 %v4091_v39  ;;  %v4176_v2 = vld [vmem:[%s8273_s9 + $0x1510] sm:$0xff]  ;;  %v4099_v39 = vld [vmem:[%s8273_s9 + $0x12a8] sm:$0xff] }
 0x33a   : > { %3138 = vmatpush.msra.mxu3 %v4260_v27  ;;  %3178 = vmatpush.msrb.mxu1 %v4261_v40  ;;  %v4177_v27 = vld [vmem:[%s8273_s9 + $0x1518] sm:$0xff]  ;;  %v4268_v40 = vld [vmem:[%s8273_s9 + $0x17f0] sm:$0xff] }
 0x33b   : > { %3051 = vmatpush.msrb.mxu2 %v4084_v41  ;;  %3091 = vmatpush.msra.mxu0 %v4085_v32  ;;  %v4269_v41 = vld [vmem:[%s8273_s9 + $0x17f8] sm:$0xff]  ;;  %v4092_v32 = vld [vmem:[%s8273_s9 + $0x1270] sm:$0xff] }
 0x33c   : > { %3139 = vmatpush.msra.mxu3 %v4254_v43  ;;  %3179 = vmatpush.msrb.mxu1 %v4255_v44  ;;  %v4093_v43 = vld [vmem:[%s8273_s9 + $0x1278] sm:$0xff]  ;;  %v4262_v44 = vld [vmem:[%s8273_s9 + $0x17c0] sm:$0xff] }
 0x33d   : > { %3052 = vmatpush.msrb.mxu2 %v4078_v45  ;;  %3092 = vmatpush.msra.mxu0 %v4079_v46  ;;  %v4263_v45 = vld [vmem:[%s8273_s9 + $0x17c8] sm:$0xff]  ;;  %v4086_v46 = vld [vmem:[%s8273_s9 + $0x1240] sm:$0xff] }
 0x33e   : > { %3053 = vmatmul.f32.vlgmr.msrb.gmra.mxu2 %v7799_v47  ;;  %3093 = vmatmul.f32.vlgmr.msra.gmra.mxu0 %v7799_v47 }
 0x33f   : > { %3117 = vmatpush.msra.mxu2 %v4170_v48  ;;  %3140 = vmatpush.msra.mxu3 %v4248_v49  ;;  %v4087_v48 = vld [vmem:[%s8273_s9 + $0x1248] sm:$0xff]  ;;  %v4256_v49 = vld [vmem:[%s8273_s9 + $0x1790] sm:$0xff] }
 0x340   : > { %3157 = vmatpush.msrb.mxu0 %v4171_v20  ;;  %3180 = vmatpush.msrb.mxu1 %v4249_v50  ;;  %v4257_v20 = vld [vmem:[%s8273_s9 + $0x1798] sm:$0xff]  ;;  %v4080_v50 = vld [vmem:[%s8273_s9 + $0x1210] sm:$0xff] }
 0x341   : > { %3118 = vmatpush.msra.mxu2 %v4164_v34  ;;  %3141 = vmatpush.msra.mxu3 %v4242_v51  ;;  %v4081_v34 = vld [vmem:[%s8273_s9 + $0x1218] sm:$0xff]  ;;  %v4172_v51 = vld [vmem:[%s8273_s9 + $0x14f0] sm:$0xff] }
 0x342   : > { %3158 = vmatpush.msrb.mxu0 %v4165_v52  ;;  %3181 = vmatpush.msrb.mxu1 %v4243_v53  ;;  %v4250_v52 = vld [vmem:[%s8273_s9 + $0x1760] sm:$0xff]  ;;  %v4173_v53 = vld [vmem:[%s8273_s9 + $0x14f8] sm:$0xff] }
 0x343   : > { %3119 = vmatpush.msra.mxu2 %v4158_v54  ;;  %3142 = vmatpush.msra.mxu3 %v4236_v31  ;;  %v4251_v54 = vld [vmem:[%s8273_s9 + $0x1768] sm:$0xff]  ;;  %v4166_v31 = vld [vmem:[%s8273_s9 + $0x14c0] sm:$0xff] }
 0x344   : > { %3159 = vmatpush.msrb.mxu0 %v4159_v55  ;;  %3182 = vmatpush.msrb.mxu1 %v4237_v56  ;;  %v4244_v55 = vld [vmem:[%s8273_s9 + $0x1730] sm:$0xff]  ;;  %v4167_v56 = vld [vmem:[%s8273_s9 + $0x14c8] sm:$0xff] }
 0x345   : > { %3120 = vmatpush.msra.mxu2 %v4152_v57  ;;  %3143 = vmatpush.msra.mxu3 %v4230_v58  ;;  %v4245_v57 = vld [vmem:[%s8273_s9 + $0x1738] sm:$0xff]  ;;  %v4160_v58 = vld [vmem:[%s8273_s9 + $0x1490] sm:$0xff] }
 0x346   : > { %3160 = vmatpush.msrb.mxu0 %v4153_v59  ;;  %3183 = vmatpush.msrb.mxu1 %v4231_v60  ;;  %v4238_v59 = vld [vmem:[%s8273_s9 + $0x1700] sm:$0xff]  ;;  %v4161_v60 = vld [vmem:[%s8273_s9 + $0x1498] sm:$0xff] }
 0x347   : > { %3121 = vmatpush.msra.mxu2 %v4146_v62  ;;  %3144 = vmatpush.msra.mxu3 %v4224_v63  ;;  %v4239_v62 = vld [vmem:[%s8273_s9 + $0x1708] sm:$0xff]  ;;  %v4154_v63 = vld [vmem:[%s8273_s9 + $0x1460] sm:$0xff] }
 0x348   : > { %3161 = vmatpush.msrb.mxu0 %v4147_v0  ;;  %3184 = vmatpush.msrb.mxu1 %v4225_v1  ;;  %v4232_v0 = vld [vmem:[%s8273_s9 + $0x16d0] sm:$0xff]  ;;  %v4155_v1 = vld [vmem:[%s8273_s9 + $0x1468] sm:$0xff] }
 0x349   : > { %3122 = vmatpush.msra.mxu2 %v4140_v5  ;;  %3145 = vmatpush.msra.mxu3 %v4218_v6  ;;  %v4233_v5 = vld [vmem:[%s8273_s9 + $0x16d8] sm:$0xff]  ;;  %v4148_v6 = vld [vmem:[%s8273_s9 + $0x1430] sm:$0xff] }
 0x34a   : > { %3162 = vmatpush.msrb.mxu0 %v4141_v7  ;;  %3185 = vmatpush.msrb.mxu1 %v4219_v8  ;;  %v4226_v7 = vld [vmem:[%s8273_s9 + $0x16a0] sm:$0xff]  ;;  %v4149_v8 = vld [vmem:[%s8273_s9 + $0x1438] sm:$0xff] }
 0x34b   : > { %3123 = vmatpush.msra.mxu2 %v4134_v9  ;;  %3146 = vmatpush.msra.mxu3 %v4212_v10  ;;  %v4227_v9 = vld [vmem:[%s8273_s9 + $0x16a8] sm:$0xff]  ;;  %v4142_v10 = vld [vmem:[%s8273_s9 + $0x1400] sm:$0xff] }
 0x34c   : > { %3163 = vmatpush.msrb.mxu0 %v4135_v42  ;;  %3186 = vmatpush.msrb.mxu1 %v4213_v11  ;;  %v4220_v42 = vld [vmem:[%s8273_s9 + $0x1670] sm:$0xff]  ;;  %v4143_v11 = vld [vmem:[%s8273_s9 + $0x1408] sm:$0xff] }
 0x34d   : > { %3124 = vmatpush.msra.mxu2 %v4128_v12  ;;  %3147 = vmatpush.msra.mxu3 %v4206_v13  ;;  %v4221_v12 = vld [vmem:[%s8273_s9 + $0x1678] sm:$0xff]  ;;  %v4136_v13 = vld [vmem:[%s8273_s9 + $0x13d0] sm:$0xff] }
 0x34e   : > { %3164 = vmatpush.msrb.mxu0 %v4129_v14  ;;  %3187 = vmatpush.msrb.mxu1 %v4207_v15  ;;  %v4214_v14 = vld [vmem:[%s8273_s9 + $0x1640] sm:$0xff]  ;;  %v4137_v15 = vld [vmem:[%s8273_s9 + $0x13d8] sm:$0xff] }
 0x34f   : > { %3125 = vmatpush.msra.mxu2 %v4122_v16  ;;  %3148 = vmatpush.msra.mxu3 %v4200_v17  ;;  %v4215_v16 = vld [vmem:[%s8273_s9 + $0x1648] sm:$0xff]  ;;  %v4130_v17 = vld [vmem:[%s8273_s9 + $0x13a0] sm:$0xff] }
 0x350   : > { %3165 = vmatpush.msrb.mxu0 %v4123_v18  ;;  %3188 = vmatpush.msrb.mxu1 %v4201_v19  ;;  %v4208_v18 = vld [vmem:[%s8273_s9 + $0x1610] sm:$0xff]  ;;  %v4131_v19 = vld [vmem:[%s8273_s9 + $0x13a8] sm:$0xff] }
 0x351   : > { %3126 = vmatpush.msra.mxu2 %v4116_v21  ;;  %3149 = vmatpush.msra.mxu3 %v4194_v22  ;;  %v4209_v21 = vld [vmem:[%s8273_s9 + $0x1618] sm:$0xff]  ;;  %v4124_v22 = vld [vmem:[%s8273_s9 + $0x1370] sm:$0xff] }
 0x352   : > { %3166 = vmatpush.msrb.mxu0 %v4117_v24  ;;  %3189 = vmatpush.msrb.mxu1 %v4195_v3  ;;  %v4202_v24 = vld [vmem:[%s8273_s9 + $0x15e0] sm:$0xff]  ;;  %v4125_v3 = vld [vmem:[%s8273_s9 + $0x1378] sm:$0xff] }
 0x353   : > { %3127 = vmatpush.msra.mxu2 %v4110_v28  ;;  %3150 = vmatpush.msra.mxu3 %v4188_v23  ;;  %v4203_v28 = vld [vmem:[%s8273_s9 + $0x15e8] sm:$0xff]  ;;  %v4118_v23 = vld [vmem:[%s8273_s9 + $0x1340] sm:$0xff] }
 0x354   : > { %3167 = vmatpush.msrb.mxu0 %v4111_v30  ;;  %3190 = vmatpush.msrb.mxu1 %v4189_v26  ;;  %v4196_v30 = vld [vmem:[%s8273_s9 + $0x15b0] sm:$0xff]  ;;  %v4119_v26 = vld [vmem:[%s8273_s9 + $0x1348] sm:$0xff] }
 0x355   : > { %3128 = vmatpush.msra.mxu2 %v4104_v33  ;;  %3151 = vmatpush.msra.mxu3 %v4182_v25  ;;  %v4197_v33 = vld [vmem:[%s8273_s9 + $0x15b8] sm:$0xff]  ;;  %v4112_v25 = vld [vmem:[%s8273_s9 + $0x1310] sm:$0xff] }
 0x356   : > { %3168 = vmatpush.msrb.mxu0 %v4105_v29  ;;  %3191 = vmatpush.msrb.mxu1 %v4183_v36  ;;  %v4190_v29 = vld [vmem:[%s8273_s9 + $0x1580] sm:$0xff]  ;;  %v4113_v36 = vld [vmem:[%s8273_s9 + $0x1318] sm:$0xff] }
 0x357   : > { %3129 = vmatpush.msra.mxu2 %v4098_v37  ;;  %3152 = vmatpush.msra.mxu3 %v4176_v2  ;;  %v4191_v37 = vld [vmem:[%s8273_s9 + $0x1588] sm:$0xff]  ;;  %v4106_v2 = vld [vmem:[%s8273_s9 + $0x12e0] sm:$0xff] }
 0x358   : > { %3169 = vmatpush.msrb.mxu0 %v4099_v39  ;;  %3192 = vmatpush.msrb.mxu1 %v4177_v27  ;;  %v4184_v39 = vld [vmem:[%s8273_s9 + $0x1550] sm:$0xff]  ;;  %v4107_v27 = vld [vmem:[%s8273_s9 + $0x12e8] sm:$0xff] }
 0x359   : > { %3153 = vmatmul.f32.vlgmr.msra.gmra.mxu3 %v7758_v35  ;;  %3193 = vmatmul.f32.vlgmr.msrb.gmra.mxu1 %v7758_v35 }
 0x35a   : > { %3217 = vmatpush.msrb.mxu3 %v4268_v40  ;;  %3257 = vmatpush.msra.mxu1 %v4269_v41  ;;  %v4185_v40 = vld [vmem:[%s8273_s9 + $0x1558] sm:$0xff]  ;;  %v4100_v41 = vld [vmem:[%s8273_s9 + $0x12b0] sm:$0xff] }
 0x35b   : > { %3130 = vmatpush.msra.mxu2 %v4092_v32  ;;  %3170 = vmatpush.msrb.mxu0 %v4093_v43  ;;  %v4178_v32 = vld [vmem:[%s8273_s9 + $0x1520] sm:$0xff]  ;;  %v4101_v43 = vld [vmem:[%s8273_s9 + $0x12b8] sm:$0xff] }
 0x35c   : > { %3218 = vmatpush.msrb.mxu3 %v4262_v44  ;;  %3258 = vmatpush.msra.mxu1 %v4263_v45  ;;  %v4179_v44 = vld [vmem:[%s8273_s9 + $0x1528] sm:$0xff]  ;;  %v4094_v45 = vld [vmem:[%s8273_s9 + $0x1280] sm:$0xff] }
 0x35d   : > { %3131 = vmatpush.msra.mxu2 %v4086_v46  ;;  %3171 = vmatpush.msrb.mxu0 %v4087_v48  ;;  %v4095_v46 = vld [vmem:[%s8273_s9 + $0x1288] sm:$0xff]  ;;  %v4088_v48 = vld [vmem:[%s8273_s9 + $0x1250] sm:$0xff] }
 0x35e   : > { %3219 = vmatpush.msrb.mxu3 %v4256_v49  ;;  %3259 = vmatpush.msra.mxu1 %v4257_v20  ;;  %v4089_v49 = vld [vmem:[%s8273_s9 + $0x1258] sm:$0xff]  ;;  %v4082_v20 = vld [vmem:[%s8273_s9 + $0x1220] sm:$0xff] }
 0x35f   : > { %3132 = vmatpush.msra.mxu2 %v4080_v50  ;;  %3172 = vmatpush.msrb.mxu0 %v4081_v34  ;;  %v4083_v50 = vld [vmem:[%s8273_s9 + $0x1228] sm:$0xff]  ;;  %v2204_v34 = vpop.f32.mrf.mxu1 }
 0x360   : > { %3133 = vmatmul.f32.vlgmr.msra.gmra.mxu2 %v7799_v47  ;;  %3173 = vmatmul.f32.vlgmr.msrb.gmra.mxu0 %v7799_v47 }
 0x361   : > { %3197 = vmatpush.msrb.mxu2 %v4172_v51  ;;  %3220 = vmatpush.msrb.mxu3 %v4250_v52  ;;  %v2164_v51 = vpop.f32.mrf.mxu3  ;;  %v2144_v52 = vpop.f32.mrf.mxu2 }
 0x362   : > { %3237 = vmatpush.msra.mxu0 %v4173_v53  ;;  %3260 = vmatpush.msra.mxu1 %v4251_v54 }
 0x363   : > { %3198 = vmatpush.msrb.mxu2 %v4166_v31  ;;  %3221 = vmatpush.msrb.mxu3 %v4244_v55 }
 0x364   : > { %3238 = vmatpush.msra.mxu0 %v4167_v56  ;;  %3261 = vmatpush.msra.mxu1 %v4245_v57 }
 0x365   : > { %3199 = vmatpush.msrb.mxu2 %v4160_v58  ;;  %3222 = vmatpush.msrb.mxu3 %v4238_v59 }
 0x366   : > { %3239 = vmatpush.msra.mxu0 %v4161_v60  ;;  %3262 = vmatpush.msra.mxu1 %v4239_v62 }
 0x367   : > { %3200 = vmatpush.msrb.mxu2 %v4154_v63  ;;  %3223 = vmatpush.msrb.mxu3 %v4232_v0  ;;  %v2284_v54 = vpop.f32.mrf.mxu1 }
 0x368   : > { %3240 = vmatpush.msra.mxu0 %v4155_v1  ;;  %3263 = vmatpush.msra.mxu1 %v4233_v5 }
 0x369   : > { %3201 = vmatpush.msrb.mxu2 %v4148_v6  ;;  %3224 = vmatpush.msrb.mxu3 %v4226_v7  ;;  %v2244_v31 = vpop.f32.mrf.mxu3  ;;  %v2224_v55 = vpop.f32.mrf.mxu2 }
 0x36a   : > { %3241 = vmatpush.msra.mxu0 %v4149_v8  ;;  %3264 = vmatpush.msra.mxu1 %v4227_v9 }
 0x36b   : > { %3202 = vmatpush.msrb.mxu2 %v4142_v10  ;;  %3225 = vmatpush.msrb.mxu3 %v4220_v42 }
 0x36c   : > { %3242 = vmatpush.msra.mxu0 %v4143_v11  ;;  %3265 = vmatpush.msra.mxu1 %v4221_v12 }
 0x36d   : > { %3203 = vmatpush.msrb.mxu2 %v4136_v13  ;;  %3226 = vmatpush.msrb.mxu3 %v4214_v14 }
 0x36e   : > { %3243 = vmatpush.msra.mxu0 %v4137_v15  ;;  %3266 = vmatpush.msra.mxu1 %v4215_v16 }
 0x36f   : > { %3204 = vmatpush.msrb.mxu2 %v4130_v17  ;;  %3227 = vmatpush.msrb.mxu3 %v4208_v18  ;;  %v2364_v57 = vpop.f32.mrf.mxu1 }
 0x370   : > { %3244 = vmatpush.msra.mxu0 %v4131_v19  ;;  %3267 = vmatpush.msra.mxu1 %v4209_v21 }
 0x371   : > { %3205 = vmatpush.msrb.mxu2 %v4124_v22  ;;  %3228 = vmatpush.msrb.mxu3 %v4202_v24  ;;  %v2324_v58 = vpop.f32.mrf.mxu3  ;;  %v2304_v59 = vpop.f32.mrf.mxu2  ;;  %v2245_v22 = vadd.f32 %v2244_v31, %v2224_v55 }
 0x372   : > { %3245 = vmatpush.msra.mxu0 %v4125_v3  ;;  %3268 = vmatpush.msra.mxu1 %v4203_v28  ;;  %v2325_v14 = vadd.f32 %v2324_v58, %v2304_v59 }
 0x373   : > { %3206 = vmatpush.msrb.mxu2 %v4118_v23  ;;  %3229 = vmatpush.msrb.mxu3 %v4196_v30 }
 0x374   : > { %3246 = vmatpush.msra.mxu0 %v4119_v26  ;;  %3269 = vmatpush.msra.mxu1 %v4197_v33  ;;  %v2376_v18 = vrot.slane %v2325_v14, 4 }
 0x375   : > { %3207 = vmatpush.msrb.mxu2 %v4112_v25  ;;  %3230 = vmatpush.msrb.mxu3 %v4190_v29  ;;  %v2165_v29 = vadd.f32 %v2164_v51, %v2144_v52 }
 0x376   : > { %3247 = vmatpush.msra.mxu0 %v4113_v36  ;;  %3270 = vmatpush.msra.mxu1 %v4191_v37 }
 0x377   : > { %3208 = vmatpush.msrb.mxu2 %v4106_v2  ;;  %3231 = vmatpush.msrb.mxu3 %v4184_v39  ;;  %v2659_v62 = vpop.f32.mrf.mxu1  ;;  %v2374_v39 = vrot.slane %v2245_v22, 6 }
 0x378   : > { %3248 = vmatpush.msra.mxu0 %v4107_v27  ;;  %3271 = vmatpush.msra.mxu1 %v4185_v40 }
 0x379   : > { %3209 = vmatpush.msrb.mxu2 %v4100_v41  ;;  %3232 = vmatpush.msrb.mxu3 %v4178_v32  ;;  %v2619_v63 = vpop.f32.mrf.mxu3  ;;  %v2599_v0 = vpop.f32.mrf.mxu2 }
 0x37a   : > { %3249 = vmatpush.msra.mxu0 %v4101_v43  ;;  %3272 = vmatpush.msra.mxu1 %v4179_v44  ;;  %v2620_v41 = vadd.f32 %v2619_v63, %v2599_v0 }
 0x37b   : > { %3233 = vmatmul.f32.vlgmr.msrb.gmra.mxu3 %v7758_v35  ;;  %3273 = vmatmul.f32.vlgmr.msra.gmra.mxu1 %v7758_v35  ;;  %v2184_v35 = vpop.f32.mrf.mxu0 }
 0x37c   : > { %3210 = vmatpush.msrb.mxu2 %v4094_v45  ;;  %3250 = vmatpush.msra.mxu0 %v4095_v46  ;;  %v2205_v23 = vadd.f32 %v2204_v34, %v2184_v35 }
 0x37e   : > { %3211 = vmatpush.msrb.mxu2 %v4088_v48  ;;  %3251 = vmatpush.msra.mxu0 %v4089_v49  ;;  %v2373_v40 = vrot.slane %v2205_v23, 7  ;;  %v1472_v49 = vld [vmem:[%s8274_s10] sm:$0x3f] }
 0x37f   : > { %v2739_v5 = vpop.f32.mrf.mxu1 }
 0x380   : > { %3212 = vmatpush.msrb.mxu2 %v4082_v20  ;;  %3252 = vmatpush.msra.mxu0 %v4083_v50  ;;  %v2378_v20 = vsel %vm1916_vm6, %v2165_v29, %v2373_v40 }
 0x381   : > { %3213 = vmatmul.f32.vlgmr.msrb.gmra.mxu2 %v7799_v47  ;;  %3253 = vmatmul.f32.vlgmr.msra.gmra.mxu0 %v7799_v47  ;;  %v2699_v6 = vpop.f32.mrf.mxu3  ;;  %v2679_v47 = vpop.f32.mrf.mxu2  ;;  %v2379_v52 = vsel %vm1918_vm7, %v2378_v20, %v2374_v39 }
 0x382   : > { %v2700_v33 = vadd.f32 %v2699_v6, %v2679_v47 }
 0x383   : > { %v2264_v53 = vpop.f32.mrf.mxu0 }
 0x384   : > { %v2285_v15 = vadd.f32 %v2284_v54, %v2264_v53  ;;  %v2829_v45 = vrot.slane %v2700_v33, 6 }
 0x386   : > { %v2375_v30 = vrot.slane %v2285_v15, 5 }
 0x388   : > { %v2380_v36 = vsel %vm1920_vm8, %v2375_v30, %v2376_v18 }
 0x38b   : > { %v2344_v56 = vpop.f32.mrf.mxu0 }
 0x38c   : > { %v2365_v24 = vadd.f32 %v2364_v57, %v2344_v56 }
 0x38e   : > { %v2377_v27 = vrot.slane %v2365_v24, 3 }
 0x390   : > { %v2381_v44 = vsel %vm1922_vm9, %v2380_v36, %v2377_v27 }
 0x391   : > { %v2382_v56 = vsel %vm1924_vm10, %v2379_v52, %v2381_v44 }
 0x392   : > { %v2819_v8 = vpop.f32.mrf.mxu1 }
 0x393   : > { %v2639_v60 = vpop.f32.mrf.mxu0 }
 0x394   : > { %v2660_v37 = vadd.f32 %v2659_v62, %v2639_v60  ;;  %v1927_v60 = vadd.f32 %v7237_v38, %v1472_v49 }
 0x396   : > { %v2828_v50 = vrot.slane %v2660_v37, 7  ;;  %v2384_v47 = vadd.f32 %v2382_v56, %v1927_v60 }
 0x398   : > { %v2779_v9 = vpop.f32.mrf.mxu3  ;;  %v2833_v57 = vsel %vm1916_vm6, %v2620_v41, %v2828_v50 }
 0x399   : > { %v2834_v62 = vsel %vm1918_vm7, %v2833_v57, %v2829_v45 }
 0x39b   : > { %v2719_v1 = vpop.f32.mrf.mxu0 }
 0x39c   : > { %v2740_v19 = vadd.f32 %v2739_v5, %v2719_v1 }
 0x39e   : > { %v2830_v2 = vrot.slane %v2740_v19, 5 }
 0x39f   : > { %v2759_v10 = vpop.f32.mrf.mxu2 }
 0x3a0   : > { %v2780_v16 = vadd.f32 %v2779_v9, %v2759_v10 }
 0x3a2   : > { %v2831_v26 = vrot.slane %v2780_v16, 4 }
 0x3a3   : > { %v2799_v7 = vpop.f32.mrf.mxu0 }
 0x3a4   : > { %v2820_v25 = vadd.f32 %v2819_v8, %v2799_v7  ;;  %v2835_v32 = vsel %vm1920_vm8, %v2830_v2, %v2831_v26 }
 0x3a6   : > { %v2832_v46 = vrot.slane %v2820_v25, 3 }
 0x3a8   : > { %v2836_v53 = vsel %vm1922_vm9, %v2835_v32, %v2832_v46 }
 0x3a9   : > { %v2837_v0 = vsel %vm1924_vm10, %v2834_v62, %v2836_v53 }
 0x3aa   : > { %v2839_v9 = vadd.f32 %v2837_v0, %v2384_v47 }
 0x3b4   : > { %v3114_v11 = vpop.f32.mrf.mxu1 }
 0x3ba   : > { %v3074_v12 = vpop.f32.mrf.mxu3 }
 0x3bb   : > { %v3094_v42 = vpop.f32.mrf.mxu0 }
 0x3bc   : > { %v3115_v35 = vadd.f32 %v3114_v11, %v3094_v42 }
 0x3be   : > { %v3283_v1 = vrot.slane %v3115_v35, 7 }
 0x3c1   : > { %v3054_v13 = vpop.f32.mrf.mxu2 }
 0x3c2   : > { %v3075_v58 = vadd.f32 %v3074_v12, %v3054_v13 }
 0x3c4   : > { %v3288_v38 = vsel %vm1916_vm6, %v3075_v58, %v3283_v1 }
 0x3d6   : > { %v3194_v21 = vpop.f32.mrf.mxu1 }
 0x3dc   : > { %v3154_v3 = vpop.f32.mrf.mxu3 }
 0x3dd   : > { %v3174_v17 = vpop.f32.mrf.mxu0 }
 0x3de   : > { %v3195_v34 = vadd.f32 %v3194_v21, %v3174_v17 }
 0x3e0   : > { %v3285_v5 = vrot.slane %v3195_v34, 5 }
 0x3e3   : > { %v3134_v28 = vpop.f32.mrf.mxu2 }
 0x3e4   : > { %v3155_v48 = vadd.f32 %v3154_v3, %v3134_v28 }
 0x3e6   : > { %v3284_v63 = vrot.slane %v3155_v48, 6 }
 0x3e8   : > { %v3289_v10 = vsel %vm1918_vm7, %v3288_v38, %v3284_v63 }
 0x3f8   : > { %v3274_v51 = vpop.f32.mrf.mxu1 }
 0x3fe   : > { %v3254_v43 = vpop.f32.mrf.mxu0  ;;  %v3234_v54 = vpop.f32.mrf.mxu3 }
 0x3ff   : > { %v3275_v31 = vadd.f32 %v3274_v51, %v3254_v43 }
 0x401   : > { %v3287_v7 = vrot.slane %v3275_v31, 3 }
 0x404   : > { %v3214_v55 = vpop.f32.mrf.mxu2 }
 0x405   : > { %v3235_v59 = vadd.f32 %v3234_v54, %v3214_v55 }
 0x407   : > { %v3286_v6 = vrot.slane %v3235_v59, 4 }
 0x409   : > { %v3290_v8 = vsel %vm1920_vm8, %v3285_v5, %v3286_v6 }
 0x40a   : > { %v3291_v42 = vsel %vm1922_vm9, %v3290_v8, %v3287_v7 }
 0x40b   : > { %v3292_v11 = vsel %vm1924_vm10, %v3289_v10, %v3291_v42 }
 0x40c   : > { %v3294_v12 = vadd.f32 %v3292_v11, %v2839_v9 }
 0x40e   : > { %v3297_v14 = vrot.slane %v3294_v12, 2  ;;  %3295 = vst.msk [vmem:[%s415_s20] sm:$0x3] %vm4927_vm1, %v3294_v12 }
 0x40f   : > { %4348 = shalt.err (!%p4345_p3)
}
 0x410   : > { %4277 = dma.vmem_to_hbm [thread:$0]  (%p4521_p5), %s3335_s28, 32, %s3337_s0, %s3308_s29   ;;  %3301 = vst.msk [vmem:[%s408_s30] sm:$0xf] %vm8210_vm11, %v3297_v14 }
 0x411   : > { %s3303_s20 = scalar_lea.sflag [#allocation4], %s8179_s17  ;;  %s4363_s27 = sshra.s32 %s8216_s26, 4  ;;  %s4364_s27 = int_to_ptr.hbm [resolvable:$true] %s4363_s27 }
 0x412   : > { %s4365_s18 = scalar_lea.hbm %s4364_s27, 4  ;;  %s4369_s19 = scalar_lea.hbm %s8275_s11, 8 }
 0x413   : > { %p4366_p4 = scmp.ne.s32.totalorder %s4364_s27, %s4365_s18  ;;  %p4370_p9 = scmp.lt.s32.totalorder %s4364_s27, %s8275_s11 }
 0x414   : > { %p4371_p10 = scmp.lt.s32.totalorder %s4369_s19, %s4365_s18 }
 0x415   : > { %p4367_p7 = pnand %p4366_p4, %p4521_p5 }
 0x416   : > { %p4372_p11 = por %p4371_p10, %p4370_p9 }
 0x417   : > { %p4368_p8 = pneg %p4367_p7 }
 0x419   : > { %p4373_p12 = pnand %p4372_p11, %p4368_p8 }
 0x41b   : > { %4376 = shalt.err (!%p4373_p12)
}
 0x41c   : > { %4276 = dma.vmem_to_hbm [thread:$0]  (%p4521_p5), %s8214_s16, 64, %s8216_s26, %s3303_s20  }
 0x41d PF: > { %p4287_p13 = scmp.ge.s32.totalorder %s4415_s24, 2  ;;  %s3348_s0 = sand.u32 1, %s4403_s21  }
 0x41e   : > { %s3349_s17 = scalar_lea.sflag [#allocation4], %s3348_s0 }
 0x41f   : > { %p4281_p0 = pnand %p4287_p13, %p4525_p6 }
 0x421   : > { %p4282_p1 = pneg %p4281_p0 }
 0x423   : > { %4394 = dma.done.wait (%p4282_p1), %s3349_s17, 64  }
 0x424   : > { %4396 = vsyncadd (%p4282_p1), %s3349_s17, 4294967232  ;;  %s3359_s28 = scalar_lea.sflag [#allocation6], %s3348_s0 }
 0x425   : > { %4398 = dma.done.wait (%p4282_p1), %s3359_s28, 32  }
 0x426   : > { %4400 = vsyncadd (%p4282_p1), %s3359_s28, 4294967264  ;;  %s8293_s24 = sld [smem:[#allocation10_spill]]  ;;  %s8296_s21 = smov %s4407_s22 }
 0x427   : > { %s8294_s13 = sld [smem:[#allocation9_spill]] }
 0x428   : > { %s8295_s23 = sld [smem:[#allocation11_spill]] }
 0x42c   : > { %p26_p5 = scmp.ge.s32.totalorder %s8293_s24, 4  }
 0x42d   : > { %s8297_s22 = smov %s8294_s13 }
 0x42e   :  { %28 = sbr.rel (!%p26_p5) target bundleno = 8 (0x8), region = 124 }
 0x433   :  { %3365 = vsyncpa [#allocation4], 1 }
 0x434   :  { %3367 = vsyncpa [#allocation4 + $0x1], 1 }
 0x435   :  { %3368 = vsyncpa [#allocation6], 1 }
 0x436   :  { %3370 = vsyncpa [#allocation6 + $0x1], 1 }

</bundles_post_ra>
